<compile_context>
chip_gen: v7x
topology: tpu7x:2x2x1
jax: 0.10.0
libtpu: 0.0.40
codegen_flags: <defaults>
</compile_context>

<pallas_src>
import functools

import numpy as np
import jax
import jax.numpy as jnp
from jax import lax
from jax.experimental import pallas as pl
from jax.experimental.pallas import tpu as pltpu

_LANE = 128  # vreg / MXU lane width; every padded channel dim and row block uses it

CONFIG = dict(
    vocab_size=50,
    block_size=8,
    emb_1=32,
    emb_2=40,
    emb_3=48,
    emb_4=64,
    kernel_size=1,   # required so the U-Net skip connections keep matching shapes
    stride=1,
    padding=0,
    n_layer=1,
    n_head=1,        # required so torch's (B, N, N) attn_mask is shape-valid
    n_uet=1,
    n_model_aug=1,
    transformer_dropout=0.1,
    unet_dropout=0.1,
    ma_dropout=0.1,
    negative_slope=0.01,
    pffn_residual=True,
    bn_eps=1e-5,     # PyTorch BatchNorm1d default, taken from config (review note)
)


# ----------------------------- in-kernel helpers ---------------------------- #

def _erf(v):
    # TODO(synk): exact lax.erf lowering inside Mosaic is not guaranteed, so we
    # use the Abramowitz & Stegun 7.1.26 rational approximation (|err| < 1.5e-7).
    a1, a2, a3, a4, a5 = 0.254829592, -0.284496736, 1.421413741, -1.453152027, 1.061405429
    pp = 0.3275911
    sgn = jnp.where(v >= 0.0, 1.0, -1.0)
    av = jnp.abs(v)
    t = 1.0 / (1.0 + pp * av)
    poly = ((((a5 * t + a4) * t + a3) * t + a2) * t + a1) * t
    return sgn * (1.0 - poly * jnp.exp(-av * av))


def _gelu(v):
    # erf-based gelu (F.gelu default)
    return 0.5 * v * (1.0 + _erf(v * 0.7071067811865476))


# ------------------------------- fused kernel ------------------------------- #

def _fused_kernel(idx_ref, pos_ref, w_ref, v_ref, out_ref, *, off, cfg, n_seq, b_blk):
    N = n_seq
    rows = b_blk * N                       # == _LANE (asserted host-side)
    slope = cfg["negative_slope"]
    E1, E4 = cfg["emb_1"], cfg["emb_4"]

    def wmat(i):                           # (128,128) weight tile, 128-aligned load
        return w_ref[pl.ds(i * _LANE, _LANE), :]

    def vrow(i):                           # (1,128) bias / LayerNorm vector row
        return v_ref[pl.ds(i, 1), :]

    def linear(h, c):                      # h @ W + b on zero-padded 128-lane tiles
        return jnp.dot(h, wmat(c["w"]), preferred_element_type=jnp.float32) + vrow(c["b"])

    def conv_act(h, c, res=None):          # Conv1d(k=1) + folded BN + LeakyReLU (+skip)
        y = linear(h, c)
        y = jnp.where(y > 0, y, slope * y)
        return y if res is None else y + res

    # Lane masks so LayerNorm statistics run over the true width of the
    # zero-padded 128-lane activations (hoisted, built once).
    lane = lax.broadcasted_iota(jnp.int32, (1, _LANE), 1)
    mask_e1 = (lane < E1).astype(jnp.float32)
    mask_e4 = (lane < E4).astype(jnp.float32)

    def layernorm(a, gi, bi, d, mask, eps):
        mu = jnp.sum(a, axis=-1, keepdims=True) * (1.0 / d)
        diff = (a - mu) * mask             # keeps zero-padded lanes at exactly 0
        var = jnp.sum(diff * diff, axis=-1, keepdims=True) * (1.0 / d)
        return diff * lax.rsqrt(var + eps) * vrow(gi) + vrow(bi)

    # -------- embedding: in-kernel one-hot gather on the MXU + tiled pos-emb --- #
    idxv = idx_ref[...]                                        # (rows, 1) int32
    vocab_iota = lax.broadcasted_iota(jnp.int32, (rows, _LANE), 1)
    one_hot = (vocab_iota == idxv).astype(jnp.float32)
    x = jnp.dot(one_hot, wmat(off["tok_emb"]),                 # sqrt(E1) pre-folded
                preferred_element_type=jnp.float32)
    x = x + wmat(off["pos_tile"])                              # pre-tiled pos embedding
    # embedding dropout = identity (inference)

    # Block-diagonal additive attention bias, precomputed host-side (hoisted,
    # loop-invariant): reference tril-of-ones inside each batch block,
    # -1e30 across batch blocks so stacked batches never mix.
    attn_bias = wmat(off["attn_bias"])

    # ------------------------------ UET blocks -------------------------------- #
    for u in off["uet"]:
        x_ln = layernorm(x, u["ln_g"], u["ln_b"], E1, mask_e1, 1e-8)

        e1 = conv_act(x_ln, u["enc1"])     # skip "x2"
        e2 = conv_act(e1, u["enc2"])       # skip "x3"
        t = conv_act(e2, u["enc3"])

        for blk in u["blocks"]:
            # --- causal multi-head attention (n_head = 1), batch-stacked ---
            h1 = layernorm(t, blk["ln1_g"], blk["ln1_b"], E4, mask_e4, 1e-8)
            q = linear(h1, blk["q"])       # 1/sqrt(head_dim) folded into Wq/bq
            k = linear(h1, blk["k"])
            v = linear(h1, blk["v"])
            s = lax.dot_general(q, k, (((1,), (1,)), ((), ())),
                                preferred_element_type=jnp.float32)
            s = s + attn_bias
            mx = jnp.max(s, axis=-1, keepdims=True)
            ex = jnp.exp(s - mx)
            p = ex / jnp.sum(ex, axis=-1, keepdims=True)        # exact divide
            ctx = jnp.dot(p, v, preferred_element_type=jnp.float32)
            t = linear(ctx, blk["o"]) + t

            # --- point-wise feed forward ---
            h2 = layernorm(t, blk["ln2_g"], blk["ln2_b"], E4, mask_e4, 1e-8)
            ff = jnp.maximum(linear(h2, blk["f1"]), 0.0)
            ff = linear(ff, blk["f2"])
            if cfg["pffn_residual"]:
                ff = ff + h2
            t = ff + t

        d = conv_act(t, u["dec1"], e2)     # dec1(x) + x3
        d = conv_act(d, u["dec2"], e1)     # dec2(x) + x2
        d = conv_act(d, u["dec3"], x_ln)   # dec3(x) + x1
        x = x_ln + d

    # ----------------------- model-augmentation blocks ------------------------ #
    for ma in off["ma"]:
        x = layernorm(x, ma["ln_g"], ma["ln_b"], E1, mask_e1, 1e-8)
        h = _gelu(linear(x, ma["dense"])) + x
        x = layernorm(h, ma["g"], ma["beta"], E1, mask_e1, 1e-12)

    x = layernorm(x, off["ln_f_g"], off["ln_f_b"], E1, mask_e1, 1e-8)

    # ------------ last valid position (one-hot MXU select) + heads ------------ #
    posv = pos_ref[...]                                         # (b_blk,1) = (tok_pos-1) mod N
    target = lax.broadcasted_iota(jnp.int32, (b_blk, rows), 0) * N + posv
    col = lax.broadcasted_iota(jnp.int32, (b_blk, rows), 1)
    sel = (col == target).astype(jnp.float32)                   # (b_blk, rows)
    state = jnp.dot(sel, x, preferred_element_type=jnp.float32)  # (b_blk, 128)
    heads = jnp.dot(state, wmat(off["head_w"]),
                    preferred_element_type=jnp.float32) + vrow(off["head_b"])
    out_ref[...] = jnp.concatenate([state, heads], axis=1)       # lane-dense (b_blk, 256)


# ------------------------------ host-side wrapper ---------------------------- #

def uet4rec_forward(w_slab, v_slab, idx, tok_pos, *, offsets, cfg):
    B, N = idx.shape
    E1, V = cfg["emb_1"], cfg["vocab_size"]
    assert _LANE % N == 0, "block_size must divide 128 for batch blocking"
    b_blk = _LANE // N
    rows = b_blk * N
    n_blocks = -(-B // b_blk)                     # ceil
    Bpad = n_blocks * b_blk

    idx_p = jnp.zeros((Bpad, N), jnp.int32).at[:B].set(idx.astype(jnp.int32))
    pos_p = jnp.ones((Bpad,), jnp.int32).at[:B].set(tok_pos.astype(jnp.int32))
    idx2d = idx_p.reshape(Bpad * N, 1)
    # (tok_pos - 1) mod N also reproduces torch's negative indexing for tok_pos == 0.
    last2d = jnp.mod(pos_p - 1, N).reshape(Bpad, 1)

    kernel = functools.partial(_fused_kernel, off=offsets, cfg=cfg,
                               n_seq=N, b_blk=b_blk)

    out = pl.pallas_call(
        kernel,
        grid_spec=pltpu.PrefetchScalarGridSpec(
            num_scalar_prefetch=0,
            grid=(n_blocks,),                      # one 128-row batch block per step
            in_specs=[
                pl.BlockSpec((rows, 1), lambda b: (b, 0)),      # token ids
                pl.BlockSpec((b_blk, 1), lambda b: (b, 0)),     # last valid positions
                pl.BlockSpec(w_slab.shape, lambda b: (0, 0)),   # weight slab (VMEM-resident)
                pl.BlockSpec(v_slab.shape, lambda b: (0, 0)),   # bias/LN slab
            ],
            out_specs=pl.BlockSpec((b_blk, 2 * _LANE), lambda b: (b, 0)),
        ),
        out_shape=jax.ShapeDtypeStruct((Bpad, 2 * _LANE), jnp.float32),
        # TODO(synk): on v7x switch to pltpu.CORE_PARALLEL (with >=2 batch blocks)
        # to split the batch-block axis across the two TensorCores.
        compiler_params=pltpu.CompilerParams(dimension_semantics=("parallel",)),
    )(idx2d, last2d, w_slab, v_slab)

    state = out[:B, :E1]
    heads = out[:B, _LANE:]
    return {
        "state": state,
        "q_values": heads[:, :V],
        "action_selection": heads[:, V:2 * V],
    }


# --------------------------- parameter construction -------------------------- #

class _KeyGen:
    def __init__(self, key):
        self.key = key

    def __call__(self):
        self.key, sub = jax.random.split(self.key)
        return sub


def init_params(key, cfg):
    kg = _KeyGen(key)
    E1, E2, E3, E4 = cfg["emb_1"], cfg["emb_2"], cfg["emb_3"], cfg["emb_4"]

    def lin(cin, cout):
        w = jax.random.normal(kg(), (cin, cout), jnp.float32) / (cin ** 0.5)
        b = 0.1 * jax.random.normal(kg(), (1, cout), jnp.float32)
        return w, b

    def ln(d):
        g = 1.0 + 0.1 * jax.random.normal(kg(), (1, d), jnp.float32)
        b = 0.1 * jax.random.normal(kg(), (1, d), jnp.float32)
        return g, b

    def conv_bn(cin, cout):
        w, b = lin(cin, cout)
        g, beta = ln(cout)
        return dict(
            w=w, b=b, g=g, beta=beta,
            mean=jnp.zeros((1, cout), jnp.float32),   # BatchNorm running stats
            var=jnp.ones((1, cout), jnp.float32),
        )

    def transformer_block(E):
        wq, bq = lin(E, E)
        wk, bk = lin(E, E)
        wv, bv = lin(E, E)
        wo, bo = lin(E, E)
        ln1_g, ln1_b = ln(E)
        ln2_g, ln2_b = ln(E)
        w1, b1 = lin(E, E)
        w2, b2 = lin(E, E)
        return dict(
            ln1_g=ln1_g, ln1_b=ln1_b, ln2_g=ln2_g, ln2_b=ln2_b,
            wq=wq, bq=bq, wk=wk, bk=bk, wv=wv, bv=bv, wo=wo, bo=bo,
            w1=w1, b1=b1, w2=w2, b2=b2,
        )

    def uet_block():
        return dict(
            enc1=conv_bn(E1, E2), enc2=conv_bn(E2, E3), enc3=conv_bn(E3, E4),
            blocks=[transformer_block(E4) for _ in range(cfg["n_layer"])],
            dec1=conv_bn(E4, E3), dec2=conv_bn(E3, E2), dec3=conv_bn(E2, E1),
        )

    def ma_block():
        w, b = lin(E1, E1)
        g, beta = ln(E1)
        return dict(w=w, b=b, g=g, beta=beta)

    return dict(
        tok_emb=0.02 * jax.random.normal(kg(), (cfg["vocab_size"], E1), jnp.float32),
        pos_emb=0.02 * jax.random.normal(kg(), (cfg["block_size"], E1), jnp.float32),
        uet_ln=[ln(E1) for _ in range(cfg["n_uet"])],
        uet=[uet_block() for _ in range(cfg["n_uet"])],
        ma_ln=[ln(E1) for _ in range(cfg["n_model_aug"])],
        ma=[ma_block() for _ in range(cfg["n_model_aug"])],
        ln_f=ln(E1),
        q_head=lin(E1, cfg["vocab_size"]),
        p_head=lin(E1, cfg["vocab_size"]),
    )


def prepare_kernel_params(params, cfg):
    """Pack all parameters into two lane-dense VMEM slabs + static row offsets.

    - weight slab: every matrix zero-padded to (128,128); sqrt(E1) folded into
      tok_emb, 1/sqrt(head_dim) folded into Wq/bq, eval-mode BatchNorm folded
      into the k=1 convs, both heads merged, pos-emb pre-tiled, attention bias
      precomputed (block-diagonal over the stacked batch).
    - vector slab: one (1,128) row per bias / LayerNorm gain / LayerNorm bias.
    Done once, outside jit / the kernel."""
    E1, E2, E3, E4 = cfg["emb_1"], cfg["emb_2"], cfg["emb_3"], cfg["emb_4"]
    V, N = cfg["vocab_size"], cfg["block_size"]
    assert _LANE % N == 0
    assert max(E1, E2, E3, E4) <= _LANE and V <= _LANE and 2 * V <= _LANE
    b_blk = _LANE // N
    rows = b_blk * N
    head_dim = E4 // cfg["n_head"]
    qk_scale = 1.0 / (head_dim ** 0.5)
    bn_eps = cfg["bn_eps"]

    mats, vecs = [], []

    def add_mat(w):
        i = len(mats)
        mats.append(jnp.pad(w.astype(jnp.float32),
                            ((0, _LANE - w.shape[0]), (0, _LANE - w.shape[1]))))
        return i

    def add_vec(b):
        i = len(vecs)
        vecs.append(jnp.pad(b.astype(jnp.float32), ((0, 0), (0, _LANE - b.shape[1]))))
        return i

    def add_linear(w, b):
        return dict(w=add_mat(w), b=add_vec(b))

    def fold_conv_bn(cp):
        s = cp["g"] / jnp.sqrt(cp["var"] + bn_eps)
        return add_linear(cp["w"] * s, (cp["b"] - cp["mean"]) * s + cp["beta"])

    off = {}
    off["tok_emb"] = add_mat(params["tok_emb"] * (E1 ** 0.5))
    off["pos_tile"] = add_mat(jnp.tile(params["pos_emb"][:N], (b_blk, 1)))

    # Additive attention bias for the batch-stacked (128,128) score matrix:
    # reference float tril-of-ones (+1 visible / 0 above diag, faithfully NOT a
    # real mask) inside each batch's 8x8 block, -1e30 across batch blocks.
    r = np.arange(rows)
    same = (r[:, None] // N) == (r[None, :] // N)
    tril = (r[:, None] % N) >= (r[None, :] % N)
    bias = np.where(same, np.where(tril, 1.0, 0.0), -1e30).astype(np.float32)
    off["attn_bias"] = add_mat(jnp.asarray(bias))

    uet_offs = []
    for (g, b), up in zip(params["uet_ln"], params["uet"]):
        blocks = []
        for blk in up["blocks"]:
            blocks.append(dict(
                ln1_g=add_vec(blk["ln1_g"]), ln1_b=add_vec(blk["ln1_b"]),
                ln2_g=add_vec(blk["ln2_g"]), ln2_b=add_vec(blk["ln2_b"]),
                q=add_linear(blk["wq"] * qk_scale, blk["bq"] * qk_scale),
                k=add_linear(blk["wk"], blk["bk"]),
                v=add_linear(blk["wv"], blk["bv"]),
                o=add_linear(blk["wo"], blk["bo"]),
                f1=add_linear(blk["w1"], blk["b1"]),
                f2=add_linear(blk["w2"], blk["b2"]),
            ))
        uet_offs.append(dict(
            ln_g=add_vec(g), ln_b=add_vec(b),
            enc1=fold_conv_bn(up["enc1"]), enc2=fold_conv_bn(up["enc2"]),
            enc3=fold_conv_bn(up["enc3"]),
            blocks=blocks,
            dec1=fold_conv_bn(up["dec1"]), dec2=fold_conv_bn(up["dec2"]),
            dec3=fold_conv_bn(up["dec3"]),
        ))
    off["uet"] = uet_offs

    ma_offs = []
    for (g, b), mp in zip(params["ma_ln"], params["ma"]):
        ma_offs.append(dict(
            ln_g=add_vec(g), ln_b=add_vec(b),
            dense=add_linear(mp["w"], mp["b"]),
            g=add_vec(mp["g"]), beta=add_vec(mp["beta"]),
        ))
    off["ma"] = ma_offs

    gf, bf = params["ln_f"]
    off["ln_f_g"], off["ln_f_b"] = add_vec(gf), add_vec(bf)

    qw, qb = params["q_head"]
    pw, pb = params["p_head"]
    off["head_w"] = add_mat(jnp.concatenate([qw, pw], axis=1))   # merged heads
    off["head_b"] = add_vec(jnp.concatenate([qb, pb], axis=1))

    # TODO(synk): on v6e, if the kernel becomes MXU-bound at larger configs,
    # pre-cast the weight slab to bf16 here (keep f32 accumulation in-kernel).
    w_slab = jnp.concatenate(mats, axis=0)      # (n_mats*128, 128) f32
    v_slab = jnp.concatenate(vecs, axis=0)      # (n_vecs, 128) f32
    return w_slab, v_slab, off


# ----------------------------------- main ------------------------------------ #

if __name__ == "__main__":
    cfg = CONFIG
    assert cfg["kernel_size"] == 1 and cfg["stride"] == 1 and cfg["padding"] == 0
    assert cfg["n_head"] == 1

    key = jax.random.PRNGKey(0)
    pkey, ikey, tkey = jax.random.split(key, 3)
    params = init_params(pkey, cfg)
    w_slab, v_slab, offsets = prepare_kernel_params(params, cfg)

    B, N = 2, cfg["block_size"]
    idx = jax.random.randint(ikey, (B, N), 0, cfg["vocab_size"], dtype=jnp.int32)
    tok_pos = jax.random.randint(tkey, (B,), 1, N + 1, dtype=jnp.int32)

    fwd = jax.jit(functools.partial(uet4rec_forward, offsets=offsets, cfg=cfg))
    out = fwd(w_slab, v_slab, idx, tok_pos)
    jax.block_until_ready(out)

    assert out["state"].shape == (B, cfg["emb_1"])
    assert out["q_values"].shape == (B, cfg["vocab_size"])
    assert out["action_selection"].shape == (B, cfg["vocab_size"])
    print("KERNEL_OK")
</pallas_src>

<mosaic_0001>
module attributes {stable_mosaic.version = 11 : i64} {
  func.func @_fused_kernel(%arg0: i32, %arg1: memref<128x1xi32, #tpu.memory_space<vmem>>, %arg2: memref<16x1xi32, #tpu.memory_space<vmem>>, %arg3: memref<2176x128xf32, #tpu.memory_space<vmem>>, %arg4: memref<26x128xf32, #tpu.memory_space<vmem>>, %arg5: memref<16x256xf32, #tpu.memory_space<vmem>>) attributes {dimension_semantics = [#tpu.dimension_semantics<parallel>], iteration_bounds = array<i64: 1>, scalar_prefetch = 0 : i64, scratch_operands = 0 : i64, tpu.core_type = #tpu.core_type<tc>, window_params = [{transform_indices = @transform_0, window_bounds = array<i64: 128, 1>}, {transform_indices = @transform_1, window_bounds = array<i64: 16, 1>}, {pipeline_mode = #tpu.pipeline_mode<synchronous>, transform_indices = @transform_2, window_bounds = array<i64: 2176, 128>}, {pipeline_mode = #tpu.pipeline_mode<synchronous>, transform_indices = @transform_3, window_bounds = array<i64: 26, 128>}, {transform_indices = @transform_4, window_bounds = array<i64: 16, 256>}]} {
    %0 = tpu.iota {dimensions = array<i32: 1>} : vector<1x128xi32>
    %c32_i32 = arith.constant 32 : i32
    %1 = vector.broadcast %c32_i32 : i32 to vector<1x128xi32>
    %2 = arith.cmpi slt, %0, %1 : vector<1x128xi32>
    %3 = arith.extui %2 : vector<1x128xi1> to vector<1x128xi32>
    %4 = arith.sitofp %3 : vector<1x128xi32> to vector<1x128xf32>
    %c64_i32 = arith.constant 64 : i32
    %5 = vector.broadcast %c64_i32 : i32 to vector<1x128xi32>
    %6 = arith.cmpi slt, %0, %5 : vector<1x128xi32>
    %7 = arith.extui %6 : vector<1x128xi1> to vector<1x128xi32>
    %8 = arith.sitofp %7 : vector<1x128xi32> to vector<1x128xf32>
    %c0 = arith.constant 0 : index
    %c0_0 = arith.constant 0 : index
    %9 = vector.load %arg1[%c0, %c0_0] : memref<128x1xi32, #tpu.memory_space<vmem>>, vector<128x1xi32>
    %10 = tpu.iota {dimensions = array<i32: 1>} : vector<128x128xi32>
    %11 = vector.broadcast %9 : vector<128x1xi32> to vector<128x128xi32>
    %12 = arith.cmpi eq, %10, %11 : vector<128x128xi32>
    %13 = arith.extui %12 : vector<128x128xi1> to vector<128x128xi32>
    %14 = arith.sitofp %13 : vector<128x128xi32> to vector<128x128xf32>
    %c0_1 = arith.constant 0 : index
    %c0_2 = arith.constant 0 : index
    %15 = vector.load %arg3[%c0_1, %c0_2] : memref<2176x128xf32, #tpu.memory_space<vmem>>, vector<128x128xf32>
    %cst = arith.constant dense<0.000000e+00> : vector<128x128xf32>
    %16 = tpu.matmul %14, %15, %cst {dimension_numbers = #tpu.dot_dimension_numbers<[1], [0], [0], [1], [0, 0, 1, 1], [], []>} : vector<128x128xf32>, vector<128x128xf32>, vector<128x128xf32> -> vector<128x128xf32>
    %c128 = arith.constant 128 : index
    %c0_3 = arith.constant 0 : index
    %17 = vector.load %arg3[%c128, %c0_3] : memref<2176x128xf32, #tpu.memory_space<vmem>>, vector<128x128xf32>
    %18 = arith.addf %16, %17 : vector<128x128xf32>
    %c256 = arith.constant 256 : index
    %c0_4 = arith.constant 0 : index
    %19 = vector.load %arg3[%c256, %c0_4] : memref<2176x128xf32, #tpu.memory_space<vmem>>, vector<128x128xf32>
    %cst_5 = arith.constant dense<0.000000e+00> : vector<128xf32>
    %20 = vector.multi_reduction <add>, %18, %cst_5 [1] : vector<128x128xf32> to vector<128xf32>
    %21 = vector.shape_cast %20 : vector<128xf32> to vector<128x1xf32>
    %cst_6 = arith.constant 3.125000e-02 : f32
    %22 = vector.broadcast %cst_6 : f32 to vector<128x1xf32>
    %23 = arith.mulf %21, %22 : vector<128x1xf32>
    %24 = vector.broadcast %23 : vector<128x1xf32> to vector<128x128xf32>
    %25 = arith.subf %18, %24 : vector<128x128xf32>
    %26 = vector.broadcast %4 : vector<1x128xf32> to vector<128x128xf32>
    %27 = arith.mulf %25, %26 : vector<128x128xf32>
    %28 = arith.mulf %27, %27 : vector<128x128xf32>
    %cst_7 = arith.constant dense<0.000000e+00> : vector<128xf32>
    %29 = vector.multi_reduction <add>, %28, %cst_7 [1] : vector<128x128xf32> to vector<128xf32>
    %30 = vector.shape_cast %29 : vector<128xf32> to vector<128x1xf32>
    %cst_8 = arith.constant 3.125000e-02 : f32
    %31 = vector.broadcast %cst_8 : f32 to vector<128x1xf32>
    %32 = arith.mulf %30, %31 : vector<128x1xf32>
    %cst_9 = arith.constant 9.99999993E-9 : f32
    %33 = vector.broadcast %cst_9 : f32 to vector<128x1xf32>
    %34 = arith.addf %32, %33 : vector<128x1xf32>
    %35 = math.rsqrt %34 : vector<128x1xf32>
    %36 = vector.broadcast %35 : vector<128x1xf32> to vector<128x128xf32>
    %37 = arith.mulf %27, %36 : vector<128x128xf32>
    %c10 = arith.constant 10 : index
    %c0_10 = arith.constant 0 : index
    %38 = vector.load %arg4[%c10, %c0_10] : memref<26x128xf32, #tpu.memory_space<vmem>>, vector<1x128xf32>
    %39 = vector.broadcast %38 : vector<1x128xf32> to vector<128x128xf32>
    %40 = arith.mulf %37, %39 : vector<128x128xf32>
    %c11 = arith.constant 11 : index
    %c0_11 = arith.constant 0 : index
    %41 = vector.load %arg4[%c11, %c0_11] : memref<26x128xf32, #tpu.memory_space<vmem>>, vector<1x128xf32>
    %42 = vector.broadcast %41 : vector<1x128xf32> to vector<128x128xf32>
    %43 = arith.addf %40, %42 : vector<128x128xf32>
    %c1152 = arith.constant 1152 : index
    %c0_12 = arith.constant 0 : index
    %44 = vector.load %arg3[%c1152, %c0_12] : memref<2176x128xf32, #tpu.memory_space<vmem>>, vector<128x128xf32>
    %cst_13 = arith.constant dense<0.000000e+00> : vector<128x128xf32>
    %45 = tpu.matmul %43, %44, %cst_13 {dimension_numbers = #tpu.dot_dimension_numbers<[1], [0], [0], [1], [0, 0, 1, 1], [], []>} : vector<128x128xf32>, vector<128x128xf32>, vector<128x128xf32> -> vector<128x128xf32>
    %c12 = arith.constant 12 : index
    %c0_14 = arith.constant 0 : index
    %46 = vector.load %arg4[%c12, %c0_14] : memref<26x128xf32, #tpu.memory_space<vmem>>, vector<1x128xf32>
    %47 = vector.broadcast %46 : vector<1x128xf32> to vector<128x128xf32>
    %48 = arith.addf %45, %47 : vector<128x128xf32>
    %cst_15 = arith.constant 0.000000e+00 : f32
    %49 = vector.broadcast %cst_15 : f32 to vector<128x128xf32>
    %50 = arith.cmpf ogt, %48, %49 : vector<128x128xf32>
    %cst_16 = arith.constant 0.00999999977 : f32
    %51 = vector.broadcast %cst_16 : f32 to vector<128x128xf32>
    %52 = arith.mulf %51, %48 : vector<128x128xf32>
    %53 = arith.select %50, %48, %52 : vector<128x128xi1>, vector<128x128xf32>
    %c1280 = arith.constant 1280 : index
    %c0_17 = arith.constant 0 : index
    %54 = vector.load %arg3[%c1280, %c0_17] : memref<2176x128xf32, #tpu.memory_space<vmem>>, vector<128x128xf32>
    %cst_18 = arith.constant dense<0.000000e+00> : vector<128x128xf32>
    %55 = tpu.matmul %53, %54, %cst_18 {dimension_numbers = #tpu.dot_dimension_numbers<[1], [0], [0], [1], [0, 0, 1, 1], [], []>} : vector<128x128xf32>, vector<128x128xf32>, vector<128x128xf32> -> vector<128x128xf32>
    %c13 = arith.constant 13 : index
    %c0_19 = arith.constant 0 : index
    %56 = vector.load %arg4[%c13, %c0_19] : memref<26x128xf32, #tpu.memory_space<vmem>>, vector<1x128xf32>
    %57 = vector.broadcast %56 : vector<1x128xf32> to vector<128x128xf32>
    %58 = arith.addf %55, %57 : vector<128x128xf32>
    %cst_20 = arith.constant 0.000000e+00 : f32
    %59 = vector.broadcast %cst_20 : f32 to vector<128x128xf32>
    %60 = arith.cmpf ogt, %58, %59 : vector<128x128xf32>
    %cst_21 = arith.constant 0.00999999977 : f32
    %61 = vector.broadcast %cst_21 : f32 to vector<128x128xf32>
    %62 = arith.mulf %61, %58 : vector<128x128xf32>
    %63 = arith.select %60, %58, %62 : vector<128x128xi1>, vector<128x128xf32>
    %c1408 = arith.constant 1408 : index
    %c0_22 = arith.constant 0 : index
    %64 = vector.load %arg3[%c1408, %c0_22] : memref<2176x128xf32, #tpu.memory_space<vmem>>, vector<128x128xf32>
    %cst_23 = arith.constant dense<0.000000e+00> : vector<128x128xf32>
    %65 = tpu.matmul %63, %64, %cst_23 {dimension_numbers = #tpu.dot_dimension_numbers<[1], [0], [0], [1], [0, 0, 1, 1], [], []>} : vector<128x128xf32>, vector<128x128xf32>, vector<128x128xf32> -> vector<128x128xf32>
    %c14 = arith.constant 14 : index
    %c0_24 = arith.constant 0 : index
    %66 = vector.load %arg4[%c14, %c0_24] : memref<26x128xf32, #tpu.memory_space<vmem>>, vector<1x128xf32>
    %67 = vector.broadcast %66 : vector<1x128xf32> to vector<128x128xf32>
    %68 = arith.addf %65, %67 : vector<128x128xf32>
    %cst_25 = arith.constant 0.000000e+00 : f32
    %69 = vector.broadcast %cst_25 : f32 to vector<128x128xf32>
    %70 = arith.cmpf ogt, %68, %69 : vector<128x128xf32>
    %cst_26 = arith.constant 0.00999999977 : f32
    %71 = vector.broadcast %cst_26 : f32 to vector<128x128xf32>
    %72 = arith.mulf %71, %68 : vector<128x128xf32>
    %73 = arith.select %70, %68, %72 : vector<128x128xi1>, vector<128x128xf32>
    %cst_27 = arith.constant dense<0.000000e+00> : vector<128xf32>
    %74 = vector.multi_reduction <add>, %73, %cst_27 [1] : vector<128x128xf32> to vector<128xf32>
    %75 = vector.shape_cast %74 : vector<128xf32> to vector<128x1xf32>
    %cst_28 = arith.constant 1.562500e-02 : f32
    %76 = vector.broadcast %cst_28 : f32 to vector<128x1xf32>
    %77 = arith.mulf %75, %76 : vector<128x1xf32>
    %78 = vector.broadcast %77 : vector<128x1xf32> to vector<128x128xf32>
    %79 = arith.subf %73, %78 : vector<128x128xf32>
    %80 = vector.broadcast %8 : vector<1x128xf32> to vector<128x128xf32>
    %81 = arith.mulf %79, %80 : vector<128x128xf32>
    %82 = arith.mulf %81, %81 : vector<128x128xf32>
    %cst_29 = arith.constant dense<0.000000e+00> : vector<128xf32>
    %83 = vector.multi_reduction <add>, %82, %cst_29 [1] : vector<128x128xf32> to vector<128xf32>
    %84 = vector.shape_cast %83 : vector<128xf32> to vector<128x1xf32>
    %cst_30 = arith.constant 1.562500e-02 : f32
    %85 = vector.broadcast %cst_30 : f32 to vector<128x1xf32>
    %86 = arith.mulf %84, %85 : vector<128x1xf32>
    %cst_31 = arith.constant 9.99999993E-9 : f32
    %87 = vector.broadcast %cst_31 : f32 to vector<128x1xf32>
    %88 = arith.addf %86, %87 : vector<128x1xf32>
    %89 = math.rsqrt %88 : vector<128x1xf32>
    %90 = vector.broadcast %89 : vector<128x1xf32> to vector<128x128xf32>
    %91 = arith.mulf %81, %90 : vector<128x128xf32>
    %c0_32 = arith.constant 0 : index
    %c0_33 = arith.constant 0 : index
    %92 = vector.load %arg4[%c0_32, %c0_33] : memref<26x128xf32, #tpu.memory_space<vmem>>, vector<1x128xf32>
    %93 = vector.broadcast %92 : vector<1x128xf32> to vector<128x128xf32>
    %94 = arith.mulf %91, %93 : vector<128x128xf32>
    %c1 = arith.constant 1 : index
    %c0_34 = arith.constant 0 : index
    %95 = vector.load %arg4[%c1, %c0_34] : memref<26x128xf32, #tpu.memory_space<vmem>>, vector<1x128xf32>
    %96 = vector.broadcast %95 : vector<1x128xf32> to vector<128x128xf32>
    %97 = arith.addf %94, %96 : vector<128x128xf32>
    %c384 = arith.constant 384 : index
    %c0_35 = arith.constant 0 : index
    %98 = vector.load %arg3[%c384, %c0_35] : memref<2176x128xf32, #tpu.memory_space<vmem>>, vector<128x128xf32>
    %cst_36 = arith.constant dense<0.000000e+00> : vector<128x128xf32>
    %99 = tpu.matmul %97, %98, %cst_36 {dimension_numbers = #tpu.dot_dimension_numbers<[1], [0], [0], [1], [0, 0, 1, 1], [], []>} : vector<128x128xf32>, vector<128x128xf32>, vector<128x128xf32> -> vector<128x128xf32>
    %c4 = arith.constant 4 : index
    %c0_37 = arith.constant 0 : index
    %100 = vector.load %arg4[%c4, %c0_37] : memref<26x128xf32, #tpu.memory_space<vmem>>, vector<1x128xf32>
    %101 = vector.broadcast %100 : vector<1x128xf32> to vector<128x128xf32>
    %102 = arith.addf %99, %101 : vector<128x128xf32>
    %c512 = arith.constant 512 : index
    %c0_38 = arith.constant 0 : index
    %103 = vector.load %arg3[%c512, %c0_38] : memref<2176x128xf32, #tpu.memory_space<vmem>>, vector<128x128xf32>
    %cst_39 = arith.constant dense<0.000000e+00> : vector<128x128xf32>
    %104 = tpu.matmul %97, %103, %cst_39 {dimension_numbers = #tpu.dot_dimension_numbers<[1], [0], [0], [1], [0, 0, 1, 1], [], []>} : vector<128x128xf32>, vector<128x128xf32>, vector<128x128xf32> -> vector<128x128xf32>
    %c5 = arith.constant 5 : index
    %c0_40 = arith.constant 0 : index
    %105 = vector.load %arg4[%c5, %c0_40] : memref<26x128xf32, #tpu.memory_space<vmem>>, vector<1x128xf32>
    %106 = vector.broadcast %105 : vector<1x128xf32> to vector<128x128xf32>
    %107 = arith.addf %104, %106 : vector<128x128xf32>
    %c640 = arith.constant 640 : index
    %c0_41 = arith.constant 0 : index
    %108 = vector.load %arg3[%c640, %c0_41] : memref<2176x128xf32, #tpu.memory_space<vmem>>, vector<128x128xf32>
    %cst_42 = arith.constant dense<0.000000e+00> : vector<128x128xf32>
    %109 = tpu.matmul %97, %108, %cst_42 {dimension_numbers = #tpu.dot_dimension_numbers<[1], [0], [0], [1], [0, 0, 1, 1], [], []>} : vector<128x128xf32>, vector<128x128xf32>, vector<128x128xf32> -> vector<128x128xf32>
    %c6 = arith.constant 6 : index
    %c0_43 = arith.constant 0 : index
    %110 = vector.load %arg4[%c6, %c0_43] : memref<26x128xf32, #tpu.memory_space<vmem>>, vector<1x128xf32>
    %111 = vector.broadcast %110 : vector<1x128xf32> to vector<128x128xf32>
    %112 = arith.addf %109, %111 : vector<128x128xf32>
    %cst_44 = arith.constant dense<0.000000e+00> : vector<128x128xf32>
    %113 = tpu.matmul %102, %107, %cst_44 {dimension_numbers = #tpu.dot_dimension_numbers<[1], [1], [0], [0], [0, 0, 1, 0], [], []>} : vector<128x128xf32>, vector<128x128xf32>, vector<128x128xf32> -> vector<128x128xf32>
    %114 = arith.addf %113, %19 : vector<128x128xf32>
    %cst_45 = arith.constant dense<0xFF800000> : vector<128xf32>
    %115 = vector.multi_reduction <maximumf>, %114, %cst_45 [1] : vector<128x128xf32> to vector<128xf32>
    %116 = vector.shape_cast %115 : vector<128xf32> to vector<128x1xf32>
    %117 = vector.broadcast %116 : vector<128x1xf32> to vector<128x128xf32>
    %118 = arith.subf %114, %117 : vector<128x128xf32>
    %119 = math.exp %118 : vector<128x128xf32>
    %cst_46 = arith.constant dense<0.000000e+00> : vector<128xf32>
    %120 = vector.multi_reduction <add>, %119, %cst_46 [1] : vector<128x128xf32> to vector<128xf32>
    %121 = vector.shape_cast %120 : vector<128xf32> to vector<128x1xf32>
    %122 = vector.broadcast %121 : vector<128x1xf32> to vector<128x128xf32>
    %123 = arith.divf %119, %122 : vector<128x128xf32>
    %cst_47 = arith.constant dense<0.000000e+00> : vector<128x128xf32>
    %124 = tpu.matmul %123, %112, %cst_47 {dimension_numbers = #tpu.dot_dimension_numbers<[1], [0], [0], [1], [0, 0, 1, 1], [], []>} : vector<128x128xf32>, vector<128x128xf32>, vector<128x128xf32> -> vector<128x128xf32>
    %c768 = arith.constant 768 : index
    %c0_48 = arith.constant 0 : index
    %125 = vector.load %arg3[%c768, %c0_48] : memref<2176x128xf32, #tpu.memory_space<vmem>>, vector<128x128xf32>
    %cst_49 = arith.constant dense<0.000000e+00> : vector<128x128xf32>
    %126 = tpu.matmul %124, %125, %cst_49 {dimension_numbers = #tpu.dot_dimension_numbers<[1], [0], [0], [1], [0, 0, 1, 1], [], []>} : vector<128x128xf32>, vector<128x128xf32>, vector<128x128xf32> -> vector<128x128xf32>
    %c7 = arith.constant 7 : index
    %c0_50 = arith.constant 0 : index
    %127 = vector.load %arg4[%c7, %c0_50] : memref<26x128xf32, #tpu.memory_space<vmem>>, vector<1x128xf32>
    %128 = vector.broadcast %127 : vector<1x128xf32> to vector<128x128xf32>
    %129 = arith.addf %126, %128 : vector<128x128xf32>
    %130 = arith.addf %129, %73 : vector<128x128xf32>
    %cst_51 = arith.constant dense<0.000000e+00> : vector<128xf32>
    %131 = vector.multi_reduction <add>, %130, %cst_51 [1] : vector<128x128xf32> to vector<128xf32>
    %132 = vector.shape_cast %131 : vector<128xf32> to vector<128x1xf32>
    %cst_52 = arith.constant 1.562500e-02 : f32
    %133 = vector.broadcast %cst_52 : f32 to vector<128x1xf32>
    %134 = arith.mulf %132, %133 : vector<128x1xf32>
    %135 = vector.broadcast %134 : vector<128x1xf32> to vector<128x128xf32>
    %136 = arith.subf %130, %135 : vector<128x128xf32>
    %137 = vector.broadcast %8 : vector<1x128xf32> to vector<128x128xf32>
    %138 = arith.mulf %136, %137 : vector<128x128xf32>
    %139 = arith.mulf %138, %138 : vector<128x128xf32>
    %cst_53 = arith.constant dense<0.000000e+00> : vector<128xf32>
    %140 = vector.multi_reduction <add>, %139, %cst_53 [1] : vector<128x128xf32> to vector<128xf32>
    %141 = vector.shape_cast %140 : vector<128xf32> to vector<128x1xf32>
    %cst_54 = arith.constant 1.562500e-02 : f32
    %142 = vector.broadcast %cst_54 : f32 to vector<128x1xf32>
    %143 = arith.mulf %141, %142 : vector<128x1xf32>
    %cst_55 = arith.constant 9.99999993E-9 : f32
    %144 = vector.broadcast %cst_55 : f32 to vector<128x1xf32>
    %145 = arith.addf %143, %144 : vector<128x1xf32>
    %146 = math.rsqrt %145 : vector<128x1xf32>
    %147 = vector.broadcast %146 : vector<128x1xf32> to vector<128x128xf32>
    %148 = arith.mulf %138, %147 : vector<128x128xf32>
    %c2 = arith.constant 2 : index
    %c0_56 = arith.constant 0 : index
    %149 = vector.load %arg4[%c2, %c0_56] : memref<26x128xf32, #tpu.memory_space<vmem>>, vector<1x128xf32>
    %150 = vector.broadcast %149 : vector<1x128xf32> to vector<128x128xf32>
    %151 = arith.mulf %148, %150 : vector<128x128xf32>
    %c3 = arith.constant 3 : index
    %c0_57 = arith.constant 0 : index
    %152 = vector.load %arg4[%c3, %c0_57] : memref<26x128xf32, #tpu.memory_space<vmem>>, vector<1x128xf32>
    %153 = vector.broadcast %152 : vector<1x128xf32> to vector<128x128xf32>
    %154 = arith.addf %151, %153 : vector<128x128xf32>
    %c896 = arith.constant 896 : index
    %c0_58 = arith.constant 0 : index
    %155 = vector.load %arg3[%c896, %c0_58] : memref<2176x128xf32, #tpu.memory_space<vmem>>, vector<128x128xf32>
    %cst_59 = arith.constant dense<0.000000e+00> : vector<128x128xf32>
    %156 = tpu.matmul %154, %155, %cst_59 {dimension_numbers = #tpu.dot_dimension_numbers<[1], [0], [0], [1], [0, 0, 1, 1], [], []>} : vector<128x128xf32>, vector<128x128xf32>, vector<128x128xf32> -> vector<128x128xf32>
    %c8 = arith.constant 8 : index
    %c0_60 = arith.constant 0 : index
    %157 = vector.load %arg4[%c8, %c0_60] : memref<26x128xf32, #tpu.memory_space<vmem>>, vector<1x128xf32>
    %158 = vector.broadcast %157 : vector<1x128xf32> to vector<128x128xf32>
    %159 = arith.addf %156, %158 : vector<128x128xf32>
    %cst_61 = arith.constant 0.000000e+00 : f32
    %160 = vector.broadcast %cst_61 : f32 to vector<128x128xf32>
    %161 = arith.maximumf %159, %160 : vector<128x128xf32>
    %c1024 = arith.constant 1024 : index
    %c0_62 = arith.constant 0 : index
    %162 = vector.load %arg3[%c1024, %c0_62] : memref<2176x128xf32, #tpu.memory_space<vmem>>, vector<128x128xf32>
    %cst_63 = arith.constant dense<0.000000e+00> : vector<128x128xf32>
    %163 = tpu.matmul %161, %162, %cst_63 {dimension_numbers = #tpu.dot_dimension_numbers<[1], [0], [0], [1], [0, 0, 1, 1], [], []>} : vector<128x128xf32>, vector<128x128xf32>, vector<128x128xf32> -> vector<128x128xf32>
    %c9 = arith.constant 9 : index
    %c0_64 = arith.constant 0 : index
    %164 = vector.load %arg4[%c9, %c0_64] : memref<26x128xf32, #tpu.memory_space<vmem>>, vector<1x128xf32>
    %165 = vector.broadcast %164 : vector<1x128xf32> to vector<128x128xf32>
    %166 = arith.addf %163, %165 : vector<128x128xf32>
    %167 = arith.addf %166, %154 : vector<128x128xf32>
    %168 = arith.addf %167, %130 : vector<128x128xf32>
    %c1536 = arith.constant 1536 : index
    %c0_65 = arith.constant 0 : index
    %169 = vector.load %arg3[%c1536, %c0_65] : memref<2176x128xf32, #tpu.memory_space<vmem>>, vector<128x128xf32>
    %cst_66 = arith.constant dense<0.000000e+00> : vector<128x128xf32>
    %170 = tpu.matmul %168, %169, %cst_66 {dimension_numbers = #tpu.dot_dimension_numbers<[1], [0], [0], [1], [0, 0, 1, 1], [], []>} : vector<128x128xf32>, vector<128x128xf32>, vector<128x128xf32> -> vector<128x128xf32>
    %c15 = arith.constant 15 : index
    %c0_67 = arith.constant 0 : index
    %171 = vector.load %arg4[%c15, %c0_67] : memref<26x128xf32, #tpu.memory_space<vmem>>, vector<1x128xf32>
    %172 = vector.broadcast %171 : vector<1x128xf32> to vector<128x128xf32>
    %173 = arith.addf %170, %172 : vector<128x128xf32>
    %cst_68 = arith.constant 0.000000e+00 : f32
    %174 = vector.broadcast %cst_68 : f32 to vector<128x128xf32>
    %175 = arith.cmpf ogt, %173, %174 : vector<128x128xf32>
    %cst_69 = arith.constant 0.00999999977 : f32
    %176 = vector.broadcast %cst_69 : f32 to vector<128x128xf32>
    %177 = arith.mulf %176, %173 : vector<128x128xf32>
    %178 = arith.select %175, %173, %177 : vector<128x128xi1>, vector<128x128xf32>
    %179 = arith.addf %178, %63 : vector<128x128xf32>
    %c1664 = arith.constant 1664 : index
    %c0_70 = arith.constant 0 : index
    %180 = vector.load %arg3[%c1664, %c0_70] : memref<2176x128xf32, #tpu.memory_space<vmem>>, vector<128x128xf32>
    %cst_71 = arith.constant dense<0.000000e+00> : vector<128x128xf32>
    %181 = tpu.matmul %179, %180, %cst_71 {dimension_numbers = #tpu.dot_dimension_numbers<[1], [0], [0], [1], [0, 0, 1, 1], [], []>} : vector<128x128xf32>, vector<128x128xf32>, vector<128x128xf32> -> vector<128x128xf32>
    %c16 = arith.constant 16 : index
    %c0_72 = arith.constant 0 : index
    %182 = vector.load %arg4[%c16, %c0_72] : memref<26x128xf32, #tpu.memory_space<vmem>>, vector<1x128xf32>
    %183 = vector.broadcast %182 : vector<1x128xf32> to vector<128x128xf32>
    %184 = arith.addf %181, %183 : vector<128x128xf32>
    %cst_73 = arith.constant 0.000000e+00 : f32
    %185 = vector.broadcast %cst_73 : f32 to vector<128x128xf32>
    %186 = arith.cmpf ogt, %184, %185 : vector<128x128xf32>
    %cst_74 = arith.constant 0.00999999977 : f32
    %187 = vector.broadcast %cst_74 : f32 to vector<128x128xf32>
    %188 = arith.mulf %187, %184 : vector<128x128xf32>
    %189 = arith.select %186, %184, %188 : vector<128x128xi1>, vector<128x128xf32>
    %190 = arith.addf %189, %53 : vector<128x128xf32>
    %c1792 = arith.constant 1792 : index
    %c0_75 = arith.constant 0 : index
    %191 = vector.load %arg3[%c1792, %c0_75] : memref<2176x128xf32, #tpu.memory_space<vmem>>, vector<128x128xf32>
    %cst_76 = arith.constant dense<0.000000e+00> : vector<128x128xf32>
    %192 = tpu.matmul %190, %191, %cst_76 {dimension_numbers = #tpu.dot_dimension_numbers<[1], [0], [0], [1], [0, 0, 1, 1], [], []>} : vector<128x128xf32>, vector<128x128xf32>, vector<128x128xf32> -> vector<128x128xf32>
    %c17 = arith.constant 17 : index
    %c0_77 = arith.constant 0 : index
    %193 = vector.load %arg4[%c17, %c0_77] : memref<26x128xf32, #tpu.memory_space<vmem>>, vector<1x128xf32>
    %194 = vector.broadcast %193 : vector<1x128xf32> to vector<128x128xf32>
    %195 = arith.addf %192, %194 : vector<128x128xf32>
    %cst_78 = arith.constant 0.000000e+00 : f32
    %196 = vector.broadcast %cst_78 : f32 to vector<128x128xf32>
    %197 = arith.cmpf ogt, %195, %196 : vector<128x128xf32>
    %cst_79 = arith.constant 0.00999999977 : f32
    %198 = vector.broadcast %cst_79 : f32 to vector<128x128xf32>
    %199 = arith.mulf %198, %195 : vector<128x128xf32>
    %200 = arith.select %197, %195, %199 : vector<128x128xi1>, vector<128x128xf32>
    %201 = arith.addf %200, %43 : vector<128x128xf32>
    %202 = arith.addf %43, %201 : vector<128x128xf32>
    %cst_80 = arith.constant dense<0.000000e+00> : vector<128xf32>
    %203 = vector.multi_reduction <add>, %202, %cst_80 [1] : vector<128x128xf32> to vector<128xf32>
    %204 = vector.shape_cast %203 : vector<128xf32> to vector<128x1xf32>
    %cst_81 = arith.constant 3.125000e-02 : f32
    %205 = vector.broadcast %cst_81 : f32 to vector<128x1xf32>
    %206 = arith.mulf %204, %205 : vector<128x1xf32>
    %207 = vector.broadcast %206 : vector<128x1xf32> to vector<128x128xf32>
    %208 = arith.subf %202, %207 : vector<128x128xf32>
    %209 = vector.broadcast %4 : vector<1x128xf32> to vector<128x128xf32>
    %210 = arith.mulf %208, %209 : vector<128x128xf32>
    %211 = arith.mulf %210, %210 : vector<128x128xf32>
    %cst_82 = arith.constant dense<0.000000e+00> : vector<128xf32>
    %212 = vector.multi_reduction <add>, %211, %cst_82 [1] : vector<128x128xf32> to vector<128xf32>
    %213 = vector.shape_cast %212 : vector<128xf32> to vector<128x1xf32>
    %cst_83 = arith.constant 3.125000e-02 : f32
    %214 = vector.broadcast %cst_83 : f32 to vector<128x1xf32>
    %215 = arith.mulf %213, %214 : vector<128x1xf32>
    %cst_84 = arith.constant 9.99999993E-9 : f32
    %216 = vector.broadcast %cst_84 : f32 to vector<128x1xf32>
    %217 = arith.addf %215, %216 : vector<128x1xf32>
    %218 = math.rsqrt %217 : vector<128x1xf32>
    %219 = vector.broadcast %218 : vector<128x1xf32> to vector<128x128xf32>
    %220 = arith.mulf %210, %219 : vector<128x128xf32>
    %c18 = arith.constant 18 : index
    %c0_85 = arith.constant 0 : index
    %221 = vector.load %arg4[%c18, %c0_85] : memref<26x128xf32, #tpu.memory_space<vmem>>, vector<1x128xf32>
    %222 = vector.broadcast %221 : vector<1x128xf32> to vector<128x128xf32>
    %223 = arith.mulf %220, %222 : vector<128x128xf32>
    %c19 = arith.constant 19 : index
    %c0_86 = arith.constant 0 : index
    %224 = vector.load %arg4[%c19, %c0_86] : memref<26x128xf32, #tpu.memory_space<vmem>>, vector<1x128xf32>
    %225 = vector.broadcast %224 : vector<1x128xf32> to vector<128x128xf32>
    %226 = arith.addf %223, %225 : vector<128x128xf32>
    %c1920 = arith.constant 1920 : index
    %c0_87 = arith.constant 0 : index
    %227 = vector.load %arg3[%c1920, %c0_87] : memref<2176x128xf32, #tpu.memory_space<vmem>>, vector<128x128xf32>
    %cst_88 = arith.constant dense<0.000000e+00> : vector<128x128xf32>
    %228 = tpu.matmul %226, %227, %cst_88 {dimension_numbers = #tpu.dot_dimension_numbers<[1], [0], [0], [1], [0, 0, 1, 1], [], []>} : vector<128x128xf32>, vector<128x128xf32>, vector<128x128xf32> -> vector<128x128xf32>
    %c20 = arith.constant 20 : index
    %c0_89 = arith.constant 0 : index
    %229 = vector.load %arg4[%c20, %c0_89] : memref<26x128xf32, #tpu.memory_space<vmem>>, vector<1x128xf32>
    %230 = vector.broadcast %229 : vector<1x128xf32> to vector<128x128xf32>
    %231 = arith.addf %228, %230 : vector<128x128xf32>
    %cst_90 = arith.constant 5.000000e-01 : f32
    %232 = vector.broadcast %cst_90 : f32 to vector<128x128xf32>
    %233 = arith.mulf %232, %231 : vector<128x128xf32>
    %cst_91 = arith.constant 0.707106769 : f32
    %234 = vector.broadcast %cst_91 : f32 to vector<128x128xf32>
    %235 = arith.mulf %231, %234 : vector<128x128xf32>
    %cst_92 = arith.constant 0.000000e+00 : f32
    %236 = vector.broadcast %cst_92 : f32 to vector<128x128xf32>
    %237 = arith.cmpf oge, %235, %236 : vector<128x128xf32>
    %cst_93 = arith.constant 1.000000e+00 : f32
    %cst_94 = arith.constant -1.000000e+00 : f32
    %238 = vector.broadcast %cst_93 : f32 to vector<128x128xf32>
    %239 = vector.broadcast %cst_94 : f32 to vector<128x128xf32>
    %240 = arith.select %237, %238, %239 : vector<128x128xi1>, vector<128x128xf32>
    %241 = math.absf %235 : vector<128x128xf32>
    %cst_95 = arith.constant 0.327591091 : f32
    %242 = vector.broadcast %cst_95 : f32 to vector<128x128xf32>
    %243 = arith.mulf %242, %241 : vector<128x128xf32>
    %cst_96 = arith.constant 1.000000e+00 : f32
    %244 = vector.broadcast %cst_96 : f32 to vector<128x128xf32>
    %245 = arith.addf %244, %243 : vector<128x128xf32>
    %cst_97 = arith.constant 1.000000e+00 : f32
    %246 = vector.broadcast %cst_97 : f32 to vector<128x128xf32>
    %247 = arith.divf %246, %245 : vector<128x128xf32>
    %cst_98 = arith.constant 1.06140542 : f32
    %248 = vector.broadcast %cst_98 : f32 to vector<128x128xf32>
    %249 = arith.mulf %248, %247 : vector<128x128xf32>
    %cst_99 = arith.constant -1.45315206 : f32
    %250 = vector.broadcast %cst_99 : f32 to vector<128x128xf32>
    %251 = arith.addf %249, %250 : vector<128x128xf32>
    %252 = arith.mulf %251, %247 : vector<128x128xf32>
    %cst_100 = arith.constant 1.42141378 : f32
    %253 = vector.broadcast %cst_100 : f32 to vector<128x128xf32>
    %254 = arith.addf %252, %253 : vector<128x128xf32>
    %255 = arith.mulf %254, %247 : vector<128x128xf32>
    %cst_101 = arith.constant -0.284496725 : f32
    %256 = vector.broadcast %cst_101 : f32 to vector<128x128xf32>
    %257 = arith.addf %255, %256 : vector<128x128xf32>
    %258 = arith.mulf %257, %247 : vector<128x128xf32>
    %cst_102 = arith.constant 0.254829586 : f32
    %259 = vector.broadcast %cst_102 : f32 to vector<128x128xf32>
    %260 = arith.addf %258, %259 : vector<128x128xf32>
    %261 = arith.mulf %260, %247 : vector<128x128xf32>
    %cst_103 = arith.constant 0.000000e+00 : f32
    %262 = vector.broadcast %cst_103 : f32 to vector<128x128xf32>
    %263 = arith.subf %262, %241 : vector<128x128xf32>
    %264 = arith.mulf %263, %241 : vector<128x128xf32>
    %265 = math.exp %264 : vector<128x128xf32>
    %266 = arith.mulf %261, %265 : vector<128x128xf32>
    %cst_104 = arith.constant 1.000000e+00 : f32
    %267 = vector.broadcast %cst_104 : f32 to vector<128x128xf32>
    %268 = arith.subf %267, %266 : vector<128x128xf32>
    %269 = arith.mulf %240, %268 : vector<128x128xf32>
    %cst_105 = arith.constant 1.000000e+00 : f32
    %270 = vector.broadcast %cst_105 : f32 to vector<128x128xf32>
    %271 = arith.addf %270, %269 : vector<128x128xf32>
    %272 = arith.mulf %233, %271 : vector<128x128xf32>
    %273 = arith.addf %272, %226 : vector<128x128xf32>
    %cst_106 = arith.constant dense<0.000000e+00> : vector<128xf32>
    %274 = vector.multi_reduction <add>, %273, %cst_106 [1] : vector<128x128xf32> to vector<128xf32>
    %275 = vector.shape_cast %274 : vector<128xf32> to vector<128x1xf32>
    %cst_107 = arith.constant 3.125000e-02 : f32
    %276 = vector.broadcast %cst_107 : f32 to vector<128x1xf32>
    %277 = arith.mulf %275, %276 : vector<128x1xf32>
    %278 = vector.broadcast %277 : vector<128x1xf32> to vector<128x128xf32>
    %279 = arith.subf %273, %278 : vector<128x128xf32>
    %280 = vector.broadcast %4 : vector<1x128xf32> to vector<128x128xf32>
    %281 = arith.mulf %279, %280 : vector<128x128xf32>
    %282 = arith.mulf %281, %281 : vector<128x128xf32>
    %cst_108 = arith.constant dense<0.000000e+00> : vector<128xf32>
    %283 = vector.multi_reduction <add>, %282, %cst_108 [1] : vector<128x128xf32> to vector<128xf32>
    %284 = vector.shape_cast %283 : vector<128xf32> to vector<128x1xf32>
    %cst_109 = arith.constant 3.125000e-02 : f32
    %285 = vector.broadcast %cst_109 : f32 to vector<128x1xf32>
    %286 = arith.mulf %284, %285 : vector<128x1xf32>
    %cst_110 = arith.constant 9.99999996E-13 : f32
    %287 = vector.broadcast %cst_110 : f32 to vector<128x1xf32>
    %288 = arith.addf %286, %287 : vector<128x1xf32>
    %289 = math.rsqrt %288 : vector<128x1xf32>
    %290 = vector.broadcast %289 : vector<128x1xf32> to vector<128x128xf32>
    %291 = arith.mulf %281, %290 : vector<128x128xf32>
    %c21 = arith.constant 21 : index
    %c0_111 = arith.constant 0 : index
    %292 = vector.load %arg4[%c21, %c0_111] : memref<26x128xf32, #tpu.memory_space<vmem>>, vector<1x128xf32>
    %293 = vector.broadcast %292 : vector<1x128xf32> to vector<128x128xf32>
    %294 = arith.mulf %291, %293 : vector<128x128xf32>
    %c22 = arith.constant 22 : index
    %c0_112 = arith.constant 0 : index
    %295 = vector.load %arg4[%c22, %c0_112] : memref<26x128xf32, #tpu.memory_space<vmem>>, vector<1x128xf32>
    %296 = vector.broadcast %295 : vector<1x128xf32> to vector<128x128xf32>
    %297 = arith.addf %294, %296 : vector<128x128xf32>
    %cst_113 = arith.constant dense<0.000000e+00> : vector<128xf32>
    %298 = vector.multi_reduction <add>, %297, %cst_113 [1] : vector<128x128xf32> to vector<128xf32>
    %299 = vector.shape_cast %298 : vector<128xf32> to vector<128x1xf32>
    %cst_114 = arith.constant 3.125000e-02 : f32
    %300 = vector.broadcast %cst_114 : f32 to vector<128x1xf32>
    %301 = arith.mulf %299, %300 : vector<128x1xf32>
    %302 = vector.broadcast %301 : vector<128x1xf32> to vector<128x128xf32>
    %303 = arith.subf %297, %302 : vector<128x128xf32>
    %304 = vector.broadcast %4 : vector<1x128xf32> to vector<128x128xf32>
    %305 = arith.mulf %303, %304 : vector<128x128xf32>
    %306 = arith.mulf %305, %305 : vector<128x128xf32>
    %cst_115 = arith.constant dense<0.000000e+00> : vector<128xf32>
    %307 = vector.multi_reduction <add>, %306, %cst_115 [1] : vector<128x128xf32> to vector<128xf32>
    %308 = vector.shape_cast %307 : vector<128xf32> to vector<128x1xf32>
    %cst_116 = arith.constant 3.125000e-02 : f32
    %309 = vector.broadcast %cst_116 : f32 to vector<128x1xf32>
    %310 = arith.mulf %308, %309 : vector<128x1xf32>
    %cst_117 = arith.constant 9.99999993E-9 : f32
    %311 = vector.broadcast %cst_117 : f32 to vector<128x1xf32>
    %312 = arith.addf %310, %311 : vector<128x1xf32>
    %313 = math.rsqrt %312 : vector<128x1xf32>
    %314 = vector.broadcast %313 : vector<128x1xf32> to vector<128x128xf32>
    %315 = arith.mulf %305, %314 : vector<128x128xf32>
    %c23 = arith.constant 23 : index
    %c0_118 = arith.constant 0 : index
    %316 = vector.load %arg4[%c23, %c0_118] : memref<26x128xf32, #tpu.memory_space<vmem>>, vector<1x128xf32>
    %317 = vector.broadcast %316 : vector<1x128xf32> to vector<128x128xf32>
    %318 = arith.mulf %315, %317 : vector<128x128xf32>
    %c24 = arith.constant 24 : index
    %c0_119 = arith.constant 0 : index
    %319 = vector.load %arg4[%c24, %c0_119] : memref<26x128xf32, #tpu.memory_space<vmem>>, vector<1x128xf32>
    %320 = vector.broadcast %319 : vector<1x128xf32> to vector<128x128xf32>
    %321 = arith.addf %318, %320 : vector<128x128xf32>
    %c0_120 = arith.constant 0 : index
    %c0_121 = arith.constant 0 : index
    %322 = vector.load %arg2[%c0_120, %c0_121] : memref<16x1xi32, #tpu.memory_space<vmem>>, vector<16x1xi32>
    %323 = tpu.iota {dimensions = array<i32: 0>} : vector<16x128xi32>
    %c8_i32 = arith.constant 8 : i32
    %324 = vector.broadcast %c8_i32 : i32 to vector<16x128xi32>
    %325 = arith.muli %323, %324 : vector<16x128xi32>
    %326 = vector.broadcast %322 : vector<16x1xi32> to vector<16x128xi32>
    %327 = arith.addi %325, %326 : vector<16x128xi32>
    %328 = tpu.iota {dimensions = array<i32: 1>} : vector<16x128xi32>
    %329 = arith.cmpi eq, %328, %327 : vector<16x128xi32>
    %330 = arith.extui %329 : vector<16x128xi1> to vector<16x128xi32>
    %331 = arith.sitofp %330 : vector<16x128xi32> to vector<16x128xf32>
    %cst_122 = arith.constant dense<0.000000e+00> : vector<16x128xf32>
    %332 = tpu.matmul %331, %321, %cst_122 {dimension_numbers = #tpu.dot_dimension_numbers<[1], [0], [0], [1], [0, 0, 1, 1], [], []>} : vector<16x128xf32>, vector<128x128xf32>, vector<16x128xf32> -> vector<16x128xf32>
    %c2048 = arith.constant 2048 : index
    %c0_123 = arith.constant 0 : index
    %333 = vector.load %arg3[%c2048, %c0_123] : memref<2176x128xf32, #tpu.memory_space<vmem>>, vector<128x128xf32>
    %cst_124 = arith.constant dense<0.000000e+00> : vector<16x128xf32>
    %334 = tpu.matmul %332, %333, %cst_124 {dimension_numbers = #tpu.dot_dimension_numbers<[1], [0], [0], [1], [0, 0, 1, 1], [], []>} : vector<16x128xf32>, vector<128x128xf32>, vector<16x128xf32> -> vector<16x128xf32>
    %c25 = arith.constant 25 : index
    %c0_125 = arith.constant 0 : index
    %335 = vector.load %arg4[%c25, %c0_125] : memref<26x128xf32, #tpu.memory_space<vmem>>, vector<1x128xf32>
    %336 = vector.broadcast %335 : vector<1x128xf32> to vector<16x128xf32>
    %337 = arith.addf %334, %336 : vector<16x128xf32>
    %338 = tpu.concatenate %332, %337 in 1 : vector<16x128xf32>, vector<16x128xf32> -> vector<16x256xf32>
    %c0_126 = arith.constant 0 : index
    %c0_127 = arith.constant 0 : index
    %339 = vector.load %arg5[%c0_126, %c0_127] : memref<16x256xf32, #tpu.memory_space<vmem>>, vector<16x256xf32>
    tpu.vector_store %arg5[%c0_126, %c0_127], %338 {strides = array<i32>} : memref<16x256xf32, #tpu.memory_space<vmem>>, vector<16x256xf32>,
    return
  }
  func.func @transform_0(%arg0: i32) -> (i32, i32) {
    %c0_i32 = arith.constant 0 : i32
    %c0_i32_0 = arith.constant 0 : i32
    return %arg0, %c0_i32 : i32, i32
  }
  func.func @transform_1(%arg0: i32) -> (i32, i32) {
    %c0_i32 = arith.constant 0 : i32
    %c0_i32_0 = arith.constant 0 : i32
    return %arg0, %c0_i32 : i32, i32
  }
  func.func @transform_2(%arg0: i32) -> (i32, i32) {
    %c0_i32 = arith.constant 0 : i32
    %c0_i32_0 = arith.constant 0 : i32
    %c0_i32_1 = arith.constant 0 : i32
    return %c0_i32, %c0_i32_0 : i32, i32
  }
  func.func @transform_3(%arg0: i32) -> (i32, i32) {
    %c0_i32 = arith.constant 0 : i32
    %c0_i32_0 = arith.constant 0 : i32
    %c0_i32_1 = arith.constant 0 : i32
    return %c0_i32, %c0_i32_0 : i32, i32
  }
  func.func @transform_4(%arg0: i32) -> (i32, i32) {
    %c0_i32 = arith.constant 0 : i32
    %c0_i32_0 = arith.constant 0 : i32
    return %arg0, %c0_i32 : i32, i32
  }
}

</mosaic_0001>

<bundles_post_ra>
// kernel: uet4rec_forward.1
= control target key start
LH: loop header
LB: loop body
LE: loop exit
PB: predicated region body
PF: predicated region fallthrough
CT: control target
= control target key end

     0   :  { %9 = vsyncpa [#allocation3], 0  ;;  %s10412_s0 = inlined_call_operand.vmem [shape: s32[128,1], index: 0, kind: input, shape index: {}]   ;;  %s10413_s1 = inlined_call_operand.vmem [shape: s32[16,1], index: 1, kind: input, shape index: {}]   ;;  %s10414_s2 = inlined_call_operand.hbm [shape: f32[2176,128], index: 2, kind: input, shape index: {}]   ;;  %s10415_s3 = inlined_call_operand.hbm [shape: f32[26,128], index: 3, kind: input, shape index: {}]   ;;  %s10416_s4 = inlined_call_operand.vmem [shape: f32[16,256], index: 4, kind: output, shape index: {}]  }
   0x1   :  { %10 = vsyncpa [#allocation5], 0  ;;  %s7952_s15 = smov [#allocation2]   ;;  %s7904_s19 = scalar_lea.hbm %s10414_s2, 34816 }
   0x2   :  { %s20_s16 = sshll.u32 %s7952_s15, 4  ;;  %p7905_p0 = scmp.ne.s32.totalorder %s10414_s2, %s7904_s19  ;;  %s21_s16 = int_to_ptr.vmem [resolvable:$true] %s20_s16 }
   0x3   :  { %p7908_p1 = scmp.lt.u32.totalorder %s7904_s19, %s10414_s2 }
   0x5   :  { %p7910_p2 = pnand %p7908_p1, %p7905_p0 }
   0x7   :  { %7913 = shalt.err (!%p7910_p2)
}
   0x8   :  { %s7914_s24 = scalar_lea.vmem %s21_s16, 34816  ;;  %p7919_p4 = scmp.lt.s32.totalorder %s21_s16, %s21_s16 }
   0x9   :  { %p7915_p3 = scmp.ne.s32.totalorder %s21_s16, %s7914_s24  ;;  %p7920_p5 = scmp.lt.s32.totalorder %s7914_s24, %s7914_s24 }
   0xb   :  { %p7921_p6 = por %p7920_p5, %p7919_p4 }
   0xd   :  { %p7922_p7 = pnand %p7921_p6, %p7915_p3 }
   0xf   :  { %7925 = shalt.err (!%p7922_p7)
}
  0x10   :  { %s7953_s25 = smov 128   ;;  %s7954_s26 = smov 8  }
  0x11   :  { %26 = dma.hbm_to_vmem [thread:$0]  %s10414_s2, 34816, %s21_s16, [#allocation3], %s7953_s25, %s7953_s25, %s7954_s26  }
  0x12   :  { %s7955_s29 = smov [#allocation4]   ;;  %s7926_s7 = scalar_lea.hbm %s10415_s3, 512 }
  0x13   :  { %s32_s30 = sshll.u32 %s7955_s29, 4  ;;  %p7927_p8 = scmp.ne.s32.totalorder %s10415_s3, %s7926_s7  ;;  %s33_s30 = int_to_ptr.vmem [resolvable:$true] %s32_s30 }
  0x14   :  { %p7930_p9 = scmp.lt.u32.totalorder %s7926_s7, %s10415_s3 }
  0x16   :  { %p7932_p10 = pnand %p7930_p9, %p7927_p8 }
  0x18   :  { %7935 = shalt.err (!%p7932_p10)
}
  0x19   :  { %s7936_s12 = scalar_lea.vmem %s33_s30, 512  ;;  %p7941_p12 = scmp.lt.s32.totalorder %s33_s30, %s33_s30 }
  0x1a   :  { %p7937_p11 = scmp.ne.s32.totalorder %s33_s30, %s7936_s12  ;;  %p7942_p13 = scmp.lt.s32.totalorder %s7936_s12, %s7936_s12 }
  0x1c   :  { %p7943_p0 = por %p7942_p13, %p7941_p12 }
  0x1e   :  { %p7944_p1 = pnand %p7943_p0, %p7937_p11 }
  0x20   :  { %7947 = shalt.err (!%p7944_p1)
}
  0x21   :  { %38 = dma.hbm_to_vmem [thread:$0]  %s10415_s3, 512, %s33_s30, [#allocation5], %s7953_s25, %s7953_s25, %s7954_s26  }
  0x22   :  { %7948 = dma.done.wait [#allocation3], 34816  }
  0x23   :  { %7949 = vsyncadd [#allocation3], 4294932480 }
  0x24   :  { %7950 = dma.done.wait [#allocation5], 512  }
  0x25   :  { %7951 = vsyncadd [#allocation5], 4294966784  ;;  %v7956_v0 = vmov 0   ;;  %v55_v1 = vld [vmem:[%s10412_s0 + $0x10] sm:$0xff]  ;;  %v53_v2 = vld [vmem:[%s10412_s0] sm:$0xff]  ;;  %v10419_v41 = vlaneseq  ;;  %v10417_v45 = vmov 1.0  }
  0x26   :  { %7583 = vset.pattern.permute.xlu1 %v7956_v0  ;;  %7582 = vset.pattern.permute.xlu0 %v7956_v0  ;;  %v56_v3 = vld [vmem:[%s10412_s0 + $0x18] sm:$0xff]  ;;  %v54_v4 = vld [vmem:[%s10412_s0 + $0x8] sm:$0xff]  ;;  %v165_v6 = vld [vmem:[#allocation2] sm:$0xff] }
  0x27   :  { %76 = vperm.xlu1 %7583, %v55_v1   ;;  %70 = vperm.xlu0 %7582, %v53_v2   ;;  %v58_v5 = vld [vmem:[%s10412_s0 + $0x28] sm:$0xff]  ;;  %v57_v8 = vld [vmem:[%s10412_s0 + $0x20] sm:$0xff]  ;;  %v167_v10 = vld [vmem:[#allocation2 + $0x10] sm:$0xff]  ;;  %v8058_v42 = vand.u32 127, %v10419_v41 }
  0x28   :  { %v166_v7 = vld [vmem:[#allocation2 + $0x8] sm:$0xff]  ;;  %v168_v11 = vld [vmem:[#allocation2 + $0x18] sm:$0xff]  ;;  %v169_v13 = vld [vmem:[#allocation2 + $0x20] sm:$0xff] }
  0x29   :  { %v6998_v9 = vpack.c.bf16 %v166_v7, %v165_v6  ;;  %v7002_v12 = vpack.c.bf16 %v168_v11, %v167_v10  ;;  %v170_v14 = vld [vmem:[#allocation2 + $0x28] sm:$0xff]  ;;  %v60_v15 = vld [vmem:[%s10412_s0 + $0x38] sm:$0xff]  ;;  %v59_v16 = vld [vmem:[%s10412_s0 + $0x30] sm:$0xff]  ;;  %10496 = vst [vmem:[#allocation8_spill] sm:$0xff] %v8058_v42 }
  0x2a   :  { %v7006_v17 = vpack.c.bf16 %v170_v14, %v169_v13  ;;  %v171_v18 = vld [vmem:[#allocation2 + $0x30] sm:$0xff]  ;;  %v172_v19 = vld [vmem:[#allocation2 + $0x38] sm:$0xff]  ;;  %v62_v20 = vld [vmem:[%s10412_s0 + $0x48] sm:$0xff] }
  0x2b   :  { %79 = vperm.xlu1 %7583, %v56_v3   ;;  %73 = vperm.xlu0 %7582, %v54_v4   ;;  %v61_v21 = vld [vmem:[%s10412_s0 + $0x40] sm:$0xff]  ;;  %v7010_v22 = vpack.c.bf16 %v172_v19, %v171_v18  ;;  %v174_v24 = vld [vmem:[#allocation2 + $0x48] sm:$0xff]  ;;  %v64_v25 = vld [vmem:[%s10412_s0 + $0x58] sm:$0xff] }
  0x2c   :  { %6999 = vmatprep.subr.bf16.mxu0 %v6998_v9  ;;  %v173_v23 = vld [vmem:[#allocation2 + $0x40] sm:$0xff]  ;;  %v63_v26 = vld [vmem:[%s10412_s0 + $0x50] sm:$0xff]  ;;  %v176_v29 = vld [vmem:[#allocation2 + $0x58] sm:$0xff] }
  0x2d   :  { %7001 = vmatpush3.bf16.msra.mxu0 %v6998_v9  ;;  %v7014_v27 = vpack.c.bf16 %v174_v24, %v173_v23  ;;  %v175_v28 = vld [vmem:[#allocation2 + $0x50] sm:$0xff]  ;;  %v66_v30 = vld [vmem:[%s10412_s0 + $0x68] sm:$0xff]  ;;  %v65_v31 = vld [vmem:[%s10412_s0 + $0x60] sm:$0xff] }
  0x2e   :  { %7003 = vmatprep.subr.bf16.mxu0 %v7002_v12  ;;  %v7018_v32 = vpack.c.bf16 %v176_v29, %v175_v28  ;;  %v177_v33 = vld [vmem:[#allocation2 + $0x60] sm:$0xff]  ;;  %v178_v34 = vld [vmem:[#allocation2 + $0x68] sm:$0xff]  ;;  %v68_v35 = vld [vmem:[%s10412_s0 + $0x78] sm:$0xff] }
  0x2f   :  { %85 = vperm.xlu1 %7583, %v58_v5   ;;  %82 = vperm.xlu0 %7582, %v57_v8   ;;  %v67_v36 = vld [vmem:[%s10412_s0 + $0x70] sm:$0xff]  ;;  %v7022_v37 = vpack.c.bf16 %v178_v34, %v177_v33  ;;  %v180_v39 = vld [vmem:[#allocation2 + $0x78] sm:$0xff]  ;;  %v182_v60 = vld [vmem:[#allocation2 + $0x88] sm:$0xff] }
  0x30   :  { %v179_v38 = vld [vmem:[#allocation2 + $0x70] sm:$0xff]  ;;  %v181_v61 = vld [vmem:[#allocation2 + $0x80] sm:$0xff]  ;;  %v184_v6 = vld [vmem:[#allocation2 + $0x98] sm:$0xff] }
  0x31   :  { %7005 = vmatpush3.bf16.msra.mxu0 %v7002_v12  ;;  %v7026_v40 = vpack.c.bf16 %v180_v39, %v179_v38  ;;  %v183_v2 = vld [vmem:[#allocation2 + $0x90] sm:$0xff]  ;;  %v185_v7 = vld [vmem:[#allocation2 + $0xa0] sm:$0xff]  ;;  %v186_v12 = vld [vmem:[#allocation2 + $0xa8] sm:$0xff] }
  0x32   :  { %7007 = vmatprep.subr.bf16.mxu0 %v7006_v17  ;;  %v187_v13 = vld [vmem:[#allocation2 + $0xb0] sm:$0xff]  ;;  %v188_v18 = vld [vmem:[#allocation2 + $0xb8] sm:$0xff]  ;;  %v189_v19 = vld [vmem:[#allocation2 + $0xc0] sm:$0xff] }
  0x33   :  { %91 = vperm.xlu1 %7583, %v60_v15   ;;  %88 = vperm.xlu0 %7582, %v59_v16   ;;  %v190_v24 = vld [vmem:[#allocation2 + $0xc8] sm:$0xff] }
  0x35   :  { %7009 = vmatpush3.bf16.msra.mxu0 %v7006_v17 }
  0x36   :  { %7011 = vmatprep.subr.bf16.mxu0 %v7010_v22 }
  0x37   :  { %97 = vperm.xlu1 %7583, %v62_v20   ;;  %94 = vperm.xlu0 %7582, %v61_v21  }
  0x39   :  { %7013 = vmatpush3.bf16.msra.mxu0 %v7010_v22 }
  0x3a   :  { %7015 = vmatprep.subr.bf16.mxu0 %v7014_v27 }
  0x3b   :  { %103 = vperm.xlu1 %7583, %v64_v25   ;;  %100 = vperm.xlu0 %7582, %v63_v26   ;;  %v191_v25 = vld [vmem:[#allocation2 + $0xd0] sm:$0xff] }
  0x3d   :  { %7017 = vmatpush3.bf16.msra.mxu0 %v7014_v27 }
  0x3e   :  { %7019 = vmatprep.subr.bf16.mxu0 %v7018_v32 }
  0x3f   :  { %109 = vperm.xlu1 %7583, %v66_v30   ;;  %106 = vperm.xlu0 %7582, %v65_v31   ;;  %v192_v30 = vld [vmem:[#allocation2 + $0xd8] sm:$0xff]  ;;  %v193_v31 = vld [vmem:[#allocation2 + $0xe0] sm:$0xff] }
  0x41   :  { %7021 = vmatpush3.bf16.msra.mxu0 %v7018_v32 }
  0x42   :  { %7023 = vmatprep.subr.bf16.mxu0 %v7022_v37 }
  0x43   :  { %115 = vperm.xlu1 %7583, %v68_v35   ;;  %112 = vperm.xlu0 %7582, %v67_v36   ;;  %v194_v36 = vld [vmem:[#allocation2 + $0xe8] sm:$0xff] }
  0x45   :  { %7025 = vmatpush3.bf16.msra.mxu0 %v7022_v37  ;;  %v195_v37 = vld [vmem:[#allocation2 + $0xf0] sm:$0xff] }
  0x46   :  { %7027 = vmatprep.subr.bf16.mxu0 %v7026_v40 }
  0x49   :  { %7029 = vmatpush3.bf16.msra.mxu0 %v7026_v40 }
  0xa6   :  { %v77_v43 = vpop.permute.xlu1 %76  ;;  %v71_v44 = vpop.permute.xlu0 %70 }
  0xa7   :  { %vm117_vm0 = vcmp.eq.s32.totalorder %v8058_v42, %v71_v44  ;;  %vm119_vm1 = vcmp.eq.s32.totalorder %v8058_v42, %v77_v43  ;;  %v196_v44 = vld [vmem:[#allocation2 + $0xf8] sm:$0xff] }
  0xa8   :  { %6064 = vmatprep.mubr.msk.f32.mxu0 %vm117_vm0, %v10417_v45  ;;  %vm47_vm0 = vcmp.lt.s32.totalorder %v8058_v42, 32 }
  0xaa   :  { %v80_v46 = vpop.permute.xlu1 %79  ;;  %v74_v47 = vpop.permute.xlu0 %73 }
  0xab   :  { %vm118_vm2 = vcmp.eq.s32.totalorder %v8058_v42, %v74_v47  ;;  %vm120_vm3 = vcmp.eq.s32.totalorder %v8058_v42, %v80_v46  ;;  %v592_v47 = vld [vmem:[#allocation2 + $0x480] sm:$0xff] }
  0xac   :  { %6065 = vmatmul.mubr.msk.f32.vlgmr.msra.gmra.mrb[0].mxu0 %vm118_vm2, %v10417_v45 }
  0xad   :  { %6067 = vmatprep.mubr.msk.f32.mxu0 %vm119_vm1, %v10417_v45 }
  0xae   :  { %v86_v48 = vpop.permute.xlu1 %85  ;;  %v83_v49 = vpop.permute.xlu0 %82 }
  0xaf   :  { %vm121_vm4 = vcmp.eq.s32.totalorder %v8058_v42, %v83_v49  ;;  %vm122_vm5 = vcmp.eq.s32.totalorder %v8058_v42, %v86_v48  ;;  %v593_v48 = vld [vmem:[#allocation2 + $0x488] sm:$0xff]  ;;  %v594_v49 = vld [vmem:[#allocation2 + $0x490] sm:$0xff] }
  0xb0   :  { %6068 = vmatmul.mubr.msk.f32.gmra.mrb[2].mxu0 %vm120_vm3, %v10417_v45 }
  0xb1   :  { %6070 = vmatprep.mubr.msk.f32.mxu0 %vm121_vm4, %v10417_v45 }
  0xb2   :  { %v92_v50 = vpop.permute.xlu1 %91  ;;  %v89_v51 = vpop.permute.xlu0 %88 }
  0xb3   :  { %vm123_vm6 = vcmp.eq.s32.totalorder %v8058_v42, %v89_v51  ;;  %vm124_vm7 = vcmp.eq.s32.totalorder %v8058_v42, %v92_v50  ;;  %v7030_v50 = vpack.c.bf16 %v593_v48, %v592_v47  ;;  %v595_v51 = vld [vmem:[#allocation2 + $0x498] sm:$0xff] }
  0xb4   :  { %6071 = vmatmul.mubr.msk.f32.gmra.mrb[4].mxu0 %vm122_vm5, %v10417_v45 }
  0xb5   :  { %6073 = vmatprep.mubr.msk.f32.mxu0 %vm123_vm6, %v10417_v45  ;;  %7031 = vmatprep.subr.bf16.mxu1 %v7030_v50 }
  0xb6   :  { %v98_v52 = vpop.permute.xlu1 %97  ;;  %v95_v53 = vpop.permute.xlu0 %94  ;;  %7033 = vmatpush3.bf16.msra.mxu1 %v7030_v50 }
  0xb7   :  { %vm125_vm8 = vcmp.eq.s32.totalorder %v8058_v42, %v95_v53  ;;  %vm126_vm9 = vcmp.eq.s32.totalorder %v8058_v42, %v98_v52  ;;  %v7034_v52 = vpack.c.bf16 %v595_v51, %v594_v49  ;;  %v596_v53 = vld [vmem:[#allocation2 + $0x4a0] sm:$0xff] }
  0xb8   :  { %6074 = vmatmul.mubr.msk.f32.gmra.mrb[6].mxu0 %vm124_vm7, %v10417_v45 }
  0xb9   :  { %6076 = vmatprep.mubr.msk.f32.mxu0 %vm125_vm8, %v10417_v45  ;;  %7035 = vmatprep.subr.bf16.mxu1 %v7034_v52 }
  0xba   :  { %v104_v54 = vpop.permute.xlu1 %103  ;;  %v101_v55 = vpop.permute.xlu0 %100  ;;  %7037 = vmatpush3.bf16.msra.mxu1 %v7034_v52 }
  0xbb   :  { %vm127_vm10 = vcmp.eq.s32.totalorder %v8058_v42, %v101_v55  ;;  %vm128_vm11 = vcmp.eq.s32.totalorder %v8058_v42, %v104_v54  ;;  %v597_v54 = vld [vmem:[#allocation2 + $0x4a8] sm:$0xff] }
  0xbc   :  { %6077 = vmatmul.mubr.msk.f32.gmra.mrb[8].mxu0 %vm126_vm9, %v10417_v45  ;;  %v7038_v55 = vpack.c.bf16 %v597_v54, %v596_v53 }
  0xbd   :  { %6079 = vmatprep.mubr.msk.f32.mxu0 %vm127_vm10, %v10417_v45 }
  0xbe   :  { %v110_v56 = vpop.permute.xlu1 %109  ;;  %v107_v57 = vpop.permute.xlu0 %106  ;;  %7039 = vmatprep.subr.bf16.mxu1 %v7038_v55 }
  0xbf   :  { %vm129_vm12 = vcmp.eq.s32.totalorder %v8058_v42, %v107_v57  ;;  %vm130_vm13 = vcmp.eq.s32.totalorder %v8058_v42, %v110_v56  ;;  %7041 = vmatpush3.bf16.msra.mxu1 %v7038_v55 }
  0xc0   :  { %6080 = vmatmul.mubr.msk.f32.gmra.mrb[10].mxu0 %vm128_vm11, %v10417_v45 }
  0xc1   :  { %6082 = vmatprep.mubr.msk.f32.mxu0 %vm129_vm12, %v10417_v45 }
  0xc2   :  { %v113_v58 = vpop.permute.xlu0 %112  ;;  %v116_v59 = vpop.permute.xlu1 %115 }
  0xc3   :  { %vm131_vm14 = vcmp.eq.s32.totalorder %v8058_v42, %v113_v58  ;;  %vm132_vm15 = vcmp.eq.s32.totalorder %v8058_v42, %v116_v59 }
  0xc4   :  { %6083 = vmatmul.mubr.msk.f32.gmra.mrb[12].mxu0 %vm130_vm13, %v10417_v45 }
  0xc5   :  { %6085 = vmatprep.mubr.msk.f32.mxu0 %vm131_vm14, %v10417_v45 }
  0xc8   :  { %6086 = vmatmul.mubr.msk.f32.gmra.mrb[14].mxu0 %vm132_vm15, %v10417_v45 }
 0x17f   :  { %v6066_v62 = vpop.f32.mrb[0].mxu0 }
 0x180   :  { %v8092_v63 = vadd.f32 %v6066_v62, %v182_v60  ;;  %v263_v0 = vpop.f32.mrb[1].mxu0  ;;  %v10420_v60 = vmov 0.0  }
 0x181   :  { %v8094_v1 = vadd.f32 %v263_v0, %v181_v61  ;;  %v8142_v61 = vsel %vm47_vm0, 1.0, %v10420_v60 }
 0x182   :  { %360 = vadd.xlane.f32.xlu1 %v8092_v63  ;;  %10497 = vst [vmem:[#allocation9_spill] sm:$0xff] %v8142_v61 }
 0x183   :  { %v6069_v3 = vpop.f32.mrb[2].mxu0  ;;  %358 = vadd.xlane.f32.xlu0 %v8094_v1 }
 0x184   :  { %v273_v4 = vpop.f32.mrb[3].mxu0  ;;  %v8101_v10 = vadd.f32 %v6069_v3, %v184_v6 }
 0x185   :  { %v8098_v5 = vadd.f32 %v273_v4, %v183_v2 }
 0x187   :  { %362 = vadd.xlane.f32.xlu0 %v8098_v5  ;;  %v6072_v8 = vpop.f32.mrb[4].mxu0 }
 0x188   :  { %v283_v9 = vpop.f32.mrb[5].mxu0  ;;  %v8107_v16 = vadd.f32 %v6072_v8, %v186_v12 }
 0x189   :  { %v8103_v11 = vadd.f32 %v283_v9, %v185_v7 }
 0x18b   :  { %364 = vadd.xlane.f32.xlu0 %v8101_v10  ;;  %366 = vadd.xlane.f32.xlu1 %v8103_v11  ;;  %v6075_v14 = vpop.f32.mrb[6].mxu0 }
 0x18c   :  { %v293_v15 = vpop.f32.mrb[7].mxu0  ;;  %v8113_v22 = vadd.f32 %v6075_v14, %v188_v18 }
 0x18d   :  { %v8109_v17 = vadd.f32 %v293_v15, %v187_v13 }
 0x18f   :  { %368 = vadd.xlane.f32.xlu0 %v8107_v16  ;;  %370 = vadd.xlane.f32.xlu1 %v8109_v17  ;;  %v6078_v20 = vpop.f32.mrb[8].mxu0 }
 0x190   :  { %v303_v21 = vpop.f32.mrb[9].mxu0  ;;  %v8119_v28 = vadd.f32 %v6078_v20, %v190_v24 }
 0x191   :  { %v8115_v23 = vadd.f32 %v303_v21, %v189_v19 }
 0x193   :  { %372 = vadd.xlane.f32.xlu0 %v8113_v22  ;;  %374 = vadd.xlane.f32.xlu1 %v8115_v23  ;;  %v6081_v26 = vpop.f32.mrb[10].mxu0 }
 0x194   :  { %v313_v27 = vpop.f32.mrb[11].mxu0  ;;  %v8125_v34 = vadd.f32 %v6081_v26, %v192_v30 }
 0x195   :  { %v8121_v29 = vadd.f32 %v313_v27, %v191_v25 }
 0x197   :  { %376 = vadd.xlane.f32.xlu0 %v8119_v28  ;;  %378 = vadd.xlane.f32.xlu1 %v8121_v29  ;;  %v6084_v32 = vpop.f32.mrb[12].mxu0 }
 0x198   :  { %v323_v33 = vpop.f32.mrb[13].mxu0  ;;  %v8131_v40 = vadd.f32 %v6084_v32, %v194_v36 }
 0x199   :  { %v8127_v35 = vadd.f32 %v323_v33, %v193_v31 }
 0x19b   :  { %380 = vadd.xlane.f32.xlu0 %v8125_v34  ;;  %382 = vadd.xlane.f32.xlu1 %v8127_v35  ;;  %v6087_v38 = vpop.f32.mrb[14].mxu0 }
 0x19c   :  { %v333_v39 = vpop.f32.mrb[15].mxu0  ;;  %v8137_v46 = vadd.f32 %v6087_v38, %v196_v44 }
 0x19d   :  { %v8133_v43 = vadd.f32 %v333_v39, %v195_v37 }
 0x19f   :  { %384 = vadd.xlane.f32.xlu0 %v8131_v40  ;;  %386 = vadd.xlane.f32.xlu1 %v8133_v43 }
 0x1a3   :  { %388 = vadd.xlane.f32.xlu0 %v8137_v46 }
 0x20f   :  { %v361_v56 = vpop.xlane.xlu1 %360 }
 0x210   :  { %v391_v57 = vmul.f32 0.03125, %v361_v56  ;;  %v359_v58 = vpop.xlane.xlu0 %358 }
 0x211   :  { %v390_v59 = vmul.f32 0.03125, %v359_v58 }
 0x212   :  { %v407_v62 = vsub.f32 %v8092_v63, %v391_v57 }
 0x213   :  { %v406_v0 = vsub.f32 %v8094_v1, %v390_v59 }
 0x214   :  { %v363_v2 = vpop.xlane.xlu0 %362  ;;  %v8147_v3 = vmul.f32 %v8142_v61, %v407_v62 }
 0x215   :  { %v392_v4 = vmul.f32 0.03125, %v363_v2  ;;  %v8150_v6 = vmul.f32 %v8142_v61, %v406_v0 }
 0x216   :  { %v439_v7 = vmul.f32 %v8147_v3, %v8147_v3 }
 0x217   :  { %v408_v8 = vsub.f32 %v8098_v5, %v392_v4  ;;  %v438_v9 = vmul.f32 %v8150_v6, %v8150_v6  ;;  %v601_v4 = vld [vmem:[#allocation2 + $0x4c8] sm:$0xff] }
 0x218   :  { %v367_v12 = vpop.xlane.xlu1 %366  ;;  %456 = vadd.xlane.f32.xlu0 %v439_v7  ;;  %v365_v63 = vpop.xlane.xlu0 %364 }
 0x219   :  { %v394_v1 = vmul.f32 0.03125, %v367_v12  ;;  %v393_v13 = vmul.f32 0.03125, %v365_v63  ;;  %454 = vadd.xlane.f32.xlu1 %v438_v9  ;;  %v8158_v14 = vmul.f32 %v8142_v61, %v408_v8 }
 0x21b   :  { %v410_v15 = vsub.f32 %v8103_v11, %v394_v1  ;;  %v409_v18 = vsub.f32 %v8101_v10, %v393_v13  ;;  %v440_v19 = vmul.f32 %v8158_v14, %v8158_v14 }
 0x21c   :  { %v371_v5 = vpop.xlane.xlu1 %370  ;;  %v369_v20 = vpop.xlane.xlu0 %368 }
 0x21d   :  { %v396_v21 = vmul.f32 0.03125, %v371_v5  ;;  %v395_v24 = vmul.f32 0.03125, %v369_v20  ;;  %458 = vadd.xlane.f32.xlu1 %v440_v19  ;;  %v8165_v25 = vmul.f32 %v8142_v61, %v410_v15  ;;  %v8168_v26 = vmul.f32 %v8142_v61, %v409_v18 }
 0x21f   :  { %v412_v27 = vsub.f32 %v8109_v17, %v396_v21  ;;  %v411_v11 = vsub.f32 %v8107_v16, %v395_v24  ;;  %v442_v10 = vmul.f32 %v8165_v25, %v8165_v25  ;;  %v441_v30 = vmul.f32 %v8168_v26, %v8168_v26  ;;  %v602_v24 = vld [vmem:[#allocation2 + $0x4d0] sm:$0xff] }
 0x220   :  { %v375_v31 = vpop.xlane.xlu1 %374  ;;  %v373_v32 = vpop.xlane.xlu0 %372 }
 0x221   :  { %v398_v33 = vmul.f32 0.03125, %v375_v31  ;;  %v397_v36 = vmul.f32 0.03125, %v373_v32  ;;  %462 = vadd.xlane.f32.xlu1 %v442_v10  ;;  %460 = vadd.xlane.f32.xlu0 %v441_v30  ;;  %v8177_v37 = vmul.f32 %v8142_v61, %v412_v27  ;;  %v8180_v38 = vmul.f32 %v8142_v61, %v411_v11  ;;  %v603_v27 = vld [vmem:[#allocation2 + $0x4d8] sm:$0xff] }
 0x222   :  { %v7050_v10 = vpack.c.bf16 %v603_v27, %v602_v24 }
 0x223   :  { %v414_v16 = vsub.f32 %v8115_v23, %v398_v33  ;;  %v413_v17 = vsub.f32 %v8113_v22, %v397_v36  ;;  %v444_v39 = vmul.f32 %v8177_v37, %v8177_v37  ;;  %v443_v44 = vmul.f32 %v8180_v38, %v8180_v38  ;;  %v598_v23 = vld [vmem:[#allocation2 + $0x4b0] sm:$0xff]  ;;  %v599_v22 = vld [vmem:[#allocation2 + $0x4b8] sm:$0xff]  ;;  %v604_v36 = vld [vmem:[#allocation2 + $0x4e0] sm:$0xff] }
 0x224   :  { %v379_v47 = vpop.xlane.xlu1 %378  ;;  %v377_v48 = vpop.xlane.xlu0 %376  ;;  %v7042_v59 = vpack.c.bf16 %v599_v22, %v598_v23  ;;  %v808_v23 = vld [vmem:[#allocation2 + $0x510] sm:$0xff] }
 0x225   :  { %v400_v49 = vmul.f32 0.03125, %v379_v47  ;;  %v399_v50 = vmul.f32 0.03125, %v377_v48  ;;  %466 = vadd.xlane.f32.xlu1 %v444_v39  ;;  %464 = vadd.xlane.f32.xlu0 %v443_v44  ;;  %v8189_v51 = vmul.f32 %v8142_v61, %v414_v16  ;;  %v8192_v52 = vmul.f32 %v8142_v61, %v413_v17  ;;  %v605_v16 = vld [vmem:[#allocation2 + $0x4e8] sm:$0xff]  ;;  %v607_v47 = vld [vmem:[#allocation2 + $0x4f8] sm:$0xff] }
 0x226   :  { %7043 = vmatprep.subr.bf16.mxu1 %v7042_v59  ;;  %v7054_v17 = vpack.c.bf16 %v605_v16, %v604_v36 }
 0x227   :  { %v416_v53 = vsub.f32 %v8121_v29, %v400_v49  ;;  %v415_v54 = vsub.f32 %v8119_v28, %v399_v50  ;;  %v446_v55 = vmul.f32 %v8189_v51, %v8189_v51  ;;  %v445_v56 = vmul.f32 %v8192_v52, %v8192_v52  ;;  %v600_v28 = vld [vmem:[#allocation2 + $0x4c0] sm:$0xff]  ;;  %7045 = vmatpush3.bf16.msra.mxu1 %v7042_v59  ;;  %v807_v50 = vld [vmem:[#allocation2 + $0x508] sm:$0xff]  ;;  %v813_v59 = vld [vmem:[#allocation2 + $0x538] sm:$0xff] }
 0x228   :  { %v383_v57 = vpop.xlane.xlu1 %382  ;;  %v381_v58 = vpop.xlane.xlu0 %380  ;;  %v7046_v13 = vpack.c.bf16 %v601_v4, %v600_v28  ;;  %v806_v49 = vld [vmem:[#allocation2 + $0x500] sm:$0xff]  ;;  %v815_v28 = vld [vmem:[#allocation2 + $0x548] sm:$0xff] }
 0x229   :  { %v402_v62 = vmul.f32 0.03125, %v383_v57  ;;  %v401_v0 = vmul.f32 0.03125, %v381_v58  ;;  %470 = vadd.xlane.f32.xlu1 %v446_v55  ;;  %468 = vadd.xlane.f32.xlu0 %v445_v56  ;;  %v8201_v2 = vmul.f32 %v8142_v61, %v416_v53  ;;  %v8204_v29 = vmul.f32 %v8142_v61, %v415_v54  ;;  %v809_v53 = vld [vmem:[#allocation2 + $0x518] sm:$0xff]  ;;  %v810_v55 = vld [vmem:[#allocation2 + $0x520] sm:$0xff]  ;;  %v811_v56 = vld [vmem:[#allocation2 + $0x528] sm:$0xff] }
 0x22a   :  { %7047 = vmatprep.subr.bf16.mxu1 %v7046_v13  ;;  %v7062_v22 = vpack.c.bf16 %v807_v50, %v806_v49  ;;  %v7066_v54 = vpack.c.bf16 %v809_v53, %v808_v23  ;;  %v7070_v57 = vpack.c.bf16 %v811_v56, %v810_v55  ;;  %v812_v58 = vld [vmem:[#allocation2 + $0x530] sm:$0xff] }
 0x22b   :  { %v418_v7 = vsub.f32 %v8127_v35, %v402_v62  ;;  %v417_v8 = vsub.f32 %v8125_v34, %v401_v0  ;;  %v448_v9 = vmul.f32 %v8201_v2, %v8201_v2  ;;  %v447_v12 = vmul.f32 %v8204_v29, %v8204_v29  ;;  %7049 = vmatpush3.bf16.msra.mxu1 %v7046_v13  ;;  %v814_v0 = vld [vmem:[#allocation2 + $0x540] sm:$0xff] }
 0x22c   :  { %v387_v63 = vpop.xlane.xlu1 %386  ;;  %v385_v1 = vpop.xlane.xlu0 %384  ;;  %7051 = vmatprep.subr.bf16.mxu1 %v7050_v10  ;;  %7063 = vmatprep.subr.bf16.mxu0 %v7062_v22  ;;  %v7074_v62 = vpack.c.bf16 %v813_v59, %v812_v58  ;;  %v7078_v4 = vpack.c.bf16 %v815_v28, %v814_v0 }
 0x22d   :  { %v404_v15 = vmul.f32 0.03125, %v387_v63  ;;  %v403_v18 = vmul.f32 0.03125, %v385_v1  ;;  %474 = vadd.xlane.f32.xlu1 %v448_v9  ;;  %472 = vadd.xlane.f32.xlu0 %v447_v12  ;;  %v8213_v19 = vmul.f32 %v8142_v61, %v418_v7  ;;  %v8216_v35 = vmul.f32 %v8142_v61, %v417_v8  ;;  %v816_v7 = vld [vmem:[#allocation2 + $0x550] sm:$0xff]  ;;  %v817_v8 = vld [vmem:[#allocation2 + $0x558] sm:$0xff] }
 0x22e   :  { %7065 = vmatpush3.bf16.msra.mxu0 %v7062_v22  ;;  %v7082_v9 = vpack.c.bf16 %v817_v8, %v816_v7 }
 0x22f   :  { %v420_v34 = vsub.f32 %v8133_v43, %v404_v15  ;;  %v419_v5 = vsub.f32 %v8131_v40, %v403_v18  ;;  %v450_v20 = vmul.f32 %v8213_v19, %v8213_v19  ;;  %v449_v21 = vmul.f32 %v8216_v35, %v8216_v35  ;;  %7053 = vmatpush3.bf16.msra.mxu1 %v7050_v10 }
 0x230   :  { %v389_v11 = vpop.xlane.xlu0 %388  ;;  %7055 = vmatprep.subr.bf16.mxu1 %v7054_v17  ;;  %7067 = vmatprep.subr.bf16.mxu0 %v7066_v54 }
 0x231   :  { %v405_v30 = vmul.f32 0.03125, %v389_v11  ;;  %478 = vadd.xlane.f32.xlu1 %v450_v20  ;;  %476 = vadd.xlane.f32.xlu0 %v449_v21  ;;  %v8225_v31 = vmul.f32 %v8142_v61, %v420_v34  ;;  %v8228_v43 = vmul.f32 %v8142_v61, %v419_v5 }
 0x232   :  { %7069 = vmatpush3.bf16.msra.mxu0 %v7066_v54  ;;  %v8244_v54 = vld [vmem:[#allocation4 + $0xb] ss:$0 sm:$0xff] }
 0x233   :  { %v421_v40 = vsub.f32 %v8137_v46, %v405_v30  ;;  %v452_v32 = vmul.f32 %v8225_v31, %v8225_v31  ;;  %v451_v33 = vmul.f32 %v8228_v43, %v8228_v43  ;;  %7057 = vmatpush3.bf16.msra.mxu1 %v7054_v17  ;;  %v606_v46 = vld [vmem:[#allocation2 + $0x4f0] sm:$0xff]  ;;  %7071 = vmatprep.subr.bf16.mxu0 %v7070_v57  ;;  %v8240_v17 = vld [vmem:[#allocation4 + $0xa] ss:$0 sm:$0xff] }
 0x234   :  { %v7058_v48 = vpack.c.bf16 %v607_v47, %v606_v46 }
 0x235   :  { %482 = vadd.xlane.f32.xlu1 %v452_v32  ;;  %480 = vadd.xlane.f32.xlu0 %v451_v33  ;;  %v8236_v39 = vmul.f32 %v8142_v61, %v421_v40 }
 0x236   :  { %7059 = vmatprep.subr.bf16.mxu1 %v7058_v48  ;;  %7073 = vmatpush3.bf16.msra.mxu0 %v7070_v57 }
 0x237   :  { %v453_v44 = vmul.f32 %v8236_v39, %v8236_v39  ;;  %7061 = vmatpush3.bf16.msra.mxu1 %v7058_v48  ;;  %7075 = vmatprep.subr.bf16.mxu0 %v7074_v62 }
 0x239   :  { %484 = vadd.xlane.f32.xlu0 %v453_v44 }
 0x23a   :  { %7077 = vmatpush3.bf16.msra.mxu0 %v7074_v62 }
 0x23b   :  { %7079 = vmatprep.subr.bf16.mxu0 %v7078_v4 }
 0x23e   :  { %7081 = vmatpush3.bf16.msra.mxu0 %v7078_v4 }
 0x23f   :  { %7083 = vmatprep.subr.bf16.mxu0 %v7082_v9 }
 0x242   :  { %7085 = vmatpush3.bf16.msra.mxu0 %v7082_v9 }
 0x2a5   :  { %v457_v12 = vpop.xlane.xlu0 %456 }
 0x2a6   :  { %v487_v63 = vmul.f32 0.03125, %v457_v12  ;;  %v455_v1 = vpop.xlane.xlu1 %454 }
 0x2a7   :  { %v486_v13 = vmul.f32 0.03125, %v455_v1 }
 0x2a8   :  { %v503_v15 = vadd.f32 1e-08, %v487_v63 }
 0x2a9   :  { %v502_v18 = vadd.f32 1e-08, %v486_v13 }
 0x2aa   :  { %7584 = vrsqrt.f32 %v503_v15  ;;  %v459_v34 = vpop.xlane.xlu1 %458 }
 0x2ab   :  { %7586 = vrsqrt.f32 %v502_v18  ;;  %v488_v5 = vmul.f32 0.03125, %v459_v34 }
 0x2ad   :  { %v504_v20 = vadd.f32 1e-08, %v488_v5 }
 0x2ae   :  { %v463_v21 = vpop.xlane.xlu1 %462  ;;  %v461_v24 = vpop.xlane.xlu0 %460 }
 0x2af   :  { %7588 = vrsqrt.f32 %v504_v20  ;;  %v490_v27 = vmul.f32 0.03125, %v463_v21  ;;  %v489_v11 = vmul.f32 0.03125, %v461_v24 }
 0x2b1   :  { %v506_v10 = vadd.f32 1e-08, %v490_v27  ;;  %v505_v30 = vadd.f32 1e-08, %v489_v11 }
 0x2b2   :  { %v467_v40 = vpop.xlane.xlu1 %466  ;;  %v465_v32 = vpop.xlane.xlu0 %464 }
 0x2b3   :  { %7590 = vrsqrt.f32 %v506_v10  ;;  %v492_v33 = vmul.f32 0.03125, %v467_v40  ;;  %v491_v36 = vmul.f32 0.03125, %v465_v32 }
 0x2b4   :  { %v7585_v16 = vpop.eup %7584  ;;  %7592 = vrsqrt.f32 %v505_v30 }
 0x2b5   :  { %v7587_v44 = vpop.eup %7586  ;;  %v508_v46 = vadd.f32 1e-08, %v492_v33  ;;  %v507_v47 = vadd.f32 1e-08, %v491_v36  ;;  %v535_v48 = vmul.f32 %v7585_v16, %v8147_v3 }
 0x2b6   :  { %v471_v49 = vpop.xlane.xlu1 %470  ;;  %v469_v50 = vpop.xlane.xlu0 %468  ;;  %v534_v23 = vmul.f32 %v7587_v44, %v8150_v6 }
 0x2b7   :  { %7594 = vrsqrt.f32 %v508_v46  ;;  %v494_v22 = vmul.f32 0.03125, %v471_v49  ;;  %v493_v53 = vmul.f32 0.03125, %v469_v50  ;;  %v556_v55 = vmul.f32 %v8240_v17, %v535_v48 }
 0x2b8   :  { %7596 = vrsqrt.f32 %v507_v47  ;;  %v555_v56 = vmul.f32 %v8240_v17, %v534_v23 }
 0x2b9   :  { %v7589_v57 = vpop.eup %7588  ;;  %v510_v58 = vadd.f32 1e-08, %v494_v22  ;;  %v509_v59 = vadd.f32 1e-08, %v493_v53  ;;  %v8253_v7 = vadd.f32 %v8244_v54, %v556_v55 }
 0x2ba   :  { %v475_v62 = vpop.xlane.xlu1 %474  ;;  %v473_v0 = vpop.xlane.xlu0 %472  ;;  %v8249_v3 = vadd.f32 %v8244_v54, %v555_v56  ;;  %v536_v6 = vmul.f32 %v7589_v57, %v8158_v14 }
 0x2bb   :  { %7598 = vrsqrt.f32 %v510_v58  ;;  %v496_v28 = vmul.f32 0.03125, %v475_v62  ;;  %v495_v4 = vmul.f32 0.03125, %v473_v0  ;;  %10499 = vst [vmem:[#allocation11_spill] sm:$0xff] %v8253_v7 }
 0x2bc   :  { %10498 = vst [vmem:[#allocation10_spill] sm:$0xff] %v8249_v3  ;;  %7600 = vrsqrt.f32 %v509_v59  ;;  %6120 = vmatprep.mubr.f32.mxu1 %v8249_v3  ;;  %v557_v8 = vmul.f32 %v8240_v17, %v536_v6  ;;  %v1636_v3 = vld [vmem:[#allocation2 + $0x210] sm:$0xff] }
 0x2bd   :  { %v7591_v9 = vpop.eup %7590  ;;  %v512_v12 = vadd.f32 1e-08, %v496_v28  ;;  %v511_v63 = vadd.f32 1e-08, %v495_v4  ;;  %6121 = vmatmul.mubr.f32.vlgmr.msra.gmra.mrb[0].mxu1 %v8253_v7  ;;  %v1637_v7 = vld [vmem:[#allocation2 + $0x218] sm:$0xff] }
 0x2be   :  { %v7593_v1 = vpop.eup %7592  ;;  %v479_v13 = vpop.xlane.xlu1 %478  ;;  %v8259_v14 = vadd.f32 %v8244_v54, %v557_v8  ;;  %v538_v18 = vmul.f32 %v7591_v9, %v8165_v25 }
 0x2bf   :  { %v477_v15 = vpop.xlane.xlu0 %476  ;;  %7602 = vrsqrt.f32 %v512_v12  ;;  %v498_v34 = vmul.f32 0.03125, %v479_v13  ;;  %v537_v20 = vmul.f32 %v7593_v1, %v8168_v26 }
 0x2c0   :  { %10500 = vst [vmem:[#allocation12_spill] sm:$0xff] %v8259_v14  ;;  %v497_v5 = vmul.f32 0.03125, %v477_v15  ;;  %7604 = vrsqrt.f32 %v511_v63  ;;  %6123 = vmatprep.mubr.f32.mxu1 %v8259_v14  ;;  %v559_v21 = vmul.f32 %v8240_v17, %v538_v18 }
 0x2c1   :  { %v7595_v24 = vpop.eup %7594  ;;  %v514_v27 = vadd.f32 1e-08, %v498_v34  ;;  %v558_v10 = vmul.f32 %v8240_v17, %v537_v20 }
 0x2c2   :  { %v513_v11 = vadd.f32 1e-08, %v497_v5  ;;  %v7597_v30 = vpop.eup %7596  ;;  %v483_v40 = vpop.xlane.xlu1 %482  ;;  %v8267_v25 = vadd.f32 %v8244_v54, %v559_v21  ;;  %v540_v33 = vmul.f32 %v7595_v24, %v8177_v37 }
 0x2c3   :  { %v481_v32 = vpop.xlane.xlu0 %480  ;;  %7606 = vrsqrt.f32 %v514_v27  ;;  %v500_v26 = vmul.f32 0.03125, %v483_v40  ;;  %v8271_v16 = vadd.f32 %v8244_v54, %v558_v10  ;;  %v539_v44 = vmul.f32 %v7597_v30, %v8180_v38  ;;  %v819_v40 = vld [vmem:[#allocation2 + $0x568] sm:$0xff] }
 0x2c4   :  { %10501 = vst [vmem:[#allocation13_spill] sm:$0xff] %v8267_v25  ;;  %v499_v36 = vmul.f32 0.03125, %v481_v32  ;;  %7608 = vrsqrt.f32 %v513_v11  ;;  %v561_v46 = vmul.f32 %v8240_v17, %v540_v33  ;;  %v820_v33 = vld [vmem:[#allocation2 + $0x570] sm:$0xff] }
 0x2c5   :  { %10502 = vst [vmem:[#allocation14_spill] sm:$0xff] %v8271_v16  ;;  %v7599_v47 = vpop.eup %7598  ;;  %v516_v48 = vadd.f32 1e-08, %v500_v26  ;;  %6124 = vmatmul.mubr.f32.gmra.mrb[2].mxu1 %v8271_v16  ;;  %v560_v23 = vmul.f32 %v8240_v17, %v539_v44  ;;  %v821_v26 = vld [vmem:[#allocation2 + $0x578] sm:$0xff]  ;;  %v1021_v44 = vld [vmem:[#allocation2 + $0x588] sm:$0xff] }
 0x2c6   :  { %v515_v49 = vadd.f32 1e-08, %v499_v36  ;;  %v7601_v50 = vpop.eup %7600  ;;  %6126 = vmatprep.mubr.f32.mxu1 %v8267_v25  ;;  %v542_v22 = vmul.f32 %v7599_v47, %v8189_v51  ;;  %v8280_v55 = vadd.f32 %v8244_v54, %v561_v46  ;;  %v7090_v36 = vpack.c.bf16 %v821_v26, %v820_v33  ;;  %v1022_v46 = vld [vmem:[#allocation2 + $0x590] sm:$0xff] }
 0x2c7   :  { %v485_v37 = vpop.xlane.xlu0 %484  ;;  %7610 = vrsqrt.f32 %v516_v48  ;;  %v541_v38 = vmul.f32 %v7601_v50, %v8192_v52  ;;  %v8284_v56 = vadd.f32 %v8244_v54, %v560_v23  ;;  %v1025_v50 = vld [vmem:[#allocation2 + $0x5a8] sm:$0xff]  ;;  %v1026_v23 = vld [vmem:[#allocation2 + $0x5b0] sm:$0xff] }
 0x2c8   :  { %v501_v53 = vmul.f32 0.03125, %v485_v37  ;;  %10503 = vst [vmem:[#allocation15_spill] sm:$0xff] %v8280_v55  ;;  %7612 = vrsqrt.f32 %v515_v49  ;;  %v563_v57 = vmul.f32 %v8240_v17, %v542_v22  ;;  %v1024_v49 = vld [vmem:[#allocation2 + $0x5a0] sm:$0xff]  ;;  %v1027_v22 = vld [vmem:[#allocation2 + $0x5b8] sm:$0xff] }
 0x2c9   :  { %10504 = vst [vmem:[#allocation16_spill] sm:$0xff] %v8284_v56  ;;  %v7603_v58 = vpop.eup %7602  ;;  %v562_v62 = vmul.f32 %v8240_v17, %v541_v38  ;;  %6127 = vmatmul.mubr.f32.gmra.mrb[4].mxu1 %v8284_v56  ;;  %v7102_v37 = vpack.c.bf16 %v1025_v50, %v1024_v49  ;;  %v1028_v38 = vld [vmem:[#allocation2 + $0x5c0] sm:$0xff]  ;;  %v1471_v56 = vld [vmem:[#allocation2 + $0x198] sm:$0xff] }
 0x2ca   :  { %v517_v59 = vadd.f32 1e-08, %v501_v53  ;;  %v7605_v0 = vpop.eup %7604  ;;  %v544_v51 = vmul.f32 %v7603_v58, %v8201_v2  ;;  %6129 = vmatprep.mubr.f32.mxu1 %v8280_v55  ;;  %v8295_v6 = vadd.f32 %v8244_v54, %v563_v57  ;;  %v7106_v53 = vpack.c.bf16 %v1027_v22, %v1026_v23  ;;  %v1029_v57 = vld [vmem:[#allocation2 + $0x5c8] sm:$0xff] }
 0x2cb   :  { %v8292_v52 = vadd.f32 %v8244_v54, %v562_v62  ;;  %v543_v28 = vmul.f32 %v7605_v0, %v8204_v29  ;;  %v7110_v58 = vpack.c.bf16 %v1029_v57, %v1028_v38  ;;  %v1031_v62 = vld [vmem:[#allocation2 + $0x5d8] sm:$0xff] }
 0x2cc   :  { %7614 = vrsqrt.f32 %v517_v59  ;;  %10506 = vst [vmem:[#allocation18_spill] sm:$0xff] %v8295_v6  ;;  %v565_v4 = vmul.f32 %v8240_v17, %v544_v51  ;;  %v1030_v59 = vld [vmem:[#allocation2 + $0x5d0] sm:$0xff]  ;;  %v8340_v51 = vld [vmem:[#allocation4 + $0xc] ss:$0 sm:$0xff] }
 0x2cd   :  { %10505 = vst [vmem:[#allocation17_spill] sm:$0xff] %v8292_v52  ;;  %v7607_v8 = vpop.eup %7606  ;;  %v564_v9 = vmul.f32 %v8240_v17, %v543_v28  ;;  %6130 = vmatmul.mubr.f32.gmra.mrb[6].mxu1 %v8292_v52  ;;  %v7114_v0 = vpack.c.bf16 %v1031_v62, %v1030_v59 }
 0x2ce   :  { %v7609_v12 = vpop.eup %7608  ;;  %v546_v2 = vmul.f32 %v7607_v8, %v8213_v19  ;;  %6132 = vmatprep.mubr.f32.mxu1 %v8295_v6  ;;  %v8307_v1 = vadd.f32 %v8244_v54, %v565_v4 }
 0x2cf   :  { %v8304_v63 = vadd.f32 %v8244_v54, %v564_v9  ;;  %v545_v29 = vmul.f32 %v7609_v12, %v8216_v35 }
 0x2d0   :  { %10508 = vst [vmem:[#allocation20_spill] sm:$0xff] %v8307_v1  ;;  %v567_v13 = vmul.f32 %v8240_v17, %v546_v2 }
 0x2d1   :  { %10507 = vst [vmem:[#allocation19_spill] sm:$0xff] %v8304_v63  ;;  %v7611_v15 = vpop.eup %7610  ;;  %v566_v18 = vmul.f32 %v8240_v17, %v545_v29  ;;  %6133 = vmatmul.mubr.f32.gmra.mrb[8].mxu1 %v8304_v63 }
 0x2d2   :  { %v7613_v34 = vpop.eup %7612  ;;  %v548_v19 = vmul.f32 %v7611_v15, %v8225_v31  ;;  %6135 = vmatprep.mubr.f32.mxu1 %v8307_v1  ;;  %v8319_v20 = vadd.f32 %v8244_v54, %v567_v13 }
 0x2d3   :  { %v8316_v5 = vadd.f32 %v8244_v54, %v566_v18  ;;  %v547_v35 = vmul.f32 %v7613_v34, %v8228_v43 }
 0x2d4   :  { %10510 = vst [vmem:[#allocation22_spill] sm:$0xff] %v8319_v20  ;;  %v569_v21 = vmul.f32 %v8240_v17, %v548_v19 }
 0x2d5   :  { %10509 = vst [vmem:[#allocation21_spill] sm:$0xff] %v8316_v5  ;;  %v568_v27 = vmul.f32 %v8240_v17, %v547_v35  ;;  %6136 = vmatmul.mubr.f32.gmra.mrb[10].mxu1 %v8316_v5 }
 0x2d6   :  { %v7615_v24 = vpop.eup %7614  ;;  %6138 = vmatprep.mubr.f32.mxu1 %v8319_v20  ;;  %v8331_v10 = vadd.f32 %v8244_v54, %v569_v21 }
 0x2d7   :  { %v549_v11 = vmul.f32 %v7615_v24, %v8236_v39  ;;  %v8328_v31 = vadd.f32 %v8244_v54, %v568_v27  ;;  %v818_v39 = vld [vmem:[#allocation2 + $0x560] sm:$0xff] }
 0x2d8   :  { %10512 = vst [vmem:[#allocation24_spill] sm:$0xff] %v8331_v10  ;;  %v7086_v32 = vpack.c.bf16 %v819_v40, %v818_v39 }
 0x2d9   :  { %10511 = vst [vmem:[#allocation23_spill] sm:$0xff] %v8328_v31  ;;  %v570_v30 = vmul.f32 %v8240_v17, %v549_v11  ;;  %6139 = vmatmul.mubr.f32.gmra.mrb[12].mxu1 %v8328_v31  ;;  %v1020_v17 = vld [vmem:[#allocation2 + $0x580] sm:$0xff] }
 0x2da   :  { %6141 = vmatprep.mubr.f32.mxu1 %v8331_v10  ;;  %7087 = vmatprep.subr.bf16.mxu0 %v7086_v32  ;;  %v7094_v47 = vpack.c.bf16 %v1021_v44, %v1020_v17 }
 0x2db   :  { %v8336_v43 = vadd.f32 %v8244_v54, %v570_v30  ;;  %7089 = vmatpush3.bf16.msra.mxu0 %v7086_v32  ;;  %v1023_v54 = vld [vmem:[#allocation2 + $0x598] sm:$0xff] }
 0x2dc   :  { %7091 = vmatprep.subr.bf16.mxu0 %v7090_v36  ;;  %v7098_v48 = vpack.c.bf16 %v1023_v54, %v1022_v46  ;;  %7095 = vmatprep.subr.bf16.mxu1 %v7094_v47 }
 0x2dd   :  { %10513 = vst [vmem:[#allocation25_spill] sm:$0xff] %v8336_v43  ;;  %6142 = vmatmul.mubr.f32.gmra.mrb[14].mxu1 %v8336_v43 }
 0x2de   :  { %7097 = vmatpush3.bf16.msra.mxu1 %v7094_v47 }
 0x2df   :  { %7093 = vmatpush3.bf16.msra.mxu0 %v7090_v36  ;;  %7099 = vmatprep.subr.bf16.mxu1 %v7098_v48 }
 0x2e2   :  { %7101 = vmatpush3.bf16.msra.mxu1 %v7098_v48 }
 0x2e3   :  { %7103 = vmatprep.subr.bf16.mxu1 %v7102_v37 }
 0x2e6   :  { %7105 = vmatpush3.bf16.msra.mxu1 %v7102_v37 }
 0x2e7   :  { %7107 = vmatprep.subr.bf16.mxu1 %v7106_v53 }
 0x2ea   :  { %7109 = vmatpush3.bf16.msra.mxu1 %v7106_v53 }
 0x2eb   :  { %7111 = vmatprep.subr.bf16.mxu1 %v7110_v58 }
 0x2ee   :  { %7113 = vmatpush3.bf16.msra.mxu1 %v7110_v58 }
 0x2ef   :  { %7115 = vmatprep.subr.bf16.mxu1 %v7114_v0 }
 0x2f2   :  { %7117 = vmatpush3.bf16.msra.mxu1 %v7114_v0 }
 0x390   :  { %v6122_v28 = vpop.f32.mrb[0].mxu1 }
 0x391   :  { %v685_v4 = vadd.f32 %v6122_v28, %v8340_v51  ;;  %v679_v8 = vpop.f32.mrb[1].mxu1 }
 0x392   :  { %v680_v9 = vadd.f32 %v8340_v51, %v679_v8 }
 0x393   :  { %v775_v12 = vmul.f32 0.01, %v685_v4  ;;  %vm759_vm1 = vcmp.gt.f32.partialorder %v685_v4, 0.0 }
 0x394   :  { %v774_v2 = vmul.f32 0.01, %v680_v9  ;;  %vm758_vm2 = vcmp.gt.f32.partialorder %v680_v9, 0.0 }
 0x395   :  { %v8346_v13 = vsel %vm759_vm1, %v685_v4, %v775_v12 }
 0x396   :  { %v8344_v29 = vsel %vm758_vm2, %v680_v9, %v774_v2  ;;  %10515 = vst [vmem:[#allocation27_spill] sm:$0xff] %v8346_v13 }
 0x397   :  { %10514 = vst [vmem:[#allocation26_spill] sm:$0xff] %v8344_v29  ;;  %6176 = vmatprep.mubr.f32.mxu0 %v8344_v29 }
 0x398   :  { %v6125_v15 = vpop.f32.mrb[2].mxu1  ;;  %6177 = vmatmul.mubr.f32.vlgmr.msra.gmra.mrb[16].mxu0 %v8346_v13 }
 0x399   :  { %v695_v18 = vadd.f32 %v6125_v15, %v8340_v51  ;;  %v689_v34 = vpop.f32.mrb[3].mxu1 }
 0x39a   :  { %v690_v19 = vadd.f32 %v8340_v51, %v689_v34 }
 0x39b   :  { %v777_v35 = vmul.f32 0.01, %v695_v18  ;;  %vm761_vm4 = vcmp.gt.f32.partialorder %v695_v18, 0.0 }
 0x39c   :  { %v776_v21 = vmul.f32 0.01, %v690_v19  ;;  %vm760_vm3 = vcmp.gt.f32.partialorder %v690_v19, 0.0  ;;  %v6128_v24 = vpop.f32.mrb[4].mxu1 }
 0x39d   :  { %v705_v27 = vadd.f32 %v6128_v24, %v8340_v51  ;;  %v699_v11 = vpop.f32.mrb[5].mxu1  ;;  %v8357_v40 = vsel %vm761_vm4, %v695_v18, %v777_v35 }
 0x39e   :  { %v8353_v30 = vsel %vm760_vm3, %v690_v19, %v776_v21  ;;  %v700_v39 = vadd.f32 %v8340_v51, %v699_v11  ;;  %10517 = vst [vmem:[#allocation29_spill] sm:$0xff] %v8357_v40 }
 0x39f   :  { %10516 = vst [vmem:[#allocation28_spill] sm:$0xff] %v8353_v30  ;;  %6179 = vmatprep.mubr.f32.mxu0 %v8353_v30  ;;  %v779_v32 = vmul.f32 0.01, %v705_v27  ;;  %vm763_vm6 = vcmp.gt.f32.partialorder %v705_v27, 0.0 }
 0x3a0   :  { %6180 = vmatmul.mubr.f32.gmra.mrb[18].mxu0 %v8357_v40  ;;  %v778_v33 = vmul.f32 0.01, %v700_v39  ;;  %v6131_v26 = vpop.f32.mrb[6].mxu1  ;;  %vm762_vm5 = vcmp.gt.f32.partialorder %v700_v39, 0.0 }
 0x3a1   :  { %v715_v36 = vadd.f32 %v6131_v26, %v8340_v51  ;;  %v709_v17 = vpop.f32.mrb[7].mxu1  ;;  %v8365_v54 = vsel %vm763_vm6, %v705_v27, %v779_v32 }
 0x3a2   :  { %v710_v44 = vadd.f32 %v8340_v51, %v709_v17  ;;  %v8362_v46 = vsel %vm762_vm5, %v700_v39, %v778_v33  ;;  %10519 = vst [vmem:[#allocation31_spill] sm:$0xff] %v8365_v54 }
 0x3a3   :  { %10518 = vst [vmem:[#allocation30_spill] sm:$0xff] %v8362_v46  ;;  %v781_v47 = vmul.f32 0.01, %v715_v36  ;;  %6182 = vmatprep.mubr.f32.mxu0 %v8362_v46  ;;  %vm765_vm8 = vcmp.gt.f32.partialorder %v715_v36, 0.0 }
 0x3a4   :  { %v780_v48 = vmul.f32 0.01, %v710_v44  ;;  %v6134_v49 = vpop.f32.mrb[8].mxu1  ;;  %6183 = vmatmul.mubr.f32.gmra.mrb[20].mxu0 %v8365_v54  ;;  %vm764_vm7 = vcmp.gt.f32.partialorder %v710_v44, 0.0 }
 0x3a5   :  { %v725_v50 = vadd.f32 %v6134_v49, %v8340_v51  ;;  %v719_v37 = vpop.f32.mrb[9].mxu1  ;;  %v8373_v38 = vsel %vm765_vm8, %v715_v36, %v781_v47  ;;  %v1033_v47 = vld [vmem:[#allocation2 + $0x5e8] sm:$0xff]  ;;  %v1034_v49 = vld [vmem:[#allocation2 + $0x5f0] sm:$0xff] }
 0x3a6   :  { %v720_v23 = vadd.f32 %v8340_v51, %v719_v37  ;;  %v8370_v22 = vsel %vm764_vm7, %v710_v44, %v780_v48  ;;  %10521 = vst [vmem:[#allocation33_spill] sm:$0xff] %v8373_v38 }
 0x3a7   :  { %10520 = vst [vmem:[#allocation32_spill] sm:$0xff] %v8370_v22  ;;  %v783_v53 = vmul.f32 0.01, %v725_v50  ;;  %6185 = vmatprep.mubr.f32.mxu0 %v8370_v22  ;;  %vm767_vm10 = vcmp.gt.f32.partialorder %v725_v50, 0.0 }
 0x3a8   :  { %v782_v57 = vmul.f32 0.01, %v720_v23  ;;  %v6137_v58 = vpop.f32.mrb[10].mxu1  ;;  %6186 = vmatmul.mubr.f32.gmra.mrb[22].mxu0 %v8373_v38  ;;  %vm766_vm9 = vcmp.gt.f32.partialorder %v720_v23, 0.0 }
 0x3a9   :  { %v735_v59 = vadd.f32 %v6137_v58, %v8340_v51  ;;  %v729_v62 = vpop.f32.mrb[11].mxu1  ;;  %v8381_v8 = vsel %vm767_vm10, %v725_v50, %v783_v53  ;;  %v1035_v50 = vld [vmem:[#allocation2 + $0x5f8] sm:$0xff] }
 0x3aa   :  { %v730_v0 = vadd.f32 %v8340_v51, %v729_v62  ;;  %v8378_v28 = vsel %vm766_vm9, %v720_v23, %v782_v57  ;;  %10523 = vst [vmem:[#allocation35_spill] sm:$0xff] %v8381_v8  ;;  %v7122_v37 = vpack.c.bf16 %v1035_v50, %v1034_v49  ;;  %v8406_v23 = vld [vmem:[#allocation4 + $0xd] ss:$0 sm:$0xff] }
 0x3ab   :  { %10522 = vst [vmem:[#allocation34_spill] sm:$0xff] %v8378_v28  ;;  %v785_v4 = vmul.f32 0.01, %v735_v59  ;;  %6188 = vmatprep.mubr.f32.mxu0 %v8378_v28  ;;  %vm769_vm12 = vcmp.gt.f32.partialorder %v735_v59, 0.0 }
 0x3ac   :  { %v784_v9 = vmul.f32 0.01, %v730_v0  ;;  %v6140_v12 = vpop.f32.mrb[12].mxu1  ;;  %6189 = vmatmul.mubr.f32.gmra.mrb[24].mxu0 %v8381_v8  ;;  %vm768_vm11 = vcmp.gt.f32.partialorder %v730_v0, 0.0 }
 0x3ad   :  { %v745_v2 = vadd.f32 %v6140_v12, %v8340_v51  ;;  %v739_v15 = vpop.f32.mrb[13].mxu1  ;;  %v8389_v35 = vsel %vm769_vm12, %v735_v59, %v785_v4 }
 0x3ae   :  { %v740_v18 = vadd.f32 %v8340_v51, %v739_v15  ;;  %v8386_v34 = vsel %vm768_vm11, %v730_v0, %v784_v9  ;;  %10525 = vst [vmem:[#allocation37_spill] sm:$0xff] %v8389_v35 }
 0x3af   :  { %10524 = vst [vmem:[#allocation36_spill] sm:$0xff] %v8386_v34  ;;  %v787_v19 = vmul.f32 0.01, %v745_v2  ;;  %6191 = vmatprep.mubr.f32.mxu0 %v8386_v34  ;;  %vm771_vm14 = vcmp.gt.f32.partialorder %v745_v2, 0.0  ;;  %v1475_v34 = vld [vmem:[#allocation2 + $0x1b8] sm:$0xff] }
 0x3b0   :  { %v786_v21 = vmul.f32 0.01, %v740_v18  ;;  %v6143_v24 = vpop.f32.mrb[14].mxu1  ;;  %6192 = vmatmul.mubr.f32.gmra.mrb[26].mxu0 %v8389_v35  ;;  %vm770_vm13 = vcmp.gt.f32.partialorder %v740_v18, 0.0 }
 0x3b1   :  { %v755_v27 = vadd.f32 %v6143_v24, %v8340_v51  ;;  %v749_v11 = vpop.f32.mrb[15].mxu1  ;;  %v8397_v26 = vsel %vm771_vm14, %v745_v2, %v787_v19 }
 0x3b2   :  { %v750_v39 = vadd.f32 %v8340_v51, %v749_v11  ;;  %v8394_v32 = vsel %vm770_vm13, %v740_v18, %v786_v21  ;;  %10527 = vst [vmem:[#allocation39_spill] sm:$0xff] %v8397_v26  ;;  %v1032_v51 = vld [vmem:[#allocation2 + $0x5e0] sm:$0xff] }
 0x3b3   :  { %10526 = vst [vmem:[#allocation38_spill] sm:$0xff] %v8394_v32  ;;  %v789_v33 = vmul.f32 0.01, %v755_v27  ;;  %6194 = vmatprep.mubr.f32.mxu0 %v8394_v32  ;;  %vm773_vm0 = vcmp.gt.f32.partialorder %v755_v27, 0.0  ;;  %v7118_v48 = vpack.c.bf16 %v1033_v47, %v1032_v51 }
 0x3b4   :  { %v788_v36 = vmul.f32 0.01, %v750_v39  ;;  %6195 = vmatmul.mubr.f32.gmra.mrb[28].mxu0 %v8397_v26  ;;  %vm772_vm15 = vcmp.gt.f32.partialorder %v750_v39, 0.0 }
 0x3b5   :  { %v8403_v44 = vsel %vm773_vm0, %v755_v27, %v789_v33  ;;  %7119 = vmatprep.subr.bf16.mxu1 %v7118_v48 }
 0x3b6   :  { %v8400_v17 = vsel %vm772_vm15, %v750_v39, %v788_v36  ;;  %10529 = vst [vmem:[#allocation41_spill] sm:$0xff] %v8403_v44  ;;  %7121 = vmatpush3.bf16.msra.mxu1 %v7118_v48 }
 0x3b7   :  { %10528 = vst [vmem:[#allocation40_spill] sm:$0xff] %v8400_v17  ;;  %6197 = vmatprep.mubr.f32.mxu0 %v8400_v17  ;;  %7123 = vmatprep.subr.bf16.mxu1 %v7122_v37  ;;  %v1638_v17 = vld [vmem:[#allocation2 + $0x220] sm:$0xff] }
 0x3b8   :  { %6198 = vmatmul.mubr.f32.gmra.mrb[30].mxu0 %v8403_v44  ;;  %v1472_v44 = vld [vmem:[#allocation2 + $0x1a0] sm:$0xff] }
 0x3ba   :  { %7125 = vmatpush3.bf16.msra.mxu1 %v7122_v37 }
 0x46b   :  { %v6178_v53 = vpop.f32.mrb[16].mxu0 }
 0x46c   :  { %v899_v57 = vadd.f32 %v6178_v53, %v8406_v23  ;;  %v893_v58 = vpop.f32.mrb[17].mxu0 }
 0x46d   :  { %v894_v59 = vadd.f32 %v8406_v23, %v893_v58 }
 0x46e   :  { %v989_v62 = vmul.f32 0.01, %v899_v57  ;;  %vm973_vm1 = vcmp.gt.f32.partialorder %v899_v57, 0.0 }
 0x46f   :  { %v988_v0 = vmul.f32 0.01, %v894_v59  ;;  %vm972_vm2 = vcmp.gt.f32.partialorder %v894_v59, 0.0 }
 0x470   :  { %v8412_v9 = vsel %vm973_vm1, %v899_v57, %v989_v62 }
 0x471   :  { %v8410_v4 = vsel %vm972_vm2, %v894_v59, %v988_v0 }
 0x472   :  { %6232 = vmatprep.mubr.f32.mxu1 %v8410_v4 }
 0x473   :  { %v6181_v12 = vpop.f32.mrb[18].mxu0  ;;  %6233 = vmatmul.mubr.f32.vlgmr.msra.gmra.mrb[16].mxu1 %v8412_v9 }
 0x474   :  { %v909_v2 = vadd.f32 %v6181_v12, %v8406_v23  ;;  %v903_v15 = vpop.f32.mrb[19].mxu0 }
 0x475   :  { %v904_v18 = vadd.f32 %v8406_v23, %v903_v15 }
 0x476   :  { %v991_v19 = vmul.f32 0.01, %v909_v2  ;;  %vm975_vm4 = vcmp.gt.f32.partialorder %v909_v2, 0.0 }
 0x477   :  { %v990_v21 = vmul.f32 0.01, %v904_v18  ;;  %vm974_vm3 = vcmp.gt.f32.partialorder %v904_v18, 0.0  ;;  %v6184_v24 = vpop.f32.mrb[20].mxu0 }
 0x478   :  { %v919_v27 = vadd.f32 %v6184_v24, %v8406_v23  ;;  %v913_v11 = vpop.f32.mrb[21].mxu0  ;;  %v8423_v36 = vsel %vm975_vm4, %v909_v2, %v991_v19 }
 0x479   :  { %v8419_v39 = vsel %vm974_vm3, %v904_v18, %v990_v21  ;;  %v914_v33 = vadd.f32 %v8406_v23, %v913_v11 }
 0x47a   :  { %6235 = vmatprep.mubr.f32.mxu1 %v8419_v39  ;;  %v993_v51 = vmul.f32 0.01, %v919_v27  ;;  %vm977_vm6 = vcmp.gt.f32.partialorder %v919_v27, 0.0 }
 0x47b   :  { %6236 = vmatmul.mubr.f32.gmra.mrb[18].mxu1 %v8423_v36  ;;  %v992_v47 = vmul.f32 0.01, %v914_v33  ;;  %v6187_v48 = vpop.f32.mrb[22].mxu0  ;;  %vm976_vm5 = vcmp.gt.f32.partialorder %v914_v33, 0.0 }
 0x47c   :  { %v929_v49 = vadd.f32 %v6187_v48, %v8406_v23  ;;  %v923_v50 = vpop.f32.mrb[23].mxu0  ;;  %v8431_v58 = vsel %vm977_vm6, %v919_v27, %v993_v51 }
 0x47d   :  { %v924_v37 = vadd.f32 %v8406_v23, %v923_v50  ;;  %v8428_v53 = vsel %vm976_vm5, %v914_v33, %v992_v47 }
 0x47e   :  { %v995_v57 = vmul.f32 0.01, %v929_v49  ;;  %6238 = vmatprep.mubr.f32.mxu1 %v8428_v53  ;;  %vm979_vm8 = vcmp.gt.f32.partialorder %v929_v49, 0.0 }
 0x47f   :  { %v994_v59 = vmul.f32 0.01, %v924_v37  ;;  %v6190_v62 = vpop.f32.mrb[24].mxu0  ;;  %6239 = vmatmul.mubr.f32.gmra.mrb[20].mxu1 %v8431_v58  ;;  %vm978_vm7 = vcmp.gt.f32.partialorder %v924_v37, 0.0 }
 0x480   :  { %v939_v0 = vadd.f32 %v6190_v62, %v8406_v23  ;;  %v933_v12 = vpop.f32.mrb[25].mxu0  ;;  %v8439_v19 = vsel %vm979_vm8, %v929_v49, %v995_v57 }
 0x481   :  { %v934_v2 = vadd.f32 %v8406_v23, %v933_v12  ;;  %v8436_v15 = vsel %vm978_vm7, %v924_v37, %v994_v59 }
 0x482   :  { %v997_v18 = vmul.f32 0.01, %v939_v0  ;;  %6241 = vmatprep.mubr.f32.mxu1 %v8436_v15  ;;  %vm981_vm10 = vcmp.gt.f32.partialorder %v939_v0, 0.0 }
 0x483   :  { %v996_v21 = vmul.f32 0.01, %v934_v2  ;;  %v6193_v24 = vpop.f32.mrb[26].mxu0  ;;  %6242 = vmatmul.mubr.f32.gmra.mrb[22].mxu1 %v8439_v19  ;;  %vm980_vm9 = vcmp.gt.f32.partialorder %v934_v2, 0.0 }
 0x484   :  { %v949_v27 = vadd.f32 %v6193_v24, %v8406_v23  ;;  %v943_v11 = vpop.f32.mrb[27].mxu0  ;;  %v8447_v48 = vsel %vm981_vm10, %v939_v0, %v997_v18 }
 0x485   :  { %v944_v33 = vadd.f32 %v8406_v23, %v943_v11  ;;  %v8444_v51 = vsel %vm980_vm9, %v934_v2, %v996_v21  ;;  %10531 = vst [vmem:[#allocation43_spill] sm:$0xff] %v8447_v48 }
 0x486   :  { %10530 = vst [vmem:[#allocation42_spill] sm:$0xff] %v8444_v51  ;;  %v999_v47 = vmul.f32 0.01, %v949_v27  ;;  %6244 = vmatprep.mubr.f32.mxu1 %v8444_v51  ;;  %vm983_vm12 = vcmp.gt.f32.partialorder %v949_v27, 0.0 }
 0x487   :  { %v998_v49 = vmul.f32 0.01, %v944_v33  ;;  %v6196_v50 = vpop.f32.mrb[28].mxu0  ;;  %6245 = vmatmul.mubr.f32.gmra.mrb[24].mxu1 %v8447_v48  ;;  %vm982_vm11 = vcmp.gt.f32.partialorder %v944_v33, 0.0 }
 0x488   :  { %v959_v37 = vadd.f32 %v6196_v50, %v8406_v23  ;;  %v953_v57 = vpop.f32.mrb[29].mxu0  ;;  %v8455_v2 = vsel %vm983_vm12, %v949_v27, %v999_v47 }
 0x489   :  { %v954_v59 = vadd.f32 %v8406_v23, %v953_v57  ;;  %v8452_v62 = vsel %vm982_vm11, %v944_v33, %v998_v49  ;;  %10533 = vst [vmem:[#allocation45_spill] sm:$0xff] %v8455_v2 }
 0x48a   :  { %10532 = vst [vmem:[#allocation44_spill] sm:$0xff] %v8452_v62  ;;  %v1001_v12 = vmul.f32 0.01, %v959_v37  ;;  %6247 = vmatprep.mubr.f32.mxu1 %v8452_v62  ;;  %vm985_vm14 = vcmp.gt.f32.partialorder %v959_v37, 0.0 }
 0x48b   :  { %v1000_v0 = vmul.f32 0.01, %v954_v59  ;;  %v6199_v18 = vpop.f32.mrb[30].mxu0  ;;  %6248 = vmatmul.mubr.f32.gmra.mrb[26].mxu1 %v8455_v2  ;;  %vm984_vm13 = vcmp.gt.f32.partialorder %v954_v59, 0.0 }
 0x48c   :  { %v969_v21 = vadd.f32 %v6199_v18, %v8406_v23  ;;  %v963_v24 = vpop.f32.mrb[31].mxu0  ;;  %v8463_v49 = vsel %vm985_vm14, %v959_v37, %v1001_v12 }
 0x48d   :  { %v964_v11 = vadd.f32 %v8406_v23, %v963_v24  ;;  %v8460_v50 = vsel %vm984_vm13, %v954_v59, %v1000_v0  ;;  %10535 = vst [vmem:[#allocation47_spill] sm:$0xff] %v8463_v49  ;;  %v8472_v23 = vld [vmem:[#allocation4 + $0xe] ss:$0 sm:$0xff] }
 0x48e   :  { %10534 = vst [vmem:[#allocation46_spill] sm:$0xff] %v8460_v50  ;;  %v1003_v33 = vmul.f32 0.01, %v969_v21  ;;  %6250 = vmatprep.mubr.f32.mxu1 %v8460_v50  ;;  %vm987_vm0 = vcmp.gt.f32.partialorder %v969_v21, 0.0  ;;  %v1803_v50 = vld [vmem:[#allocation2 + $0x298] sm:$0xff] }
 0x48f   :  { %v1002_v27 = vmul.f32 0.01, %v964_v11  ;;  %6251 = vmatmul.mubr.f32.gmra.mrb[28].mxu1 %v8463_v49  ;;  %vm986_vm15 = vcmp.gt.f32.partialorder %v964_v11, 0.0 }
 0x490   :  { %v8469_v57 = vsel %vm987_vm0, %v969_v21, %v1003_v33 }
 0x491   :  { %v8466_v47 = vsel %vm986_vm15, %v964_v11, %v1002_v27  ;;  %10537 = vst [vmem:[#allocation49_spill] sm:$0xff] %v8469_v57 }
 0x492   :  { %10536 = vst [vmem:[#allocation48_spill] sm:$0xff] %v8466_v47  ;;  %6253 = vmatprep.mubr.f32.mxu1 %v8466_v47 }
 0x493   :  { %6254 = vmatmul.mubr.f32.gmra.mrb[30].mxu1 %v8469_v57 }
 0x546   :  { %v6234_v59 = vpop.f32.mrb[16].mxu1 }
 0x547   :  { %v1113_v0 = vadd.f32 %v6234_v59, %v8472_v23  ;;  %v1107_v37 = vpop.f32.mrb[17].mxu1 }
 0x548   :  { %v1108_v12 = vadd.f32 %v8472_v23, %v1107_v37 }
 0x549   :  { %v1203_v18 = vmul.f32 0.01, %v1113_v0  ;;  %vm1187_vm1 = vcmp.gt.f32.partialorder %v1113_v0, 0.0 }
 0x54a   :  { %v1202_v24 = vmul.f32 0.01, %v1108_v12  ;;  %vm1186_vm2 = vcmp.gt.f32.partialorder %v1108_v12, 0.0 }
 0x54b   :  { %v8476_v11 = vsel %vm1187_vm1, %v1113_v0, %v1203_v18  ;;  %vm50_vm1 = vcmp.lt.s32.totalorder %v8058_v42, 64 }
 0x54c   :  { %1236 = vadd.xlane.f32.xlu0 %v8476_v11  ;;  %v8479_v21 = vsel %vm1186_vm2, %v1108_v12, %v1202_v24 }
 0x54d   :  { %1234 = vadd.xlane.f32.xlu1 %v8479_v21 }
 0x54e   :  { %v6237_v33 = vpop.f32.mrb[18].mxu1 }
 0x54f   :  { %v1123_v27 = vadd.f32 %v6237_v33, %v8472_v23  ;;  %v1117_v45 = vpop.f32.mrb[19].mxu1 }
 0x550   :  { %v1118_v59 = vadd.f32 %v8472_v23, %v1117_v45 }
 0x551   :  { %v1205_v41 = vmul.f32 0.01, %v1123_v27  ;;  %vm1189_vm3 = vcmp.gt.f32.partialorder %v1123_v27, 0.0 }
 0x552   :  { %v1204_v37 = vmul.f32 0.01, %v1118_v59  ;;  %vm1188_vm4 = vcmp.gt.f32.partialorder %v1118_v59, 0.0  ;;  %v6240_v60 = vpop.f32.mrb[20].mxu1 }
 0x553   :  { %v8484_v61 = vsel %vm1189_vm3, %v1123_v27, %v1205_v41  ;;  %v1133_v0 = vadd.f32 %v6240_v60, %v8472_v23  ;;  %v1127_v18 = vpop.f32.mrb[21].mxu1 }
 0x554   :  { %1240 = vadd.xlane.f32.xlu0 %v8484_v61  ;;  %v8488_v12 = vsel %vm1188_vm4, %v1118_v59, %v1204_v37  ;;  %v1128_v24 = vadd.f32 %v8472_v23, %v1127_v18 }
 0x555   :  { %1238 = vadd.xlane.f32.xlu1 %v8488_v12  ;;  %v1207_v33 = vmul.f32 0.01, %v1133_v0  ;;  %vm1191_vm5 = vcmp.gt.f32.partialorder %v1133_v0, 0.0 }
 0x556   :  { %v1206_v45 = vmul.f32 0.01, %v1128_v24  ;;  %v6243_v10 = vpop.f32.mrb[22].mxu1  ;;  %vm1190_vm6 = vcmp.gt.f32.partialorder %v1128_v24, 0.0 }
 0x557   :  { %v1143_v43 = vadd.f32 %v6243_v10, %v8472_v23  ;;  %v1137_v41 = vpop.f32.mrb[23].mxu1  ;;  %v8493_v27 = vsel %vm1191_vm5, %v1133_v0, %v1207_v33 }
 0x558   :  { %v1138_v60 = vadd.f32 %v8472_v23, %v1137_v41  ;;  %1244 = vadd.xlane.f32.xlu0 %v8493_v27  ;;  %v8497_v59 = vsel %vm1190_vm6, %v1128_v24, %v1206_v45 }
 0x559   :  { %v1209_v37 = vmul.f32 0.01, %v1143_v43  ;;  %1242 = vadd.xlane.f32.xlu1 %v8497_v59  ;;  %vm1193_vm7 = vcmp.gt.f32.partialorder %v1143_v43, 0.0 }
 0x55a   :  { %v1208_v18 = vmul.f32 0.01, %v1138_v60  ;;  %v6246_v20 = vpop.f32.mrb[24].mxu1  ;;  %vm1192_vm8 = vcmp.gt.f32.partialorder %v1138_v60, 0.0 }
 0x55b   :  { %v1153_v31 = vadd.f32 %v6246_v20, %v8472_v23  ;;  %v1147_v1 = vpop.f32.mrb[25].mxu1  ;;  %v8501_v10 = vsel %vm1193_vm7, %v1143_v43, %v1209_v37 }
 0x55c   :  { %v1148_v0 = vadd.f32 %v8472_v23, %v1147_v1  ;;  %1248 = vadd.xlane.f32.xlu0 %v8501_v10  ;;  %v8505_v33 = vsel %vm1192_vm8, %v1138_v60, %v1208_v18 }
 0x55d   :  { %v1211_v24 = vmul.f32 0.01, %v1153_v31  ;;  %1246 = vadd.xlane.f32.xlu1 %v8505_v33  ;;  %vm1195_vm9 = vcmp.gt.f32.partialorder %v1153_v31, 0.0 }
 0x55e   :  { %v1210_v45 = vmul.f32 0.01, %v1148_v0  ;;  %v6249_v41 = vpop.f32.mrb[26].mxu1  ;;  %vm1194_vm10 = vcmp.gt.f32.partialorder %v1148_v0, 0.0 }
 0x55f   :  { %v1163_v5 = vadd.f32 %v6249_v41, %v8472_v23  ;;  %v1157_v6 = vpop.f32.mrb[27].mxu1  ;;  %v8509_v20 = vsel %vm1195_vm9, %v1153_v31, %v1211_v24 }
 0x560   :  { %v1158_v43 = vadd.f32 %v8472_v23, %v1157_v6  ;;  %1252 = vadd.xlane.f32.xlu0 %v8509_v20  ;;  %v8513_v1 = vsel %vm1194_vm10, %v1148_v0, %v1210_v45 }
 0x561   :  { %v1213_v60 = vmul.f32 0.01, %v1163_v5  ;;  %1250 = vadd.xlane.f32.xlu1 %v8513_v1  ;;  %vm1197_vm11 = vcmp.gt.f32.partialorder %v1163_v5, 0.0 }
 0x562   :  { %v1212_v37 = vmul.f32 0.01, %v1158_v43  ;;  %v6252_v18 = vpop.f32.mrb[28].mxu1  ;;  %vm1196_vm12 = vcmp.gt.f32.partialorder %v1158_v43, 0.0 }
 0x563   :  { %v1173_v63 = vadd.f32 %v6252_v18, %v8472_v23  ;;  %v1167_v55 = vpop.f32.mrb[29].mxu1  ;;  %v8517_v41 = vsel %vm1197_vm11, %v1163_v5, %v1213_v60 }
 0x564   :  { %v1168_v31 = vadd.f32 %v8472_v23, %v1167_v55  ;;  %1256 = vadd.xlane.f32.xlu0 %v8517_v41  ;;  %v8521_v6 = vsel %vm1196_vm12, %v1158_v43, %v1212_v37 }
 0x565   :  { %v1215_v0 = vmul.f32 0.01, %v1173_v63  ;;  %1254 = vadd.xlane.f32.xlu1 %v8521_v6  ;;  %vm1199_vm13 = vcmp.gt.f32.partialorder %v1173_v63, 0.0 }
 0x566   :  { %v1214_v24 = vmul.f32 0.01, %v1168_v31  ;;  %v6255_v45 = vpop.f32.mrb[30].mxu1  ;;  %vm1198_vm14 = vcmp.gt.f32.partialorder %v1168_v31, 0.0 }
 0x567   :  { %v1183_v52 = vadd.f32 %v6255_v45, %v8472_v23  ;;  %v1177_v25 = vpop.f32.mrb[31].mxu1  ;;  %v8525_v18 = vsel %vm1199_vm13, %v1173_v63, %v1215_v0  ;;  %v1468_v63 = vld [vmem:[#allocation2 + $0x180] sm:$0xff] }
 0x568   :  { %v1178_v5 = vadd.f32 %v8472_v23, %v1177_v25  ;;  %1260 = vadd.xlane.f32.xlu0 %v8525_v18  ;;  %v8529_v55 = vsel %vm1198_vm14, %v1168_v31, %v1214_v24  ;;  %v1469_v25 = vld [vmem:[#allocation2 + $0x188] sm:$0xff]  ;;  %v1634_v23 = vld [vmem:[#allocation2 + $0x200] sm:$0xff]  ;;  %v1470_v24 = vld [vmem:[#allocation2 + $0x190] sm:$0xff] }
 0x569   :  { %v1217_v43 = vmul.f32 0.01, %v1183_v52  ;;  %1258 = vadd.xlane.f32.xlu1 %v8529_v55  ;;  %vm1201_vm15 = vcmp.gt.f32.partialorder %v1183_v52, 0.0  ;;  %v7126_v0 = vpack.c.bf16 %v1469_v25, %v1468_v63  ;;  %v1635_v31 = vld [vmem:[#allocation2 + $0x208] sm:$0xff]  ;;  %v7130_v16 = vpack.c.bf16 %v1471_v56, %v1470_v24 }
 0x56a   :  { %v1216_v60 = vmul.f32 0.01, %v1178_v5  ;;  %vm1200_vm0 = vcmp.gt.f32.partialorder %v1178_v5, 0.0  ;;  %v7158_v14 = vpack.c.bf16 %v1635_v31, %v1634_v23  ;;  %v10538_v23 = vmov 0.0  }
 0x56b   :  { %v8532_v37 = vsel %vm1201_vm15, %v1183_v52, %v1217_v43  ;;  %7127 = vmatprep.subr.bf16.mxu0 %v7126_v0  ;;  %v7162_v52 = vpack.c.bf16 %v1637_v7, %v1636_v3  ;;  %v1473_v43 = vld [vmem:[#allocation2 + $0x1a8] sm:$0xff]  ;;  %v8540_v31 = vsel %vm50_vm1, 1.0, %v10538_v23 }
 0x56c   :  { %1264 = vadd.xlane.f32.xlu0 %v8532_v37  ;;  %v8535_v45 = vsel %vm1200_vm0, %v1178_v5, %v1216_v60  ;;  %v1639_v5 = vld [vmem:[#allocation2 + $0x228] sm:$0xff]  ;;  %7159 = vmatprep.subr.bf16.mxu1 %v7158_v14  ;;  %v7134_v60 = vpack.c.bf16 %v1473_v43, %v1472_v44 }
 0x56d   :  { %1262 = vadd.xlane.f32.xlu1 %v8535_v45  ;;  %7129 = vmatpush3.bf16.msra.mxu0 %v7126_v0  ;;  %v7166_v63 = vpack.c.bf16 %v1639_v5, %v1638_v17 }
 0x56e   :  { %7161 = vmatpush3.bf16.msra.mxu1 %v7158_v14  ;;  %7131 = vmatprep.subr.bf16.mxu0 %v7130_v16 }
 0x56f   :  { %7163 = vmatprep.subr.bf16.mxu1 %v7162_v52 }
 0x571   :  { %7133 = vmatpush3.bf16.msra.mxu0 %v7130_v16 }
 0x572   :  { %7165 = vmatpush3.bf16.msra.mxu1 %v7162_v52  ;;  %7135 = vmatprep.subr.bf16.mxu0 %v7134_v60 }
 0x573   :  { %7167 = vmatprep.subr.bf16.mxu1 %v7166_v63 }
 0x575   :  { %7137 = vmatpush3.bf16.msra.mxu0 %v7134_v60 }
 0x576   :  { %7169 = vmatpush3.bf16.msra.mxu1 %v7166_v63 }
 0x5d9   :  { %v1237_v56 = vpop.xlane.xlu0 %1236 }
 0x5da   :  { %v1267_v3 = vmul.f32 0.015625, %v1237_v56  ;;  %v1235_v7 = vpop.xlane.xlu1 %1234 }
 0x5db   :  { %v1266_v25 = vmul.f32 0.015625, %v1235_v7 }
 0x5dc   :  { %v1283_v14 = vsub.f32 %v8476_v11, %v1267_v3 }
 0x5dd   :  { %v1282_v44 = vsub.f32 %v8479_v21, %v1266_v25 }
 0x5de   :  { %v8545_v16 = vmul.f32 %v8540_v31, %v1283_v14 }
 0x5df   :  { %v8548_v17 = vmul.f32 %v8540_v31, %v1282_v44 }
 0x5e0   :  { %v1315_v0 = vmul.f32 %v8545_v16, %v8545_v16 }
 0x5e1   :  { %v1241_v24 = vpop.xlane.xlu0 %1240  ;;  %v1314_v52 = vmul.f32 %v8548_v17, %v8548_v17 }
 0x5e2   :  { %v1269_v43 = vmul.f32 0.015625, %v1241_v24  ;;  %v1239_v5 = vpop.xlane.xlu1 %1238  ;;  %1332 = vadd.xlane.f32.xlu0 %v1315_v0 }
 0x5e3   :  { %v1268_v60 = vmul.f32 0.015625, %v1239_v5  ;;  %1330 = vadd.xlane.f32.xlu1 %v1314_v52 }
 0x5e4   :  { %v1285_v63 = vsub.f32 %v8484_v61, %v1269_v43 }
 0x5e5   :  { %v1284_v56 = vsub.f32 %v8488_v12, %v1268_v60  ;;  %v1245_v3 = vpop.xlane.xlu0 %1244 }
 0x5e6   :  { %v8557_v7 = vmul.f32 %v8540_v31, %v1285_v63  ;;  %v1271_v25 = vmul.f32 0.015625, %v1245_v3  ;;  %v1243_v23 = vpop.xlane.xlu1 %1242 }
 0x5e7   :  { %v8560_v14 = vmul.f32 %v8540_v31, %v1284_v56  ;;  %v1270_v44 = vmul.f32 0.015625, %v1243_v23 }
 0x5e8   :  { %v1317_v24 = vmul.f32 %v8557_v7, %v8557_v7  ;;  %v1287_v0 = vsub.f32 %v8493_v27, %v1271_v25 }
 0x5e9   :  { %v1316_v52 = vmul.f32 %v8560_v14, %v8560_v14  ;;  %v1286_v43 = vsub.f32 %v8497_v59, %v1270_v44  ;;  %v1249_v5 = vpop.xlane.xlu0 %1248 }
 0x5ea   :  { %1336 = vadd.xlane.f32.xlu0 %v1317_v24  ;;  %v1273_v60 = vmul.f32 0.015625, %v1249_v5  ;;  %v1247_v63 = vpop.xlane.xlu1 %1246  ;;  %v8569_v3 = vmul.f32 %v8540_v31, %v1287_v0 }
 0x5eb   :  { %1334 = vadd.xlane.f32.xlu1 %v1316_v52  ;;  %v1272_v56 = vmul.f32 0.015625, %v1247_v63  ;;  %v8572_v23 = vmul.f32 %v8540_v31, %v1286_v43 }
 0x5ec   :  { %v1289_v42 = vsub.f32 %v8501_v10, %v1273_v60  ;;  %v1319_v25 = vmul.f32 %v8569_v3, %v8569_v3 }
 0x5ed   :  { %v1288_v26 = vsub.f32 %v8505_v33, %v1272_v56  ;;  %v1253_v44 = vpop.xlane.xlu0 %1252  ;;  %v1318_v24 = vmul.f32 %v8572_v23, %v8572_v23 }
 0x5ee   :  { %v1275_v5 = vmul.f32 0.015625, %v1253_v44  ;;  %v1251_v52 = vpop.xlane.xlu1 %1250  ;;  %1340 = vadd.xlane.f32.xlu0 %v1319_v25  ;;  %v8581_v0 = vmul.f32 %v8540_v31, %v1289_v42  ;;  %v1474_v25 = vld [vmem:[#allocation2 + $0x1b0] sm:$0xff] }
 0x5ef   :  { %v1274_v63 = vmul.f32 0.015625, %v1251_v52  ;;  %1338 = vadd.xlane.f32.xlu1 %v1318_v24  ;;  %v8584_v43 = vmul.f32 %v8540_v31, %v1288_v26  ;;  %v1640_v42 = vld [vmem:[#allocation2 + $0x230] sm:$0xff]  ;;  %v7138_v24 = vpack.c.bf16 %v1475_v34, %v1474_v25  ;;  %v1476_v34 = vld [vmem:[#allocation2 + $0x1c0] sm:$0xff] }
 0x5f0   :  { %v1291_v60 = vsub.f32 %v8509_v20, %v1275_v5  ;;  %v1321_v56 = vmul.f32 %v8581_v0, %v8581_v0  ;;  %v1641_v5 = vld [vmem:[#allocation2 + $0x238] sm:$0xff]  ;;  %v1642_v25 = vld [vmem:[#allocation2 + $0x240] sm:$0xff] }
 0x5f1   :  { %v1290_v32 = vsub.f32 %v8513_v1, %v1274_v63  ;;  %v1257_v35 = vpop.xlane.xlu0 %1256  ;;  %v1320_v44 = vmul.f32 %v8584_v43, %v8584_v43  ;;  %v7170_v63 = vpack.c.bf16 %v1641_v5, %v1640_v42  ;;  %7139 = vmatprep.subr.bf16.mxu0 %v7138_v24  ;;  %v1643_v5 = vld [vmem:[#allocation2 + $0x248] sm:$0xff] }
 0x5f2   :  { %v1277_v8 = vmul.f32 0.015625, %v1257_v35  ;;  %v1255_v52 = vpop.xlane.xlu1 %1254  ;;  %1344 = vadd.xlane.f32.xlu0 %v1321_v56  ;;  %v8593_v26 = vmul.f32 %v8540_v31, %v1291_v60  ;;  %7141 = vmatpush3.bf16.msra.mxu0 %v7138_v24  ;;  %v7174_v40 = vpack.c.bf16 %v1643_v5, %v1642_v25 }
 0x5f3   :  { %v1276_v28 = vmul.f32 0.015625, %v1255_v52  ;;  %1342 = vadd.xlane.f32.xlu1 %v1320_v44  ;;  %v8596_v38 = vmul.f32 %v8540_v31, %v1290_v32  ;;  %7171 = vmatprep.subr.bf16.mxu1 %v7170_v63  ;;  %v1477_v44 = vld [vmem:[#allocation2 + $0x1c8] sm:$0xff] }
 0x5f4   :  { %v1293_v22 = vsub.f32 %v8517_v41, %v1277_v8  ;;  %v1323_v54 = vmul.f32 %v8593_v26, %v8593_v26  ;;  %7173 = vmatpush3.bf16.msra.mxu1 %v7170_v63  ;;  %v7142_v42 = vpack.c.bf16 %v1477_v44, %v1476_v34  ;;  %v1478_v63 = vld [vmem:[#allocation2 + $0x1d0] sm:$0xff] }
 0x5f5   :  { %v1292_v35 = vsub.f32 %v8521_v6, %v1276_v28  ;;  %v1261_v56 = vpop.xlane.xlu0 %1260  ;;  %v1322_v60 = vmul.f32 %v8596_v38, %v8596_v38  ;;  %7175 = vmatprep.subr.bf16.mxu1 %v7174_v40  ;;  %v1644_v34 = vld [vmem:[#allocation2 + $0x250] sm:$0xff] }
 0x5f6   :  { %v1279_v32 = vmul.f32 0.015625, %v1261_v56  ;;  %v1259_v52 = vpop.xlane.xlu1 %1258  ;;  %1348 = vadd.xlane.f32.xlu0 %v1323_v54  ;;  %v8605_v8 = vmul.f32 %v8540_v31, %v1293_v22  ;;  %7143 = vmatprep.subr.bf16.mxu0 %v7142_v42 }
 0x5f7   :  { %v1278_v46 = vmul.f32 0.015625, %v1259_v52  ;;  %1346 = vadd.xlane.f32.xlu1 %v1322_v60  ;;  %v8608_v28 = vmul.f32 %v8540_v31, %v1292_v35  ;;  %7145 = vmatpush3.bf16.msra.mxu0 %v7142_v42  ;;  %v1479_v60 = vld [vmem:[#allocation2 + $0x1d8] sm:$0xff] }
 0x5f8   :  { %v1295_v24 = vsub.f32 %v8525_v18, %v1279_v32  ;;  %v1325_v30 = vmul.f32 %v8605_v8, %v8605_v8  ;;  %7177 = vmatpush3.bf16.msra.mxu1 %v7174_v40  ;;  %v7146_v32 = vpack.c.bf16 %v1479_v60, %v1478_v63  ;;  %v1645_v52 = vld [vmem:[#allocation2 + $0x258] sm:$0xff]  ;;  %v1480_v40 = vld [vmem:[#allocation2 + $0x1e0] sm:$0xff]  ;;  %v1647_v60 = vld [vmem:[#allocation2 + $0x268] sm:$0xff] }
 0x5f9   :  { %v1294_v54 = vsub.f32 %v8529_v55, %v1278_v46  ;;  %v1265_v56 = vpop.xlane.xlu0 %1264  ;;  %v1324_v22 = vmul.f32 %v8608_v28, %v8608_v28  ;;  %v7178_v13 = vpack.c.bf16 %v1645_v52, %v1644_v34  ;;  %v1483_v52 = vld [vmem:[#allocation2 + $0x1f8] sm:$0xff] }
 0x5fa   :  { %v1281_v35 = vmul.f32 0.015625, %v1265_v56  ;;  %1352 = vadd.xlane.f32.xlu0 %v1325_v30  ;;  %v1263_v44 = vpop.xlane.xlu1 %1262  ;;  %v8617_v25 = vmul.f32 %v8540_v31, %v1295_v24  ;;  %7147 = vmatprep.subr.bf16.mxu0 %v7146_v32  ;;  %v1481_v56 = vld [vmem:[#allocation2 + $0x1e8] sm:$0xff] }
 0x5fb   :  { %v1280_v5 = vmul.f32 0.015625, %v1263_v44  ;;  %1350 = vadd.xlane.f32.xlu1 %v1324_v22  ;;  %v8620_v46 = vmul.f32 %v8540_v31, %v1294_v54  ;;  %7179 = vmatprep.subr.bf16.mxu1 %v7178_v13  ;;  %v1646_v22 = vld [vmem:[#allocation2 + $0x260] sm:$0xff]  ;;  %v7150_v63 = vpack.c.bf16 %v1481_v56, %v1480_v40  ;;  %v1801_v40 = vld [vmem:[#allocation2 + $0x288] sm:$0xff] }
 0x5fc   :  { %v1297_v42 = vsub.f32 %v8532_v37, %v1281_v35  ;;  %v1327_v29 = vmul.f32 %v8617_v25, %v8617_v25  ;;  %7149 = vmatpush3.bf16.msra.mxu0 %v7146_v32  ;;  %7181 = vmatpush3.bf16.msra.mxu1 %v7178_v13  ;;  %v7182_v35 = vpack.c.bf16 %v1647_v60, %v1646_v22 }
 0x5fd   :  { %v1296_v30 = vsub.f32 %v8535_v45, %v1280_v5  ;;  %v1326_v24 = vmul.f32 %v8620_v46, %v8620_v46  ;;  %7151 = vmatprep.subr.bf16.mxu0 %v7150_v63  ;;  %v1648_v5 = vld [vmem:[#allocation2 + $0x270] sm:$0xff] }
 0x5fe   :  { %1356 = vadd.xlane.f32.xlu0 %v1327_v29  ;;  %v8629_v54 = vmul.f32 %v8540_v31, %v1297_v42  ;;  %7183 = vmatprep.subr.bf16.mxu1 %v7182_v35  ;;  %v1482_v29 = vld [vmem:[#allocation2 + $0x1f0] sm:$0xff]  ;;  %v1649_v42 = vld [vmem:[#allocation2 + $0x278] sm:$0xff] }
 0x5ff   :  { %1354 = vadd.xlane.f32.xlu1 %v1326_v24  ;;  %v8632_v34 = vmul.f32 %v8540_v31, %v1296_v30  ;;  %v7154_v13 = vpack.c.bf16 %v1483_v52, %v1482_v29  ;;  %v7186_v30 = vpack.c.bf16 %v1649_v42, %v1648_v5  ;;  %v1800_v24 = vld [vmem:[#allocation2 + $0x280] sm:$0xff] }
 0x600   :  { %v1329_v44 = vmul.f32 %v8629_v54, %v8629_v54  ;;  %7153 = vmatpush3.bf16.msra.mxu0 %v7150_v63  ;;  %7185 = vmatpush3.bf16.msra.mxu1 %v7182_v35  ;;  %v7190_v56 = vpack.c.bf16 %v1801_v40, %v1800_v24 }
 0x601   :  { %v1328_v32 = vmul.f32 %v8632_v34, %v8632_v34  ;;  %7155 = vmatprep.subr.bf16.mxu0 %v7154_v13  ;;  %7187 = vmatprep.subr.bf16.mxu1 %v7186_v30 }
 0x602   :  { %1360 = vadd.xlane.f32.xlu0 %v1329_v44 }
 0x603   :  { %1358 = vadd.xlane.f32.xlu1 %v1328_v32 }
 0x604   :  { %7157 = vmatpush3.bf16.msra.mxu0 %v7154_v13  ;;  %7189 = vmatpush3.bf16.msra.mxu1 %v7186_v30 }
 0x605   :  { %7191 = vmatprep.subr.bf16.mxu0 %v7190_v56 }
 0x66f   :  { %v1333_v22 = vpop.xlane.xlu0 %1332 }
 0x670   :  { %v1363_v60 = vmul.f32 0.015625, %v1333_v22  ;;  %v1331_v63 = vpop.xlane.xlu1 %1330  ;;  %v8638_v22 = vld [vmem:[#allocation4] ss:$0 sm:$0xff] }
 0x671   :  { %v1362_v57 = vmul.f32 0.015625, %v1331_v63 }
 0x672   :  { %v1379_v47 = vadd.f32 1e-08, %v1363_v60 }
 0x673   :  { %v1378_v49 = vadd.f32 1e-08, %v1362_v57 }
 0x674   :  { %7616 = vrsqrt.f32 %v1379_v47 }
 0x675   :  { %7618 = vrsqrt.f32 %v1378_v49 }
 0x677   :  { %v1337_v35 = vpop.xlane.xlu0 %1336 }
 0x678   :  { %v1365_v44 = vmul.f32 0.015625, %v1337_v35  ;;  %v1335_v32 = vpop.xlane.xlu1 %1334 }
 0x679   :  { %v1364_v29 = vmul.f32 0.015625, %v1335_v32 }
 0x67a   :  { %v1381_v52 = vadd.f32 1e-08, %v1365_v44 }
 0x67b   :  { %v1380_v5 = vadd.f32 1e-08, %v1364_v29  ;;  %v1341_v13 = vpop.xlane.xlu0 %1340  ;;  %v8642_v29 = vld [vmem:[#allocation4 + $0x1] ss:$0 sm:$0xff] }
 0x67c   :  { %7620 = vrsqrt.f32 %v1381_v52  ;;  %v1367_v42 = vmul.f32 0.015625, %v1341_v13  ;;  %v1339_v30 = vpop.xlane.xlu1 %1338 }
 0x67d   :  { %7622 = vrsqrt.f32 %v1380_v5  ;;  %v1366_v40 = vmul.f32 0.015625, %v1339_v30  ;;  %v1802_v30 = vld [vmem:[#allocation2 + $0x290] sm:$0xff] }
 0x67e   :  { %v7617_v24 = vpop.eup %7616  ;;  %v1383_v47 = vadd.f32 1e-08, %v1367_v42 }
 0x67f   :  { %v7619_v63 = vpop.eup %7618  ;;  %v1411_v57 = vmul.f32 %v7617_v24, %v8545_v16  ;;  %v1382_v49 = vadd.f32 1e-08, %v1366_v40  ;;  %v1345_v60 = vpop.xlane.xlu0 %1344 }
 0x680   :  { %v1410_v35 = vmul.f32 %v7619_v63, %v8548_v17  ;;  %7624 = vrsqrt.f32 %v1383_v47  ;;  %v1369_v44 = vmul.f32 0.015625, %v1345_v60  ;;  %v1343_v32 = vpop.xlane.xlu1 %1342  ;;  %v7194_v47 = vpack.c.bf16 %v1803_v50, %v1802_v30  ;;  %v1804_v60 = vld [vmem:[#allocation2 + $0x2a0] sm:$0xff] }
 0x681   :  { %v1432_v52 = vmul.f32 %v8638_v22, %v1411_v57  ;;  %7626 = vrsqrt.f32 %v1382_v49  ;;  %v1368_v5 = vmul.f32 0.015625, %v1343_v32 }
 0x682   :  { %v1431_v13 = vmul.f32 %v8638_v22, %v1410_v35  ;;  %v1385_v2 = vadd.f32 1e-08, %v1369_v44  ;;  %v1805_v35 = vld [vmem:[#allocation2 + $0x2a8] sm:$0xff] }
 0x683   :  { %v1384_v16 = vadd.f32 1e-08, %v1368_v5  ;;  %v1349_v42 = vpop.xlane.xlu0 %1348  ;;  %v8650_v63 = vadd.f32 %v8642_v29, %v1432_v52 }
 0x684   :  { %v8647_v24 = vadd.f32 %v8642_v29, %v1431_v13  ;;  %7628 = vrsqrt.f32 %v1385_v2  ;;  %v1371_v17 = vmul.f32 0.015625, %v1349_v42  ;;  %v1347_v40 = vpop.xlane.xlu1 %1346  ;;  %v7198_v42 = vpack.c.bf16 %v1805_v35, %v1804_v60 }
 0x685   :  { %7630 = vrsqrt.f32 %v1384_v16  ;;  %v1370_v49 = vmul.f32 0.015625, %v1347_v40  ;;  %v1806_v40 = vld [vmem:[#allocation2 + $0x2b0] sm:$0xff] }
 0x686   :  { %v7621_v57 = vpop.eup %7620  ;;  %6288 = vmatprep.mubr.f32.mxu0 %v8647_v24  ;;  %6344 = vmatprep.mubr.f32.mxu1 %v8647_v24  ;;  %v1387_v32 = vadd.f32 1e-08, %v1371_v17  ;;  %v1807_v17 = vld [vmem:[#allocation2 + $0x2b8] sm:$0xff] }
 0x687   :  { %v7623_v44 = vpop.eup %7622  ;;  %6289 = vmatmul.mubr.f32.vlgmr.msra.gmra.mrb[32].mxu0 %v8650_v63  ;;  %6345 = vmatmul.mubr.f32.vlgmr.msra.gmra.mrb[32].mxu1 %v8650_v63  ;;  %v1413_v2 = vmul.f32 %v7621_v57, %v8557_v7  ;;  %v1386_v52 = vadd.f32 1e-08, %v1370_v49  ;;  %v1353_v5 = vpop.xlane.xlu0 %1352 }
 0x688   :  { %7193 = vmatpush3.bf16.msra.mxu0 %v7190_v56  ;;  %v1412_v50 = vmul.f32 %v7623_v44, %v8560_v14  ;;  %7632 = vrsqrt.f32 %v1387_v32  ;;  %v1373_v13 = vmul.f32 0.015625, %v1353_v5  ;;  %v1351_v30 = vpop.xlane.xlu1 %1350  ;;  %v7202_v32 = vpack.c.bf16 %v1807_v17, %v1806_v40  ;;  %v1808_v5 = vld [vmem:[#allocation2 + $0x2c0] sm:$0xff] }
 0x689   :  { %v1434_v16 = vmul.f32 %v8638_v22, %v1413_v2  ;;  %7195 = vmatprep.subr.bf16.mxu0 %v7194_v47  ;;  %7634 = vrsqrt.f32 %v1386_v52  ;;  %v1372_v62 = vmul.f32 0.015625, %v1351_v30 }
 0x68a   :  { %v1433_v48 = vmul.f32 %v8638_v22, %v1412_v50  ;;  %v7625_v51 = vpop.eup %7624  ;;  %v1389_v7 = vadd.f32 1e-08, %v1373_v13  ;;  %v1809_v50 = vld [vmem:[#allocation2 + $0x2c8] sm:$0xff] }
 0x68b   :  { %v7627_v57 = vpop.eup %7626  ;;  %v1388_v49 = vadd.f32 1e-08, %v1372_v62  ;;  %v1357_v56 = vpop.xlane.xlu0 %1356  ;;  %v1415_v44 = vmul.f32 %v7625_v51, %v8569_v3  ;;  %v8665_v2 = vadd.f32 %v8642_v29, %v1434_v16  ;;  %v7206_v40 = vpack.c.bf16 %v1809_v50, %v1808_v5  ;;  %v1811_v5 = vld [vmem:[#allocation2 + $0x2d8] sm:$0xff] }
 0x68c   :  { %v8661_v14 = vadd.f32 %v8642_v29, %v1433_v48  ;;  %7197 = vmatpush3.bf16.msra.mxu0 %v7194_v47  ;;  %7636 = vrsqrt.f32 %v1389_v7  ;;  %v1375_v60 = vmul.f32 0.015625, %v1357_v56  ;;  %v1355_v35 = vpop.xlane.xlu1 %1354  ;;  %v1414_v52 = vmul.f32 %v7627_v57, %v8572_v23 }
 0x68d   :  { %7199 = vmatprep.subr.bf16.mxu0 %v7198_v42  ;;  %7638 = vrsqrt.f32 %v1388_v49  ;;  %v1374_v62 = vmul.f32 0.015625, %v1355_v35  ;;  %v1436_v51 = vmul.f32 %v8638_v22, %v1415_v44 }
 0x68e   :  { %6291 = vmatprep.mubr.f32.mxu0 %v8661_v14  ;;  %6347 = vmatprep.mubr.f32.mxu1 %v8661_v14  ;;  %v7629_v48 = vpop.eup %7628  ;;  %v1391_v3 = vadd.f32 1e-08, %v1375_v60  ;;  %v1435_v47 = vmul.f32 %v8638_v22, %v1414_v52  ;;  %v1810_v52 = vld [vmem:[#allocation2 + $0x2d0] sm:$0xff] }
 0x68f   :  { %6292 = vmatmul.mubr.f32.gmra.mrb[34].mxu0 %v8665_v2  ;;  %6348 = vmatmul.mubr.f32.gmra.mrb[34].mxu1 %v8665_v2  ;;  %v7631_v23 = vpop.eup %7630  ;;  %v1390_v13 = vadd.f32 1e-08, %v1374_v62  ;;  %v1361_v30 = vpop.xlane.xlu0 %1360  ;;  %v1417_v16 = vmul.f32 %v7629_v48, %v8581_v0  ;;  %v8680_v44 = vadd.f32 %v8642_v29, %v1436_v51 }
 0x690   :  { %7201 = vmatpush3.bf16.msra.mxu0 %v7198_v42  ;;  %7640 = vrsqrt.f32 %v1391_v3  ;;  %v1377_v17 = vmul.f32 0.015625, %v1361_v30  ;;  %v1359_v7 = vpop.xlane.xlu1 %1358  ;;  %v8676_v57 = vadd.f32 %v8642_v29, %v1435_v47  ;;  %v1416_v49 = vmul.f32 %v7631_v23, %v8584_v43  ;;  %v1812_v30 = vld [vmem:[#allocation2 + $0x2e0] sm:$0xff] }
 0x691   :  { %7203 = vmatprep.subr.bf16.mxu0 %v7202_v32  ;;  %7642 = vrsqrt.f32 %v1390_v13  ;;  %v1376_v56 = vmul.f32 0.015625, %v1359_v7  ;;  %v1438_v60 = vmul.f32 %v8638_v22, %v1417_v16  ;;  %v7210_v23 = vpack.c.bf16 %v1811_v5, %v1810_v52  ;;  %v1813_v16 = vld [vmem:[#allocation2 + $0x2e8] sm:$0xff]  ;;  %v1815_v52 = vld [vmem:[#allocation2 + $0x2f8] sm:$0xff] }
 0x692   :  { %v7633_v42 = vpop.eup %7632  ;;  %v1393_v35 = vadd.f32 1e-08, %v1377_v17  ;;  %6294 = vmatprep.mubr.f32.mxu0 %v8676_v57  ;;  %6350 = vmatprep.mubr.f32.mxu1 %v8676_v57  ;;  %v1437_v0 = vmul.f32 %v8638_v22, %v1416_v49 }
 0x693   :  { %v7635_v50 = vpop.eup %7634  ;;  %v1392_v43 = vadd.f32 1e-08, %v1376_v56  ;;  %6295 = vmatmul.mubr.f32.gmra.mrb[36].mxu0 %v8680_v44  ;;  %6351 = vmatmul.mubr.f32.gmra.mrb[36].mxu1 %v8680_v44  ;;  %v1419_v62 = vmul.f32 %v7633_v42, %v8593_v26  ;;  %v8694_v3 = vadd.f32 %v8642_v29, %v1438_v60  ;;  %v7214_v60 = vpack.c.bf16 %v1813_v16, %v1812_v30 }
 0x694   :  { %7644 = vrsqrt.f32 %v1393_v35  ;;  %v8690_v51 = vadd.f32 %v8642_v29, %v1437_v0  ;;  %7205 = vmatpush3.bf16.msra.mxu0 %v7202_v32  ;;  %v1418_v48 = vmul.f32 %v7635_v50, %v8596_v38  ;;  %v1814_v0 = vld [vmem:[#allocation2 + $0x2f0] sm:$0xff] }
 0x695   :  { %7646 = vrsqrt.f32 %v1392_v43  ;;  %v1440_v47 = vmul.f32 %v8638_v22, %v1419_v62  ;;  %7207 = vmatprep.subr.bf16.mxu0 %v7206_v40  ;;  %v7218_v62 = vpack.c.bf16 %v1815_v52, %v1814_v0 }
 0x696   :  { %v7637_v13 = vpop.eup %7636  ;;  %6297 = vmatprep.mubr.f32.mxu0 %v8690_v51  ;;  %6353 = vmatprep.mubr.f32.mxu1 %v8690_v51  ;;  %v1439_v26 = vmul.f32 %v8638_v22, %v1418_v48 }
 0x697   :  { %v7639_v32 = vpop.eup %7638  ;;  %6298 = vmatmul.mubr.f32.gmra.mrb[38].mxu0 %v8694_v3  ;;  %6354 = vmatmul.mubr.f32.gmra.mrb[38].mxu1 %v8694_v3  ;;  %v1421_v38 = vmul.f32 %v7637_v13, %v8605_v8  ;;  %v1461_v49 = vadd.f32 %v8642_v29, %v1440_v47 }
 0x698   :  { %v1460_v17 = vadd.f32 %v8642_v29, %v1439_v26  ;;  %7209 = vmatpush3.bf16.msra.mxu0 %v7206_v40  ;;  %v1420_v7 = vmul.f32 %v7639_v32, %v8608_v28 }
 0x699   :  { %v1442_v56 = vmul.f32 %v8638_v22, %v1421_v38  ;;  %7211 = vmatprep.subr.bf16.mxu0 %v7210_v23 }
 0x69a   :  { %v7641_v42 = vpop.eup %7640  ;;  %6300 = vmatprep.mubr.f32.mxu0 %v1460_v17  ;;  %6356 = vmatprep.mubr.f32.mxu1 %v1460_v17  ;;  %v1441_v35 = vmul.f32 %v8638_v22, %v1420_v7 }
 0x69b   :  { %v7643_v5 = vpop.eup %7642  ;;  %6301 = vmatmul.mubr.f32.gmra.mrb[40].mxu0 %v1461_v49  ;;  %6357 = vmatmul.mubr.f32.gmra.mrb[40].mxu1 %v1461_v49  ;;  %v1423_v8 = vmul.f32 %v7641_v42, %v8617_v25  ;;  %v1463_v50 = vadd.f32 %v8642_v29, %v1442_v56 }
 0x69c   :  { %v1462_v28 = vadd.f32 %v8642_v29, %v1441_v35  ;;  %7213 = vmatpush3.bf16.msra.mxu0 %v7210_v23  ;;  %v1422_v40 = vmul.f32 %v7643_v5, %v8620_v46 }
 0x69d   :  { %v1444_v43 = vmul.f32 %v8638_v22, %v1423_v8  ;;  %7215 = vmatprep.subr.bf16.mxu0 %v7214_v60 }
 0x69e   :  { %v7645_v48 = vpop.eup %7644  ;;  %6303 = vmatprep.mubr.f32.mxu0 %v1462_v28  ;;  %6359 = vmatprep.mubr.f32.mxu1 %v1462_v28  ;;  %v1443_v47 = vmul.f32 %v8638_v22, %v1422_v40 }
 0x69f   :  { %v7647_v13 = vpop.eup %7646  ;;  %6304 = vmatmul.mubr.f32.gmra.mrb[42].mxu0 %v1463_v50  ;;  %6360 = vmatmul.mubr.f32.gmra.mrb[42].mxu1 %v1463_v50  ;;  %v1425_v25 = vmul.f32 %v7645_v48, %v8629_v54  ;;  %v1465_v26 = vadd.f32 %v8642_v29, %v1444_v43 }
 0x6a0   :  { %v1464_v23 = vadd.f32 %v8642_v29, %v1443_v47  ;;  %7217 = vmatpush3.bf16.msra.mxu0 %v7214_v60  ;;  %v1424_v46 = vmul.f32 %v7647_v13, %v8632_v34  ;;  %v8730_v34 = vld [vmem:[#allocation4 + $0x4] ss:$0 sm:$0xff] }
 0x6a1   :  { %v1446_v30 = vmul.f32 %v8638_v22, %v1425_v25  ;;  %7219 = vmatprep.subr.bf16.mxu0 %v7218_v62 }
 0x6a2   :  { %6306 = vmatprep.mubr.f32.mxu0 %v1464_v23  ;;  %6362 = vmatprep.mubr.f32.mxu1 %v1464_v23  ;;  %v1445_v16 = vmul.f32 %v8638_v22, %v1424_v46  ;;  %v8732_v22 = vld [vmem:[#allocation4 + $0x5] ss:$0 sm:$0xff] }
 0x6a3   :  { %6307 = vmatmul.mubr.f32.gmra.mrb[44].mxu0 %v1465_v26  ;;  %6363 = vmatmul.mubr.f32.gmra.mrb[44].mxu1 %v1465_v26  ;;  %v1467_v54 = vadd.f32 %v8642_v29, %v1446_v30 }
 0x6a4   :  { %v1466_v32 = vadd.f32 %v8642_v29, %v1445_v16  ;;  %7221 = vmatpush3.bf16.msra.mxu0 %v7218_v62 }
 0x6a6   :  { %6309 = vmatprep.mubr.f32.mxu0 %v1466_v32  ;;  %6365 = vmatprep.mubr.f32.mxu1 %v1466_v32 }
 0x6a7   :  { %6310 = vmatmul.mubr.f32.gmra.mrb[46].mxu0 %v1467_v54  ;;  %6366 = vmatmul.mubr.f32.gmra.mrb[46].mxu1 %v1467_v54 }
 0x6a8   :  { %6400 = vmatprep.mubr.f32.mxu0 %v8647_v24 }
 0x6ab   :  { %6401 = vmatmul.mubr.f32.vlgmr.msra.gmra.mrb[48].mxu0 %v8650_v63 }
 0x6ac   :  { %6403 = vmatprep.mubr.f32.mxu0 %v8661_v14 }
 0x6af   :  { %6404 = vmatmul.mubr.f32.gmra.mrb[50].mxu0 %v8665_v2 }
 0x6b0   :  { %6406 = vmatprep.mubr.f32.mxu0 %v8676_v57 }
 0x6b3   :  { %6407 = vmatmul.mubr.f32.gmra.mrb[52].mxu0 %v8680_v44 }
 0x6b4   :  { %6409 = vmatprep.mubr.f32.mxu0 %v8690_v51 }
 0x6b7   :  { %6410 = vmatmul.mubr.f32.gmra.mrb[54].mxu0 %v8694_v3 }
 0x6b8   :  { %6412 = vmatprep.mubr.f32.mxu0 %v1460_v17 }
 0x6bb   :  { %6413 = vmatmul.mubr.f32.gmra.mrb[56].mxu0 %v1461_v49 }
 0x6bc   :  { %6415 = vmatprep.mubr.f32.mxu0 %v1462_v28 }
 0x6bf   :  { %6416 = vmatmul.mubr.f32.gmra.mrb[58].mxu0 %v1463_v50 }
 0x6c0   :  { %6418 = vmatprep.mubr.f32.mxu0 %v1464_v23 }
 0x6c3   :  { %6419 = vmatmul.mubr.f32.gmra.mrb[60].mxu0 %v1465_v26 }
 0x6c4   :  { %6421 = vmatprep.mubr.f32.mxu0 %v1466_v32 }
 0x6c7   :  { %6422 = vmatmul.mubr.f32.gmra.mrb[62].mxu0 %v1467_v54 }
 0x75a   :  { %v6290_v29 = vpop.f32.mrb[32].mxu0  ;;  %v6346_v24 = vpop.f32.mrb[32].mxu1 }
 0x75b   :  { %v8735_v63 = vadd.f32 %v6290_v29, %v8730_v34  ;;  %v1727_v14 = vadd.f32 %v6346_v24, %v8732_v22  ;;  %v1555_v2 = vpop.f32.mrb[33].mxu0  ;;  %v1721_v57 = vpop.f32.mrb[33].mxu1 }
 0x75c   :  { %v1556_v44 = vadd.f32 %v8730_v34, %v1555_v2  ;;  %v1722_v51 = vadd.f32 %v8732_v22, %v1721_v57 }
 0x75e   :  { %v7222_v3 = vpack.c.bf16 %v1727_v14, %v1722_v51  ;;  %6456 = vmatprep.mubr.f32.mxu1 %v1556_v44 }
 0x760   :  { %7223 = vmatprep.subr.bf16.mxu1 %v7222_v3 }
 0x761   :  { %7225 = vmatpush3.bf16.xpose.msra.mxu1 %v7222_v3 }
 0x762   :  { %v6293_v38 = vpop.f32.mrb[34].mxu0  ;;  %v6349_v17 = vpop.f32.mrb[34].mxu1 }
 0x763   :  { %v8741_v7 = vadd.f32 %v6293_v38, %v8730_v34  ;;  %v1737_v49 = vadd.f32 %v6349_v17, %v8732_v22  ;;  %v1565_v56 = vpop.f32.mrb[35].mxu0  ;;  %v1731_v60 = vpop.f32.mrb[35].mxu1 }
 0x764   :  { %v8745_v42 = vadd.f32 %v8730_v34, %v1565_v56  ;;  %v1732_v35 = vadd.f32 %v8732_v22, %v1731_v60 }
 0x766   :  { %v7226_v0 = vpack.c.bf16 %v1737_v49, %v1732_v35  ;;  %v6296_v52 = vpop.f32.mrb[36].mxu0  ;;  %v6352_v5 = vpop.f32.mrb[36].mxu1 }
 0x767   :  { %v8749_v8 = vadd.f32 %v6296_v52, %v8730_v34  ;;  %v1747_v28 = vadd.f32 %v6352_v5, %v8732_v22  ;;  %v1575_v40 = vpop.f32.mrb[37].mxu0  ;;  %v1741_v50 = vpop.f32.mrb[37].mxu1 }
 0x768   :  { %7227 = vmatprep.subr.bf16.mxu1 %v7226_v0  ;;  %v8753_v43 = vadd.f32 %v8730_v34, %v1575_v40  ;;  %v1742_v62 = vadd.f32 %v8732_v22, %v1741_v50 }
 0x769   :  { %7229 = vmatpush3.bf16.xpose.msra.mxu1 %v7226_v0 }
 0x76a   :  { %v7230_v48 = vpack.c.bf16 %v1747_v28, %v1742_v62  ;;  %v6299_v47 = vpop.f32.mrb[38].mxu0  ;;  %v6355_v13 = vpop.f32.mrb[38].mxu1 }
 0x76b   :  { %v8757_v25 = vadd.f32 %v6299_v47, %v8730_v34  ;;  %v1757_v23 = vadd.f32 %v6355_v13, %v8732_v22  ;;  %v1585_v46 = vpop.f32.mrb[39].mxu0  ;;  %v1751_v26 = vpop.f32.mrb[39].mxu1 }
 0x76c   :  { %v8761_v30 = vadd.f32 %v8730_v34, %v1585_v46  ;;  %v1752_v16 = vadd.f32 %v8732_v22, %v1751_v26  ;;  %7231 = vmatprep.subr.bf16.mxu1 %v7230_v48 }
 0x76e   :  { %v7234_v32 = vpack.c.bf16 %v1757_v23, %v1752_v16  ;;  %v6302_v54 = vpop.f32.mrb[40].mxu0  ;;  %v6358_v29 = vpop.f32.mrb[40].mxu1 }
 0x76f   :  { %v8765_v24 = vadd.f32 %v6302_v54, %v8730_v34  ;;  %v1767_v14 = vadd.f32 %v6358_v29, %v8732_v22  ;;  %v1595_v2 = vpop.f32.mrb[41].mxu0  ;;  %v1761_v57 = vpop.f32.mrb[41].mxu1 }
 0x770   :  { %v8769_v44 = vadd.f32 %v8730_v34, %v1595_v2  ;;  %v1762_v51 = vadd.f32 %v8732_v22, %v1761_v57 }
 0x771   :  { %7233 = vmatpush3.bf16.xpose.msra.mxu1 %v7230_v48 }
 0x772   :  { %7235 = vmatprep.subr.bf16.mxu1 %v7234_v32  ;;  %v7238_v3 = vpack.c.bf16 %v1767_v14, %v1762_v51  ;;  %v6305_v38 = vpop.f32.mrb[42].mxu0  ;;  %v6361_v17 = vpop.f32.mrb[42].mxu1 }
 0x773   :  { %v8773_v49 = vadd.f32 %v6305_v38, %v8730_v34  ;;  %v1777_v56 = vadd.f32 %v6361_v17, %v8732_v22  ;;  %v1605_v60 = vpop.f32.mrb[43].mxu0  ;;  %v1771_v35 = vpop.f32.mrb[43].mxu1  ;;  %v5463_v38 = vld [vmem:[#allocation4 + $0x6] ss:$0 sm:$0xff] }
 0x774   :  { %v8777_v0 = vadd.f32 %v8730_v34, %v1605_v60  ;;  %v1772_v52 = vadd.f32 %v8732_v22, %v1771_v35 }
 0x776   :  { %v7242_v5 = vpack.c.bf16 %v1777_v56, %v1772_v52  ;;  %v6308_v28 = vpop.f32.mrb[44].mxu0  ;;  %v6364_v40 = vpop.f32.mrb[44].mxu1 }
 0x777   :  { %v8781_v50 = vadd.f32 %v6308_v28, %v8730_v34  ;;  %v1787_v62 = vadd.f32 %v6364_v40, %v8732_v22  ;;  %v1615_v48 = vpop.f32.mrb[45].mxu0  ;;  %v1781_v47 = vpop.f32.mrb[45].mxu1 }
 0x778   :  { %v8785_v13 = vadd.f32 %v8730_v34, %v1615_v48  ;;  %v1782_v23 = vadd.f32 %v8732_v22, %v1781_v47 }
 0x779   :  { %7237 = vmatpush3.bf16.xpose.msra.mxu1 %v7234_v32 }
 0x77a   :  { %7239 = vmatprep.subr.bf16.mxu1 %v7238_v3  ;;  %v7246_v46 = vpack.c.bf16 %v1787_v62, %v1782_v23  ;;  %v6311_v26 = vpop.f32.mrb[46].mxu0  ;;  %v6367_v16 = vpop.f32.mrb[46].mxu1 }
 0x77b   :  { %v8789_v54 = vadd.f32 %v6311_v26, %v8730_v34  ;;  %v1797_v29 = vadd.f32 %v6367_v16, %v8732_v22  ;;  %v1625_v14 = vpop.f32.mrb[47].mxu0  ;;  %v1791_v2 = vpop.f32.mrb[47].mxu1 }
 0x77c   :  { %v8793_v57 = vadd.f32 %v8730_v34, %v1625_v14  ;;  %v1792_v51 = vadd.f32 %v8732_v22, %v1791_v2 }
 0x77e   :  { %v7250_v17 = vpack.c.bf16 %v1797_v29, %v1792_v51  ;;  %v6402_v56 = vpop.f32.mrb[48].mxu0 }
 0x77f   :  { %v1893_v32 = vadd.f32 %v6402_v56, %v5463_v38  ;;  %v1887_v60 = vpop.f32.mrb[49].mxu0 }
 0x780   :  { %v1888_v35 = vadd.f32 %v5463_v38, %v1887_v60 }
 0x781   :  { %7241 = vmatpush3.bf16.xpose.msra.mxu1 %v7238_v3 }
 0x782   :  { %7243 = vmatprep.subr.bf16.mxu1 %v7242_v5  ;;  %v7254_v52 = vpack.c.bf16 %v1893_v32, %v1888_v35  ;;  %v6405_v28 = vpop.f32.mrb[50].mxu0 }
 0x783   :  { %v1903_v40 = vadd.f32 %v6405_v28, %v5463_v38  ;;  %v1897_v62 = vpop.f32.mrb[51].mxu0 }
 0x784   :  { %v1898_v48 = vadd.f32 %v5463_v38, %v1897_v62  ;;  %7255 = vmatprep.subr.bf16.mxu0 %v7254_v52 }
 0x785   :  { %7257 = vmatpush3.bf16.msra.mxu0 %v7254_v52 }
 0x786   :  { %v7258_v47 = vpack.c.bf16 %v1903_v40, %v1898_v48  ;;  %v6408_v34 = vpop.f32.mrb[52].mxu0 }
 0x787   :  { %v1913_v23 = vadd.f32 %v6408_v34, %v5463_v38  ;;  %v1907_v26 = vpop.f32.mrb[53].mxu0 }
 0x788   :  { %v1908_v22 = vadd.f32 %v5463_v38, %v1907_v26  ;;  %7259 = vmatprep.subr.bf16.mxu0 %v7258_v47 }
 0x789   :  { %7245 = vmatpush3.bf16.xpose.msra.mxu1 %v7242_v5  ;;  %7261 = vmatpush3.bf16.msra.mxu0 %v7258_v47 }
 0x78a   :  { %7247 = vmatprep.subr.bf16.mxu1 %v7246_v46  ;;  %v7262_v16 = vpack.c.bf16 %v1913_v23, %v1908_v22  ;;  %v6411_v29 = vpop.f32.mrb[54].mxu0 }
 0x78b   :  { %v1923_v3 = vadd.f32 %v6411_v29, %v5463_v38  ;;  %v1917_v14 = vpop.f32.mrb[55].mxu0 }
 0x78c   :  { %v1918_v2 = vadd.f32 %v5463_v38, %v1917_v14  ;;  %7263 = vmatprep.subr.bf16.mxu0 %v7262_v16 }
 0x78d   :  { %7265 = vmatpush3.bf16.msra.mxu0 %v7262_v16 }
 0x78e   :  { %v7266_v51 = vpack.c.bf16 %v1923_v3, %v1918_v2  ;;  %v6414_v56 = vpop.f32.mrb[56].mxu0 }
 0x78f   :  { %v1933_v32 = vadd.f32 %v6414_v56, %v5463_v38  ;;  %v1927_v60 = vpop.f32.mrb[57].mxu0  ;;  %v348_v56 = vld [vmem:[#allocation2 + $0x130] sm:$0xff] }
 0x790   :  { %v1928_v35 = vadd.f32 %v5463_v38, %v1927_v60  ;;  %7267 = vmatprep.subr.bf16.mxu0 %v7266_v51 }
 0x791   :  { %7249 = vmatpush3.bf16.xpose.msra.mxu1 %v7246_v46  ;;  %7269 = vmatpush3.bf16.msra.mxu0 %v7266_v51  ;;  %v349_v51 = vld [vmem:[#allocation2 + $0x138] sm:$0xff] }
 0x792   :  { %7251 = vmatprep.subr.bf16.mxu1 %v7250_v17  ;;  %v7270_v52 = vpack.c.bf16 %v1933_v32, %v1928_v35  ;;  %v6417_v5 = vpop.f32.mrb[58].mxu0 }
 0x793   :  { %v1943_v28 = vadd.f32 %v6417_v5, %v5463_v38  ;;  %v1937_v40 = vpop.f32.mrb[59].mxu0  ;;  %v351_v5 = vld [vmem:[#allocation2 + $0x148] sm:$0xff] }
 0x794   :  { %v1938_v62 = vadd.f32 %v5463_v38, %v1937_v40  ;;  %7271 = vmatprep.subr.bf16.mxu0 %v7270_v52 }
 0x795   :  { %7273 = vmatpush3.bf16.msra.mxu0 %v7270_v52 }
 0x796   :  { %v7274_v48 = vpack.c.bf16 %v1943_v28, %v1938_v62  ;;  %v6420_v47 = vpop.f32.mrb[60].mxu0  ;;  %v350_v28 = vld [vmem:[#allocation2 + $0x140] sm:$0xff] }
 0x797   :  { %v1953_v34 = vadd.f32 %v6420_v47, %v5463_v38  ;;  %v1947_v23 = vpop.f32.mrb[61].mxu0 }
 0x798   :  { %v1948_v26 = vadd.f32 %v5463_v38, %v1947_v23  ;;  %7275 = vmatprep.subr.bf16.mxu0 %v7274_v48  ;;  %v352_v23 = vld [vmem:[#allocation2 + $0x150] sm:$0xff] }
 0x799   :  { %7253 = vmatpush3.bf16.xpose.msra.mxu1 %v7250_v17  ;;  %7277 = vmatpush3.bf16.msra.mxu0 %v7274_v48 }
 0x79a   :  { %v7278_v22 = vpack.c.bf16 %v1953_v34, %v1948_v26  ;;  %v6423_v16 = vpop.f32.mrb[62].mxu0  ;;  %v353_v34 = vld [vmem:[#allocation2 + $0x158] sm:$0xff] }
 0x79b   :  { %v1963_v46 = vadd.f32 %v6423_v16, %v5463_v38  ;;  %v1957_v29 = vpop.f32.mrb[63].mxu0 }
 0x79c   :  { %v1958_v3 = vadd.f32 %v5463_v38, %v1957_v29  ;;  %7279 = vmatprep.subr.bf16.mxu0 %v7278_v22  ;;  %v355_v29 = vld [vmem:[#allocation2 + $0x168] sm:$0xff] }
 0x79d   :  { %7281 = vmatpush3.bf16.msra.mxu0 %v7278_v22 }
 0x79e   :  { %v7282_v14 = vpack.c.bf16 %v1963_v46, %v1958_v3  ;;  %v354_v3 = vld [vmem:[#allocation2 + $0x160] sm:$0xff] }
 0x7a0   :  { %6457 = vmatmul.mubr.f32.vlgmr.msra.gmra.mrb[48].mxu1 %v8735_v63  ;;  %7283 = vmatprep.subr.bf16.mxu0 %v7282_v14  ;;  %v343_v63 = vld [vmem:[#allocation2 + $0x108] sm:$0xff] }
 0x7a1   :  { %6459 = vmatprep.mubr.f32.mxu1 %v8745_v42  ;;  %7285 = vmatpush3.bf16.msra.mxu0 %v7282_v14 }
 0x7a4   :  { %6460 = vmatmul.mubr.f32.gmra.mrb[50].mxu1 %v8741_v7  ;;  %v342_v7 = vld [vmem:[#allocation2 + $0x100] sm:$0xff] }
 0x7a5   :  { %6462 = vmatprep.mubr.f32.mxu1 %v8753_v43 }
 0x7a8   :  { %6463 = vmatmul.mubr.f32.gmra.mrb[52].mxu1 %v8749_v8 }
 0x7a9   :  { %6465 = vmatprep.mubr.f32.mxu1 %v8761_v30  ;;  %v345_v30 = vld [vmem:[#allocation2 + $0x118] sm:$0xff] }
 0x7ac   :  { %6466 = vmatmul.mubr.f32.gmra.mrb[54].mxu1 %v8757_v25 }
 0x7ad   :  { %6468 = vmatprep.mubr.f32.mxu1 %v8769_v44 }
 0x7b0   :  { %6469 = vmatmul.mubr.f32.gmra.mrb[56].mxu1 %v8765_v24  ;;  %v344_v24 = vld [vmem:[#allocation2 + $0x110] sm:$0xff] }
 0x7b1   :  { %6471 = vmatprep.mubr.f32.mxu1 %v8777_v0 }
 0x7b4   :  { %6472 = vmatmul.mubr.f32.gmra.mrb[58].mxu1 %v8773_v49 }
 0x7b5   :  { %6474 = vmatprep.mubr.f32.mxu1 %v8785_v13  ;;  %v347_v13 = vld [vmem:[#allocation2 + $0x128] sm:$0xff] }
 0x7b8   :  { %6475 = vmatmul.mubr.f32.gmra.mrb[60].mxu1 %v8781_v50 }
 0x7b9   :  { %6477 = vmatprep.mubr.f32.mxu1 %v8793_v57 }
 0x7bc   :  { %6478 = vmatmul.mubr.f32.gmra.mrb[62].mxu1 %v8789_v54  ;;  %v346_v54 = vld [vmem:[#allocation2 + $0x120] sm:$0xff] }
 0x873   :  { %v6458_v42 = vpop.f32.mrb[48].mxu1 }
 0x874   :  { %v8811_v8 = vadd.f32 %v6458_v42, %v343_v63  ;;  %v2032_v43 = vpop.f32.mrb[49].mxu1 }
 0x875   :  { %v8813_v25 = vadd.f32 %v2032_v43, %v342_v7  ;;  %v357_v43 = vld [vmem:[#allocation2 + $0x178] sm:$0xff] }
 0x876   :  { %2113 = vmax.xlane.f32.xlu0 %v8811_v8 }
 0x877   :  { %v6461_v44 = vpop.f32.mrb[50].mxu1  ;;  %2111 = vmax.xlane.f32.xlu1 %v8813_v25 }
 0x878   :  { %v8817_v49 = vadd.f32 %v6461_v44, %v345_v30  ;;  %v2042_v0 = vpop.f32.mrb[51].mxu1  ;;  %v356_v30 = vld [vmem:[#allocation2 + $0x170] sm:$0xff] }
 0x879   :  { %v8819_v50 = vadd.f32 %v2042_v0, %v344_v24 }
 0x87a   :  { %2117 = vmax.xlane.f32.xlu0 %v8817_v49 }
 0x87b   :  { %v6464_v57 = vpop.f32.mrb[52].mxu1  ;;  %2115 = vmax.xlane.f32.xlu1 %v8819_v50 }
 0x87c   :  { %v8823_v38 = vadd.f32 %v6464_v57, %v347_v13  ;;  %v2052_v17 = vpop.f32.mrb[53].mxu1 }
 0x87d   :  { %v8825_v2 = vadd.f32 %v2052_v17, %v346_v54 }
 0x87e   :  { %2121 = vmax.xlane.f32.xlu0 %v8823_v38 }
 0x87f   :  { %v6467_v32 = vpop.f32.mrb[54].mxu1  ;;  %2119 = vmax.xlane.f32.xlu1 %v8825_v2 }
 0x880   :  { %v8829_v60 = vadd.f32 %v6467_v32, %v349_v51  ;;  %v2062_v35 = vpop.f32.mrb[55].mxu1 }
 0x881   :  { %v8831_v52 = vadd.f32 %v2062_v35, %v348_v56 }
 0x882   :  { %2125 = vmax.xlane.f32.xlu0 %v8829_v60 }
 0x883   :  { %v6470_v40 = vpop.f32.mrb[56].mxu1  ;;  %2123 = vmax.xlane.f32.xlu1 %v8831_v52 }
 0x884   :  { %v8835_v62 = vadd.f32 %v6470_v40, %v351_v5  ;;  %v2072_v48 = vpop.f32.mrb[57].mxu1 }
 0x885   :  { %v8837_v47 = vadd.f32 %v2072_v48, %v350_v28 }
 0x886   :  { %2129 = vmax.xlane.f32.xlu0 %v8835_v62 }
 0x887   :  { %v6473_v26 = vpop.f32.mrb[58].mxu1  ;;  %2127 = vmax.xlane.f32.xlu1 %v8837_v47 }
 0x888   :  { %v8841_v22 = vadd.f32 %v6473_v26, %v353_v34  ;;  %v2082_v16 = vpop.f32.mrb[59].mxu1 }
 0x889   :  { %v8843_v46 = vadd.f32 %v2082_v16, %v352_v23 }
 0x88a   :  { %2133 = vmax.xlane.f32.xlu0 %v8841_v22 }
 0x88b   :  { %v6476_v14 = vpop.f32.mrb[60].mxu1  ;;  %2131 = vmax.xlane.f32.xlu1 %v8843_v46 }
 0x88c   :  { %v8847_v63 = vadd.f32 %v6476_v14, %v355_v29  ;;  %v2092_v7 = vpop.f32.mrb[61].mxu1 }
 0x88d   :  { %v8849_v42 = vadd.f32 %v2092_v7, %v354_v3 }
 0x88e   :  { %2137 = vmax.xlane.f32.xlu0 %v8847_v63 }
 0x88f   :  { %2135 = vmax.xlane.f32.xlu1 %v8849_v42  ;;  %v6479_v24 = vpop.f32.mrb[62].mxu1 }
 0x890   :  { %v8853_v44 = vadd.f32 %v6479_v24, %v357_v43  ;;  %v2102_v0 = vpop.f32.mrb[63].mxu1 }
 0x891   :  { %v8855_v13 = vadd.f32 %v2102_v0, %v356_v30 }
 0x892   :  { %2141 = vmax.xlane.f32.xlu0 %v8853_v44 }
 0x893   :  { %2139 = vmax.xlane.f32.xlu1 %v8855_v13 }
 0x903   :  { %v2114_v54 = vpop.xlane.xlu0 %2113 }
 0x904   :  { %v2144_v57 = vsub.f32 %v8811_v8, %v2114_v54  ;;  %v2112_v17 = vpop.xlane.xlu1 %2111 }
 0x905   :  { %v2143_v51 = vsub.f32 %v8813_v25, %v2112_v17 }
 0x906   :  { %v2161_v56 = vmul.f32 1.442695, %v2144_v57 }
 0x907   :  { %v2159_v32 = vmul.f32 1.442695, %v2143_v51  ;;  %v2118_v35 = vpop.xlane.xlu0 %2117 }
 0x908   :  { %7648 = vpow2.f32 %v2161_v56  ;;  %v2146_v5 = vsub.f32 %v8817_v49, %v2118_v35  ;;  %v2116_v28 = vpop.xlane.xlu1 %2115 }
 0x909   :  { %7650 = vpow2.f32 %v2159_v32  ;;  %v2145_v40 = vsub.f32 %v8819_v50, %v2116_v28 }
 0x90a   :  { %v2165_v48 = vmul.f32 1.442695, %v2146_v5 }
 0x90b   :  { %v2163_v34 = vmul.f32 1.442695, %v2145_v40  ;;  %v2122_v23 = vpop.xlane.xlu0 %2121 }
 0x90c   :  { %7652 = vpow2.f32 %v2165_v48  ;;  %v2148_v26 = vsub.f32 %v8823_v38, %v2122_v23  ;;  %v2120_v8 = vpop.xlane.xlu1 %2119 }
 0x90d   :  { %7654 = vpow2.f32 %v2163_v34  ;;  %v2147_v25 = vsub.f32 %v8825_v2, %v2120_v8 }
 0x90e   :  { %v2169_v16 = vmul.f32 1.442695, %v2148_v26 }
 0x90f   :  { %v2167_v29 = vmul.f32 1.442695, %v2147_v25  ;;  %v2126_v3 = vpop.xlane.xlu0 %2125 }
 0x910   :  { %7656 = vpow2.f32 %v2169_v16  ;;  %v2150_v49 = vsub.f32 %v8829_v60, %v2126_v3  ;;  %v2124_v14 = vpop.xlane.xlu1 %2123 }
 0x911   :  { %7658 = vpow2.f32 %v2167_v29  ;;  %v2149_v50 = vsub.f32 %v8831_v52, %v2124_v14 }
 0x912   :  { %v8867_v7 = vpop.eup %7648  ;;  %v2173_v43 = vmul.f32 1.442695, %v2150_v49 }
 0x913   :  { %v8869_v30 = vpop.eup %7650  ;;  %v2171_v38 = vmul.f32 1.442695, %v2149_v50  ;;  %v2130_v24 = vpop.xlane.xlu0 %2129  ;;  %2193 = vadd.xlane.f32.xlu0 %v8867_v7 }
 0x914   :  { %7660 = vpow2.f32 %v2173_v43  ;;  %v2152_v2 = vsub.f32 %v8835_v62, %v2130_v24  ;;  %v2128_v0 = vpop.xlane.xlu1 %2127  ;;  %2191 = vadd.xlane.f32.xlu1 %v8869_v30 }
 0x915   :  { %7662 = vpow2.f32 %v2171_v38  ;;  %v2151_v60 = vsub.f32 %v8837_v47, %v2128_v0  ;;  %v2401_v0 = vld [vmem:[#allocation2 + $0x308] sm:$0xff] }
 0x916   :  { %v8875_v54 = vpop.eup %7652  ;;  %v2177_v52 = vmul.f32 1.442695, %v2152_v2  ;;  %v2400_v2 = vld [vmem:[#allocation2 + $0x300] sm:$0xff] }
 0x917   :  { %v8877_v57 = vpop.eup %7654  ;;  %v2175_v17 = vmul.f32 1.442695, %v2151_v60  ;;  %v2134_v51 = vpop.xlane.xlu0 %2133  ;;  %2197 = vadd.xlane.f32.xlu0 %v8875_v54  ;;  %v7286_v60 = vpack.c.bf16 %v2401_v0, %v2400_v2 }
 0x918   :  { %7664 = vpow2.f32 %v2177_v52  ;;  %v2154_v56 = vsub.f32 %v8841_v22, %v2134_v51  ;;  %v2132_v32 = vpop.xlane.xlu1 %2131  ;;  %2195 = vadd.xlane.f32.xlu1 %v8877_v57 }
 0x919   :  { %7666 = vpow2.f32 %v2175_v17  ;;  %v2153_v62 = vsub.f32 %v8843_v46, %v2132_v32  ;;  %7287 = vmatprep.subr.bf16.mxu0 %v7286_v60 }
 0x91a   :  { %v8883_v35 = vpop.eup %7656  ;;  %v2181_v47 = vmul.f32 1.442695, %v2154_v56 }
 0x91b   :  { %v8885_v5 = vpop.eup %7658  ;;  %v2179_v28 = vmul.f32 1.442695, %v2153_v62  ;;  %v2138_v40 = vpop.xlane.xlu0 %2137  ;;  %2201 = vadd.xlane.f32.xlu0 %v8883_v35 }
 0x91c   :  { %7668 = vpow2.f32 %v2181_v47  ;;  %v2156_v48 = vsub.f32 %v8847_v63, %v2138_v40  ;;  %v2136_v34 = vpop.xlane.xlu1 %2135  ;;  %2199 = vadd.xlane.f32.xlu1 %v8885_v5  ;;  %v2403_v40 = vld [vmem:[#allocation2 + $0x318] sm:$0xff] }
 0x91d   :  { %7670 = vpow2.f32 %v2179_v28  ;;  %v2155_v22 = vsub.f32 %v8849_v42, %v2136_v34  ;;  %v2402_v28 = vld [vmem:[#allocation2 + $0x310] sm:$0xff] }
 0x91e   :  { %v8891_v23 = vpop.eup %7660  ;;  %v2185_v46 = vmul.f32 1.442695, %v2156_v48 }
 0x91f   :  { %v8893_v26 = vpop.eup %7662  ;;  %v2183_v8 = vmul.f32 1.442695, %v2155_v22  ;;  %2205 = vadd.xlane.f32.xlu0 %v8891_v23  ;;  %v2142_v25 = vpop.xlane.xlu0 %2141 }
 0x920   :  { %7672 = vpow2.f32 %v2185_v46  ;;  %v2158_v16 = vsub.f32 %v8853_v44, %v2142_v25  ;;  %2203 = vadd.xlane.f32.xlu1 %v8893_v26  ;;  %v2140_v63 = vpop.xlane.xlu1 %2139  ;;  %v7290_v25 = vpack.c.bf16 %v2403_v40, %v2402_v28  ;;  %v2408_v28 = vld [vmem:[#allocation2 + $0x340] sm:$0xff]  ;;  %v2409_v40 = vld [vmem:[#allocation2 + $0x348] sm:$0xff] }
 0x921   :  { %7674 = vpow2.f32 %v2183_v8  ;;  %v2157_v29 = vsub.f32 %v8855_v13, %v2140_v63  ;;  %v2404_v63 = vld [vmem:[#allocation2 + $0x320] sm:$0xff] }
 0x922   :  { %v8899_v3 = vpop.eup %7664  ;;  %v2189_v42 = vmul.f32 1.442695, %v2158_v16 }
 0x923   :  { %v8901_v49 = vpop.eup %7666  ;;  %v2187_v14 = vmul.f32 1.442695, %v2157_v29  ;;  %2209 = vadd.xlane.f32.xlu0 %v8899_v3  ;;  %v2405_v29 = vld [vmem:[#allocation2 + $0x328] sm:$0xff] }
 0x924   :  { %7676 = vpow2.f32 %v2189_v42  ;;  %2207 = vadd.xlane.f32.xlu1 %v8901_v49 }
 0x925   :  { %7678 = vpow2.f32 %v2187_v14 }
 0x926   :  { %v8905_v50 = vpop.eup %7668 }
 0x927   :  { %v8907_v44 = vpop.eup %7670  ;;  %2213 = vadd.xlane.f32.xlu0 %v8905_v50 }
 0x928   :  { %2211 = vadd.xlane.f32.xlu1 %v8907_v44 }
 0x92a   :  { %v8911_v13 = vpop.eup %7672 }
 0x92b   :  { %v8913_v43 = vpop.eup %7674  ;;  %2217 = vadd.xlane.f32.xlu0 %v8911_v13 }
 0x92c   :  { %2215 = vadd.xlane.f32.xlu1 %v8913_v43 }
 0x92e   :  { %v8917_v38 = vpop.eup %7676 }
 0x92f   :  { %v8919_v24 = vpop.eup %7678  ;;  %2221 = vadd.xlane.f32.xlu0 %v8917_v38 }
 0x930   :  { %2219 = vadd.xlane.f32.xlu1 %v8919_v24 }
 0x9a0   :  { %v2194_v52 = vpop.xlane.xlu0 %2193 }
 0x9a1   :  { %7680 = vrcp.f32 %v2194_v52  ;;  %v2192_v17 = vpop.xlane.xlu1 %2191 }
 0x9a2   :  { %7682 = vrcp.f32 %v2192_v17 }
 0x9a4   :  { %v2198_v51 = vpop.xlane.xlu0 %2197 }
 0x9a5   :  { %7684 = vrcp.f32 %v2198_v51  ;;  %v2196_v56 = vpop.xlane.xlu1 %2195  ;;  %v2407_v51 = vld [vmem:[#allocation2 + $0x338] sm:$0xff] }
 0x9a6   :  { %7686 = vrcp.f32 %v2196_v56 }
 0x9a8   :  { %v2202_v32 = vpop.xlane.xlu0 %2201 }
 0x9a9   :  { %7688 = vrcp.f32 %v2202_v32  ;;  %v2200_v62 = vpop.xlane.xlu1 %2199 }
 0x9aa   :  { %7690 = vrcp.f32 %v2200_v62 }
 0x9ab   :  { %v7681_v47 = vpop.eup %7680 }
 0x9ac   :  { %v7683_v48 = vpop.eup %7682  ;;  %v2206_v34 = vpop.xlane.xlu0 %2205  ;;  %v2226_v8 = vmul.f32 %v7681_v47, %v8867_v7  ;;  %v2406_v7 = vld [vmem:[#allocation2 + $0x330] sm:$0xff] }
 0x9ad   :  { %7692 = vrcp.f32 %v2206_v34  ;;  %v2204_v22 = vpop.xlane.xlu1 %2203  ;;  %v2224_v46 = vmul.f32 %v7683_v48, %v8869_v30  ;;  %v7294_v30 = vpack.c.bf16 %v2405_v29, %v2404_v63 }
 0x9ae   :  { %7694 = vrcp.f32 %v2204_v22 }
 0x9af   :  { %v7685_v16 = vpop.eup %7684  ;;  %6512 = vmatprep.mubr.f32.mxu0 %v2224_v46 }
 0x9b0   :  { %v7687_v42 = vpop.eup %7686  ;;  %v2210_v14 = vpop.xlane.xlu0 %2209  ;;  %6513 = vmatmul.mubr.f32.vlgmr.msra.gmra.mrb[64].mxu0 %v2226_v8  ;;  %v2230_v52 = vmul.f32 %v7685_v16, %v8875_v54  ;;  %v7302_v8 = vpack.c.bf16 %v2409_v40, %v2408_v28  ;;  %v2411_v16 = vld [vmem:[#allocation2 + $0x358] sm:$0xff] }
 0x9b1   :  { %7696 = vrcp.f32 %v2210_v14  ;;  %v2208_v2 = vpop.xlane.xlu1 %2207  ;;  %v2228_v0 = vmul.f32 %v7687_v42, %v8877_v57  ;;  %7289 = vmatpush3.bf16.msra.mxu0 %v7286_v60  ;;  %v7298_v60 = vpack.c.bf16 %v2407_v51, %v2406_v7 }
 0x9b2   :  { %7698 = vrcp.f32 %v2208_v2  ;;  %7291 = vmatprep.subr.bf16.mxu0 %v7290_v25 }
 0x9b3   :  { %v7689_v17 = vpop.eup %7688  ;;  %6515 = vmatprep.mubr.f32.mxu0 %v2228_v0  ;;  %v2412_v0 = vld [vmem:[#allocation2 + $0x360] sm:$0xff] }
 0x9b4   :  { %v7691_v56 = vpop.eup %7690  ;;  %v2214_v32 = vpop.xlane.xlu0 %2213  ;;  %6516 = vmatmul.mubr.f32.gmra.mrb[66].mxu0 %v2230_v52  ;;  %v2234_v57 = vmul.f32 %v7689_v17, %v8883_v35  ;;  %v2413_v52 = vld [vmem:[#allocation2 + $0x368] sm:$0xff] }
 0x9b5   :  { %7700 = vrcp.f32 %v2214_v32  ;;  %v2212_v62 = vpop.xlane.xlu1 %2211  ;;  %v2232_v47 = vmul.f32 %v7691_v56, %v8885_v5  ;;  %7293 = vmatpush3.bf16.msra.mxu0 %v7290_v25  ;;  %v2410_v25 = vld [vmem:[#allocation2 + $0x350] sm:$0xff]  ;;  %v7310_v51 = vpack.c.bf16 %v2413_v52, %v2412_v0  ;;  %v2415_v32 = vld [vmem:[#allocation2 + $0x378] sm:$0xff] }
 0x9b6   :  { %7702 = vrcp.f32 %v2212_v62  ;;  %7295 = vmatprep.subr.bf16.mxu0 %v7294_v30  ;;  %v7306_v2 = vpack.c.bf16 %v2411_v16, %v2410_v25  ;;  %v2414_v56 = vld [vmem:[#allocation2 + $0x370] sm:$0xff] }
 0x9b7   :  { %v7693_v54 = vpop.eup %7692  ;;  %6518 = vmatprep.mubr.f32.mxu0 %v2232_v47 }
 0x9b8   :  { %v7695_v48 = vpop.eup %7694  ;;  %v2218_v34 = vpop.xlane.xlu0 %2217  ;;  %6519 = vmatmul.mubr.f32.gmra.mrb[68].mxu0 %v2234_v57  ;;  %v2238_v5 = vmul.f32 %v7693_v54, %v8891_v23  ;;  %v7314_v57 = vpack.c.bf16 %v2415_v32, %v2414_v56 }
 0x9b9   :  { %7704 = vrcp.f32 %v2218_v34  ;;  %v2216_v22 = vpop.xlane.xlu1 %2215  ;;  %v2236_v46 = vmul.f32 %v7695_v48, %v8893_v26  ;;  %7297 = vmatpush3.bf16.msra.mxu0 %v7294_v30 }
 0x9ba   :  { %7706 = vrcp.f32 %v2216_v22  ;;  %7299 = vmatprep.subr.bf16.mxu0 %v7298_v60 }
 0x9bb   :  { %v7697_v35 = vpop.eup %7696  ;;  %6521 = vmatprep.mubr.f32.mxu0 %v2236_v46 }
 0x9bc   :  { %v7699_v63 = vpop.eup %7698  ;;  %v2222_v29 = vpop.xlane.xlu0 %2221  ;;  %6522 = vmatmul.mubr.f32.gmra.mrb[70].mxu0 %v2238_v5  ;;  %v2242_v26 = vmul.f32 %v7697_v35, %v8899_v3 }
 0x9bd   :  { %7708 = vrcp.f32 %v2222_v29  ;;  %v2220_v42 = vpop.xlane.xlu1 %2219  ;;  %v2240_v14 = vmul.f32 %v7699_v63, %v8901_v49  ;;  %7301 = vmatpush3.bf16.msra.mxu0 %v7298_v60  ;;  %v5464_v29 = vld [vmem:[#allocation4 + $0x7] ss:$0 sm:$0xff] }
 0x9be   :  { %7710 = vrcp.f32 %v2220_v42  ;;  %7303 = vmatprep.subr.bf16.mxu0 %v7302_v8 }
 0x9bf   :  { %v7701_v23 = vpop.eup %7700  ;;  %6524 = vmatprep.mubr.f32.mxu0 %v2240_v14 }
 0x9c0   :  { %v7703_v30 = vpop.eup %7702  ;;  %6525 = vmatmul.mubr.f32.gmra.mrb[72].mxu0 %v2242_v26  ;;  %v2246_v7 = vmul.f32 %v7701_v23, %v8905_v50 }
 0x9c1   :  { %v2244_v17 = vmul.f32 %v7703_v30, %v8907_v44  ;;  %7305 = vmatpush3.bf16.msra.mxu0 %v7302_v8 }
 0x9c2   :  { %7307 = vmatprep.subr.bf16.mxu0 %v7306_v2 }
 0x9c3   :  { %v7705_v49 = vpop.eup %7704  ;;  %6527 = vmatprep.mubr.f32.mxu0 %v2244_v17 }
 0x9c4   :  { %v7707_v3 = vpop.eup %7706  ;;  %6528 = vmatmul.mubr.f32.gmra.mrb[74].mxu0 %v2246_v7  ;;  %v2250_v47 = vmul.f32 %v7705_v49, %v8911_v13 }
 0x9c5   :  { %v2248_v62 = vmul.f32 %v7707_v3, %v8913_v43  ;;  %7309 = vmatpush3.bf16.msra.mxu0 %v7306_v2 }
 0x9c6   :  { %7311 = vmatprep.subr.bf16.mxu0 %v7310_v51 }
 0x9c7   :  { %v7709_v60 = vpop.eup %7708  ;;  %6530 = vmatprep.mubr.f32.mxu0 %v2248_v62 }
 0x9c8   :  { %v7711_v44 = vpop.eup %7710  ;;  %6531 = vmatmul.mubr.f32.gmra.mrb[76].mxu0 %v2250_v47  ;;  %v2254_v54 = vmul.f32 %v7709_v60, %v8917_v38 }
 0x9c9   :  { %v2252_v50 = vmul.f32 %v7711_v44, %v8919_v24  ;;  %7313 = vmatpush3.bf16.msra.mxu0 %v7310_v51 }
 0x9ca   :  { %7315 = vmatprep.subr.bf16.mxu0 %v7314_v57 }
 0x9cb   :  { %6533 = vmatprep.mubr.f32.mxu0 %v2252_v50 }
 0x9cc   :  { %6534 = vmatmul.mubr.f32.gmra.mrb[78].mxu0 %v2254_v54 }
 0x9cd   :  { %7317 = vmatpush3.bf16.msra.mxu0 %v7314_v57 }
 0xa83   :  { %v6514_v28 = vpop.f32.mrb[64].mxu0 }
 0xa84   :  { %v2321_v43 = vpop.f32.mrb[65].mxu0 }
 0xa85   :  { %6568 = vmatprep.mubr.f32.mxu0 %v2321_v43 }
 0xa86   :  { %6569 = vmatmul.mubr.f32.vlgmr.msra.gmra.mrb[80].mxu0 %v6514_v28 }
 0xa87   :  { %v6517_v13 = vpop.f32.mrb[66].mxu0 }
 0xa88   :  { %v2331_v40 = vpop.f32.mrb[67].mxu0 }
 0xa89   :  { %6571 = vmatprep.mubr.f32.mxu0 %v2331_v40 }
 0xa8a   :  { %6572 = vmatmul.mubr.f32.gmra.mrb[82].mxu0 %v6517_v13 }
 0xa8b   :  { %v6520_v48 = vpop.f32.mrb[68].mxu0 }
 0xa8c   :  { %v2341_v34 = vpop.f32.mrb[69].mxu0 }
 0xa8d   :  { %6574 = vmatprep.mubr.f32.mxu0 %v2341_v34 }
 0xa8e   :  { %6575 = vmatmul.mubr.f32.gmra.mrb[84].mxu0 %v6520_v48 }
 0xa8f   :  { %v6523_v24 = vpop.f32.mrb[70].mxu0 }
 0xa90   :  { %v2351_v22 = vpop.f32.mrb[71].mxu0 }
 0xa91   :  { %6577 = vmatprep.mubr.f32.mxu0 %v2351_v22 }
 0xa92   :  { %6578 = vmatmul.mubr.f32.gmra.mrb[86].mxu0 %v6523_v24 }
 0xa93   :  { %v6526_v38 = vpop.f32.mrb[72].mxu0 }
 0xa94   :  { %v2361_v46 = vpop.f32.mrb[73].mxu0 }
 0xa95   :  { %6580 = vmatprep.mubr.f32.mxu0 %v2361_v46 }
 0xa96   :  { %6581 = vmatmul.mubr.f32.gmra.mrb[88].mxu0 %v6526_v38 }
 0xa97   :  { %v6529_v5 = vpop.f32.mrb[74].mxu0 }
 0xa98   :  { %v2371_v8 = vpop.f32.mrb[75].mxu0 }
 0xa99   :  { %6583 = vmatprep.mubr.f32.mxu0 %v2371_v8 }
 0xa9a   :  { %6584 = vmatmul.mubr.f32.gmra.mrb[90].mxu0 %v6529_v5 }
 0xa9b   :  { %v6532_v35 = vpop.f32.mrb[76].mxu0 }
 0xa9c   :  { %v2381_v25 = vpop.f32.mrb[77].mxu0 }
 0xa9d   :  { %6586 = vmatprep.mubr.f32.mxu0 %v2381_v25 }
 0xa9e   :  { %6587 = vmatmul.mubr.f32.gmra.mrb[92].mxu0 %v6532_v35 }
 0xa9f   :  { %v6535_v16 = vpop.f32.mrb[78].mxu0 }
 0xaa0   :  { %v2391_v63 = vpop.f32.mrb[79].mxu0 }
 0xaa1   :  { %6589 = vmatprep.mubr.f32.mxu0 %v2391_v63 }
 0xaa2   :  { %6590 = vmatmul.mubr.f32.gmra.mrb[94].mxu0 %v6535_v16  ;;  %v2818_v16 = vld [vmem:[#allocation2 + $0x390] sm:$0xff] }
 0xb59   :  { %v6570_v42 = vpop.f32.mrb[80].mxu0 }
 0xb5a   :  { %v2493_v14 = vadd.f32 %v6570_v42, %v5464_v29  ;;  %v2487_v26 = vpop.f32.mrb[81].mxu0  ;;  %v2819_v42 = vld [vmem:[#allocation2 + $0x398] sm:$0xff] }
 0xb5b   :  { %v2488_v2 = vadd.f32 %v5464_v29, %v2487_v26  ;;  %v2820_v26 = vld [vmem:[#allocation2 + $0x3a0] sm:$0xff] }
 0xb5c   :  { %v8940_v23 = vadd.f32 %v2493_v14, %v8476_v11  ;;  %v7322_v14 = vpack.c.bf16 %v2819_v42, %v2818_v16 }
 0xb5d   :  { %v8943_v0 = vadd.f32 %v2488_v2, %v8479_v21  ;;  %v6573_v52 = vpop.f32.mrb[82].mxu0 }
 0xb5e   :  { %v2503_v30 = vadd.f32 %v6573_v52, %v5464_v29  ;;  %2584 = vadd.xlane.f32.xlu0 %v8940_v23  ;;  %v2497_v17 = vpop.f32.mrb[83].mxu0 }
 0xb5f   :  { %v2498_v7 = vadd.f32 %v5464_v29, %v2497_v17  ;;  %2582 = vadd.xlane.f32.xlu1 %v8943_v0 }
 0xb60   :  { %v8948_v51 = vadd.f32 %v2503_v30, %v8484_v61 }
 0xb61   :  { %v8951_v49 = vadd.f32 %v2498_v7, %v8488_v12  ;;  %v6576_v56 = vpop.f32.mrb[84].mxu0 }
 0xb62   :  { %v2513_v11 = vadd.f32 %v6576_v56, %v5464_v29  ;;  %2588 = vadd.xlane.f32.xlu0 %v8948_v51  ;;  %v2507_v21 = vpop.f32.mrb[85].mxu0 }
 0xb63   :  { %v2508_v32 = vadd.f32 %v5464_v29, %v2507_v21  ;;  %2586 = vadd.xlane.f32.xlu1 %v8951_v49 }
 0xb64   :  { %v8956_v3 = vadd.f32 %v2513_v11, %v8493_v27 }
 0xb65   :  { %v8959_v62 = vadd.f32 %v2508_v32, %v8497_v59  ;;  %v6579_v47 = vpop.f32.mrb[86].mxu0 }
 0xb66   :  { %v2523_v61 = vadd.f32 %v6579_v47, %v5464_v29  ;;  %2592 = vadd.xlane.f32.xlu0 %v8956_v3  ;;  %v2517_v12 = vpop.f32.mrb[87].mxu0 }
 0xb67   :  { %v2518_v57 = vadd.f32 %v5464_v29, %v2517_v12  ;;  %2590 = vadd.xlane.f32.xlu1 %v8959_v62 }
 0xb68   :  { %v8964_v60 = vadd.f32 %v2523_v61, %v8501_v10 }
 0xb69   :  { %v8967_v44 = vadd.f32 %v2518_v57, %v8505_v33  ;;  %v6582_v50 = vpop.f32.mrb[88].mxu0 }
 0xb6a   :  { %v2533_v27 = vadd.f32 %v6582_v50, %v5464_v29  ;;  %2596 = vadd.xlane.f32.xlu0 %v8964_v60  ;;  %v2527_v59 = vpop.f32.mrb[89].mxu0 }
 0xb6b   :  { %v2528_v54 = vadd.f32 %v5464_v29, %v2527_v59  ;;  %2594 = vadd.xlane.f32.xlu1 %v8967_v44 }
 0xb6c   :  { %v8972_v28 = vadd.f32 %v2533_v27, %v8509_v20 }
 0xb6d   :  { %v8975_v43 = vadd.f32 %v2528_v54, %v8513_v1  ;;  %v6585_v13 = vpop.f32.mrb[90].mxu0 }
 0xb6e   :  { %v2543_v10 = vadd.f32 %v6585_v13, %v5464_v29  ;;  %2600 = vadd.xlane.f32.xlu0 %v8972_v28  ;;  %v2537_v33 = vpop.f32.mrb[91].mxu0 }
 0xb6f   :  { %v2538_v40 = vadd.f32 %v5464_v29, %v2537_v33  ;;  %2598 = vadd.xlane.f32.xlu1 %v8975_v43 }
 0xb70   :  { %v8980_v48 = vadd.f32 %v2543_v10, %v8517_v41 }
 0xb71   :  { %v8983_v34 = vadd.f32 %v2538_v40, %v8521_v6  ;;  %v6588_v24 = vpop.f32.mrb[92].mxu0 }
 0xb72   :  { %v2553_v20 = vadd.f32 %v6588_v24, %v5464_v29  ;;  %2604 = vadd.xlane.f32.xlu0 %v8980_v48  ;;  %v2547_v1 = vpop.f32.mrb[93].mxu0 }
 0xb73   :  { %v2548_v22 = vadd.f32 %v5464_v29, %v2547_v1  ;;  %2602 = vadd.xlane.f32.xlu1 %v8983_v34 }
 0xb74   :  { %v8988_v38 = vadd.f32 %v2553_v20, %v8525_v18  ;;  %v2816_v18 = vld [vmem:[#allocation2 + $0x380] sm:$0xff] }
 0xb75   :  { %v8991_v46 = vadd.f32 %v2548_v22, %v8529_v55  ;;  %v6591_v5 = vpop.f32.mrb[94].mxu0  ;;  %v2817_v55 = vld [vmem:[#allocation2 + $0x388] sm:$0xff] }
 0xb76   :  { %v2563_v41 = vadd.f32 %v6591_v5, %v5464_v29  ;;  %2608 = vadd.xlane.f32.xlu0 %v8988_v38  ;;  %v2557_v6 = vpop.f32.mrb[95].mxu0  ;;  %v7318_v63 = vpack.c.bf16 %v2817_v55, %v2816_v18 }
 0xb77   :  { %v2558_v8 = vadd.f32 %v5464_v29, %v2557_v6  ;;  %2606 = vadd.xlane.f32.xlu1 %v8991_v46  ;;  %v2821_v29 = vld [vmem:[#allocation2 + $0x3a8] sm:$0xff] }
 0xb78   :  { %v8996_v35 = vadd.f32 %v2563_v41, %v8532_v37  ;;  %7319 = vmatprep.subr.bf16.mxu1 %v7318_v63  ;;  %v7326_v37 = vpack.c.bf16 %v2821_v29, %v2820_v26 }
 0xb79   :  { %v8999_v25 = vadd.f32 %v2558_v8, %v8535_v45  ;;  %7321 = vmatpush3.bf16.msra.mxu1 %v7318_v63 }
 0xb7a   :  { %2612 = vadd.xlane.f32.xlu0 %v8996_v35  ;;  %7323 = vmatprep.subr.bf16.mxu1 %v7322_v14 }
 0xb7b   :  { %2610 = vadd.xlane.f32.xlu1 %v8999_v25 }
 0xb7d   :  { %7325 = vmatpush3.bf16.msra.mxu1 %v7322_v14 }
 0xb7e   :  { %7327 = vmatprep.subr.bf16.mxu1 %v7326_v37 }
 0xb81   :  { %7329 = vmatpush3.bf16.msra.mxu1 %v7326_v37 }
 0xbeb   :  { %v2585_v45 = vpop.xlane.xlu0 %2584 }
 0xbec   :  { %v2615_v2 = vmul.f32 0.015625, %v2585_v45  ;;  %v2583_v52 = vpop.xlane.xlu1 %2582 }
 0xbed   :  { %v2614_v30 = vmul.f32 0.015625, %v2583_v52 }
 0xbee   :  { %v2631_v17 = vsub.f32 %v8940_v23, %v2615_v2 }
 0xbef   :  { %v2630_v7 = vsub.f32 %v8943_v0, %v2614_v30  ;;  %v2589_v56 = vpop.xlane.xlu0 %2588 }
 0xbf0   :  { %v9006_v11 = vmul.f32 %v8540_v31, %v2631_v17  ;;  %v2617_v21 = vmul.f32 0.015625, %v2589_v56  ;;  %v2587_v32 = vpop.xlane.xlu1 %2586 }
 0xbf1   :  { %v9009_v47 = vmul.f32 %v8540_v31, %v2630_v7  ;;  %v2616_v61 = vmul.f32 0.015625, %v2587_v32 }
 0xbf2   :  { %v2633_v12 = vsub.f32 %v8948_v51, %v2617_v21  ;;  %v2663_v57 = vmul.f32 %v9006_v11, %v9006_v11 }
 0xbf3   :  { %v2632_v50 = vsub.f32 %v8951_v49, %v2616_v61  ;;  %v2593_v27 = vpop.xlane.xlu0 %2592  ;;  %v2662_v59 = vmul.f32 %v9009_v47, %v9009_v47 }
 0xbf4   :  { %v9018_v54 = vmul.f32 %v8540_v31, %v2633_v12  ;;  %v2619_v13 = vmul.f32 0.015625, %v2593_v27  ;;  %2680 = vadd.xlane.f32.xlu0 %v2663_v57  ;;  %v2591_v10 = vpop.xlane.xlu1 %2590 }
 0xbf5   :  { %v9021_v33 = vmul.f32 %v8540_v31, %v2632_v50  ;;  %v2618_v40 = vmul.f32 0.015625, %v2591_v10  ;;  %2678 = vadd.xlane.f32.xlu1 %v2662_v59 }
 0xbf6   :  { %v2635_v24 = vsub.f32 %v8956_v3, %v2619_v13  ;;  %v2665_v20 = vmul.f32 %v9018_v54, %v9018_v54 }
 0xbf7   :  { %v2634_v1 = vsub.f32 %v8959_v62, %v2618_v40  ;;  %v2597_v22 = vpop.xlane.xlu0 %2596  ;;  %v2664_v5 = vmul.f32 %v9021_v33, %v9021_v33 }
 0xbf8   :  { %v9030_v41 = vmul.f32 %v8540_v31, %v2635_v24  ;;  %v2621_v6 = vmul.f32 0.015625, %v2597_v22  ;;  %2684 = vadd.xlane.f32.xlu0 %v2665_v20  ;;  %v2595_v8 = vpop.xlane.xlu1 %2594  ;;  %v2822_v22 = vld [vmem:[#allocation2 + $0x3b0] sm:$0xff] }
 0xbf9   :  { %v9033_v18 = vmul.f32 %v8540_v31, %v2634_v1  ;;  %v2620_v55 = vmul.f32 0.015625, %v2595_v8  ;;  %2682 = vadd.xlane.f32.xlu1 %v2664_v5  ;;  %v2823_v5 = vld [vmem:[#allocation2 + $0x3b8] sm:$0xff] }
 0xbfa   :  { %v2637_v16 = vsub.f32 %v8964_v60, %v2621_v6  ;;  %v2667_v63 = vmul.f32 %v9030_v41, %v9030_v41 }
 0xbfb   :  { %v2636_v42 = vsub.f32 %v8967_v44, %v2620_v55  ;;  %v2601_v14 = vpop.xlane.xlu0 %2600  ;;  %v2666_v26 = vmul.f32 %v9033_v18, %v9033_v18  ;;  %v7330_v55 = vpack.c.bf16 %v2823_v5, %v2822_v22  ;;  %v2828_v5 = vld [vmem:[#allocation2 + $0x3e0] sm:$0xff] }
 0xbfc   :  { %v9042_v29 = vmul.f32 %v8540_v31, %v2637_v16  ;;  %v2623_v37 = vmul.f32 0.015625, %v2601_v14  ;;  %2688 = vadd.xlane.f32.xlu0 %v2667_v63  ;;  %v2599_v45 = vpop.xlane.xlu1 %2598 }
 0xbfd   :  { %v9045_v2 = vmul.f32 %v8540_v31, %v2636_v42  ;;  %v2622_v52 = vmul.f32 0.015625, %v2599_v45  ;;  %2686 = vadd.xlane.f32.xlu1 %v2666_v26  ;;  %7331 = vmatprep.subr.bf16.mxu1 %v7330_v55 }
 0xbfe   :  { %v2639_v30 = vsub.f32 %v8972_v28, %v2623_v37  ;;  %v2669_v17 = vmul.f32 %v9042_v29, %v9042_v29  ;;  %7333 = vmatpush3.bf16.msra.mxu1 %v7330_v55 }
 0xbff   :  { %v2638_v7 = vsub.f32 %v8975_v43, %v2622_v52  ;;  %v2605_v56 = vpop.xlane.xlu0 %2604  ;;  %v2668_v21 = vmul.f32 %v9045_v2, %v9045_v2 }
 0xc00   :  { %v9054_v32 = vmul.f32 %v8540_v31, %v2639_v30  ;;  %v2625_v61 = vmul.f32 0.015625, %v2605_v56  ;;  %2692 = vadd.xlane.f32.xlu0 %v2669_v17  ;;  %v2603_v12 = vpop.xlane.xlu1 %2602  ;;  %v2824_v30 = vld [vmem:[#allocation2 + $0x3c0] sm:$0xff]  ;;  %v2825_v17 = vld [vmem:[#allocation2 + $0x3c8] sm:$0xff] }
 0xc01   :  { %v9057_v57 = vmul.f32 %v8540_v31, %v2638_v7  ;;  %v2624_v50 = vmul.f32 0.015625, %v2603_v12  ;;  %2690 = vadd.xlane.f32.xlu1 %v2668_v21  ;;  %v7334_v21 = vpack.c.bf16 %v2825_v17, %v2824_v30  ;;  %v3002_v17 = vld [vmem:[#allocation2 + $0x420] sm:$0xff] }
 0xc02   :  { %v2641_v27 = vsub.f32 %v8980_v48, %v2625_v61  ;;  %v2671_v59 = vmul.f32 %v9054_v32, %v9054_v32 }
 0xc03   :  { %v2640_v13 = vsub.f32 %v8983_v34, %v2624_v50  ;;  %v2609_v10 = vpop.xlane.xlu0 %2608  ;;  %v2670_v40 = vmul.f32 %v9057_v57, %v9057_v57  ;;  %7335 = vmatprep.subr.bf16.mxu1 %v7334_v21 }
 0xc04   :  { %v9066_v24 = vmul.f32 %v8540_v31, %v2641_v27  ;;  %v2627_v20 = vmul.f32 0.015625, %v2609_v10  ;;  %2696 = vadd.xlane.f32.xlu0 %v2671_v59  ;;  %v2607_v1 = vpop.xlane.xlu1 %2606  ;;  %7337 = vmatpush3.bf16.msra.mxu1 %v7334_v21  ;;  %v2827_v10 = vld [vmem:[#allocation2 + $0x3d8] sm:$0xff] }
 0xc05   :  { %v9069_v6 = vmul.f32 %v8540_v31, %v2640_v13  ;;  %v2626_v8 = vmul.f32 0.015625, %v2607_v1  ;;  %2694 = vadd.xlane.f32.xlu1 %v2670_v40  ;;  %v2826_v13 = vld [vmem:[#allocation2 + $0x3d0] sm:$0xff] }
 0xc06   :  { %v2643_v16 = vsub.f32 %v8988_v38, %v2627_v20  ;;  %v2673_v63 = vmul.f32 %v9066_v24, %v9066_v24  ;;  %v7338_v20 = vpack.c.bf16 %v2827_v10, %v2826_v13  ;;  %v3007_v13 = vld [vmem:[#allocation2 + $0x448] sm:$0xff] }
 0xc07   :  { %v2642_v42 = vsub.f32 %v8991_v46, %v2626_v8  ;;  %v2613_v14 = vpop.xlane.xlu0 %2612  ;;  %v2672_v26 = vmul.f32 %v9069_v6, %v9069_v6  ;;  %v2829_v8 = vld [vmem:[#allocation2 + $0x3e8] sm:$0xff] }
 0xc08   :  { %v9078_v37 = vmul.f32 %v8540_v31, %v2643_v16  ;;  %v2629_v45 = vmul.f32 0.015625, %v2613_v14  ;;  %2700 = vadd.xlane.f32.xlu0 %v2673_v63  ;;  %v2611_v52 = vpop.xlane.xlu1 %2610  ;;  %7339 = vmatprep.subr.bf16.mxu1 %v7338_v20  ;;  %v7342_v55 = vpack.c.bf16 %v2829_v8, %v2828_v5  ;;  %v2830_v16 = vld [vmem:[#allocation2 + $0x3f0] sm:$0xff]  ;;  %v2999_v14 = vld [vmem:[#allocation2 + $0x408] sm:$0xff]  ;;  %v3010_v5 = vld [vmem:[#allocation2 + $0x460] sm:$0xff] }
 0xc09   :  { %v9081_v7 = vmul.f32 %v8540_v31, %v2642_v42  ;;  %v2628_v56 = vmul.f32 0.015625, %v2611_v52  ;;  %2698 = vadd.xlane.f32.xlu1 %v2672_v26  ;;  %7341 = vmatpush3.bf16.msra.mxu1 %v7338_v20  ;;  %v2998_v42 = vld [vmem:[#allocation2 + $0x400] sm:$0xff]  ;;  %v3000_v26 = vld [vmem:[#allocation2 + $0x410] sm:$0xff]  ;;  %v3001_v52 = vld [vmem:[#allocation2 + $0x418] sm:$0xff] }
 0xc0a   :  { %v2645_v61 = vsub.f32 %v8996_v35, %v2629_v45  ;;  %v2675_v12 = vmul.f32 %v9078_v37, %v9078_v37  ;;  %7343 = vmatprep.subr.bf16.mxu1 %v7342_v55  ;;  %v7350_v45 = vpack.c.bf16 %v2999_v14, %v2998_v42  ;;  %v7354_v30 = vpack.c.bf16 %v3001_v52, %v3000_v26  ;;  %v3008_v20 = vld [vmem:[#allocation2 + $0x450] sm:$0xff]  ;;  %v3011_v8 = vld [vmem:[#allocation2 + $0x468] sm:$0xff] }
 0xc0b   :  { %v2644_v50 = vsub.f32 %v8999_v25, %v2628_v56  ;;  %v2674_v27 = vmul.f32 %v9081_v7, %v9081_v7  ;;  %v3003_v56 = vld [vmem:[#allocation2 + $0x428] sm:$0xff] }
 0xc0c   :  { %v9090_v59 = vmul.f32 %v8540_v31, %v2645_v61  ;;  %2704 = vadd.xlane.f32.xlu0 %v2675_v12  ;;  %7351 = vmatprep.subr.bf16.mxu0 %v7350_v45  ;;  %v7358_v21 = vpack.c.bf16 %v3003_v56, %v3002_v17  ;;  %v3004_v61 = vld [vmem:[#allocation2 + $0x430] sm:$0xff]  ;;  %v3005_v12 = vld [vmem:[#allocation2 + $0x438] sm:$0xff] }
 0xc0d   :  { %v9093_v40 = vmul.f32 %v8540_v31, %v2644_v50  ;;  %2702 = vadd.xlane.f32.xlu1 %v2674_v27  ;;  %7345 = vmatpush3.bf16.msra.mxu1 %v7342_v55  ;;  %v2831_v31 = vld [vmem:[#allocation2 + $0x3f8] sm:$0xff]  ;;  %v7362_v50 = vpack.c.bf16 %v3005_v12, %v3004_v61  ;;  %v3006_v27 = vld [vmem:[#allocation2 + $0x440] sm:$0xff]  ;;  %v7374_v55 = vpack.c.bf16 %v3011_v8, %v3010_v5 }
 0xc0e   :  { %v2677_v1 = vmul.f32 %v9090_v59, %v9090_v59  ;;  %v7346_v63 = vpack.c.bf16 %v2831_v31, %v2830_v16  ;;  %7353 = vmatpush3.bf16.msra.mxu0 %v7350_v45  ;;  %v7366_v10 = vpack.c.bf16 %v3007_v13, %v3006_v27 }
 0xc0f   :  { %v2676_v22 = vmul.f32 %v9093_v40, %v9093_v40  ;;  %7355 = vmatprep.subr.bf16.mxu0 %v7354_v30 }
 0xc10   :  { %2708 = vadd.xlane.f32.xlu0 %v2677_v1  ;;  %7347 = vmatprep.subr.bf16.mxu1 %v7346_v63  ;;  %v3009_v1 = vld [vmem:[#allocation2 + $0x458] sm:$0xff] }
 0xc11   :  { %2706 = vadd.xlane.f32.xlu1 %v2676_v22  ;;  %7349 = vmatpush3.bf16.msra.mxu1 %v7346_v63  ;;  %v7370_v22 = vpack.c.bf16 %v3009_v1, %v3008_v20 }
 0xc12   :  { %7357 = vmatpush3.bf16.msra.mxu0 %v7354_v30 }
 0xc13   :  { %7359 = vmatprep.subr.bf16.mxu0 %v7358_v21 }
 0xc16   :  { %7361 = vmatpush3.bf16.msra.mxu0 %v7358_v21 }
 0xc17   :  { %7363 = vmatprep.subr.bf16.mxu0 %v7362_v50 }
 0xc1a   :  { %7365 = vmatpush3.bf16.msra.mxu0 %v7362_v50 }
 0xc1b   :  { %7367 = vmatprep.subr.bf16.mxu0 %v7366_v10 }
 0xc1e   :  { %7369 = vmatpush3.bf16.msra.mxu0 %v7366_v10 }
 0xc1f   :  { %7371 = vmatprep.subr.bf16.mxu0 %v7370_v22 }
 0xc22   :  { %7373 = vmatpush3.bf16.msra.mxu0 %v7370_v22 }
 0xc23   :  { %7375 = vmatprep.subr.bf16.mxu0 %v7374_v55 }
 0xc26   :  { %7377 = vmatpush3.bf16.msra.mxu0 %v7374_v55 }
 0xc81   :  { %v2681_v16 = vpop.xlane.xlu0 %2680 }
 0xc82   :  { %v2711_v31 = vmul.f32 0.015625, %v2681_v16  ;;  %v2679_v63 = vpop.xlane.xlu1 %2678  ;;  %v9099_v16 = vld [vmem:[#allocation4 + $0x2] ss:$0 sm:$0xff] }
 0xc83   :  { %v2710_v42 = vmul.f32 0.015625, %v2679_v63 }
 0xc84   :  { %v2727_v14 = vadd.f32 1e-08, %v2711_v31 }
 0xc85   :  { %v2726_v26 = vadd.f32 1e-08, %v2710_v42  ;;  %v2685_v45 = vpop.xlane.xlu0 %2684 }
 0xc86   :  { %7712 = vrsqrt.f32 %v2727_v14  ;;  %v2713_v52 = vmul.f32 0.015625, %v2685_v45  ;;  %v2683_v30 = vpop.xlane.xlu1 %2682 }
 0xc87   :  { %7714 = vrsqrt.f32 %v2726_v26  ;;  %v2712_v17 = vmul.f32 0.015625, %v2683_v30 }
 0xc88   :  { %v2729_v56 = vadd.f32 1e-08, %v2713_v52 }
 0xc89   :  { %v2728_v21 = vadd.f32 1e-08, %v2712_v17  ;;  %v2689_v61 = vpop.xlane.xlu0 %2688  ;;  %v9103_v17 = vld [vmem:[#allocation4 + $0x3] ss:$0 sm:$0xff] }
 0xc8a   :  { %7716 = vrsqrt.f32 %v2729_v56  ;;  %v2715_v12 = vmul.f32 0.015625, %v2689_v61  ;;  %v2687_v50 = vpop.xlane.xlu1 %2686 }
 0xc8b   :  { %7718 = vrsqrt.f32 %v2728_v21  ;;  %v2714_v27 = vmul.f32 0.015625, %v2687_v50 }
 0xc8c   :  { %v2731_v13 = vadd.f32 1e-08, %v2715_v12 }
 0xc8d   :  { %v2730_v10 = vadd.f32 1e-08, %v2714_v27  ;;  %v2693_v20 = vpop.xlane.xlu0 %2692 }
 0xc8e   :  { %7720 = vrsqrt.f32 %v2731_v13  ;;  %v2717_v1 = vmul.f32 0.015625, %v2693_v20  ;;  %v2691_v22 = vpop.xlane.xlu1 %2690 }
 0xc8f   :  { %7722 = vrsqrt.f32 %v2730_v10  ;;  %v2716_v5 = vmul.f32 0.015625, %v2691_v22 }
 0xc90   :  { %v7713_v8 = vpop.eup %7712  ;;  %v2733_v55 = vadd.f32 1e-08, %v2717_v1 }
 0xc91   :  { %v7715_v31 = vpop.eup %7714  ;;  %v2759_v63 = vmul.f32 %v7713_v8, %v9006_v11  ;;  %v2732_v42 = vadd.f32 1e-08, %v2716_v5  ;;  %v2697_v14 = vpop.xlane.xlu0 %2696 }
 0xc92   :  { %7724 = vrsqrt.f32 %v2733_v55  ;;  %v2719_v26 = vmul.f32 0.015625, %v2697_v14  ;;  %v2695_v45 = vpop.xlane.xlu1 %2694  ;;  %v2758_v52 = vmul.f32 %v7715_v31, %v9009_v47 }
 0xc93   :  { %7726 = vrsqrt.f32 %v2732_v42  ;;  %v2718_v30 = vmul.f32 0.015625, %v2695_v45  ;;  %v2780_v56 = vmul.f32 %v9099_v16, %v2759_v63 }
 0xc94   :  { %v7717_v21 = vpop.eup %7716  ;;  %v2735_v61 = vadd.f32 1e-08, %v2719_v26  ;;  %v2779_v12 = vmul.f32 %v9099_v16, %v2758_v52 }
 0xc95   :  { %v7719_v50 = vpop.eup %7718  ;;  %v2734_v27 = vadd.f32 1e-08, %v2718_v30  ;;  %v2701_v11 = vpop.xlane.xlu0 %2700  ;;  %v2761_v13 = vmul.f32 %v7717_v21, %v9018_v54  ;;  %v9113_v5 = vadd.f32 %v9103_v17, %v2780_v56 }
 0xc96   :  { %7728 = vrsqrt.f32 %v2735_v61  ;;  %v2721_v10 = vmul.f32 0.015625, %v2701_v11  ;;  %v2699_v20 = vpop.xlane.xlu1 %2698  ;;  %v9109_v47 = vadd.f32 %v9103_v17, %v2779_v12  ;;  %v2760_v1 = vmul.f32 %v7719_v50, %v9021_v33 }
 0xc97   :  { %7730 = vrsqrt.f32 %v2734_v27  ;;  %v2720_v22 = vmul.f32 0.015625, %v2699_v20  ;;  %v2782_v8 = vmul.f32 %v9099_v16, %v2761_v13 }
 0xc98   :  { %v7721_v55 = vpop.eup %7720  ;;  %v2737_v31 = vadd.f32 1e-08, %v2721_v10  ;;  %6624 = vmatprep.mubr.f32.mxu1 %v9109_v47  ;;  %v2781_v54 = vmul.f32 %v9099_v16, %v2760_v1 }
 0xc99   :  { %v7723_v63 = vpop.eup %7722  ;;  %v2736_v42 = vadd.f32 1e-08, %v2720_v22  ;;  %v2705_v14 = vpop.xlane.xlu0 %2704  ;;  %6625 = vmatmul.mubr.f32.vlgmr.msra.gmra.mrb[64].mxu1 %v9113_v5  ;;  %v2763_v33 = vmul.f32 %v7721_v55, %v9030_v41  ;;  %v9125_v21 = vadd.f32 %v9103_v17, %v2782_v8 }
 0xc9a   :  { %7732 = vrsqrt.f32 %v2737_v31  ;;  %v2723_v26 = vmul.f32 0.015625, %v2705_v14  ;;  %v2703_v45 = vpop.xlane.xlu1 %2702  ;;  %v9121_v52 = vadd.f32 %v9103_v17, %v2781_v54  ;;  %v2762_v30 = vmul.f32 %v7723_v63, %v9033_v18 }
 0xc9b   :  { %7734 = vrsqrt.f32 %v2736_v42  ;;  %v2722_v56 = vmul.f32 0.015625, %v2703_v45  ;;  %v2784_v61 = vmul.f32 %v9099_v16, %v2763_v33 }
 0xc9c   :  { %v7725_v12 = vpop.eup %7724  ;;  %v2739_v50 = vadd.f32 1e-08, %v2723_v26  ;;  %6627 = vmatprep.mubr.f32.mxu1 %v9121_v52  ;;  %v2783_v41 = vmul.f32 %v9099_v16, %v2762_v30 }
 0xc9d   :  { %v7727_v27 = vpop.eup %7726  ;;  %v2738_v11 = vadd.f32 1e-08, %v2722_v56  ;;  %v2709_v13 = vpop.xlane.xlu0 %2708  ;;  %6628 = vmatmul.mubr.f32.gmra.mrb[66].mxu1 %v9125_v21  ;;  %v2765_v18 = vmul.f32 %v7725_v12, %v9042_v29  ;;  %v9137_v55 = vadd.f32 %v9103_v17, %v2784_v61 }
 0xc9e   :  { %7736 = vrsqrt.f32 %v2739_v50  ;;  %v2725_v10 = vmul.f32 0.015625, %v2709_v13  ;;  %v2707_v20 = vpop.xlane.xlu1 %2706  ;;  %v9133_v1 = vadd.f32 %v9103_v17, %v2783_v41  ;;  %v2764_v22 = vmul.f32 %v7727_v27, %v9045_v2 }
 0xc9f   :  { %7738 = vrsqrt.f32 %v2738_v11  ;;  %v2724_v8 = vmul.f32 0.015625, %v2707_v20  ;;  %v2786_v31 = vmul.f32 %v9099_v16, %v2765_v18 }
 0xca0   :  { %v7729_v54 = vpop.eup %7728  ;;  %v2741_v63 = vadd.f32 1e-08, %v2725_v10  ;;  %6630 = vmatprep.mubr.f32.mxu1 %v9133_v1  ;;  %v2785_v29 = vmul.f32 %v9099_v16, %v2764_v22 }
 0xca1   :  { %v7731_v42 = vpop.eup %7730  ;;  %v2740_v14 = vadd.f32 1e-08, %v2724_v8  ;;  %6631 = vmatmul.mubr.f32.gmra.mrb[68].mxu1 %v9137_v55  ;;  %v2767_v33 = vmul.f32 %v7729_v54, %v9054_v32  ;;  %v9149_v45 = vadd.f32 %v9103_v17, %v2786_v31 }
 0xca2   :  { %7740 = vrsqrt.f32 %v2741_v63  ;;  %v9145_v2 = vadd.f32 %v9103_v17, %v2785_v29  ;;  %v2766_v26 = vmul.f32 %v7731_v42, %v9057_v57 }
 0xca3   :  { %7742 = vrsqrt.f32 %v2740_v14  ;;  %v2788_v30 = vmul.f32 %v9099_v16, %v2767_v33 }
 0xca4   :  { %v7733_v56 = vpop.eup %7732  ;;  %6633 = vmatprep.mubr.f32.mxu1 %v9145_v2  ;;  %v2787_v61 = vmul.f32 %v9099_v16, %v2766_v26  ;;  %v3013_v26 = vld [vmem:[#allocation2 + $0x478] sm:$0xff] }
 0xca5   :  { %v7735_v12 = vpop.eup %7734  ;;  %6634 = vmatmul.mubr.f32.gmra.mrb[70].mxu1 %v9149_v45  ;;  %v2769_v32 = vmul.f32 %v7733_v56, %v9066_v24  ;;  %v9161_v41 = vadd.f32 %v9103_v17, %v2788_v30  ;;  %v3196_v56 = vld [vmem:[#allocation2 + $0x600] sm:$0xff] }
 0xca6   :  { %v9157_v50 = vadd.f32 %v9103_v17, %v2787_v61  ;;  %v2768_v57 = vmul.f32 %v7735_v12, %v9069_v6  ;;  %v3197_v61 = vld [vmem:[#allocation2 + $0x608] sm:$0xff] }
 0xca7   :  { %v2790_v27 = vmul.f32 %v9099_v16, %v2769_v32  ;;  %v7382_v12 = vpack.c.bf16 %v3197_v61, %v3196_v56  ;;  %v3199_v32 = vld [vmem:[#allocation2 + $0x618] sm:$0xff] }
 0xca8   :  { %v7737_v11 = vpop.eup %7736  ;;  %6636 = vmatprep.mubr.f32.mxu1 %v9157_v50  ;;  %v2789_v13 = vmul.f32 %v9099_v16, %v2768_v57 }
 0xca9   :  { %v7739_v18 = vpop.eup %7738  ;;  %6637 = vmatmul.mubr.f32.gmra.mrb[72].mxu1 %v9161_v41  ;;  %v2771_v24 = vmul.f32 %v7737_v11, %v9078_v37  ;;  %v9173_v20 = vadd.f32 %v9103_v17, %v2790_v27  ;;  %v3200_v27 = vld [vmem:[#allocation2 + $0x620] sm:$0xff]  ;;  %v3201_v11 = vld [vmem:[#allocation2 + $0x628] sm:$0xff]  ;;  %7383 = vmatprep.subr.bf16.mxu1 %v7382_v12 }
 0xcaa   :  { %v9169_v10 = vadd.f32 %v9103_v17, %v2789_v13  ;;  %v2770_v6 = vmul.f32 %v7739_v18, %v9081_v7  ;;  %7385 = vmatpush3.bf16.msra.mxu1 %v7382_v12  ;;  %v3202_v13 = vld [vmem:[#allocation2 + $0x630] sm:$0xff]  ;;  %v3203_v18 = vld [vmem:[#allocation2 + $0x638] sm:$0xff] }
 0xcab   :  { %v2792_v22 = vmul.f32 %v9099_v16, %v2771_v24  ;;  %v7394_v24 = vpack.c.bf16 %v3203_v18, %v3202_v13 }
 0xcac   :  { %v7741_v8 = vpop.eup %7740  ;;  %6639 = vmatprep.mubr.f32.mxu1 %v9169_v10  ;;  %v2791_v31 = vmul.f32 %v9099_v16, %v2770_v6  ;;  %v3204_v6 = vld [vmem:[#allocation2 + $0x640] sm:$0xff] }
 0xcad   :  { %v7743_v54 = vpop.eup %7742  ;;  %6640 = vmatmul.mubr.f32.gmra.mrb[74].mxu1 %v9173_v20  ;;  %v2773_v37 = vmul.f32 %v7741_v8, %v9090_v59  ;;  %v9185_v29 = vadd.f32 %v9103_v17, %v2792_v22  ;;  %v3205_v22 = vld [vmem:[#allocation2 + $0x648] sm:$0xff] }
 0xcae   :  { %v9181_v63 = vadd.f32 %v9103_v17, %v2791_v31  ;;  %v2772_v7 = vmul.f32 %v7743_v54, %v9093_v40  ;;  %v3012_v40 = vld [vmem:[#allocation2 + $0x470] sm:$0xff]  ;;  %v7398_v8 = vpack.c.bf16 %v3205_v22, %v3204_v6  ;;  %v3207_v54 = vld [vmem:[#allocation2 + $0x658] sm:$0xff] }
 0xcaf   :  { %v2794_v42 = vmul.f32 %v9099_v16, %v2773_v37  ;;  %v7378_v30 = vpack.c.bf16 %v3013_v26, %v3012_v40  ;;  %v3206_v31 = vld [vmem:[#allocation2 + $0x650] sm:$0xff] }
 0xcb0   :  { %6642 = vmatprep.mubr.f32.mxu1 %v9181_v63  ;;  %v2793_v14 = vmul.f32 %v9099_v16, %v2772_v7  ;;  %v3198_v16 = vld [vmem:[#allocation2 + $0x610] sm:$0xff]  ;;  %v7402_v37 = vpack.c.bf16 %v3207_v54, %v3206_v31  ;;  %v5467_v7 = vld [vmem:[#allocation4 + $0x8] ss:$0 sm:$0xff] }
 0xcb1   :  { %6643 = vmatmul.mubr.f32.gmra.mrb[76].mxu1 %v9185_v29  ;;  %v9195_v59 = vadd.f32 %v9103_v17, %v2794_v42  ;;  %7379 = vmatprep.subr.bf16.mxu0 %v7378_v30  ;;  %v7386_v57 = vpack.c.bf16 %v3199_v32, %v3198_v16 }
 0xcb2   :  { %v9192_v33 = vadd.f32 %v9103_v17, %v2793_v14  ;;  %7381 = vmatpush3.bf16.msra.mxu0 %v7378_v30  ;;  %v7390_v17 = vpack.c.bf16 %v3201_v11, %v3200_v27 }
 0xcb3   :  { %7387 = vmatprep.subr.bf16.mxu1 %v7386_v57 }
 0xcb4   :  { %6645 = vmatprep.mubr.f32.mxu1 %v9192_v33  ;;  %7389 = vmatpush3.bf16.msra.mxu1 %v7386_v57 }
 0xcb5   :  { %6646 = vmatmul.mubr.f32.gmra.mrb[78].mxu1 %v9195_v59  ;;  %7391 = vmatprep.subr.bf16.mxu1 %v7390_v17 }
 0xcb8   :  { %7393 = vmatpush3.bf16.msra.mxu1 %v7390_v17 }
 0xcb9   :  { %7395 = vmatprep.subr.bf16.mxu1 %v7394_v24 }
 0xcbc   :  { %7397 = vmatpush3.bf16.msra.mxu1 %v7394_v24 }
 0xcbd   :  { %7399 = vmatprep.subr.bf16.mxu1 %v7398_v8 }
 0xcc0   :  { %7401 = vmatpush3.bf16.msra.mxu1 %v7398_v8 }
 0xcc1   :  { %7403 = vmatprep.subr.bf16.mxu1 %v7402_v37 }
 0xcc4   :  { %7405 = vmatpush3.bf16.msra.mxu1 %v7402_v37 }
 0xd6c   :  { %v6626_v42 = vpop.f32.mrb[64].mxu1 }
 0xd6d   :  { %v2909_v14 = vadd.f32 %v6626_v42, %v5467_v7  ;;  %v2903_v40 = vpop.f32.mrb[65].mxu1 }
 0xd6e   :  { %v2904_v26 = vadd.f32 %v5467_v7, %v2903_v40 }
 0xd6f   :  { %v2983_v61 = vmax.f32 %v2909_v14, 0.0 }
 0xd70   :  { %v2982_v30 = vmax.f32 %v2904_v26, 0.0  ;;  %v6629_v56 = vpop.f32.mrb[66].mxu1 }
 0xd71   :  { %v2919_v16 = vadd.f32 %v6629_v56, %v5467_v7  ;;  %v2913_v12 = vpop.f32.mrb[67].mxu1 }
 0xd72   :  { %v2914_v32 = vadd.f32 %v5467_v7, %v2913_v12  ;;  %6680 = vmatprep.mubr.f32.mxu0 %v2982_v30 }
 0xd73   :  { %6681 = vmatmul.mubr.f32.vlgmr.msra.gmra.mrb[96].mxu0 %v2983_v61  ;;  %v2985_v11 = vmax.f32 %v2919_v16, 0.0 }
 0xd74   :  { %v2984_v57 = vmax.f32 %v2914_v32, 0.0  ;;  %v6632_v27 = vpop.f32.mrb[68].mxu1 }
 0xd75   :  { %v2929_v17 = vadd.f32 %v6632_v27, %v5467_v7  ;;  %v2923_v13 = vpop.f32.mrb[69].mxu1 }
 0xd76   :  { %v2924_v18 = vadd.f32 %v5467_v7, %v2923_v13  ;;  %6683 = vmatprep.mubr.f32.mxu0 %v2984_v57 }
 0xd77   :  { %6684 = vmatmul.mubr.f32.gmra.mrb[98].mxu0 %v2985_v11  ;;  %v2987_v22 = vmax.f32 %v2929_v17, 0.0 }
 0xd78   :  { %v2986_v24 = vmax.f32 %v2924_v18, 0.0  ;;  %v6635_v6 = vpop.f32.mrb[70].mxu1 }
 0xd79   :  { %v2939_v8 = vadd.f32 %v6635_v6, %v5467_v7  ;;  %v2933_v31 = vpop.f32.mrb[71].mxu1 }
 0xd7a   :  { %v2934_v54 = vadd.f32 %v5467_v7, %v2933_v31  ;;  %6686 = vmatprep.mubr.f32.mxu0 %v2986_v24 }
 0xd7b   :  { %6687 = vmatmul.mubr.f32.gmra.mrb[100].mxu0 %v2987_v22  ;;  %v2989_v14 = vmax.f32 %v2939_v8, 0.0 }
 0xd7c   :  { %v2988_v37 = vmax.f32 %v2934_v54, 0.0  ;;  %v6638_v42 = vpop.f32.mrb[72].mxu1 }
 0xd7d   :  { %v2949_v40 = vadd.f32 %v6638_v42, %v5467_v7  ;;  %v2943_v26 = vpop.f32.mrb[73].mxu1 }
 0xd7e   :  { %v2944_v30 = vadd.f32 %v5467_v7, %v2943_v26  ;;  %6689 = vmatprep.mubr.f32.mxu0 %v2988_v37  ;;  %v3209_v26 = vld [vmem:[#allocation2 + $0x668] sm:$0xff] }
 0xd7f   :  { %6690 = vmatmul.mubr.f32.gmra.mrb[102].mxu0 %v2989_v14  ;;  %v2991_v16 = vmax.f32 %v2949_v40, 0.0  ;;  %v3208_v40 = vld [vmem:[#allocation2 + $0x660] sm:$0xff] }
 0xd80   :  { %v2990_v56 = vmax.f32 %v2944_v30, 0.0  ;;  %v6641_v61 = vpop.f32.mrb[74].mxu1  ;;  %v7406_v30 = vpack.c.bf16 %v3209_v26, %v3208_v40  ;;  %v9199_v40 = vld [vmem:[#allocation4 + $0x9] ss:$0 sm:$0xff] }
 0xd81   :  { %v2959_v12 = vadd.f32 %v6641_v61, %v5467_v7  ;;  %v2953_v32 = vpop.f32.mrb[75].mxu1  ;;  %v3211_v61 = vld [vmem:[#allocation2 + $0x678] sm:$0xff] }
 0xd82   :  { %v2954_v57 = vadd.f32 %v5467_v7, %v2953_v32  ;;  %6692 = vmatprep.mubr.f32.mxu0 %v2990_v56  ;;  %7407 = vmatprep.subr.bf16.mxu1 %v7406_v30  ;;  %v3210_v56 = vld [vmem:[#allocation2 + $0x670] sm:$0xff]  ;;  %v3427_v32 = vld [vmem:[#allocation2 + $0x688] sm:$0xff] }
 0xd83   :  { %6693 = vmatmul.mubr.f32.gmra.mrb[104].mxu0 %v2991_v16  ;;  %v2993_v17 = vmax.f32 %v2959_v12, 0.0  ;;  %7409 = vmatpush3.bf16.msra.mxu1 %v7406_v30  ;;  %v7410_v16 = vpack.c.bf16 %v3211_v61, %v3210_v56  ;;  %v3426_v12 = vld [vmem:[#allocation2 + $0x680] sm:$0xff] }
 0xd84   :  { %v2992_v27 = vmax.f32 %v2954_v57, 0.0  ;;  %v6644_v11 = vpop.f32.mrb[76].mxu1  ;;  %v3428_v57 = vld [vmem:[#allocation2 + $0x690] sm:$0xff] }
 0xd85   :  { %v2969_v13 = vadd.f32 %v6644_v11, %v5467_v7  ;;  %v2963_v18 = vpop.f32.mrb[77].mxu1  ;;  %7411 = vmatprep.subr.bf16.mxu1 %v7410_v16 }
 0xd86   :  { %v2964_v24 = vadd.f32 %v5467_v7, %v2963_v18  ;;  %6695 = vmatprep.mubr.f32.mxu0 %v2992_v27  ;;  %v3429_v27 = vld [vmem:[#allocation2 + $0x698] sm:$0xff] }
 0xd87   :  { %6696 = vmatmul.mubr.f32.gmra.mrb[106].mxu0 %v2993_v17  ;;  %v2995_v8 = vmax.f32 %v2969_v13, 0.0  ;;  %7413 = vmatpush3.bf16.msra.mxu1 %v7410_v16  ;;  %v7418_v11 = vpack.c.bf16 %v3429_v27, %v3428_v57  ;;  %v3430_v17 = vld [vmem:[#allocation2 + $0x6a0] sm:$0xff]  ;;  %v3431_v13 = vld [vmem:[#allocation2 + $0x6a8] sm:$0xff] }
 0xd88   :  { %v2994_v6 = vmax.f32 %v2964_v24, 0.0  ;;  %v6647_v22 = vpop.f32.mrb[78].mxu1  ;;  %v7422_v18 = vpack.c.bf16 %v3431_v13, %v3430_v17  ;;  %v3432_v24 = vld [vmem:[#allocation2 + $0x6b0] sm:$0xff] }
 0xd89   :  { %v2979_v31 = vadd.f32 %v6647_v22, %v5467_v7  ;;  %v2973_v54 = vpop.f32.mrb[79].mxu1 }
 0xd8a   :  { %v2974_v37 = vadd.f32 %v5467_v7, %v2973_v54  ;;  %6698 = vmatprep.mubr.f32.mxu0 %v2994_v6  ;;  %v7414_v7 = vpack.c.bf16 %v3427_v32, %v3426_v12  ;;  %v3433_v6 = vld [vmem:[#allocation2 + $0x6b8] sm:$0xff] }
 0xd8b   :  { %6699 = vmatmul.mubr.f32.gmra.mrb[108].mxu0 %v2995_v8  ;;  %v2997_v14 = vmax.f32 %v2979_v31, 0.0  ;;  %v7426_v22 = vpack.c.bf16 %v3433_v6, %v3432_v24  ;;  %v3434_v8 = vld [vmem:[#allocation2 + $0x6c0] sm:$0xff]  ;;  %v3435_v31 = vld [vmem:[#allocation2 + $0x6c8] sm:$0xff] }
 0xd8c   :  { %v2996_v42 = vmax.f32 %v2974_v37, 0.0  ;;  %7415 = vmatprep.subr.bf16.mxu0 %v7414_v7  ;;  %v7430_v54 = vpack.c.bf16 %v3435_v31, %v3434_v8  ;;  %v3436_v37 = vld [vmem:[#allocation2 + $0x6d0] sm:$0xff] }
 0xd8d   :  { %7417 = vmatpush3.bf16.msra.mxu0 %v7414_v7 }
 0xd8e   :  { %6701 = vmatprep.mubr.f32.mxu0 %v2996_v42  ;;  %7419 = vmatprep.subr.bf16.mxu0 %v7418_v11  ;;  %v3437_v42 = vld [vmem:[#allocation2 + $0x6d8] sm:$0xff] }
 0xd8f   :  { %6702 = vmatmul.mubr.f32.gmra.mrb[110].mxu0 %v2997_v14  ;;  %v7434_v14 = vpack.c.bf16 %v3437_v42, %v3436_v37 }
 0xd91   :  { %7421 = vmatpush3.bf16.msra.mxu0 %v7418_v11 }
 0xd92   :  { %7423 = vmatprep.subr.bf16.mxu0 %v7422_v18 }
 0xd95   :  { %7425 = vmatpush3.bf16.msra.mxu0 %v7422_v18 }
 0xd96   :  { %7427 = vmatprep.subr.bf16.mxu0 %v7426_v22 }
 0xd99   :  { %7429 = vmatpush3.bf16.msra.mxu0 %v7426_v22 }
 0xd9a   :  { %7431 = vmatprep.subr.bf16.mxu0 %v7430_v54 }
 0xd9d   :  { %7433 = vmatpush3.bf16.msra.mxu0 %v7430_v54 }
 0xd9e   :  { %7435 = vmatprep.subr.bf16.mxu0 %v7434_v14 }
 0xda1   :  { %7437 = vmatpush3.bf16.msra.mxu0 %v7434_v14 }
 0xe46   :  { %v6682_v26 = vpop.f32.mrb[96].mxu0 }
 0xe47   :  { %v3091_v30 = vadd.f32 %v6682_v26, %v9199_v40  ;;  %v3085_v56 = vpop.f32.mrb[97].mxu0 }
 0xe48   :  { %v3086_v61 = vadd.f32 %v9199_v40, %v3085_v56 }
 0xe49   :  { %v3165_v16 = vadd.f32 %v3091_v30, %v9113_v5 }
 0xe4a   :  { %v3164_v12 = vadd.f32 %v3086_v61, %v9109_v47  ;;  %v6685_v32 = vpop.f32.mrb[98].mxu0 }
 0xe4b   :  { %v3101_v57 = vadd.f32 %v6685_v32, %v9199_v40  ;;  %v3095_v7 = vpop.f32.mrb[99].mxu0  ;;  %v3181_v17 = vadd.f32 %v3165_v16, %v8940_v23 }
 0xe4c   :  { %v3096_v27 = vadd.f32 %v9199_v40, %v3095_v7  ;;  %v3180_v11 = vadd.f32 %v3164_v12, %v8943_v0 }
 0xe4d   :  { %v3167_v13 = vadd.f32 %v3101_v57, %v9125_v21 }
 0xe4e   :  { %v3166_v18 = vadd.f32 %v3096_v27, %v9121_v52  ;;  %v6688_v24 = vpop.f32.mrb[100].mxu0  ;;  %6736 = vmatprep.mubr.f32.mxu1 %v3180_v11 }
 0xe4f   :  { %v3111_v5 = vadd.f32 %v6688_v24, %v9199_v40  ;;  %v3105_v6 = vpop.f32.mrb[101].mxu0  ;;  %6737 = vmatmul.mubr.f32.vlgmr.msra.gmra.mrb[80].mxu1 %v3181_v17  ;;  %v3183_v0 = vadd.f32 %v3167_v13, %v8948_v51 }
 0xe50   :  { %v3106_v47 = vadd.f32 %v9199_v40, %v3105_v6  ;;  %v3182_v22 = vadd.f32 %v3166_v18, %v8951_v49  ;;  %v3439_v6 = vld [vmem:[#allocation2 + $0x6e8] sm:$0xff] }
 0xe51   :  { %v3169_v8 = vadd.f32 %v3111_v5, %v9137_v55  ;;  %v3438_v5 = vld [vmem:[#allocation2 + $0x6e0] sm:$0xff] }
 0xe52   :  { %v3168_v23 = vadd.f32 %v3106_v47, %v9133_v1  ;;  %v6691_v31 = vpop.f32.mrb[102].mxu0  ;;  %6739 = vmatprep.mubr.f32.mxu1 %v3182_v22  ;;  %v7438_v47 = vpack.c.bf16 %v3439_v6, %v3438_v5  ;;  %v3658_v22 = vld [vmem:[#allocation2 + $0x710] sm:$0xff] }
 0xe53   :  { %v3121_v52 = vadd.f32 %v6691_v31, %v9199_v40  ;;  %v3115_v21 = vpop.f32.mrb[103].mxu0  ;;  %6740 = vmatmul.mubr.f32.gmra.mrb[82].mxu1 %v3183_v0  ;;  %v3185_v49 = vadd.f32 %v3169_v8, %v8956_v3  ;;  %v3659_v0 = vld [vmem:[#allocation2 + $0x718] sm:$0xff] }
 0xe54   :  { %v3116_v54 = vadd.f32 %v9199_v40, %v3115_v21  ;;  %v3184_v37 = vadd.f32 %v3168_v23, %v8959_v62  ;;  %7439 = vmatprep.subr.bf16.mxu0 %v7438_v47  ;;  %v3660_v23 = vld [vmem:[#allocation2 + $0x720] sm:$0xff]  ;;  %v3663_v21 = vld [vmem:[#allocation2 + $0x738] sm:$0xff] }
 0xe55   :  { %v3171_v42 = vadd.f32 %v3121_v52, %v9149_v45  ;;  %7441 = vmatpush3.bf16.msra.mxu0 %v7438_v47  ;;  %v3662_v52 = vld [vmem:[#allocation2 + $0x730] sm:$0xff] }
 0xe56   :  { %v3170_v55 = vadd.f32 %v3116_v54, %v9145_v2  ;;  %v6694_v14 = vpop.f32.mrb[104].mxu0  ;;  %6742 = vmatprep.mubr.f32.mxu1 %v3184_v37  ;;  %v7458_v54 = vpack.c.bf16 %v3663_v21, %v3662_v52  ;;  %v3664_v37 = vld [vmem:[#allocation2 + $0x740] sm:$0xff]  ;;  %v10539_v21 = vld [vmem:[#allocation42_spill] sm:$0xff] }
 0xe57   :  { %v3131_v51 = vadd.f32 %v6694_v14, %v9199_v40  ;;  %v3125_v1 = vpop.f32.mrb[105].mxu0  ;;  %6743 = vmatmul.mubr.f32.gmra.mrb[84].mxu1 %v3185_v49  ;;  %v3187_v62 = vadd.f32 %v3171_v42, %v8964_v60  ;;  %v3665_v42 = vld [vmem:[#allocation2 + $0x748] sm:$0xff]  ;;  %v3667_v14 = vld [vmem:[#allocation2 + $0x758] sm:$0xff] }
 0xe58   :  { %v3126_v26 = vadd.f32 %v9199_v40, %v3125_v1  ;;  %v3186_v30 = vadd.f32 %v3170_v55, %v8967_v44  ;;  %v7462_v49 = vpack.c.bf16 %v3665_v42, %v3664_v37  ;;  %v3666_v55 = vld [vmem:[#allocation2 + $0x750] sm:$0xff]  ;;  %v9249_v1 = vld [vmem:[#allocation4 + $0xf] ss:$0 sm:$0xff]  ;;  %v10540_v42 = vld [vmem:[#allocation43_spill] sm:$0xff] }
 0xe59   :  { %v3173_v56 = vadd.f32 %v3131_v51, %v9161_v41  ;;  %v7466_v51 = vpack.c.bf16 %v3667_v14, %v3666_v55 }
 0xe5a   :  { %v3172_v45 = vadd.f32 %v3126_v26, %v9157_v50  ;;  %v6697_v61 = vpop.f32.mrb[106].mxu0  ;;  %6745 = vmatprep.mubr.f32.mxu1 %v3186_v30 }
 0xe5b   :  { %v3141_v3 = vadd.f32 %v6697_v61, %v9199_v40  ;;  %v3135_v2 = vpop.f32.mrb[107].mxu0  ;;  %6746 = vmatmul.mubr.f32.gmra.mrb[86].mxu1 %v3187_v62  ;;  %v3189_v44 = vadd.f32 %v3173_v56, %v8972_v28 }
 0xe5c   :  { %v3136_v16 = vadd.f32 %v9199_v40, %v3135_v2  ;;  %v3188_v12 = vadd.f32 %v3172_v45, %v8975_v43 }
 0xe5d   :  { %v3175_v32 = vadd.f32 %v3141_v3, %v9173_v20 }
 0xe5e   :  { %v3174_v41 = vadd.f32 %v3136_v16, %v9169_v10  ;;  %v6700_v57 = vpop.f32.mrb[108].mxu0  ;;  %6748 = vmatprep.mubr.f32.mxu1 %v3188_v12 }
 0xe5f   :  { %v3151_v60 = vadd.f32 %v6700_v57, %v9199_v40  ;;  %v3145_v50 = vpop.f32.mrb[109].mxu0  ;;  %6749 = vmatmul.mubr.f32.gmra.mrb[88].mxu1 %v3189_v44  ;;  %v3191_v43 = vadd.f32 %v3175_v32, %v8980_v48 }
 0xe60   :  { %v3146_v7 = vadd.f32 %v9199_v40, %v3145_v50  ;;  %v3190_v27 = vadd.f32 %v3174_v41, %v8983_v34 }
 0xe61   :  { %v3177_v11 = vadd.f32 %v3151_v60, %v9185_v29 }
 0xe62   :  { %v3176_v20 = vadd.f32 %v3146_v7, %v9181_v63  ;;  %v6703_v17 = vpop.f32.mrb[110].mxu0  ;;  %6751 = vmatprep.mubr.f32.mxu1 %v3190_v27 }
 0xe63   :  { %v3161_v28 = vadd.f32 %v6703_v17, %v9199_v40  ;;  %v3155_v10 = vpop.f32.mrb[111].mxu0  ;;  %6752 = vmatmul.mubr.f32.gmra.mrb[90].mxu1 %v3191_v43  ;;  %v3193_v34 = vadd.f32 %v3177_v11, %v8988_v38  ;;  %v3656_v38 = vld [vmem:[#allocation2 + $0x700] sm:$0xff] }
 0xe64   :  { %v3156_v13 = vadd.f32 %v9199_v40, %v3155_v10  ;;  %v3192_v18 = vadd.f32 %v3176_v20, %v8991_v46  ;;  %v3440_v46 = vld [vmem:[#allocation2 + $0x6f0] sm:$0xff]  ;;  %v3441_v40 = vld [vmem:[#allocation2 + $0x6f8] sm:$0xff] }
 0xe65   :  { %v3179_v24 = vadd.f32 %v3161_v28, %v9195_v59  ;;  %v7442_v59 = vpack.c.bf16 %v3441_v40, %v3440_v46 }
 0xe66   :  { %v3178_v29 = vadd.f32 %v3156_v13, %v9192_v33  ;;  %6754 = vmatprep.mubr.f32.mxu1 %v3192_v18  ;;  %v3657_v33 = vld [vmem:[#allocation2 + $0x708] sm:$0xff] }
 0xe67   :  { %6755 = vmatmul.mubr.f32.gmra.mrb[92].mxu1 %v3193_v34  ;;  %v3195_v63 = vadd.f32 %v3179_v24, %v8996_v35  ;;  %7443 = vmatprep.subr.bf16.mxu0 %v7442_v59  ;;  %v7446_v8 = vpack.c.bf16 %v3657_v33, %v3656_v38  ;;  %v3661_v35 = vld [vmem:[#allocation2 + $0x728] sm:$0xff] }
 0xe68   :  { %v3194_v48 = vadd.f32 %v3178_v29, %v8999_v25  ;;  %7445 = vmatpush3.bf16.msra.mxu0 %v7442_v59  ;;  %v7450_v25 = vpack.c.bf16 %v3659_v0, %v3658_v22  ;;  %v7454_v31 = vpack.c.bf16 %v3661_v35, %v3660_v23 }
 0xe69   :  { %7447 = vmatprep.subr.bf16.mxu1 %v7446_v8 }
 0xe6a   :  { %6757 = vmatprep.mubr.f32.mxu1 %v3194_v48  ;;  %7449 = vmatpush3.bf16.msra.mxu1 %v7446_v8 }
 0xe6b   :  { %6758 = vmatmul.mubr.f32.gmra.mrb[94].mxu1 %v3195_v63  ;;  %7451 = vmatprep.subr.bf16.mxu1 %v7450_v25 }
 0xe6e   :  { %7453 = vmatpush3.bf16.msra.mxu1 %v7450_v25 }
 0xe6f   :  { %7455 = vmatprep.subr.bf16.mxu1 %v7454_v31 }
 0xe72   :  { %7457 = vmatpush3.bf16.msra.mxu1 %v7454_v31 }
 0xe73   :  { %7459 = vmatprep.subr.bf16.mxu1 %v7458_v54 }
 0xe76   :  { %7461 = vmatpush3.bf16.msra.mxu1 %v7458_v54 }
 0xe77   :  { %7463 = vmatprep.subr.bf16.mxu1 %v7462_v49 }
 0xe7a   :  { %7465 = vmatpush3.bf16.msra.mxu1 %v7462_v49 }
 0xe7b   :  { %7467 = vmatprep.subr.bf16.mxu1 %v7466_v51 }
 0xe7e   :  { %7469 = vmatpush3.bf16.msra.mxu1 %v7466_v51 }
 0xf22   :  { %v6738_v26 = vpop.f32.mrb[80].mxu1 }
 0xf23   :  { %v3289_v30 = vadd.f32 %v6738_v26, %v9249_v1  ;;  %v3283_v56 = vpop.f32.mrb[81].mxu1 }
 0xf24   :  { %v3284_v62 = vadd.f32 %v9249_v1, %v3283_v56  ;;  %v10541_v56 = vld [vmem:[#allocation44_spill] sm:$0xff] }
 0xf25   :  { %vm3363_vm2 = vcmp.gt.f32.partialorder %v3289_v30, 0.0  ;;  %v3379_v45 = vmul.f32 0.01, %v3289_v30 }
 0xf26   :  { %vm3362_vm3 = vcmp.gt.f32.partialorder %v3284_v62, 0.0  ;;  %v3378_v61 = vmul.f32 0.01, %v3284_v62  ;;  %v6741_v3 = vpop.f32.mrb[82].mxu1 }
 0xf27   :  { %v3395_v2 = vsel %vm3363_vm2, %v3289_v30, %v3379_v45  ;;  %v3299_v16 = vadd.f32 %v6741_v3, %v9249_v1  ;;  %v3293_v12 = vpop.f32.mrb[83].mxu1  ;;  %v10542_v3 = vld [vmem:[#allocation45_spill] sm:$0xff] }
 0xf28   :  { %v3294_v32 = vadd.f32 %v9249_v1, %v3293_v12  ;;  %v3394_v44 = vsel %vm3362_vm3, %v3284_v62, %v3378_v61  ;;  %v3411_v60 = vadd.f32 %v3395_v2, %v8412_v9 }
 0xf29   :  { %vm3365_vm4 = vcmp.gt.f32.partialorder %v3299_v16, 0.0  ;;  %v3381_v41 = vmul.f32 0.01, %v3299_v16  ;;  %v3410_v57 = vadd.f32 %v3394_v44, %v8410_v4 }
 0xf2a   :  { %vm3364_vm5 = vcmp.gt.f32.partialorder %v3294_v32, 0.0  ;;  %v3380_v50 = vmul.f32 0.01, %v3294_v32  ;;  %v6744_v7 = vpop.f32.mrb[84].mxu1 }
 0xf2b   :  { %v3309_v27 = vadd.f32 %v6744_v7, %v9249_v1  ;;  %v3303_v11 = vpop.f32.mrb[85].mxu1  ;;  %6792 = vmatprep.mubr.f32.mxu0 %v3410_v57  ;;  %v3397_v43 = vsel %vm3365_vm4, %v3299_v16, %v3381_v41 }
 0xf2c   :  { %v3304_v20 = vadd.f32 %v9249_v1, %v3303_v11  ;;  %6793 = vmatmul.mubr.f32.vlgmr.msra.gmra.mrb[112].mxu0 %v3411_v60  ;;  %v3396_v17 = vsel %vm3364_vm5, %v3294_v32, %v3380_v50  ;;  %v3413_v9 = vadd.f32 %v3397_v43, %v8423_v36  ;;  %v10543_v60 = vld [vmem:[#allocation46_spill] sm:$0xff] }
 0xf2d   :  { %vm3367_vm6 = vcmp.gt.f32.partialorder %v3309_v27, 0.0  ;;  %v3383_v28 = vmul.f32 0.01, %v3309_v27  ;;  %v3412_v10 = vadd.f32 %v3396_v17, %v8419_v39  ;;  %v10545_v17 = vld [vmem:[#allocation48_spill] sm:$0xff] }
 0xf2e   :  { %vm3366_vm7 = vcmp.gt.f32.partialorder %v3304_v20, 0.0  ;;  %v3382_v4 = vmul.f32 0.01, %v3304_v20  ;;  %v6747_v13 = vpop.f32.mrb[86].mxu1 }
 0xf2f   :  { %v3319_v18 = vadd.f32 %v6747_v13, %v9249_v1  ;;  %v3313_v24 = vpop.f32.mrb[87].mxu1  ;;  %6795 = vmatprep.mubr.f32.mxu0 %v3412_v10  ;;  %v3399_v34 = vsel %vm3367_vm6, %v3309_v27, %v3383_v28  ;;  %v10544_v27 = vld [vmem:[#allocation47_spill] sm:$0xff]  ;;  %v10546_v10 = vld [vmem:[#allocation49_spill] sm:$0xff] }
 0xf30   :  { %v3314_v29 = vadd.f32 %v9249_v1, %v3313_v24  ;;  %6796 = vmatmul.mubr.f32.gmra.mrb[114].mxu0 %v3413_v9  ;;  %v3398_v48 = vsel %vm3366_vm7, %v3304_v20, %v3382_v4  ;;  %v3415_v47 = vadd.f32 %v3399_v34, %v8431_v58  ;;  %v3669_v13 = vld [vmem:[#allocation2 + $0x768] sm:$0xff]  ;;  %v3671_v24 = vld [vmem:[#allocation2 + $0x778] sm:$0xff] }
 0xf31   :  { %vm3369_vm8 = vcmp.gt.f32.partialorder %v3319_v18, 0.0  ;;  %v3385_v63 = vmul.f32 0.01, %v3319_v18  ;;  %v3414_v5 = vadd.f32 %v3398_v48, %v8428_v53 }
 0xf32   :  { %vm3368_vm9 = vcmp.gt.f32.partialorder %v3314_v29, 0.0  ;;  %v3384_v39 = vmul.f32 0.01, %v3314_v29  ;;  %v6750_v6 = vpop.f32.mrb[88].mxu1 }
 0xf33   :  { %v3329_v36 = vadd.f32 %v6750_v6, %v9249_v1  ;;  %v3323_v46 = vpop.f32.mrb[89].mxu1  ;;  %6798 = vmatprep.mubr.f32.mxu0 %v3414_v5  ;;  %v3401_v40 = vsel %vm3369_vm8, %v3319_v18, %v3385_v63  ;;  %v3670_v18 = vld [vmem:[#allocation2 + $0x770] sm:$0xff] }
 0xf34   :  { %v3324_v59 = vadd.f32 %v9249_v1, %v3323_v46  ;;  %6799 = vmatmul.mubr.f32.gmra.mrb[116].mxu0 %v3415_v47  ;;  %v3400_v38 = vsel %vm3368_vm9, %v3314_v29, %v3384_v39  ;;  %v3417_v0 = vadd.f32 %v3401_v40, %v8439_v19  ;;  %v7474_v34 = vpack.c.bf16 %v3671_v24, %v3670_v18  ;;  %v9283_v29 = vld [vmem:[#allocation4 + $0x10] ss:$0 sm:$0xff] }
 0xf35   :  { %vm3371_vm10 = vcmp.gt.f32.partialorder %v3329_v36, 0.0  ;;  %v3387_v33 = vmul.f32 0.01, %v3329_v36  ;;  %v3416_v22 = vadd.f32 %v3400_v38, %v8436_v15  ;;  %v10555_v24 = vld [vmem:[#allocation34_spill] sm:$0xff] }
 0xf36   :  { %vm3370_vm11 = vcmp.gt.f32.partialorder %v3324_v59, 0.0  ;;  %v3386_v53 = vmul.f32 0.01, %v3324_v59  ;;  %v6753_v8 = vpop.f32.mrb[90].mxu1 }
 0xf37   :  { %v3339_v58 = vadd.f32 %v6753_v8, %v9249_v1  ;;  %v3333_v25 = vpop.f32.mrb[91].mxu1  ;;  %6801 = vmatprep.mubr.f32.mxu0 %v3416_v22  ;;  %v3403_v23 = vsel %vm3371_vm10, %v3329_v36, %v3387_v33 }
 0xf38   :  { %v3334_v35 = vadd.f32 %v9249_v1, %v3333_v25  ;;  %6802 = vmatmul.mubr.f32.gmra.mrb[118].mxu0 %v3417_v0  ;;  %v3402_v31 = vsel %vm3370_vm11, %v3324_v59, %v3386_v53  ;;  %v3419_v49 = vadd.f32 %v3403_v23, %v10540_v42  ;;  %v10547_v53 = vld [vmem:[#allocation26_spill] sm:$0xff]  ;;  %v10548_v0 = vld [vmem:[#allocation27_spill] sm:$0xff] }
 0xf39   :  { %vm3373_vm12 = vcmp.gt.f32.partialorder %v3339_v58, 0.0  ;;  %v3389_v52 = vmul.f32 0.01, %v3339_v58  ;;  %v3418_v54 = vadd.f32 %v3402_v31, %v10539_v21 }
 0xf3a   :  { %vm3372_vm13 = vcmp.gt.f32.partialorder %v3334_v35, 0.0  ;;  %v3388_v15 = vmul.f32 0.01, %v3334_v35  ;;  %v6756_v37 = vpop.f32.mrb[92].mxu1 }
 0xf3b   :  { %v3349_v19 = vadd.f32 %v6756_v37, %v9249_v1  ;;  %v3343_v55 = vpop.f32.mrb[93].mxu1  ;;  %6804 = vmatprep.mubr.f32.mxu0 %v3418_v54  ;;  %v3405_v14 = vsel %vm3373_vm12, %v3339_v58, %v3389_v52  ;;  %v10549_v37 = vld [vmem:[#allocation28_spill] sm:$0xff] }
 0xf3c   :  { %v3344_v51 = vadd.f32 %v9249_v1, %v3343_v55  ;;  %6805 = vmatmul.mubr.f32.gmra.mrb[120].mxu0 %v3419_v49  ;;  %v3404_v26 = vsel %vm3372_vm13, %v3334_v35, %v3388_v15  ;;  %v3421_v2 = vadd.f32 %v3405_v14, %v10542_v3  ;;  %v10550_v55 = vld [vmem:[#allocation29_spill] sm:$0xff] }
 0xf3d   :  { %vm3375_vm14 = vcmp.gt.f32.partialorder %v3349_v19, 0.0  ;;  %v3391_v30 = vmul.f32 0.01, %v3349_v19  ;;  %v3420_v62 = vadd.f32 %v3404_v26, %v10541_v56 }
 0xf3e   :  { %vm3374_vm15 = vcmp.gt.f32.partialorder %v3344_v51, 0.0  ;;  %v3390_v45 = vmul.f32 0.01, %v3344_v51  ;;  %v6759_v61 = vpop.f32.mrb[94].mxu1 }
 0xf3f   :  { %v3359_v16 = vadd.f32 %v6759_v61, %v9249_v1  ;;  %v3353_v12 = vpop.f32.mrb[95].mxu1  ;;  %6807 = vmatprep.mubr.f32.mxu0 %v3420_v62  ;;  %v3407_v32 = vsel %vm3375_vm14, %v3349_v19, %v3391_v30  ;;  %v10551_v61 = vld [vmem:[#allocation30_spill] sm:$0xff] }
 0xf40   :  { %v3354_v44 = vadd.f32 %v9249_v1, %v3353_v12  ;;  %6808 = vmatmul.mubr.f32.gmra.mrb[122].mxu0 %v3421_v2  ;;  %v3406_v41 = vsel %vm3374_vm15, %v3344_v51, %v3390_v45  ;;  %v3423_v11 = vadd.f32 %v3407_v32, %v10544_v27  ;;  %v3668_v1 = vld [vmem:[#allocation2 + $0x760] sm:$0xff]  ;;  %v10552_v12 = vld [vmem:[#allocation31_spill] sm:$0xff] }
 0xf41   :  { %vm3377_vm0 = vcmp.gt.f32.partialorder %v3359_v16, 0.0  ;;  %v3393_v57 = vmul.f32 0.01, %v3359_v16  ;;  %v3422_v50 = vadd.f32 %v3406_v41, %v10543_v60  ;;  %v7470_v9 = vpack.c.bf16 %v3669_v13, %v3668_v1  ;;  %v10553_v27 = vld [vmem:[#allocation32_spill] sm:$0xff] }
 0xf42   :  { %vm3376_vm1 = vcmp.gt.f32.partialorder %v3354_v44, 0.0  ;;  %v3392_v7 = vmul.f32 0.01, %v3354_v44 }
 0xf43   :  { %6810 = vmatprep.mubr.f32.mxu0 %v3422_v50  ;;  %v3409_v43 = vsel %vm3377_vm0, %v3359_v16, %v3393_v57  ;;  %7471 = vmatprep.subr.bf16.mxu1 %v7470_v9 }
 0xf44   :  { %6811 = vmatmul.mubr.f32.gmra.mrb[124].mxu0 %v3423_v11  ;;  %v3408_v20 = vsel %vm3376_vm1, %v3354_v44, %v3392_v7  ;;  %v3425_v4 = vadd.f32 %v3409_v43, %v10546_v10  ;;  %7473 = vmatpush3.bf16.msra.mxu1 %v7470_v9 }
 0xf45   :  { %v3424_v28 = vadd.f32 %v3408_v20, %v10545_v17  ;;  %7475 = vmatprep.subr.bf16.mxu1 %v7474_v34  ;;  %v10554_v17 = vld [vmem:[#allocation33_spill] sm:$0xff] }
 0xf47   :  { %6813 = vmatprep.mubr.f32.mxu0 %v3424_v28 }
 0xf48   :  { %6814 = vmatmul.mubr.f32.gmra.mrb[126].mxu0 %v3425_v4  ;;  %7477 = vmatpush3.bf16.msra.mxu1 %v7474_v34 }
 0xfff   :  { %v6794_v48 = vpop.f32.mrb[112].mxu0 }
0x1000   :  { %v3519_v63 = vadd.f32 %v6794_v48, %v9283_v29  ;;  %v3513_v5 = vpop.f32.mrb[113].mxu0 }
0x1001   :  { %v3514_v39 = vadd.f32 %v9283_v29, %v3513_v5  ;;  %v10556_v5 = vld [vmem:[#allocation35_spill] sm:$0xff] }
0x1002   :  { %vm3593_vm2 = vcmp.gt.f32.partialorder %v3519_v63, 0.0  ;;  %v3609_v6 = vmul.f32 0.01, %v3519_v63 }
0x1003   :  { %vm3592_vm3 = vcmp.gt.f32.partialorder %v3514_v39, 0.0  ;;  %v3608_v47 = vmul.f32 0.01, %v3514_v39  ;;  %v6797_v36 = vpop.f32.mrb[114].mxu0 }
0x1004   :  { %v3625_v46 = vsel %vm3593_vm2, %v3519_v63, %v3609_v6  ;;  %v3529_v40 = vadd.f32 %v6797_v36, %v9283_v29  ;;  %v3523_v59 = vpop.f32.mrb[115].mxu0 }
0x1005   :  { %v3524_v38 = vadd.f32 %v9283_v29, %v3523_v59  ;;  %v3624_v33 = vsel %vm3592_vm3, %v3514_v39, %v3608_v47  ;;  %v3641_v58 = vadd.f32 %v3625_v46, %v10548_v0 }
0x1006   :  { %vm3595_vm4 = vcmp.gt.f32.partialorder %v3529_v40, 0.0  ;;  %v3611_v22 = vmul.f32 0.01, %v3529_v40  ;;  %v3640_v8 = vadd.f32 %v3624_v33, %v10547_v53 }
0x1007   :  { %vm3594_vm5 = vcmp.gt.f32.partialorder %v3524_v38, 0.0  ;;  %v3610_v25 = vmul.f32 0.01, %v3524_v38  ;;  %v6800_v23 = vpop.f32.mrb[116].mxu0 }
0x1008   :  { %v3539_v35 = vadd.f32 %v6800_v23, %v9283_v29  ;;  %v3533_v31 = vpop.f32.mrb[117].mxu0  ;;  %6848 = vmatprep.mubr.f32.mxu1 %v3640_v8  ;;  %v3627_v52 = vsel %vm3595_vm4, %v3529_v40, %v3611_v22  ;;  %v10558_v8 = vld [vmem:[#allocation37_spill] sm:$0xff] }
0x1009   :  { %v3534_v21 = vadd.f32 %v9283_v29, %v3533_v31  ;;  %6849 = vmatmul.mubr.f32.vlgmr.msra.gmra.mrb[96].mxu1 %v3641_v58  ;;  %v3626_v54 = vsel %vm3594_vm5, %v3524_v38, %v3610_v25  ;;  %v3643_v14 = vadd.f32 %v3627_v52, %v10550_v55  ;;  %v10557_v38 = vld [vmem:[#allocation36_spill] sm:$0xff] }
0x100a   :  { %vm3597_vm6 = vcmp.gt.f32.partialorder %v3539_v35, 0.0  ;;  %v3613_v15 = vmul.f32 0.01, %v3539_v35  ;;  %v3642_v42 = vadd.f32 %v3626_v54, %v10549_v37  ;;  %v10560_v37 = vld [vmem:[#allocation39_spill] sm:$0xff]  ;;  %v10561_v55 = vld [vmem:[#allocation40_spill] sm:$0xff] }
0x100b   :  { %vm3596_vm7 = vcmp.gt.f32.partialorder %v3534_v21, 0.0  ;;  %v3612_v49 = vmul.f32 0.01, %v3534_v21  ;;  %v6803_v19 = vpop.f32.mrb[118].mxu0 }
0x100c   :  { %v3549_v51 = vadd.f32 %v6803_v19, %v9283_v29  ;;  %v3543_v26 = vpop.f32.mrb[119].mxu0  ;;  %6851 = vmatprep.mubr.f32.mxu1 %v3642_v42  ;;  %v3629_v30 = vsel %vm3597_vm6, %v3539_v35, %v3613_v15 }
0x100d   :  { %v3544_v56 = vadd.f32 %v9283_v29, %v3543_v26  ;;  %6852 = vmatmul.mubr.f32.gmra.mrb[98].mxu1 %v3643_v14  ;;  %v3628_v62 = vsel %vm3596_vm7, %v3534_v21, %v3612_v49  ;;  %v3645_v32 = vadd.f32 %v3629_v30, %v10552_v12  ;;  %v10559_v21 = vld [vmem:[#allocation38_spill] sm:$0xff] }
0x100e   :  { %vm3599_vm8 = vcmp.gt.f32.partialorder %v3549_v51, 0.0  ;;  %v3615_v45 = vmul.f32 0.01, %v3549_v51  ;;  %v3644_v3 = vadd.f32 %v3628_v62, %v10551_v61 }
0x100f   :  { %vm3598_vm9 = vcmp.gt.f32.partialorder %v3544_v56, 0.0  ;;  %v3614_v2 = vmul.f32 0.01, %v3544_v56  ;;  %v6806_v16 = vpop.f32.mrb[120].mxu0 }
0x1010   :  { %v3559_v44 = vadd.f32 %v6806_v16, %v9283_v29  ;;  %v3553_v41 = vpop.f32.mrb[121].mxu0  ;;  %6854 = vmatprep.mubr.f32.mxu1 %v3644_v3  ;;  %v3631_v57 = vsel %vm3599_vm8, %v3549_v51, %v3615_v45  ;;  %v10562_v51 = vld [vmem:[#allocation41_spill] sm:$0xff] }
0x1011   :  { %v3554_v60 = vadd.f32 %v9283_v29, %v3553_v41  ;;  %6855 = vmatmul.mubr.f32.gmra.mrb[100].mxu1 %v3645_v32  ;;  %v3630_v50 = vsel %vm3598_vm9, %v3544_v56, %v3614_v2  ;;  %v3647_v28 = vadd.f32 %v3631_v57, %v10554_v17  ;;  %v10563_v57 = vld [vmem:[#allocation11_spill] sm:$0xff] }
0x1012   :  { %vm3601_vm10 = vcmp.gt.f32.partialorder %v3559_v44, 0.0  ;;  %v3617_v7 = vmul.f32 0.01, %v3559_v44  ;;  %v3646_v11 = vadd.f32 %v3630_v50, %v10553_v27 }
0x1013   :  { %vm3600_vm11 = vcmp.gt.f32.partialorder %v3554_v60, 0.0  ;;  %v3616_v43 = vmul.f32 0.01, %v3554_v60  ;;  %v6809_v20 = vpop.f32.mrb[122].mxu0 }
0x1014   :  { %v3569_v10 = vadd.f32 %v6809_v20, %v9283_v29  ;;  %v3563_v4 = vpop.f32.mrb[123].mxu0  ;;  %6857 = vmatprep.mubr.f32.mxu1 %v3646_v11  ;;  %v3633_v1 = vsel %vm3601_vm10, %v3559_v44, %v3617_v7  ;;  %v10564_v7 = vld [vmem:[#allocation10_spill] sm:$0xff] }
0x1015   :  { %v3564_v13 = vadd.f32 %v9283_v29, %v3563_v4  ;;  %6858 = vmatmul.mubr.f32.gmra.mrb[102].mxu1 %v3647_v28  ;;  %v3632_v9 = vsel %vm3600_vm11, %v3554_v60, %v3616_v43  ;;  %v3649_v39 = vadd.f32 %v3633_v1, %v10556_v5 }
0x1016   :  { %vm3603_vm12 = vcmp.gt.f32.partialorder %v3569_v10, 0.0  ;;  %v3619_v18 = vmul.f32 0.01, %v3569_v10  ;;  %v3648_v34 = vadd.f32 %v3632_v9, %v10555_v24  ;;  %v10565_v9 = vld [vmem:[#allocation14_spill] sm:$0xff] }
0x1017   :  { %vm3602_vm13 = vcmp.gt.f32.partialorder %v3564_v13, 0.0  ;;  %v3618_v48 = vmul.f32 0.01, %v3564_v13  ;;  %v6812_v63 = vpop.f32.mrb[124].mxu0 }
0x1018   :  { %v3579_v6 = vadd.f32 %v6812_v63, %v9283_v29  ;;  %v3573_v47 = vpop.f32.mrb[125].mxu0  ;;  %6860 = vmatprep.mubr.f32.mxu1 %v3648_v34  ;;  %v3635_v36 = vsel %vm3603_vm12, %v3569_v10, %v3619_v18  ;;  %v10566_v34 = vld [vmem:[#allocation12_spill] sm:$0xff] }
0x1019   :  { %v3574_v46 = vadd.f32 %v9283_v29, %v3573_v47  ;;  %6861 = vmatmul.mubr.f32.gmra.mrb[104].mxu1 %v3649_v39  ;;  %v3634_v40 = vsel %vm3602_vm13, %v3564_v13, %v3618_v48  ;;  %v3651_v0 = vadd.f32 %v3635_v36, %v10558_v8 }
0x101a   :  { %vm3605_vm14 = vcmp.gt.f32.partialorder %v3579_v6, 0.0  ;;  %v3621_v59 = vmul.f32 0.01, %v3579_v6  ;;  %v3650_v33 = vadd.f32 %v3634_v40, %v10557_v38  ;;  %v10567_v38 = vld [vmem:[#allocation16_spill] sm:$0xff] }
0x101b   :  { %vm3604_vm15 = vcmp.gt.f32.partialorder %v3574_v46, 0.0  ;;  %v3620_v22 = vmul.f32 0.01, %v3574_v46  ;;  %v6815_v53 = vpop.f32.mrb[126].mxu0 }
0x101c   :  { %v3589_v58 = vadd.f32 %v6815_v53, %v9283_v29  ;;  %v3583_v25 = vpop.f32.mrb[127].mxu0  ;;  %6863 = vmatprep.mubr.f32.mxu1 %v3650_v33  ;;  %v3637_v23 = vsel %vm3605_vm14, %v3579_v6, %v3621_v59  ;;  %v10568_v53 = vld [vmem:[#allocation13_spill] sm:$0xff] }
0x101d   :  { %v3584_v35 = vadd.f32 %v9283_v29, %v3583_v25  ;;  %6864 = vmatmul.mubr.f32.gmra.mrb[106].mxu1 %v3651_v0  ;;  %v3636_v31 = vsel %vm3604_vm15, %v3574_v46, %v3620_v22  ;;  %v3653_v42 = vadd.f32 %v3637_v23, %v10560_v37  ;;  %v9317_v29 = vld [vmem:[#allocation4 + $0x11] ss:$0 sm:$0xff] }
0x101e   :  { %vm3607_vm0 = vcmp.gt.f32.partialorder %v3589_v58, 0.0  ;;  %v3623_v52 = vmul.f32 0.01, %v3589_v58  ;;  %v3652_v54 = vadd.f32 %v3636_v31, %v10559_v21 }
0x101f   :  { %vm3606_vm1 = vcmp.gt.f32.partialorder %v3584_v35, 0.0  ;;  %v3622_v15 = vmul.f32 0.01, %v3584_v35 }
0x1020   :  { %6866 = vmatprep.mubr.f32.mxu1 %v3652_v54  ;;  %v3639_v49 = vsel %vm3607_vm0, %v3589_v58, %v3623_v52 }
0x1021   :  { %6867 = vmatmul.mubr.f32.gmra.mrb[108].mxu1 %v3653_v42  ;;  %v3638_v19 = vsel %vm3606_vm1, %v3584_v35, %v3622_v15  ;;  %v3655_v26 = vadd.f32 %v3639_v49, %v10562_v51  ;;  %v10569_v15 = vld [vmem:[#allocation17_spill] sm:$0xff]  ;;  %v10570_v49 = vld [vmem:[#allocation15_spill] sm:$0xff] }
0x1022   :  { %v3654_v14 = vadd.f32 %v3638_v19, %v10561_v55 }
0x1024   :  { %6869 = vmatprep.mubr.f32.mxu1 %v3654_v14 }
0x1025   :  { %6870 = vmatmul.mubr.f32.gmra.mrb[110].mxu1 %v3655_v26 }
0x10dc   :  { %v6850_v30 = vpop.f32.mrb[96].mxu1 }
0x10dd   :  { %v3749_v56 = vadd.f32 %v6850_v30, %v9317_v29  ;;  %v3743_v62 = vpop.f32.mrb[97].mxu1 }
0x10de   :  { %v3744_v45 = vadd.f32 %v9317_v29, %v3743_v62 }
0x10df   :  { %vm3823_vm2 = vcmp.gt.f32.partialorder %v3749_v56, 0.0  ;;  %v3839_v61 = vmul.f32 0.01, %v3749_v56 }
0x10e0   :  { %vm3822_vm3 = vcmp.gt.f32.partialorder %v3744_v45, 0.0  ;;  %v3838_v3 = vmul.f32 0.01, %v3744_v45  ;;  %v6853_v2 = vpop.f32.mrb[98].mxu1 }
0x10e1   :  { %v3855_v16 = vsel %vm3823_vm2, %v3749_v56, %v3839_v61  ;;  %v3759_v12 = vadd.f32 %v6853_v2, %v9317_v29  ;;  %v3753_v32 = vpop.f32.mrb[99].mxu1 }
0x10e2   :  { %v3854_v44 = vsel %vm3822_vm3, %v3744_v45, %v3838_v3  ;;  %v3754_v41 = vadd.f32 %v9317_v29, %v3753_v32  ;;  %v3871_v60 = vadd.f32 %v3855_v16, %v10563_v57  ;;  %v10571_v3 = vld [vmem:[#allocation19_spill] sm:$0xff] }
0x10e3   :  { %vm3825_vm4 = vcmp.gt.f32.partialorder %v3759_v12, 0.0  ;;  %v3841_v50 = vmul.f32 0.01, %v3759_v12  ;;  %v3870_v27 = vadd.f32 %v3854_v44, %v10564_v7 }
0x10e4   :  { %vm3824_vm5 = vcmp.gt.f32.partialorder %v3754_v41, 0.0  ;;  %v3840_v11 = vmul.f32 0.01, %v3754_v41  ;;  %v6856_v43 = vpop.f32.mrb[100].mxu1  ;;  %v9326_v20 = vadd.f32 %v3871_v60, %v10563_v57 }
0x10e5   :  { %v3857_v17 = vsel %vm3825_vm4, %v3759_v12, %v3841_v50  ;;  %v3769_v28 = vadd.f32 %v6856_v43, %v9317_v29  ;;  %v3763_v10 = vpop.f32.mrb[101].mxu1  ;;  %v9330_v4 = vadd.f32 %v3870_v27, %v10564_v7  ;;  %v10572_v12 = vld [vmem:[#allocation18_spill] sm:$0xff] }
0x10e6   :  { %v3856_v1 = vsel %vm3824_vm5, %v3754_v41, %v3840_v11  ;;  %v3764_v13 = vadd.f32 %v9317_v29, %v3763_v10  ;;  %3904 = vadd.xlane.f32.xlu0 %v9326_v20  ;;  %v3873_v18 = vadd.f32 %v3857_v17, %v10565_v9  ;;  %v10573_v17 = vld [vmem:[#allocation21_spill] sm:$0xff] }
0x10e7   :  { %vm3827_vm6 = vcmp.gt.f32.partialorder %v3769_v28, 0.0  ;;  %v3843_v24 = vmul.f32 0.01, %v3769_v28  ;;  %3902 = vadd.xlane.f32.xlu1 %v9330_v4  ;;  %v3872_v48 = vadd.f32 %v3856_v1, %v10566_v34  ;;  %v10574_v1 = vld [vmem:[#allocation20_spill] sm:$0xff] }
0x10e8   :  { %vm3826_vm7 = vcmp.gt.f32.partialorder %v3764_v13, 0.0  ;;  %v3842_v63 = vmul.f32 0.01, %v3764_v13  ;;  %v6859_v5 = vpop.f32.mrb[102].mxu1  ;;  %v9338_v39 = vadd.f32 %v3873_v18, %v10565_v9 }
0x10e9   :  { %v3859_v6 = vsel %vm3827_vm6, %v3769_v28, %v3843_v24  ;;  %v3779_v47 = vadd.f32 %v6859_v5, %v9317_v29  ;;  %v3773_v36 = vpop.f32.mrb[103].mxu1  ;;  %v9342_v46 = vadd.f32 %v3872_v48, %v10566_v34 }
0x10ea   :  { %v3858_v40 = vsel %vm3826_vm7, %v3764_v13, %v3842_v63  ;;  %v3774_v59 = vadd.f32 %v9317_v29, %v3773_v36  ;;  %3908 = vadd.xlane.f32.xlu0 %v9338_v39  ;;  %v3875_v33 = vadd.f32 %v3859_v6, %v10567_v38  ;;  %v10575_v36 = vld [vmem:[#allocation23_spill] sm:$0xff] }
0x10eb   :  { %vm3829_vm8 = vcmp.gt.f32.partialorder %v3779_v47, 0.0  ;;  %v3845_v22 = vmul.f32 0.01, %v3779_v47  ;;  %3906 = vadd.xlane.f32.xlu1 %v9342_v46  ;;  %v3874_v8 = vadd.f32 %v3858_v40, %v10568_v53 }
0x10ec   :  { %vm3828_vm9 = vcmp.gt.f32.partialorder %v3774_v59, 0.0  ;;  %v3844_v0 = vmul.f32 0.01, %v3774_v59  ;;  %v6862_v58 = vpop.f32.mrb[104].mxu1  ;;  %v9350_v25 = vadd.f32 %v3875_v33, %v10567_v38  ;;  %v10576_v38 = vld [vmem:[#allocation22_spill] sm:$0xff] }
0x10ed   :  { %v3861_v23 = vsel %vm3829_vm8, %v3779_v47, %v3845_v22  ;;  %v3789_v35 = vadd.f32 %v6862_v58, %v9317_v29  ;;  %v3783_v31 = vpop.f32.mrb[105].mxu1  ;;  %v9354_v52 = vadd.f32 %v3874_v8, %v10568_v53  ;;  %v10577_v58 = vld [vmem:[#allocation25_spill] sm:$0xff] }
0x10ee   :  { %v3860_v21 = vsel %vm3828_vm9, %v3774_v59, %v3844_v0  ;;  %v3784_v54 = vadd.f32 %v9317_v29, %v3783_v31  ;;  %3912 = vadd.xlane.f32.xlu0 %v9350_v25  ;;  %v3877_v37 = vadd.f32 %v3861_v23, %v10569_v15 }
0x10ef   :  { %vm3831_vm10 = vcmp.gt.f32.partialorder %v3789_v35, 0.0  ;;  %v3847_v42 = vmul.f32 0.01, %v3789_v35  ;;  %3910 = vadd.xlane.f32.xlu1 %v9354_v52  ;;  %v3876_v19 = vadd.f32 %v3860_v21, %v10570_v49 }
0x10f0   :  { %vm3830_vm11 = vcmp.gt.f32.partialorder %v3784_v54, 0.0  ;;  %v3846_v55 = vmul.f32 0.01, %v3784_v54  ;;  %v6865_v14 = vpop.f32.mrb[106].mxu1  ;;  %v9362_v51 = vadd.f32 %v3877_v37, %v10569_v15  ;;  %v4136_v15 = vld [vmem:[#allocation2 + $0x780] sm:$0xff]  ;;  %v4137_v37 = vld [vmem:[#allocation2 + $0x788] sm:$0xff] }
0x10f1   :  { %v3863_v26 = vsel %vm3831_vm10, %v3789_v35, %v3847_v42  ;;  %v3799_v30 = vadd.f32 %v6865_v14, %v9317_v29  ;;  %v3793_v56 = vpop.f32.mrb[107].mxu1  ;;  %v9366_v62 = vadd.f32 %v3876_v19, %v10570_v49  ;;  %v10578_v35 = vld [vmem:[#allocation24_spill] sm:$0xff]  ;;  %v4138_v42 = vld [vmem:[#allocation2 + $0x790] sm:$0xff]  ;;  %v7478_v49 = vpack.c.bf16 %v4137_v37, %v4136_v15  ;;  %v4139_v19 = vld [vmem:[#allocation2 + $0x798] sm:$0xff] }
0x10f2   :  { %v3862_v45 = vsel %vm3830_vm11, %v3784_v54, %v3846_v55  ;;  %v3794_v61 = vadd.f32 %v9317_v29, %v3793_v56  ;;  %3916 = vadd.xlane.f32.xlu0 %v9362_v51  ;;  %v3879_v2 = vadd.f32 %v3863_v26, %v10571_v3  ;;  %v7482_v55 = vpack.c.bf16 %v4139_v19, %v4138_v42  ;;  %v4140_v14 = vld [vmem:[#allocation2 + $0x7a0] sm:$0xff]  ;;  %v4141_v26 = vld [vmem:[#allocation2 + $0x7a8] sm:$0xff] }
0x10f3   :  { %vm3833_vm12 = vcmp.gt.f32.partialorder %v3799_v30, 0.0  ;;  %v3849_v16 = vmul.f32 0.01, %v3799_v30  ;;  %3914 = vadd.xlane.f32.xlu1 %v9366_v62  ;;  %v3878_v32 = vadd.f32 %v3862_v45, %v10572_v12  ;;  %7479 = vmatprep.subr.bf16.mxu0 %v7478_v49 }
0x10f4   :  { %vm3832_vm13 = vcmp.gt.f32.partialorder %v3794_v61, 0.0  ;;  %v3848_v44 = vmul.f32 0.01, %v3794_v61  ;;  %v6868_v41 = vpop.f32.mrb[108].mxu1  ;;  %v9374_v57 = vadd.f32 %v3879_v2, %v10571_v3  ;;  %7481 = vmatpush3.bf16.msra.mxu0 %v7478_v49 }
0x10f5   :  { %v3865_v60 = vsel %vm3833_vm12, %v3799_v30, %v3849_v16  ;;  %v3809_v50 = vadd.f32 %v6868_v41, %v9317_v29  ;;  %v3803_v7 = vpop.f32.mrb[109].mxu1  ;;  %v9378_v27 = vadd.f32 %v3878_v32, %v10572_v12  ;;  %7483 = vmatprep.subr.bf16.mxu0 %v7482_v55  ;;  %v7486_v30 = vpack.c.bf16 %v4141_v26, %v4140_v14  ;;  %v10579_v32 = vld [vmem:[#allocation9_spill] sm:$0xff] }
0x10f6   :  { %v3864_v11 = vsel %vm3832_vm13, %v3794_v61, %v3848_v44  ;;  %v3804_v43 = vadd.f32 %v9317_v29, %v3803_v7  ;;  %3920 = vadd.xlane.f32.xlu0 %v9374_v57  ;;  %v3881_v28 = vadd.f32 %v3865_v60, %v10573_v17 }
0x10f7   :  { %vm3835_vm14 = vcmp.gt.f32.partialorder %v3809_v50, 0.0  ;;  %v3851_v10 = vmul.f32 0.01, %v3809_v50  ;;  %3918 = vadd.xlane.f32.xlu1 %v9378_v27  ;;  %v3880_v13 = vadd.f32 %v3864_v11, %v10574_v1 }
0x10f8   :  { %vm3834_vm15 = vcmp.gt.f32.partialorder %v3804_v43, 0.0  ;;  %v3850_v9 = vmul.f32 0.01, %v3804_v43  ;;  %v6871_v18 = vpop.f32.mrb[110].mxu1  ;;  %v9386_v24 = vadd.f32 %v3881_v28, %v10573_v17  ;;  %7485 = vmatpush3.bf16.msra.mxu0 %v7482_v55 }
0x10f9   :  { %v3867_v34 = vsel %vm3835_vm14, %v3809_v50, %v3851_v10  ;;  %v3819_v48 = vadd.f32 %v6871_v18, %v9317_v29  ;;  %v3813_v63 = vpop.f32.mrb[111].mxu1  ;;  %v9390_v5 = vadd.f32 %v3880_v13, %v10574_v1  ;;  %7487 = vmatprep.subr.bf16.mxu0 %v7486_v30 }
0x10fa   :  { %v3866_v6 = vsel %vm3834_vm15, %v3804_v43, %v3850_v9  ;;  %v3814_v47 = vadd.f32 %v9317_v29, %v3813_v63  ;;  %3924 = vadd.xlane.f32.xlu0 %v9386_v24  ;;  %v3883_v40 = vadd.f32 %v3867_v34, %v10575_v36 }
0x10fb   :  { %vm3837_vm0 = vcmp.gt.f32.partialorder %v3819_v48, 0.0  ;;  %v3853_v59 = vmul.f32 0.01, %v3819_v48  ;;  %3922 = vadd.xlane.f32.xlu1 %v9390_v5  ;;  %v3882_v33 = vadd.f32 %v3866_v6, %v10576_v38 }
0x10fc   :  { %vm3836_vm1 = vcmp.gt.f32.partialorder %v3814_v47, 0.0  ;;  %v3852_v22 = vmul.f32 0.01, %v3814_v47  ;;  %v9398_v53 = vadd.f32 %v3883_v40, %v10575_v36  ;;  %7489 = vmatpush3.bf16.msra.mxu0 %v7486_v30 }
0x10fd   :  { %v3869_v8 = vsel %vm3837_vm0, %v3819_v48, %v3853_v59  ;;  %v9401_v0 = vadd.f32 %v3882_v33, %v10576_v38 }
0x10fe   :  { %v3868_v29 = vsel %vm3836_vm1, %v3814_v47, %v3852_v22  ;;  %3928 = vadd.xlane.f32.xlu0 %v9398_v53  ;;  %v3885_v23 = vadd.f32 %v3869_v8, %v10577_v58 }
0x10ff   :  { %3926 = vadd.xlane.f32.xlu1 %v9401_v0  ;;  %v3884_v31 = vadd.f32 %v3868_v29, %v10578_v35 }
0x1100   :  { %v9408_v21 = vadd.f32 %v3885_v23, %v10577_v58 }
0x1101   :  { %v9411_v54 = vadd.f32 %v3884_v31, %v10578_v35 }
0x1102   :  { %3932 = vadd.xlane.f32.xlu0 %v9408_v21 }
0x1103   :  { %3930 = vadd.xlane.f32.xlu1 %v9411_v54 }
0x1173   :  { %v3905_v56 = vpop.xlane.xlu0 %3904 }
0x1174   :  { %v3935_v45 = vmul.f32 0.03125, %v3905_v56  ;;  %v3903_v61 = vpop.xlane.xlu1 %3902 }
0x1175   :  { %v3934_v3 = vmul.f32 0.03125, %v3903_v61 }
0x1176   :  { %v3951_v2 = vsub.f32 %v9326_v20, %v3935_v45 }
0x1177   :  { %v3950_v16 = vsub.f32 %v9330_v4, %v3934_v3  ;;  %v3909_v12 = vpop.xlane.xlu0 %3908  ;;  %v4142_v3 = vld [vmem:[#allocation2 + $0x7b0] sm:$0xff] }
0x1178   :  { %v9418_v44 = vmul.f32 %v10579_v32, %v3951_v2  ;;  %v3937_v41 = vmul.f32 0.03125, %v3909_v12  ;;  %v3907_v60 = vpop.xlane.xlu1 %3906  ;;  %v4143_v2 = vld [vmem:[#allocation2 + $0x7b8] sm:$0xff] }
0x1179   :  { %v9421_v50 = vmul.f32 %v10579_v32, %v3950_v16  ;;  %v3936_v7 = vmul.f32 0.03125, %v3907_v60  ;;  %v7490_v12 = vpack.c.bf16 %v4143_v2, %v4142_v3 }
0x117a   :  { %v3953_v11 = vsub.f32 %v9338_v39, %v3937_v41  ;;  %v3983_v43 = vmul.f32 %v9418_v44, %v9418_v44 }
0x117b   :  { %v3952_v17 = vsub.f32 %v9342_v46, %v3936_v7  ;;  %v3913_v20 = vpop.xlane.xlu0 %3912  ;;  %v3982_v4 = vmul.f32 %v9421_v50, %v9421_v50  ;;  %7491 = vmatprep.subr.bf16.mxu0 %v7490_v12 }
0x117c   :  { %v9430_v28 = vmul.f32 %v10579_v32, %v3953_v11  ;;  %v3939_v10 = vmul.f32 0.03125, %v3913_v20  ;;  %v3911_v1 = vpop.xlane.xlu1 %3910  ;;  %4000 = vadd.xlane.f32.xlu0 %v3983_v43  ;;  %7493 = vmatpush3.bf16.msra.mxu0 %v7490_v12 }
0x117d   :  { %v9433_v13 = vmul.f32 %v10579_v32, %v3952_v17  ;;  %v3938_v9 = vmul.f32 0.03125, %v3911_v1  ;;  %3998 = vadd.xlane.f32.xlu1 %v3982_v4  ;;  %v4144_v4 = vld [vmem:[#allocation2 + $0x7c0] sm:$0xff] }
0x117e   :  { %v3955_v39 = vsub.f32 %v9350_v25, %v3939_v10  ;;  %v3985_v46 = vmul.f32 %v9430_v28, %v9430_v28  ;;  %v4145_v10 = vld [vmem:[#allocation2 + $0x7c8] sm:$0xff] }
0x117f   :  { %v3954_v18 = vsub.f32 %v9354_v52, %v3938_v9  ;;  %v3917_v34 = vpop.xlane.xlu0 %3916  ;;  %v3984_v48 = vmul.f32 %v9433_v13, %v9433_v13 }
0x1180   :  { %v9442_v63 = vmul.f32 %v10579_v32, %v3955_v39  ;;  %v3941_v6 = vmul.f32 0.03125, %v3917_v34  ;;  %v3915_v47 = vpop.xlane.xlu1 %3914  ;;  %4004 = vadd.xlane.f32.xlu0 %v3985_v46 }
0x1181   :  { %v9445_v36 = vmul.f32 %v10579_v32, %v3954_v18  ;;  %v3940_v40 = vmul.f32 0.03125, %v3915_v47  ;;  %4002 = vadd.xlane.f32.xlu1 %v3984_v48  ;;  %v4146_v48 = vld [vmem:[#allocation2 + $0x7d0] sm:$0xff] }
0x1182   :  { %v3957_v25 = vsub.f32 %v9362_v51, %v3941_v6  ;;  %v3987_v52 = vmul.f32 %v9442_v63, %v9442_v63  ;;  %v4147_v6 = vld [vmem:[#allocation2 + $0x7d8] sm:$0xff] }
0x1183   :  { %v3956_v59 = vsub.f32 %v9366_v62, %v3940_v40  ;;  %v3921_v38 = vpop.xlane.xlu0 %3920  ;;  %v3986_v33 = vmul.f32 %v9445_v36, %v9445_v36 }
0x1184   :  { %v9454_v22 = vmul.f32 %v10579_v32, %v3957_v25  ;;  %v3943_v8 = vmul.f32 0.03125, %v3921_v38  ;;  %v3919_v29 = vpop.xlane.xlu1 %3918  ;;  %4008 = vadd.xlane.f32.xlu0 %v3987_v52  ;;  %v4148_v25 = vld [vmem:[#allocation2 + $0x7e0] sm:$0xff]  ;;  %v4149_v52 = vld [vmem:[#allocation2 + $0x7e8] sm:$0xff]  ;;  %v4150_v38 = vld [vmem:[#allocation2 + $0x7f0] sm:$0xff] }
0x1185   :  { %v9457_v58 = vmul.f32 %v10579_v32, %v3956_v59  ;;  %v3942_v23 = vmul.f32 0.03125, %v3919_v29  ;;  %4006 = vadd.xlane.f32.xlu1 %v3986_v33  ;;  %v7502_v59 = vpack.c.bf16 %v4149_v52, %v4148_v25  ;;  %v4151_v33 = vld [vmem:[#allocation2 + $0x7f8] sm:$0xff] }
0x1186   :  { %v3959_v51 = vsub.f32 %v9374_v57, %v3943_v8  ;;  %v3989_v62 = vmul.f32 %v9454_v22, %v9454_v22  ;;  %v7506_v8 = vpack.c.bf16 %v4151_v33, %v4150_v38 }
0x1187   :  { %v3958_v35 = vsub.f32 %v9378_v27, %v3942_v23  ;;  %v3925_v31 = vpop.xlane.xlu0 %3924  ;;  %v3988_v15 = vmul.f32 %v9457_v58, %v9457_v58 }
0x1188   :  { %v9466_v37 = vmul.f32 %v10579_v32, %v3959_v51  ;;  %v3945_v42 = vmul.f32 0.03125, %v3925_v31  ;;  %v3923_v49 = vpop.xlane.xlu1 %3922  ;;  %4012 = vadd.xlane.f32.xlu0 %v3989_v62 }
0x1189   :  { %v9469_v19 = vmul.f32 %v10579_v32, %v3958_v35  ;;  %v3944_v55 = vmul.f32 0.03125, %v3923_v49  ;;  %4010 = vadd.xlane.f32.xlu1 %v3988_v15 }
0x118a   :  { %v3961_v57 = vsub.f32 %v9386_v24, %v3945_v42  ;;  %v3991_v27 = vmul.f32 %v9466_v37, %v9466_v37 }
0x118b   :  { %v3960_v14 = vsub.f32 %v9390_v5, %v3944_v55  ;;  %v3929_v26 = vpop.xlane.xlu0 %3928  ;;  %v3990_v30 = vmul.f32 %v9469_v19, %v9469_v19 }
0x118c   :  { %v9478_v56 = vmul.f32 %v10579_v32, %v3961_v57  ;;  %v3947_v45 = vmul.f32 0.03125, %v3929_v26  ;;  %v3927_v61 = vpop.xlane.xlu1 %3926  ;;  %4016 = vadd.xlane.f32.xlu0 %v3991_v27 }
0x118d   :  { %v9481_v16 = vmul.f32 %v10579_v32, %v3960_v14  ;;  %v3946_v24 = vmul.f32 0.03125, %v3927_v61  ;;  %4014 = vadd.xlane.f32.xlu1 %v3990_v30 }
0x118e   :  { %v3963_v5 = vsub.f32 %v9398_v53, %v3947_v45  ;;  %v3993_v41 = vmul.f32 %v9478_v56, %v9478_v56 }
0x118f   :  { %v3962_v60 = vsub.f32 %v9401_v0, %v3946_v24  ;;  %v3933_v7 = vpop.xlane.xlu0 %3932  ;;  %v3992_v11 = vmul.f32 %v9481_v16, %v9481_v16  ;;  %v7494_v0 = vpack.c.bf16 %v4145_v10, %v4144_v4 }
0x1190   :  { %v9490_v43 = vmul.f32 %v10579_v32, %v3963_v5  ;;  %v3949_v17 = vmul.f32 0.03125, %v3933_v7  ;;  %4020 = vadd.xlane.f32.xlu0 %v3993_v41  ;;  %v3931_v20 = vpop.xlane.xlu1 %3930  ;;  %v9511_v7 = vld [vmem:[#allocation4 + $0x12] ss:$0 sm:$0xff] }
0x1191   :  { %v9493_v53 = vmul.f32 %v10579_v32, %v3962_v60  ;;  %v3948_v1 = vmul.f32 0.03125, %v3931_v20  ;;  %4018 = vadd.xlane.f32.xlu1 %v3992_v11  ;;  %7495 = vmatprep.subr.bf16.mxu0 %v7494_v0 }
0x1192   :  { %v3965_v9 = vsub.f32 %v9408_v21, %v3949_v17  ;;  %v3995_v39 = vmul.f32 %v9490_v43, %v9490_v43  ;;  %7497 = vmatpush3.bf16.msra.mxu0 %v7494_v0  ;;  %v7498_v21 = vpack.c.bf16 %v4147_v6, %v4146_v48 }
0x1193   :  { %v3964_v46 = vsub.f32 %v9411_v54, %v3948_v1  ;;  %v3994_v18 = vmul.f32 %v9493_v53, %v9493_v53 }
0x1194   :  { %v9502_v34 = vmul.f32 %v10579_v32, %v3965_v9  ;;  %4024 = vadd.xlane.f32.xlu0 %v3995_v39  ;;  %7499 = vmatprep.subr.bf16.mxu0 %v7498_v21  ;;  %v9515_v39 = vld [vmem:[#allocation4 + $0x13] ss:$0 sm:$0xff] }
0x1195   :  { %v9505_v47 = vmul.f32 %v10579_v32, %v3964_v46  ;;  %4022 = vadd.xlane.f32.xlu1 %v3994_v18 }
0x1196   :  { %v3997_v40 = vmul.f32 %v9502_v34, %v9502_v34  ;;  %7501 = vmatpush3.bf16.msra.mxu0 %v7498_v21 }
0x1197   :  { %v3996_v54 = vmul.f32 %v9505_v47, %v9505_v47  ;;  %7503 = vmatprep.subr.bf16.mxu0 %v7502_v59 }
0x1198   :  { %4028 = vadd.xlane.f32.xlu0 %v3997_v40 }
0x1199   :  { %4026 = vadd.xlane.f32.xlu1 %v3996_v54 }
0x119a   :  { %7505 = vmatpush3.bf16.msra.mxu0 %v7502_v59 }
0x119b   :  { %7507 = vmatprep.subr.bf16.mxu0 %v7506_v8 }
0x119e   :  { %7509 = vmatpush3.bf16.msra.mxu0 %v7506_v8 }
0x1209   :  { %v4001_v29 = vpop.xlane.xlu0 %4000 }
0x120a   :  { %v4031_v23 = vmul.f32 0.03125, %v4001_v29  ;;  %v3999_v51 = vpop.xlane.xlu1 %3998 }
0x120b   :  { %v4030_v62 = vmul.f32 0.03125, %v3999_v51 }
0x120c   :  { %v4047_v35 = vadd.f32 1e-08, %v4031_v23 }
0x120d   :  { %v4046_v31 = vadd.f32 1e-08, %v4030_v62  ;;  %v4005_v15 = vpop.xlane.xlu0 %4004 }
0x120e   :  { %7744 = vrsqrt.f32 %v4047_v35  ;;  %v4033_v42 = vmul.f32 0.03125, %v4005_v15  ;;  %v4003_v49 = vpop.xlane.xlu1 %4002 }
0x120f   :  { %7746 = vrsqrt.f32 %v4046_v31  ;;  %v4032_v55 = vmul.f32 0.03125, %v4003_v49 }
0x1210   :  { %v4049_v57 = vadd.f32 1e-08, %v4033_v42 }
0x1211   :  { %v4048_v27 = vadd.f32 1e-08, %v4032_v55  ;;  %v4009_v14 = vpop.xlane.xlu0 %4008 }
0x1212   :  { %7748 = vrsqrt.f32 %v4049_v57  ;;  %v4035_v26 = vmul.f32 0.03125, %v4009_v14  ;;  %v4007_v30 = vpop.xlane.xlu1 %4006 }
0x1213   :  { %7750 = vrsqrt.f32 %v4048_v27  ;;  %v4034_v45 = vmul.f32 0.03125, %v4007_v30 }
0x1214   :  { %v4051_v61 = vadd.f32 1e-08, %v4035_v26 }
0x1215   :  { %v4050_v3 = vadd.f32 1e-08, %v4034_v45  ;;  %v4013_v2 = vpop.xlane.xlu0 %4012 }
0x1216   :  { %7752 = vrsqrt.f32 %v4051_v61  ;;  %v4037_v24 = vmul.f32 0.03125, %v4013_v2  ;;  %v4011_v12 = vpop.xlane.xlu1 %4010 }
0x1217   :  { %7754 = vrsqrt.f32 %v4050_v3  ;;  %v4036_v5 = vmul.f32 0.03125, %v4011_v12 }
0x1218   :  { %v7745_v41 = vpop.eup %7744  ;;  %v4053_v60 = vadd.f32 1e-08, %v4037_v24 }
0x1219   :  { %v7747_v11 = vpop.eup %7746  ;;  %v4079_v17 = vmul.f32 %v7745_v41, %v9418_v44  ;;  %v4052_v20 = vadd.f32 1e-08, %v4036_v5  ;;  %v4017_v4 = vpop.xlane.xlu0 %4016 }
0x121a   :  { %7756 = vrsqrt.f32 %v4053_v60  ;;  %v4039_v10 = vmul.f32 0.03125, %v4017_v4  ;;  %v4015_v1 = vpop.xlane.xlu1 %4014  ;;  %v4078_v0 = vmul.f32 %v7747_v11, %v9421_v50 }
0x121b   :  { %7758 = vrsqrt.f32 %v4052_v20  ;;  %v4038_v9 = vmul.f32 0.03125, %v4015_v1  ;;  %v4100_v46 = vmul.f32 %v9511_v7, %v4079_v17 }
0x121c   :  { %v7749_v18 = vpop.eup %7748  ;;  %v4055_v48 = vadd.f32 1e-08, %v4039_v10  ;;  %v4099_v6 = vmul.f32 %v9511_v7, %v4078_v0 }
0x121d   :  { %v7751_v21 = vpop.eup %7750  ;;  %v4054_v40 = vadd.f32 1e-08, %v4038_v9  ;;  %v4021_v44 = vpop.xlane.xlu0 %4020  ;;  %v4081_v54 = vmul.f32 %v7749_v18, %v9430_v28  ;;  %v9525_v33 = vadd.f32 %v9515_v39, %v4100_v46 }
0x121e   :  { %7760 = vrsqrt.f32 %v4055_v48  ;;  %v4041_v25 = vmul.f32 0.03125, %v4021_v44  ;;  %v4019_v52 = vpop.xlane.xlu1 %4018  ;;  %v9521_v50 = vadd.f32 %v9515_v39, %v4099_v6  ;;  %v4080_v59 = vmul.f32 %v7751_v21, %v9433_v13 }
0x121f   :  { %7762 = vrsqrt.f32 %v4054_v40  ;;  %v4040_v38 = vmul.f32 0.03125, %v4019_v52  ;;  %v4102_v8 = vmul.f32 %v9511_v7, %v4081_v54 }
0x1220   :  { %v7753_v29 = vpop.eup %7752  ;;  %v4057_v23 = vadd.f32 1e-08, %v4041_v25  ;;  %6904 = vmatprep.mubr.f32.mxu0 %v9521_v50  ;;  %v4101_v28 = vmul.f32 %v9511_v7, %v4080_v59 }
0x1221   :  { %v7755_v51 = vpop.eup %7754  ;;  %v4056_v62 = vadd.f32 1e-08, %v4040_v38  ;;  %v4025_v35 = vpop.xlane.xlu0 %4024  ;;  %6905 = vmatmul.mubr.f32.vlgmr.msra.gmra.mrb[128].mxu0 %v9525_v33  ;;  %v4083_v13 = vmul.f32 %v7753_v29, %v9442_v63  ;;  %v9537_v57 = vadd.f32 %v9515_v39, %v4102_v8 }
0x1222   :  { %7764 = vrsqrt.f32 %v4057_v23  ;;  %v4043_v31 = vmul.f32 0.03125, %v4025_v35  ;;  %v4023_v15 = vpop.xlane.xlu1 %4022  ;;  %v9533_v42 = vadd.f32 %v9515_v39, %v4101_v28  ;;  %v4082_v49 = vmul.f32 %v7755_v51, %v9445_v36 }
0x1223   :  { %7766 = vrsqrt.f32 %v4056_v62  ;;  %v4042_v55 = vmul.f32 0.03125, %v4023_v15  ;;  %v4104_v27 = vmul.f32 %v9511_v7, %v4083_v13 }
0x1224   :  { %v7757_v14 = vpop.eup %7756  ;;  %v4059_v26 = vadd.f32 1e-08, %v4043_v31  ;;  %6907 = vmatprep.mubr.f32.mxu0 %v9533_v42  ;;  %v4103_v63 = vmul.f32 %v9511_v7, %v4082_v49 }
0x1225   :  { %v7759_v30 = vpop.eup %7758  ;;  %v4058_v45 = vadd.f32 1e-08, %v4042_v55  ;;  %v4029_v61 = vpop.xlane.xlu0 %4028  ;;  %6908 = vmatmul.mubr.f32.gmra.mrb[130].mxu0 %v9537_v57  ;;  %v4085_v36 = vmul.f32 %v7757_v14, %v9454_v22  ;;  %v9549_v41 = vadd.f32 %v9515_v39, %v4104_v27 }
0x1226   :  { %7768 = vrsqrt.f32 %v4059_v26  ;;  %v4045_v3 = vmul.f32 0.03125, %v4029_v61  ;;  %v4027_v2 = vpop.xlane.xlu1 %4026  ;;  %v9545_v24 = vadd.f32 %v9515_v39, %v4103_v63  ;;  %v4084_v12 = vmul.f32 %v7759_v30, %v9457_v58 }
0x1227   :  { %7770 = vrsqrt.f32 %v4058_v45  ;;  %v4044_v5 = vmul.f32 0.03125, %v4027_v2  ;;  %10581 = vst [vmem:[#allocation43_spill] sm:$0xff] %v9549_v41  ;;  %v4106_v60 = vmul.f32 %v9511_v7, %v4085_v36 }
0x1228   :  { %10580 = vst [vmem:[#allocation42_spill] sm:$0xff] %v9545_v24  ;;  %v7761_v11 = vpop.eup %7760  ;;  %v4061_v17 = vadd.f32 1e-08, %v4045_v3  ;;  %6910 = vmatprep.mubr.f32.mxu0 %v9545_v24  ;;  %v4105_v22 = vmul.f32 %v9511_v7, %v4084_v12 }
0x1229   :  { %v7763_v20 = vpop.eup %7762  ;;  %v4060_v4 = vadd.f32 1e-08, %v4044_v5  ;;  %6911 = vmatmul.mubr.f32.gmra.mrb[132].mxu0 %v9549_v41  ;;  %v4087_v10 = vmul.f32 %v7761_v11, %v9466_v37  ;;  %v9561_v0 = vadd.f32 %v9515_v39, %v4106_v60 }
0x122a   :  { %7772 = vrsqrt.f32 %v4061_v17  ;;  %v9557_v58 = vadd.f32 %v9515_v39, %v4105_v22  ;;  %v4086_v1 = vmul.f32 %v7763_v20, %v9469_v19 }
0x122b   :  { %7774 = vrsqrt.f32 %v4060_v4  ;;  %10583 = vst [vmem:[#allocation45_spill] sm:$0xff] %v9561_v0  ;;  %v4108_v9 = vmul.f32 %v9511_v7, %v4087_v10 }
0x122c   :  { %10582 = vst [vmem:[#allocation44_spill] sm:$0xff] %v9557_v58  ;;  %v7765_v46 = vpop.eup %7764  ;;  %6913 = vmatprep.mubr.f32.mxu0 %v9557_v58  ;;  %v4107_v18 = vmul.f32 %v9511_v7, %v4086_v1 }
0x122d   :  { %v7767_v48 = vpop.eup %7766  ;;  %6914 = vmatmul.mubr.f32.gmra.mrb[134].mxu0 %v9561_v0  ;;  %v4089_v37 = vmul.f32 %v7765_v46, %v9478_v56  ;;  %v9573_v21 = vadd.f32 %v9515_v39, %v4108_v9 }
0x122e   :  { %v9569_v6 = vadd.f32 %v9515_v39, %v4107_v18  ;;  %v4088_v19 = vmul.f32 %v7767_v48, %v9481_v16 }
0x122f   :  { %10585 = vst [vmem:[#allocation47_spill] sm:$0xff] %v9573_v21  ;;  %v4110_v40 = vmul.f32 %v9511_v7, %v4089_v37 }
0x1230   :  { %10584 = vst [vmem:[#allocation46_spill] sm:$0xff] %v9569_v6  ;;  %v7769_v44 = vpop.eup %7768  ;;  %6916 = vmatprep.mubr.f32.mxu0 %v9569_v6  ;;  %v4109_v54 = vmul.f32 %v9511_v7, %v4088_v19 }
0x1231   :  { %v7771_v25 = vpop.eup %7770  ;;  %6917 = vmatmul.mubr.f32.gmra.mrb[136].mxu0 %v9573_v21  ;;  %v4091_v56 = vmul.f32 %v7769_v44, %v9490_v43  ;;  %v9585_v59 = vadd.f32 %v9515_v39, %v4110_v40 }
0x1232   :  { %v9581_v52 = vadd.f32 %v9515_v39, %v4109_v54  ;;  %v4090_v16 = vmul.f32 %v7771_v25, %v9493_v53 }
0x1233   :  { %10587 = vst [vmem:[#allocation49_spill] sm:$0xff] %v9585_v59  ;;  %v4112_v38 = vmul.f32 %v9511_v7, %v4091_v56 }
0x1234   :  { %10586 = vst [vmem:[#allocation48_spill] sm:$0xff] %v9581_v52  ;;  %v7773_v8 = vpop.eup %7772  ;;  %6919 = vmatprep.mubr.f32.mxu0 %v9581_v52  ;;  %v4111_v29 = vmul.f32 %v9511_v7, %v4090_v16 }
0x1235   :  { %v7775_v23 = vpop.eup %7774  ;;  %6920 = vmatmul.mubr.f32.gmra.mrb[138].mxu0 %v9585_v59  ;;  %v4093_v43 = vmul.f32 %v7773_v8, %v9502_v34  ;;  %v9597_v51 = vadd.f32 %v9515_v39, %v4112_v38 }
0x1236   :  { %v9593_v28 = vadd.f32 %v9515_v39, %v4111_v29  ;;  %v4092_v53 = vmul.f32 %v7775_v23, %v9505_v47  ;;  %v9611_v47 = vld [vmem:[#allocation4 + $0x14] ss:$0 sm:$0xff]  ;;  %v10483_v23 = vmov -1.0  }
0x1237   :  { %10589 = vst [vmem:[#allocation27_spill] sm:$0xff] %v9597_v51  ;;  %v4114_v62 = vmul.f32 %v9511_v7, %v4093_v43 }
0x1238   :  { %10588 = vst [vmem:[#allocation26_spill] sm:$0xff] %v9593_v28  ;;  %6922 = vmatprep.mubr.f32.mxu0 %v9593_v28  ;;  %v4113_v35 = vmul.f32 %v9511_v7, %v4092_v53 }
0x1239   :  { %6923 = vmatmul.mubr.f32.gmra.mrb[140].mxu0 %v9597_v51  ;;  %v9607_v34 = vadd.f32 %v9515_v39, %v4114_v62 }
0x123a   :  { %v9604_v13 = vadd.f32 %v9515_v39, %v4113_v35 }
0x123b   :  { %10591 = vst [vmem:[#allocation29_spill] sm:$0xff] %v9607_v34 }
0x123c   :  { %10590 = vst [vmem:[#allocation28_spill] sm:$0xff] %v9604_v13  ;;  %6925 = vmatprep.mubr.f32.mxu0 %v9604_v13 }
0x123d   :  { %6926 = vmatmul.mubr.f32.gmra.mrb[142].mxu0 %v9607_v34 }
0x12f4   :  { %v6906_v31 = vpop.f32.mrb[128].mxu0 }
0x12f5   :  { %v4229_v15 = vadd.f32 %v6906_v31, %v9611_v47  ;;  %v4223_v49 = vpop.f32.mrb[129].mxu0 }
0x12f6   :  { %v4224_v7 = vadd.f32 %v9611_v47, %v4223_v49 }
0x12f7   :  { %v4319_v55 = vmul.f32 0.70710677, %v4229_v15  ;;  %v9621_v37 = vmul.f32 0.5, %v4229_v15 }
0x12f8   :  { %v4318_v27 = vmul.f32 0.70710677, %v4224_v7  ;;  %v6909_v14 = vpop.f32.mrb[130].mxu0  ;;  %v9628_v56 = vmul.f32 0.5, %v4224_v7 }
0x12f9   :  { %v4367_v26 = vand.u32 2147483647, %v4319_v55  ;;  %v4239_v63 = vadd.f32 %v6909_v14, %v9611_v47  ;;  %v4233_v39 = vpop.f32.mrb[131].mxu0  ;;  %vm4335_vm2 = vcmp.ge.f32.partialorder %v4319_v55, 0.0 }
0x12fa   :  { %v4366_v30 = vand.u32 2147483647, %v4318_v27  ;;  %v4234_v45 = vadd.f32 %v9611_v47, %v4233_v39  ;;  %vm4334_vm3 = vcmp.ge.f32.partialorder %v4318_v27, 0.0  ;;  %v9635_v43 = vsel %vm4335_vm2, 1.0, %v10483_v23 }
0x12fb   :  { %v4383_v61 = vmul.f32 0.3275911, %v4367_v26  ;;  %v4321_v3 = vmul.f32 0.70710677, %v4239_v63  ;;  %v4591_v22 = vsub.f32 0.0, %v4367_v26  ;;  %v9641_v35 = vsel %vm4334_vm3, 1.0, %v10483_v23 }
0x12fc   :  { %v4382_v36 = vmul.f32 0.3275911, %v4366_v30  ;;  %v4320_v12 = vmul.f32 0.70710677, %v4234_v45  ;;  %v6912_v5 = vpop.f32.mrb[132].mxu0  ;;  %v4590_v10 = vsub.f32 0.0, %v4366_v30 }
0x12fd   :  { %v4399_v2 = vadd.f32 1.0, %v4383_v61  ;;  %v4369_v11 = vand.u32 2147483647, %v4321_v3  ;;  %v4243_v17 = vpop.f32.mrb[133].mxu0  ;;  %v4249_v9 = vadd.f32 %v6912_v5, %v9611_v47  ;;  %v4607_v44 = vmul.f32 %v4591_v22, %v4367_v26 }
0x12fe   :  { %v4398_v60 = vadd.f32 1.0, %v4382_v36  ;;  %v9617_v1 = vand.u32 2147483647, %v4320_v12  ;;  %v4244_v48 = vadd.f32 %v9611_v47, %v4243_v17  ;;  %v4606_v16 = vmul.f32 %v4590_v10, %v4366_v30 }
0x12ff   :  { %7776 = vrcp.f32 %v4399_v2  ;;  %v4385_v20 = vmul.f32 0.3275911, %v4369_v11  ;;  %v4323_v40 = vmul.f32 0.70710677, %v4249_v9  ;;  %vm4337_vm4 = vcmp.ge.f32.partialorder %v4321_v3, 0.0 }
0x1300   :  { %7778 = vrcp.f32 %v4398_v60  ;;  %v6915_v4 = vpop.f32.mrb[134].mxu0  ;;  %v4384_v19 = vmul.f32 0.3275911, %v9617_v1  ;;  %v9624_v54 = vmul.f32 0.70710677, %v4244_v48  ;;  %v4593_v53 = vsub.f32 0.0, %v4369_v11 }
0x1301   :  { %v4253_v46 = vpop.f32.mrb[135].mxu0  ;;  %v4401_v18 = vadd.f32 1.0, %v4385_v20  ;;  %v9630_v8 = vand.u32 2147483647, %v4323_v40  ;;  %v9643_v31 = vmul.f32 0.5, %v4239_v63  ;;  %vm4336_vm5 = vcmp.ge.f32.partialorder %v4320_v12, 0.0 }
0x1302   :  { %v4400_v38 = vadd.f32 1.0, %v4384_v19  ;;  %v9638_v62 = vand.u32 2147483647, %v9624_v54  ;;  %v4624_v49 = vmul.f32 1.442695, %v4607_v44  ;;  %v9648_v55 = vadd.f32 %v6915_v4, %v9611_v47 }
0x1303   :  { %7780 = vrcp.f32 %v4401_v18  ;;  %v4387_v15 = vmul.f32 0.3275911, %v9630_v8  ;;  %v9654_v26 = vmul.f32 1.442695, %v4606_v16  ;;  %v9657_v39 = vsel %vm4337_vm4, 1.0, %v10483_v23 }
0x1304   :  { %v9626_v25 = vpop.f32.mrb[136].mxu0  ;;  %7782 = vrcp.f32 %v4400_v38  ;;  %v4386_v7 = vmul.f32 0.3275911, %v9638_v62  ;;  %v9659_v63 = vmul.f32 0.5, %v4234_v45  ;;  %v4609_v2 = vmul.f32 %v4593_v53, %v4369_v11 }
0x1305   :  { %v9632_v29 = vpop.f32.mrb[137].mxu0  ;;  %v4403_v30 = vadd.f32 1.0, %v4387_v15  ;;  %v9667_v60 = vadd.f32 %v9611_v47, %v4253_v46  ;;  %v9672_v22 = vsel %vm4336_vm5, 1.0, %v10483_v23  ;;  %v9675_v45 = vmul.f32 0.70710677, %v9648_v55 }
0x1306   :  { %v4402_v5 = vadd.f32 1.0, %v4386_v7  ;;  %v4592_v4 = vsub.f32 0.0, %v9617_v1  ;;  %vm4339_vm6 = vcmp.ge.f32.partialorder %v4323_v40, 0.0  ;;  %v9680_v46 = vmul.f32 0.5, %v4249_v9 }
0x1307   :  { %7784 = vrcp.f32 %v4403_v30  ;;  %v9683_v18 = vand.u32 2147483647, %v9675_v45  ;;  %v4628_v16 = vmul.f32 1.442695, %v4609_v2  ;;  %v9690_v38 = vmul.f32 0.5, %v4244_v48 }
0x1308   :  { %v9650_v27 = vpop.f32.mrb[138].mxu0  ;;  %7786 = vrcp.f32 %v4402_v5  ;;  %v9693_v40 = vmul.f32 0.70710677, %v9667_v60  ;;  %v9698_v15 = vsel %vm4339_vm6, 1.0, %v10483_v23  ;;  %vm4338_vm7 = vcmp.ge.f32.partialorder %v9624_v54, 0.0 }
0x1309   :  { %v9652_v14 = vpop.eup %7776  ;;  %v9661_v61 = vpop.f32.mrb[139].mxu0  ;;  %v4389_v7 = vmul.f32 0.3275911, %v9683_v18  ;;  %vm4341_vm8 = vcmp.ge.f32.partialorder %v9675_v45, 0.0 }
0x130a   :  { %v9663_v36 = vpop.eup %7778  ;;  %v4447_v3 = vmul.f32 1.0614054, %v9652_v14  ;;  %v9703_v5 = vand.u32 2147483647, %v9693_v40  ;;  %vm4340_vm9 = vcmp.ge.f32.partialorder %v9693_v40, 0.0 }
0x130b   :  { %v4446_v17 = vmul.f32 1.0614054, %v9663_v36  ;;  %v4405_v32 = vadd.f32 1.0, %v4389_v7 }
0x130c   :  { %v4463_v20 = vadd.f32 -1.4531521, %v4447_v3  ;;  %v9678_v11 = vpop.f32.mrb[140].mxu0  ;;  %v4595_v3 = vsub.f32 0.0, %v9630_v8  ;;  %v4388_v34 = vmul.f32 0.3275911, %v9703_v5 }
0x130d   :  { %v4462_v10 = vadd.f32 -1.4531521, %v4446_v17  ;;  %v9685_v12 = vpop.f32.mrb[141].mxu0  ;;  %v9687_v19 = vpop.eup %7780  ;;  %7788 = vrcp.f32 %v4405_v32 }
0x130e   :  { %v4479_v44 = vmul.f32 %v9652_v14, %v4463_v20  ;;  %v4449_v9 = vmul.f32 1.0614054, %v9687_v19  ;;  %v9707_v2 = vpop.eup %7782  ;;  %v4404_v7 = vadd.f32 1.0, %v4388_v34  ;;  %7790 = vpow2.f32 %v4624_v49 }
0x130f   :  { %v4478_v53 = vmul.f32 %v9663_v36, %v4462_v10  ;;  %v4608_v10 = vmul.f32 %v4592_v4, %v9617_v1  ;;  %v4611_v4 = vmul.f32 %v4595_v3, %v9630_v8 }
0x1310   :  { %v4495_v30 = vadd.f32 1.4214138, %v4479_v44  ;;  %v9705_v48 = vpop.f32.mrb[142].mxu0  ;;  %v4465_v20 = vadd.f32 -1.4531521, %v4449_v9  ;;  %7792 = vrcp.f32 %v4404_v7  ;;  %v10592_v7 = vmov -1.0  }
0x1311   :  { %v4494_v17 = vadd.f32 1.4214138, %v4478_v53  ;;  %v9710_v13 = vpop.f32.mrb[143].mxu0  ;;  %v4448_v44 = vmul.f32 1.0614054, %v9707_v2  ;;  %v4594_v53 = vsub.f32 0.0, %v9638_v62  ;;  %v9720_v52 = vpop.eup %7784  ;;  %7794 = vpow2.f32 %v9654_v26 }
0x1312   :  { %v4511_v23 = vmul.f32 %v9652_v14, %v4495_v30  ;;  %v4481_v51 = vmul.f32 %v9687_v19, %v4465_v20  ;;  %v4626_v6 = vmul.f32 1.442695, %v4608_v10  ;;  %v9722_v21 = vpop.eup %7786  ;;  %v4451_v58 = vmul.f32 1.0614054, %v9720_v52 }
0x1313   :  { %v4510_v28 = vmul.f32 %v9663_v36, %v4494_v17  ;;  %v4464_v1 = vadd.f32 -1.4531521, %v4448_v44  ;;  %v4450_v34 = vmul.f32 1.0614054, %v9722_v21  ;;  %v4632_v49 = vmul.f32 1.442695, %v4611_v4 }
0x1314   :  { %v4527_v9 = vadd.f32 -0.28449672, %v4511_v23  ;;  %v4497_v59 = vadd.f32 1.4214138, %v4481_v51  ;;  %v4610_v23 = vmul.f32 %v4594_v53, %v9638_v62  ;;  %v4467_v51 = vadd.f32 -1.4531521, %v4451_v58 }
0x1315   :  { %v4526_v30 = vadd.f32 -0.28449672, %v4510_v28  ;;  %v4480_v20 = vmul.f32 %v9707_v2, %v4464_v1  ;;  %7796 = vpow2.f32 %v4628_v16  ;;  %v4466_v44 = vadd.f32 -1.4531521, %v4450_v34 }
0x1316   :  { %v4543_v17 = vmul.f32 %v9652_v14, %v4527_v9  ;;  %v4513_v8 = vmul.f32 %v9687_v19, %v4497_v59  ;;  %7798 = vpow2.f32 %v4626_v6  ;;  %v4483_v1 = vmul.f32 %v9720_v52, %v4467_v51 }
0x1317   :  { %v4542_v32 = vmul.f32 %v9663_v36, %v4526_v30  ;;  %v4496_v28 = vadd.f32 1.4214138, %v4480_v20  ;;  %v9737_v59 = vsel %vm4338_vm7, 1.0, %v10592_v7  ;;  %v4482_v26 = vmul.f32 %v9722_v21, %v4466_v44 }
0x1318   :  { %v4559_v3 = vadd.f32 0.2548296, %v4543_v17  ;;  %v4529_v10 = vadd.f32 -0.28449672, %v4513_v8  ;;  %v4630_v53 = vmul.f32 1.442695, %v4610_v23  ;;  %v9745_v17 = vpop.eup %7788  ;;  %7800 = vpow2.f32 %v4632_v49 }
0x1319   :  { %v4512_v9 = vmul.f32 %v9707_v2, %v4496_v28  ;;  %v4558_v62 = vadd.f32 0.2548296, %v4542_v32  ;;  %v9741_v58 = vmul.f32 0.5, %v9648_v55  ;;  %v4499_v30 = vadd.f32 1.4214138, %v4483_v1  ;;  %v7791_v28 = vpop.eup %7790 }
0x131a   :  { %v4545_v16 = vmul.f32 %v9687_v19, %v4529_v10  ;;  %v4597_v6 = vsub.f32 0.0, %v9683_v18  ;;  %v4575_v20 = vmul.f32 %v9652_v14, %v4559_v3  ;;  %v4498_v54 = vadd.f32 1.4214138, %v4482_v26 }
0x131b   :  { %v4528_v4 = vadd.f32 -0.28449672, %v4512_v9  ;;  %v9749_v32 = vmul.f32 0.5, %v9667_v60  ;;  %v4515_v55 = vmul.f32 %v9720_v52, %v4499_v30  ;;  %v4453_v34 = vmul.f32 1.0614054, %v9745_v17  ;;  %v9761_v60 = vpop.eup %7792 }
0x131c   :  { %v9756_v23 = vadd.f32 %v9626_v25, %v9611_v47  ;;  %v4574_v51 = vmul.f32 %v9663_v36, %v4558_v62  ;;  %v4514_v14 = vmul.f32 %v9722_v21, %v4498_v54  ;;  %7802 = vpow2.f32 %v4630_v53 }
0x131d   :  { %v4544_v8 = vmul.f32 %v9707_v2, %v4528_v4  ;;  %v4561_v49 = vadd.f32 0.2548296, %v4545_v16  ;;  %v4531_v3 = vadd.f32 -0.28449672, %v4515_v55  ;;  %v4469_v10 = vadd.f32 -1.4531521, %v4453_v34  ;;  %v7795_v4 = vpop.eup %7794 }
0x131e   :  { %v4613_v44 = vmul.f32 %v4597_v6, %v9683_v18  ;;  %v4655_v9 = vmul.f32 %v7791_v28, %v4575_v20  ;;  %v4530_v26 = vadd.f32 -0.28449672, %v4514_v14  ;;  %v4452_v25 = vmul.f32 1.0614054, %v9761_v60 }
0x131f   :  { %v4560_v1 = vadd.f32 0.2548296, %v4544_v8  ;;  %v4547_v36 = vmul.f32 %v9720_v52, %v4531_v3  ;;  %v4485_v62 = vmul.f32 %v9745_v17, %v4469_v10  ;;  %v4596_v53 = vsub.f32 0.0, %v9703_v5  ;;  %v7797_v16 = vpop.eup %7796 }
0x1320   :  { %v9769_v30 = vmul.f32 0.70710677, %v9756_v23  ;;  %v4654_v54 = vmul.f32 %v7795_v4, %v4574_v51  ;;  %v4546_v55 = vmul.f32 %v9722_v21, %v4530_v26  ;;  %v9775_v18 = vsel %vm4341_vm8, 1.0, %v10592_v7  ;;  %v7799_v20 = vpop.eup %7798 }
0x1321   :  { %v4468_v6 = vadd.f32 -1.4531521, %v4452_v25  ;;  %v4577_v8 = vmul.f32 %v9687_v19, %v4561_v49  ;;  %v4563_v34 = vadd.f32 0.2548296, %v4547_v36  ;;  %v4501_v28 = vadd.f32 1.4214138, %v4485_v62 }
0x1322   :  { %v4636_v14 = vmul.f32 1.442695, %v4613_v44  ;;  %v4671_v3 = vsub.f32 1.0, %v4655_v9  ;;  %v4576_v10 = vmul.f32 %v9707_v2, %v4560_v1  ;;  %v4562_v0 = vadd.f32 0.2548296, %v4546_v55  ;;  %v7801_v24 = vpop.eup %7800 }
0x1323   :  { %v4484_v51 = vmul.f32 %v9761_v60, %v4468_v6  ;;  %v4579_v26 = vmul.f32 %v9720_v52, %v4563_v34  ;;  %v4517_v4 = vmul.f32 %v9745_v17, %v4501_v28  ;;  %v4612_v45 = vmul.f32 %v4596_v53, %v9703_v5 }
0x1324   :  { %v4375_v25 = vand.u32 2147483647, %v9769_v30  ;;  %v4670_v41 = vsub.f32 1.0, %v4654_v54  ;;  %v4578_v19 = vmul.f32 %v9722_v21, %v4562_v0  ;;  %v4264_v44 = vadd.f32 %v9611_v47, %v9632_v29 }
0x1325   :  { %v4500_v49 = vadd.f32 1.4214138, %v4484_v51  ;;  %v4657_v2 = vmul.f32 %v7797_v16, %v4577_v8  ;;  %v4533_v9 = vadd.f32 -0.28449672, %v4517_v4  ;;  %v4687_v36 = vmul.f32 %v4671_v3, %v9635_v43 }
0x1326   :  { %v4391_v1 = vmul.f32 0.3275911, %v4375_v25  ;;  %v7803_v52 = vpop.eup %7802  ;;  %v4656_v62 = vmul.f32 %v7799_v20, %v4576_v10  ;;  %7804 = vpow2.f32 %v4636_v14  ;;  %v4659_v53 = vmul.f32 %v7801_v24, %v4579_v26 }
0x1327   :  { %v4516_v5 = vmul.f32 %v9761_v60, %v4500_v49  ;;  %v4658_v54 = vmul.f32 %v7803_v52, %v4578_v19  ;;  %v4549_v0 = vmul.f32 %v9745_v17, %v4533_v9  ;;  %v4686_v55 = vmul.f32 %v4670_v41, %v9641_v35 }
0x1328   :  { %v4407_v21 = vadd.f32 1.0, %v4391_v1  ;;  %v4634_v16 = vmul.f32 1.442695, %v4612_v45  ;;  %v4326_v6 = vmul.f32 0.70710677, %v4264_v44  ;;  %v4673_v8 = vsub.f32 1.0, %v4657_v2 }
0x1329   :  { %v4532_v29 = vadd.f32 -0.28449672, %v4516_v5  ;;  %v4565_v34 = vadd.f32 0.2548296, %v4549_v0  ;;  %v4599_v28 = vsub.f32 0.0, %v4375_v25  ;;  %v4672_v51 = vsub.f32 1.0, %v4656_v62 }
0x132a   :  { %7806 = vrcp.f32 %v4407_v21  ;;  %v9795_v43 = vsel %vm4340_vm9, 1.0, %v10592_v7  ;;  %vm4343_vm10 = vcmp.ge.f32.partialorder %v9769_v30, 0.0  ;;  %v4279_v24 = vadd.f32 %v9650_v27, %v9611_v47 }
0x132b   :  { %v4703_v20 = vadd.f32 1.0, %v4687_v36  ;;  %v4675_v41 = vsub.f32 1.0, %v4659_v53  ;;  %v4674_v35 = vsub.f32 1.0, %v4658_v54  ;;  %v4374_v14 = vand.u32 2147483647, %v4326_v6 }
0x132c   :  { %v4702_v3 = vadd.f32 1.0, %v4686_v55  ;;  %v4548_v10 = vmul.f32 %v9761_v60, %v4532_v29  ;;  %7808 = vpow2.f32 %v4634_v16  ;;  %v9802_v26 = vmul.f32 0.5, %v9756_v23 }
0x132d   :  { %v4689_v40 = vmul.f32 %v4673_v8, %v9657_v39  ;;  %v4581_v4 = vmul.f32 %v9745_v17, %v4565_v34  ;;  %v4615_v45 = vmul.f32 %v4599_v28, %v4375_v25  ;;  %v4390_v30 = vmul.f32 0.3275911, %v4374_v14 }
0x132e   :  { %v4688_v19 = vmul.f32 %v4672_v51, %v9672_v22  ;;  %v9808_v27 = vsel %vm4343_vm10, 1.0, %v10592_v7  ;;  %v9810_v49 = vmul.f32 0.70710677, %v4279_v24  ;;  %v4274_v2 = vadd.f32 %v9611_v47, %v9661_v61 }
0x132f   :  { %v9815_v9 = vmul.f32 %v4703_v20, %v9621_v37  ;;  %v4691_v23 = vmul.f32 %v4675_v41, %v9698_v15  ;;  %v4690_v39 = vmul.f32 %v4674_v35, %v9737_v59  ;;  %v4406_v17 = vadd.f32 1.0, %v4390_v30 }
0x1330   :  { %v7805_v25 = vpop.eup %7804  ;;  %v9820_v1 = vmul.f32 %v4702_v3, %v9628_v56  ;;  %v4564_v22 = vadd.f32 0.2548296, %v4548_v10  ;;  %v4377_v52 = vand.u32 2147483647, %v9810_v49  ;;  %v9825_v36 = vadd.f32 %v9678_v11, %v9611_v47 }
0x1331   :  { %v4705_v61 = vadd.f32 1.0, %v4689_v40  ;;  %v4661_v62 = vmul.f32 %v7805_v25, %v4581_v4  ;;  %v4640_v37 = vmul.f32 1.442695, %v4615_v45  ;;  %7810 = vrcp.f32 %v4406_v17 }
0x1332   :  { %v4704_v5 = vadd.f32 1.0, %v4688_v19  ;;  %v9827_v15 = vmul.f32 0.5, %v4264_v44  ;;  %v4393_v59 = vmul.f32 0.3275911, %v4377_v52  ;;  %v9829_v53 = vmul.f32 0.70710677, %v4274_v2 }
0x1333   :  { %v4707_v56 = vadd.f32 1.0, %v4691_v23  ;;  %v4706_v0 = vadd.f32 1.0, %v4690_v39  ;;  %vm4342_vm11 = vcmp.ge.f32.partialorder %v4326_v6, 0.0  ;;  %v4598_v21 = vsub.f32 0.0, %v4374_v14 }
0x1334   :  { %v9831_v54 = vpop.eup %7806  ;;  %v4580_v55 = vmul.f32 %v9761_v60, %v4564_v22  ;;  %v4409_v29 = vadd.f32 1.0, %v4393_v59  ;;  %v9836_v16 = vmul.f32 0.70710677, %v9825_v36  ;;  %v9839_v44 = vmul.f32 %v4705_v61, %v9643_v31 }
0x1335   :  { %v4455_v11 = vmul.f32 1.0614054, %v9831_v54  ;;  %v4677_v8 = vsub.f32 1.0, %v4661_v62  ;;  %7812 = vpow2.f32 %v4640_v37  ;;  %v4376_v34 = vand.u32 2147483647, %v9829_v53 }
0x1336   :  { %v7809_v28 = vpop.eup %7808  ;;  %v9843_v51 = vmul.f32 %v4704_v5, %v9659_v63  ;;  %v9846_v60 = vsel %vm4342_vm11, 1.0, %v10592_v7  ;;  %7814 = vrcp.f32 %v4409_v29  ;;  %v9849_v20 = vmul.f32 %v4707_v56, %v9680_v46 }
0x1337   :  { %v4471_v6 = vadd.f32 -1.4531521, %v4455_v11  ;;  %v4614_v41 = vmul.f32 %v4598_v21, %v4374_v14  ;;  %v9851_v35 = vmul.f32 0.5, %v4279_v24  ;;  %v4392_v31 = vmul.f32 0.3275911, %v4376_v34 }
0x1338   :  { %v9854_v3 = vmul.f32 %v4706_v0, %v9690_v38  ;;  %v4660_v10 = vmul.f32 %v7809_v28, %v4580_v55  ;;  %v4379_v63 = vand.u32 2147483647, %v9836_v16  ;;  %v4693_v4 = vmul.f32 %v4677_v8, %v9775_v18 }
0x1339   :  { %v4487_v40 = vmul.f32 %v9831_v54, %v4471_v6  ;;  %v4601_v45 = vsub.f32 0.0, %v4377_v52  ;;  %v4408_v30 = vadd.f32 1.0, %v4392_v31  ;;  %v9861_v46 = vadd.f32 %v9611_v47, %v9685_v12 }
0x133a   :  { %vm4345_vm12 = vcmp.ge.f32.partialorder %v9810_v49, 0.0  ;;  %v9864_v24 = vmul.f32 0.5, %v4274_v2  ;;  %v4395_v38 = vmul.f32 0.3275911, %v4379_v63  ;;  %v4638_v23 = vmul.f32 1.442695, %v4614_v41 }
0x133b   :  { %v4503_v14 = vadd.f32 1.4214138, %v4487_v40  ;;  %v9866_v19 = vpop.eup %7810  ;;  %7816 = vrcp.f32 %v4408_v30  ;;  %v9869_v39 = vmul.f32 0.70710677, %v9861_v46  ;;  %v9873_v18 = vadd.f32 %v9705_v48, %v9611_v47 }
0x133c   :  { %v4676_v17 = vsub.f32 1.0, %v4660_v10  ;;  %v4454_v25 = vmul.f32 1.0614054, %v9866_v19  ;;  %v4411_v49 = vadd.f32 1.0, %v4395_v38  ;;  %v4709_v2 = vadd.f32 1.0, %v4693_v4 }
0x133d   :  { %v4519_v12 = vmul.f32 %v9831_v54, %v4503_v14  ;;  %v9878_v22 = vsel %vm4345_vm12, 1.0, %v10592_v7  ;;  %v4617_v61 = vmul.f32 %v4601_v45, %v4377_v52  ;;  %v4378_v62 = vand.u32 2147483647, %v9869_v39 }
0x133e   :  { %v4470_v5 = vadd.f32 -1.4531521, %v4454_v25  ;;  %v4600_v59 = vsub.f32 0.0, %v4376_v34  ;;  %7818 = vrcp.f32 %v4411_v49  ;;  %v4603_v48 = vsub.f32 0.0, %v4379_v63 }
0x133f   :  { %v4535_v37 = vadd.f32 -0.28449672, %v4519_v12  ;;  %v7813_v56 = vpop.eup %7812  ;;  %7820 = vpow2.f32 %v4638_v23  ;;  %v4394_v0 = vmul.f32 0.3275911, %v4378_v62  ;;  %v9882_v21 = vmul.f32 0.70710677, %v9873_v18 }
0x1340   :  { %v9884_v55 = vpop.eup %7814  ;;  %v4692_v11 = vmul.f32 %v4676_v17, %v9795_v43  ;;  %v4486_v52 = vmul.f32 %v9866_v19, %v4470_v5  ;;  %v9891_v8 = vadd.f32 %v9611_v47, %v9710_v13  ;;  %v9894_v28 = vmul.f32 %v4709_v2, %v9741_v58 }
0x1341   :  { %v4551_v29 = vmul.f32 %v9831_v54, %v4535_v37  ;;  %v4457_v6 = vmul.f32 1.0614054, %v9884_v55  ;;  %v4644_v41 = vmul.f32 1.442695, %v4617_v61  ;;  %v4410_v31 = vadd.f32 1.0, %v4394_v0 }
0x1342   :  { %v4502_v40 = vadd.f32 1.4214138, %v4486_v52  ;;  %v4616_v4 = vmul.f32 %v4600_v59, %v4376_v34  ;;  %v9899_v43 = vadd.f32 %v9815_v9, %v9525_v33  ;;  %v4619_v30 = vmul.f32 %v4603_v48, %v4379_v63 }
0x1343   :  { %v4567_v10 = vadd.f32 0.2548296, %v4551_v29  ;;  %v4473_v45 = vadd.f32 -1.4531521, %v4457_v6  ;;  %7822 = vrcp.f32 %v4410_v31  ;;  %v9902_v13 = vand.u32 2147483647, %v9882_v21 }
0x1344   :  { %v4518_v58 = vmul.f32 %v9866_v19, %v4502_v40  ;;  %v9907_v14 = vmul.f32 0.70710677, %v9891_v8  ;;  %4752 = vadd.xlane.f32.xlu0 %v9899_v43  ;;  %v9912_v34 = vadd.f32 %v9820_v1, %v9521_v50  ;;  %v4708_v9 = vadd.f32 1.0, %v4692_v11 }
0x1345   :  { %v4583_v47 = vmul.f32 %v9831_v54, %v4567_v10  ;;  %v9914_v33 = vpop.eup %7816  ;;  %v4489_v63 = vmul.f32 %v9884_v55, %v4473_v45  ;;  %v4602_v38 = vsub.f32 0.0, %v4378_v62  ;;  %v4397_v23 = vmul.f32 0.3275911, %v9902_v13 }
0x1346   :  { %v4534_v17 = vadd.f32 -0.28449672, %v4518_v58  ;;  %v4456_v12 = vmul.f32 1.0614054, %v9914_v33  ;;  %v4642_v25 = vmul.f32 1.442695, %v4616_v4  ;;  %4750 = vadd.xlane.f32.xlu1 %v9912_v34  ;;  %7824 = vpow2.f32 %v4644_v41 }
0x1347   :  { %v4663_v54 = vmul.f32 %v7813_v56, %v4583_v47  ;;  %v4505_v49 = vadd.f32 1.4214138, %v4489_v63  ;;  %v4648_v2 = vmul.f32 1.442695, %v4619_v30  ;;  %v4413_v50 = vadd.f32 1.0, %v4397_v23 }
0x1348   :  { %v9920_v1 = vpop.eup %7818  ;;  %v4550_v37 = vmul.f32 %v9866_v19, %v4534_v17  ;;  %v4472_v5 = vadd.f32 -1.4531521, %v4456_v12  ;;  %v9924_v59 = vand.u32 2147483647, %v9907_v14  ;;  %v4618_v11 = vmul.f32 %v4602_v38, %v4378_v62 }
0x1349   :  { %v4679_v61 = vsub.f32 1.0, %v4663_v54  ;;  %v7821_v56 = vpop.eup %7820  ;;  %v4521_v48 = vmul.f32 %v9884_v55, %v4505_v49  ;;  %v4459_v0 = vmul.f32 1.0614054, %v9920_v1  ;;  %7826 = vrcp.f32 %v4413_v50 }
0x134a   :  { %v4724_v29 = vmul.f32 %v4708_v9, %v9749_v32  ;;  %v4566_v52 = vadd.f32 0.2548296, %v4550_v37  ;;  %v4488_v6 = vmul.f32 %v9914_v33, %v4472_v5  ;;  %v4396_v41 = vmul.f32 0.3275911, %v9924_v59 }
0x134b   :  { %v4695_v31 = vmul.f32 %v4679_v61, %v9808_v27  ;;  %v4537_v10 = vadd.f32 -0.28449672, %v4521_v48  ;;  %7828 = vpow2.f32 %v4642_v25  ;;  %v4475_v40 = vadd.f32 -1.4531521, %v4459_v0  ;;  %v10593_v61 = vld [vmem:[#allocation43_spill] sm:$0xff] }
0x134c   :  { %v4582_v4 = vmul.f32 %v9866_v19, %v4566_v52  ;;  %v4504_v45 = vadd.f32 1.4214138, %v4488_v6  ;;  %7830 = vpow2.f32 %v4648_v2  ;;  %v4412_v30 = vadd.f32 1.0, %v4396_v41 }
0x134d   :  { %v9933_v47 = vpop.eup %7822  ;;  %v4553_v62 = vmul.f32 %v9884_v55, %v4537_v10  ;;  %v4491_v32 = vmul.f32 %v9920_v1, %v4475_v40  ;;  %v4646_v58 = vmul.f32 1.442695, %v4618_v11  ;;  %v9939_v9 = vadd.f32 %v9839_v44, %v9537_v57 }
0x134e   :  { %v4662_v27 = vmul.f32 %v7821_v56, %v4582_v4  ;;  %v4520_v63 = vmul.f32 %v9914_v33, %v4504_v45  ;;  %v4458_v38 = vmul.f32 1.0614054, %v9933_v47  ;;  %v4605_v19 = vsub.f32 0.0, %v9902_v13 }
0x134f   :  { %v4711_v23 = vadd.f32 1.0, %v4695_v31  ;;  %v4569_v54 = vadd.f32 0.2548296, %v4553_v62  ;;  %v4507_v17 = vadd.f32 1.4214138, %v4491_v32  ;;  %7832 = vrcp.f32 %v4412_v30  ;;  %4756 = vadd.xlane.f32.xlu0 %v9939_v9 }
0x1350   :  { %v4678_v12 = vsub.f32 1.0, %v4662_v27  ;;  %vm4344_vm13 = vcmp.ge.f32.partialorder %v9829_v53, 0.0  ;;  %v4536_v25 = vadd.f32 -0.28449672, %v4520_v63  ;;  %v4474_v49 = vadd.f32 -1.4531521, %v4458_v38  ;;  %v7825_v44 = vpop.eup %7824 }
0x1351   :  { %v9948_v57 = vadd.f32 %v9843_v51, %v9533_v42  ;;  %v4585_v2 = vmul.f32 %v9884_v55, %v4569_v54  ;;  %v4523_v50 = vmul.f32 %v9920_v1, %v4507_v17  ;;  %7834 = vpow2.f32 %v4646_v58  ;;  %v10594_v42 = vld [vmem:[#allocation42_spill] sm:$0xff]  ;;  %v10596_v58 = vld [vmem:[#allocation44_spill] sm:$0xff] }
0x1352   :  { %v9954_v37 = vadd.f32 %v9849_v20, %v10593_v61  ;;  %v4694_v5 = vmul.f32 %v4678_v12, %v9846_v60  ;;  %v4552_v56 = vmul.f32 %v9914_v33, %v4536_v25  ;;  %v4490_v48 = vmul.f32 %v9933_v47, %v4474_v49  ;;  %v10595_v20 = vld [vmem:[#allocation45_spill] sm:$0xff] }
0x1353   :  { %4754 = vadd.xlane.f32.xlu1 %v9948_v57  ;;  %v9962_v51 = vadd.f32 %v9854_v3, %v10594_v42  ;;  %v9964_v55 = vpop.eup %7826  ;;  %v4727_v0 = vmul.f32 %v4711_v23, %v9802_v26  ;;  %v4665_v11 = vmul.f32 %v7825_v44, %v4585_v2  ;;  %v4539_v52 = vadd.f32 -0.28449672, %v4523_v50  ;;  %v10598_v50 = vld [vmem:[#allocation46_spill] sm:$0xff] }
0x1354   :  { %4760 = vadd.xlane.f32.xlu0 %v9954_v37  ;;  %v9970_v60 = vadd.f32 %v9894_v28, %v10595_v20  ;;  %v4710_v6 = vadd.f32 1.0, %v4694_v5  ;;  %v4568_v41 = vadd.f32 0.2548296, %v4552_v56  ;;  %v4506_v31 = vadd.f32 1.4214138, %v4490_v48 }
0x1355   :  { %v4621_v10 = vmul.f32 %v4605_v19, %v9902_v13  ;;  %v7829_v40 = vpop.eup %7828  ;;  %v4681_v3 = vsub.f32 1.0, %v4665_v11  ;;  %v4555_v4 = vmul.f32 %v9920_v1, %v4539_v52  ;;  %v4461_v45 = vmul.f32 1.0614054, %v9964_v55  ;;  %v10597_v19 = vld [vmem:[#allocation47_spill] sm:$0xff] }
0x1356   :  { %v4604_v26 = vsub.f32 0.0, %v9924_v59  ;;  %v7831_v30 = vpop.eup %7830  ;;  %v4726_v62 = vmul.f32 %v4710_v6, %v9827_v15  ;;  %v4584_v32 = vmul.f32 %v9914_v33, %v4568_v41  ;;  %v4522_v28 = vmul.f32 %v9933_v47, %v4506_v31  ;;  %v10599_v41 = vld [vmem:[#allocation49_spill] sm:$0xff] }
0x1357   :  { %4758 = vadd.xlane.f32.xlu1 %v9962_v51  ;;  %v9981_v27 = vadd.f32 %v4724_v29, %v10596_v58  ;;  %v4697_v13 = vmul.f32 %v4681_v3, %v9878_v22  ;;  %v4571_v63 = vadd.f32 0.2548296, %v4555_v4  ;;  %v4477_v38 = vadd.f32 -1.4531521, %v4461_v45  ;;  %v10600_v58 = vld [vmem:[#allocation48_spill] sm:$0xff] }
0x1358   :  { %4764 = vadd.xlane.f32.xlu0 %v9970_v60  ;;  %v9986_v23 = vadd.f32 %v4727_v0, %v10597_v19  ;;  %v4664_v54 = vmul.f32 %v7829_v40, %v4584_v32  ;;  %vm4347_vm14 = vcmp.ge.f32.partialorder %v9836_v16, 0.0  ;;  %v4538_v15 = vadd.f32 -0.28449672, %v4522_v28 }
0x1359   :  { %v4652_v33 = vmul.f32 1.442695, %v4621_v10  ;;  %v7833_v17 = vpop.eup %7832  ;;  %v4713_v12 = vadd.f32 1.0, %v4697_v13  ;;  %v4587_v25 = vmul.f32 %v9920_v1, %v4571_v63  ;;  %v4493_v29 = vmul.f32 %v9964_v55, %v4477_v38 }
0x135a   :  { %v4620_v22 = vmul.f32 %v4604_v26, %v9924_v59  ;;  %v4680_v49 = vsub.f32 1.0, %v4664_v54  ;;  %v4554_v44 = vmul.f32 %v9933_v47, %v4538_v15  ;;  %v4460_v2 = vmul.f32 1.0614054, %v7833_v17 }
0x135b   :  { %4762 = vadd.xlane.f32.xlu1 %v9981_v27  ;;  %v9995_v61 = vadd.f32 %v4726_v62, %v10598_v50  ;;  %v7835_v5 = vpop.eup %7834  ;;  %v4729_v56 = vmul.f32 %v4713_v12, %v9851_v35  ;;  %v4360_v1 = vsel %vm4344_vm13, 1.0, %v10592_v7  ;;  %v4667_v48 = vmul.f32 %v7831_v30, %v4587_v25 }
0x135c   :  { %v4509_v42 = vadd.f32 1.4214138, %v4493_v29  ;;  %4768 = vadd.xlane.f32.xlu0 %v9986_v23  ;;  %v4696_v59 = vmul.f32 %v4680_v49, %v4360_v1  ;;  %v4570_v0 = vadd.f32 0.2548296, %v4554_v44  ;;  %7836 = vpow2.f32 %v4652_v33 }
0x135d   :  { %v4476_v11 = vadd.f32 -1.4531521, %v4460_v2  ;;  %v4683_v52 = vsub.f32 1.0, %v4667_v48  ;;  %v4650_v6 = vmul.f32 1.442695, %v4620_v22  ;;  %v10004_v31 = vadd.f32 %v4729_v56, %v10599_v41 }
0x135e   :  { %v4525_v20 = vmul.f32 %v9964_v55, %v4509_v42  ;;  %v4712_v35 = vadd.f32 1.0, %v4696_v59  ;;  %v4363_v53 = vsel %vm4347_vm14, 1.0, %v10592_v7  ;;  %v4586_v10 = vmul.f32 %v9933_v47, %v4570_v0 }
0x135f   :  { %v4492_v40 = vmul.f32 %v7833_v17, %v4476_v11  ;;  %4766 = vadd.xlane.f32.xlu1 %v9995_v61  ;;  %v4699_v3 = vmul.f32 %v4683_v52, %v4363_v53  ;;  %vm4346_vm15 = vcmp.ge.f32.partialorder %v9869_v39, 0.0  ;;  %v4315_v62 = vmul.f32 0.5, %v9825_v36  ;;  %v10601_v36 = vld [vmem:[#allocation27_spill] sm:$0xff] }
0x1360   :  { %v4541_v4 = vadd.f32 -0.28449672, %v4525_v20  ;;  %4772 = vadd.xlane.f32.xlu0 %v10004_v31  ;;  %v4728_v45 = vmul.f32 %v4712_v35, %v9864_v24  ;;  %v4666_v26 = vmul.f32 %v7835_v5, %v4586_v10  ;;  %7838 = vpow2.f32 %v4650_v6  ;;  %v10603_v20 = vld [vmem:[#allocation29_spill] sm:$0xff]  ;;  %v10604_v35 = vld [vmem:[#allocation28_spill] sm:$0xff] }
0x1361   :  { %v4508_v30 = vadd.f32 1.4214138, %v4492_v40  ;;  %v4715_v32 = vadd.f32 1.0, %v4699_v3  ;;  %v4362_v38 = vsel %vm4346_vm15, 1.0, %v10592_v7  ;;  %v4314_v12 = vmul.f32 0.5, %v9861_v46 }
0x1362   :  { %v4557_v16 = vmul.f32 %v9964_v55, %v4541_v4  ;;  %v4682_v47 = vsub.f32 1.0, %v4666_v26  ;;  %v10017_v13 = vadd.f32 %v4728_v45, %v10600_v58  ;;  %vm4349_vm0 = vcmp.ge.f32.partialorder %v9882_v21, 0.0  ;;  %v10605_v4 = vld [vmem:[#allocation9_spill] sm:$0xff] }
0x1363   :  { %v4524_v28 = vmul.f32 %v7833_v17, %v4508_v30  ;;  %v4731_v63 = vmul.f32 %v4715_v32, %v4315_v62  ;;  %v4365_v50 = vsel %vm4349_vm0, 1.0, %v10592_v7  ;;  %vm4348_vm1 = vcmp.ge.f32.partialorder %v9907_v14, 0.0 }
0x1364   :  { %v4573_v19 = vadd.f32 0.2548296, %v4557_v16  ;;  %v4698_v24 = vmul.f32 %v4682_v47, %v4362_v38  ;;  %4770 = vadd.xlane.f32.xlu1 %v10017_v13  ;;  %v4317_v21 = vmul.f32 0.5, %v9873_v18  ;;  %v4364_v11 = vsel %vm4348_vm1, 1.0, %v10592_v7 }
0x1365   :  { %v4540_v54 = vadd.f32 -0.28449672, %v4524_v28  ;;  %v10023_v15 = vadd.f32 %v4731_v63, %v10601_v36  ;;  %v4316_v6 = vmul.f32 0.5, %v9891_v8 }
0x1366   :  { %v4589_v39 = vmul.f32 %v9964_v55, %v4573_v19  ;;  %v7837_v33 = vpop.eup %7836  ;;  %v4714_v25 = vadd.f32 1.0, %v4698_v24  ;;  %v10602_v55 = vld [vmem:[#allocation26_spill] sm:$0xff] }
0x1367   :  { %v4556_v29 = vmul.f32 %v7833_v17, %v4540_v54  ;;  %4776 = vadd.xlane.f32.xlu0 %v10023_v15 }
0x1368   :  { %v4669_v22 = vmul.f32 %v7837_v33, %v4589_v39  ;;  %v4730_v49 = vmul.f32 %v4714_v25, %v4314_v12 }
0x1369   :  { %v4572_v44 = vadd.f32 0.2548296, %v4556_v29 }
0x136a   :  { %v4685_v2 = vsub.f32 1.0, %v4669_v22  ;;  %v10030_v56 = vadd.f32 %v4730_v49, %v10602_v55  ;;  %v7839_v1 = vpop.eup %7838 }
0x136b   :  { %v4588_v5 = vmul.f32 %v7833_v17, %v4572_v44 }
0x136c   :  { %v4701_v48 = vmul.f32 %v4685_v2, %v4365_v50  ;;  %4774 = vadd.xlane.f32.xlu1 %v10030_v56 }
0x136d   :  { %v4668_v46 = vmul.f32 %v7839_v1, %v4588_v5 }
0x136e   :  { %v4717_v42 = vadd.f32 1.0, %v4701_v48 }
0x136f   :  { %v4684_v59 = vsub.f32 1.0, %v4668_v46 }
0x1370   :  { %v4733_v0 = vmul.f32 %v4717_v42, %v4317_v21 }
0x1371   :  { %v4700_v52 = vmul.f32 %v4684_v59, %v4364_v11 }
0x1372   :  { %v10037_v17 = vadd.f32 %v4733_v0, %v10603_v20 }
0x1373   :  { %v4716_v41 = vadd.f32 1.0, %v4700_v52 }
0x1374   :  { %4780 = vadd.xlane.f32.xlu0 %v10037_v17 }
0x1375   :  { %v4732_v14 = vmul.f32 %v4716_v41, %v4316_v6 }
0x1377   :  { %v10042_v53 = vadd.f32 %v4732_v14, %v10604_v35 }
0x1379   :  { %4778 = vadd.xlane.f32.xlu1 %v10042_v53 }
0x13d1   :  { %v4753_v18 = vpop.xlane.xlu0 %4752 }
0x13d2   :  { %v4783_v10 = vmul.f32 0.03125, %v4753_v18 }
0x13d3   :  { %v4751_v40 = vpop.xlane.xlu1 %4750 }
0x13d4   :  { %v4799_v7 = vsub.f32 %v9899_v43, %v4783_v10  ;;  %v4782_v3 = vmul.f32 0.03125, %v4751_v40 }
0x13d6   :  { %v10047_v45 = vmul.f32 %v10605_v4, %v4799_v7  ;;  %v4798_v8 = vsub.f32 %v9912_v34, %v4782_v3 }
0x13d8   :  { %v10051_v26 = vmul.f32 %v10605_v4, %v4798_v8  ;;  %v4831_v30 = vmul.f32 %v10047_v45, %v10047_v45 }
0x13da   :  { %4848 = vadd.xlane.f32.xlu0 %v4831_v30  ;;  %v4830_v62 = vmul.f32 %v10051_v26, %v10051_v26 }
0x13dc   :  { %v4757_v32 = vpop.xlane.xlu0 %4756  ;;  %4846 = vadd.xlane.f32.xlu1 %v4830_v62 }
0x13dd   :  { %v4785_v16 = vmul.f32 0.03125, %v4757_v32 }
0x13df   :  { %v4801_v43 = vsub.f32 %v9939_v9, %v4785_v16 }
0x13e0   :  { %v4755_v47 = vpop.xlane.xlu1 %4754 }
0x13e1   :  { %v4784_v28 = vmul.f32 0.03125, %v4755_v47  ;;  %v4761_v58 = vpop.xlane.xlu0 %4760  ;;  %v10059_v34 = vmul.f32 %v10605_v4, %v4801_v43 }
0x13e2   :  { %v4787_v63 = vmul.f32 0.03125, %v4761_v58 }
0x13e3   :  { %v4800_v38 = vsub.f32 %v9948_v57, %v4784_v28  ;;  %v4833_v54 = vmul.f32 %v10059_v34, %v10059_v34 }
0x13e4   :  { %v4803_v19 = vsub.f32 %v9954_v37, %v4787_v63  ;;  %v4759_v24 = vpop.xlane.xlu1 %4758 }
0x13e5   :  { %v10066_v39 = vmul.f32 %v10605_v4, %v4800_v38  ;;  %v4786_v36 = vmul.f32 0.03125, %v4759_v24  ;;  %v4765_v9 = vpop.xlane.xlu0 %4764  ;;  %4852 = vadd.xlane.f32.xlu0 %v4833_v54 }
0x13e6   :  { %v10069_v33 = vmul.f32 %v10605_v4, %v4803_v19  ;;  %v4789_v12 = vmul.f32 0.03125, %v4765_v9 }
0x13e7   :  { %v4802_v25 = vsub.f32 %v9962_v51, %v4786_v36  ;;  %v4832_v57 = vmul.f32 %v10066_v39, %v10066_v39 }
0x13e8   :  { %v4805_v37 = vsub.f32 %v9970_v60, %v4789_v12  ;;  %v4763_v29 = vpop.xlane.xlu1 %4762  ;;  %v4835_v22 = vmul.f32 %v10069_v33, %v10069_v33 }
0x13e9   :  { %v10078_v49 = vmul.f32 %v10605_v4, %v4802_v25  ;;  %v4788_v44 = vmul.f32 0.03125, %v4763_v29  ;;  %4850 = vadd.xlane.f32.xlu1 %v4832_v57  ;;  %v4769_v2 = vpop.xlane.xlu0 %4768 }
0x13ea   :  { %v10081_v50 = vmul.f32 %v10605_v4, %v4805_v37  ;;  %v4791_v5 = vmul.f32 0.03125, %v4769_v2  ;;  %4856 = vadd.xlane.f32.xlu0 %v4835_v22 }
0x13eb   :  { %v4804_v51 = vsub.f32 %v9981_v27, %v4788_v44  ;;  %v4834_v60 = vmul.f32 %v10078_v49, %v10078_v49 }
0x13ec   :  { %v4807_v55 = vsub.f32 %v9986_v23, %v4791_v5  ;;  %v4767_v1 = vpop.xlane.xlu1 %4766  ;;  %v4837_v48 = vmul.f32 %v10081_v50, %v10081_v50 }
0x13ed   :  { %v10090_v46 = vmul.f32 %v10605_v4, %v4804_v51  ;;  %v4790_v21 = vmul.f32 0.03125, %v4767_v1  ;;  %4854 = vadd.xlane.f32.xlu1 %v4834_v60  ;;  %v4773_v42 = vpop.xlane.xlu0 %4772  ;;  %v10141_v51 = vld [vmem:[#allocation4 + $0x15] ss:$0 sm:$0xff] }
0x13ee   :  { %v10093_v59 = vmul.f32 %v10605_v4, %v4807_v55  ;;  %v4793_v0 = vmul.f32 0.03125, %v4773_v42  ;;  %4860 = vadd.xlane.f32.xlu0 %v4837_v48 }
0x13ef   :  { %v4806_v27 = vsub.f32 %v9995_v61, %v4790_v21  ;;  %v4836_v23 = vmul.f32 %v10090_v46, %v10090_v46  ;;  %v10144_v21 = vld [vmem:[#allocation4 + $0x16] ss:$0 sm:$0xff] }
0x13f0   :  { %v4809_v11 = vsub.f32 %v10004_v31, %v4793_v0  ;;  %v4839_v52 = vmul.f32 %v10093_v59, %v10093_v59 }
0x13f1   :  { %v10102_v20 = vmul.f32 %v10605_v4, %v4806_v27  ;;  %4858 = vadd.xlane.f32.xlu1 %v4836_v23  ;;  %v4771_v41 = vpop.xlane.xlu1 %4770 }
0x13f2   :  { %v10105_v6 = vmul.f32 %v10605_v4, %v4809_v11  ;;  %4864 = vadd.xlane.f32.xlu0 %v4839_v52  ;;  %v4792_v14 = vmul.f32 0.03125, %v4771_v41 }
0x13f3   :  { %v4838_v61 = vmul.f32 %v10102_v20, %v10102_v20 }
0x13f4   :  { %v4841_v35 = vmul.f32 %v10105_v6, %v10105_v6  ;;  %v4808_v31 = vsub.f32 %v10017_v13, %v4792_v14  ;;  %v4777_v18 = vpop.xlane.xlu0 %4776 }
0x13f5   :  { %4862 = vadd.xlane.f32.xlu1 %v4838_v61  ;;  %v4795_v10 = vmul.f32 0.03125, %v4777_v18 }
0x13f6   :  { %4868 = vadd.xlane.f32.xlu0 %v4841_v35  ;;  %v10113_v40 = vmul.f32 %v10605_v4, %v4808_v31 }
0x13f7   :  { %v4811_v7 = vsub.f32 %v10023_v15, %v4795_v10 }
0x13f8   :  { %v4840_v3 = vmul.f32 %v10113_v40, %v10113_v40 }
0x13f9   :  { %v10119_v8 = vmul.f32 %v10605_v4, %v4811_v7  ;;  %v4775_v30 = vpop.xlane.xlu1 %4774 }
0x13fa   :  { %v4794_v62 = vmul.f32 0.03125, %v4775_v30  ;;  %4866 = vadd.xlane.f32.xlu1 %v4840_v3 }
0x13fb   :  { %v4843_v13 = vmul.f32 %v10119_v8, %v10119_v8 }
0x13fc   :  { %v4810_v32 = vsub.f32 %v10030_v56, %v4794_v62 }
0x13fd   :  { %4872 = vadd.xlane.f32.xlu0 %v4843_v13 }
0x13fe   :  { %v10125_v16 = vmul.f32 %v10605_v4, %v4810_v32 }
0x1400   :  { %v4842_v15 = vmul.f32 %v10125_v16, %v10125_v16 }
0x1401   :  { %v4781_v43 = vpop.xlane.xlu0 %4780 }
0x1402   :  { %v4797_v47 = vmul.f32 0.03125, %v4781_v43  ;;  %4870 = vadd.xlane.f32.xlu1 %v4842_v15 }
0x1404   :  { %v4813_v28 = vsub.f32 %v10037_v17, %v4797_v47 }
0x1406   :  { %v10131_v58 = vmul.f32 %v10605_v4, %v4813_v28  ;;  %v4779_v63 = vpop.xlane.xlu1 %4778 }
0x1407   :  { %v4796_v38 = vmul.f32 0.03125, %v4779_v63 }
0x1408   :  { %v4845_v56 = vmul.f32 %v10131_v58, %v10131_v58 }
0x1409   :  { %v4812_v19 = vsub.f32 %v10042_v53, %v4796_v38 }
0x140a   :  { %4876 = vadd.xlane.f32.xlu0 %v4845_v56 }
0x140b   :  { %v10137_v24 = vmul.f32 %v10605_v4, %v4812_v19 }
0x140d   :  { %v4844_v54 = vmul.f32 %v10137_v24, %v10137_v24 }
0x140f   :  { %4874 = vadd.xlane.f32.xlu1 %v4844_v54 }
0x1467   :  { %v4849_v36 = vpop.xlane.xlu0 %4848 }
0x1468   :  { %v4879_v17 = vmul.f32 0.03125, %v4849_v36 }
0x1469   :  { %v4847_v9 = vpop.xlane.xlu1 %4846 }
0x146a   :  { %v4895_v12 = vadd.f32 1e-12, %v4879_v17  ;;  %v4878_v25 = vmul.f32 0.03125, %v4847_v9 }
0x146c   :  { %7840 = vrsqrt.f32 %v4895_v12  ;;  %v4894_v57 = vadd.f32 1e-12, %v4878_v25 }
0x146e   :  { %7842 = vrsqrt.f32 %v4894_v57 }
0x1472   :  { %v4853_v37 = vpop.xlane.xlu0 %4852 }
0x1473   :  { %v4881_v29 = vmul.f32 0.03125, %v4853_v37 }
0x1475   :  { %v4897_v22 = vadd.f32 1e-12, %v4881_v29 }
0x1476   :  { %v4851_v53 = vpop.xlane.xlu1 %4850  ;;  %v7841_v44 = vpop.eup %7840 }
0x1477   :  { %v4880_v2 = vmul.f32 0.03125, %v4851_v53  ;;  %v4857_v5 = vpop.xlane.xlu0 %4856  ;;  %7844 = vrsqrt.f32 %v4897_v22  ;;  %v4927_v55 = vmul.f32 %v7841_v44, %v10047_v45 }
0x1478   :  { %v4883_v60 = vmul.f32 0.03125, %v4857_v5  ;;  %v7843_v1 = vpop.eup %7842 }
0x1479   :  { %v4896_v48 = vadd.f32 1e-12, %v4880_v2  ;;  %v4948_v27 = vmul.f32 %v10141_v51, %v4927_v55  ;;  %v4926_v23 = vmul.f32 %v7843_v1, %v10051_v26 }
0x147a   :  { %v4899_v42 = vadd.f32 1e-12, %v4883_v60  ;;  %v4855_v0 = vpop.xlane.xlu1 %4854 }
0x147b   :  { %7846 = vrsqrt.f32 %v4896_v48  ;;  %v4882_v11 = vmul.f32 0.03125, %v4855_v0  ;;  %v4861_v52 = vpop.xlane.xlu0 %4860  ;;  %v10149_v14 = vadd.f32 %v10144_v21, %v4948_v27  ;;  %v4947_v45 = vmul.f32 %v10141_v51, %v4926_v23 }
0x147c   :  { %7848 = vrsqrt.f32 %v4899_v42  ;;  %v4885_v41 = vmul.f32 0.03125, %v4861_v52 }
0x147d   :  { %v4898_v61 = vadd.f32 1e-12, %v4882_v11  ;;  %4986 = vadd.xlane.f32.xlu0 %v10149_v14  ;;  %v10154_v18 = vadd.f32 %v10144_v21, %v4947_v45 }
0x147e   :  { %v4901_v35 = vadd.f32 1e-12, %v4885_v41  ;;  %v4859_v31 = vpop.xlane.xlu1 %4858 }
0x147f   :  { %7850 = vrsqrt.f32 %v4898_v61  ;;  %v4884_v26 = vmul.f32 0.03125, %v4859_v31  ;;  %v4865_v10 = vpop.xlane.xlu0 %4864  ;;  %4984 = vadd.xlane.f32.xlu1 %v10154_v18 }
0x1480   :  { %7852 = vrsqrt.f32 %v4901_v35  ;;  %v4887_v7 = vmul.f32 0.03125, %v4865_v10 }
0x1481   :  { %v4900_v3 = vadd.f32 1e-12, %v4884_v26  ;;  %v7845_v30 = vpop.eup %7844 }
0x1482   :  { %v4903_v62 = vadd.f32 1e-12, %v4887_v7  ;;  %v4863_v13 = vpop.xlane.xlu1 %4862  ;;  %v4929_v15 = vmul.f32 %v7845_v30, %v10059_v34 }
0x1483   :  { %7854 = vrsqrt.f32 %v4900_v3  ;;  %v4886_v32 = vmul.f32 0.03125, %v4863_v13  ;;  %v4869_v43 = vpop.xlane.xlu0 %4868 }
0x1484   :  { %7856 = vrsqrt.f32 %v4903_v62  ;;  %v4889_v47 = vmul.f32 0.03125, %v4869_v43  ;;  %v4950_v38 = vmul.f32 %v10141_v51, %v4929_v15 }
0x1485   :  { %v7847_v28 = vpop.eup %7846  ;;  %v4902_v63 = vadd.f32 1e-12, %v4886_v32 }
0x1486   :  { %v7849_v56 = vpop.eup %7848  ;;  %v4905_v19 = vadd.f32 1e-12, %v4889_v47  ;;  %v4928_v54 = vmul.f32 %v7847_v28, %v10066_v39  ;;  %v10161_v36 = vadd.f32 %v10144_v21, %v4950_v38 }
0x1487   :  { %7858 = vrsqrt.f32 %v4902_v63  ;;  %v4931_v17 = vmul.f32 %v7849_v56, %v10069_v33  ;;  %v4867_v9 = vpop.xlane.xlu1 %4866 }
0x1488   :  { %7860 = vrsqrt.f32 %v4905_v19  ;;  %v4949_v34 = vmul.f32 %v10141_v51, %v4928_v54  ;;  %v4888_v25 = vmul.f32 0.03125, %v4867_v9  ;;  %4990 = vadd.xlane.f32.xlu0 %v10161_v36 }
0x1489   :  { %v7851_v12 = vpop.eup %7850  ;;  %v4952_v57 = vmul.f32 %v10141_v51, %v4931_v17 }
0x148a   :  { %v7853_v37 = vpop.eup %7852  ;;  %v10168_v29 = vadd.f32 %v10144_v21, %v4949_v34  ;;  %v4930_v39 = vmul.f32 %v7851_v12, %v10078_v49  ;;  %v4904_v22 = vadd.f32 1e-12, %v4888_v25  ;;  %v4873_v53 = vpop.xlane.xlu0 %4872 }
0x148b   :  { %v10172_v33 = vadd.f32 %v10144_v21, %v4952_v57  ;;  %v4933_v44 = vmul.f32 %v7853_v37, %v10081_v50  ;;  %v4891_v2 = vmul.f32 0.03125, %v4873_v53 }
0x148c   :  { %4988 = vadd.xlane.f32.xlu1 %v10168_v29  ;;  %v4951_v5 = vmul.f32 %v10141_v51, %v4930_v39  ;;  %7862 = vrsqrt.f32 %v4904_v22 }
0x148d   :  { %v7855_v60 = vpop.eup %7854  ;;  %4994 = vadd.xlane.f32.xlu0 %v10172_v33  ;;  %v4954_v55 = vmul.f32 %v10141_v51, %v4933_v44  ;;  %v4907_v49 = vadd.f32 1e-12, %v4891_v2 }
0x148e   :  { %v7857_v1 = vpop.eup %7856  ;;  %v10180_v48 = vadd.f32 %v10144_v21, %v4951_v5  ;;  %v4932_v42 = vmul.f32 %v7855_v60, %v10090_v46 }
0x148f   :  { %v10184_v50 = vadd.f32 %v10144_v21, %v4954_v55  ;;  %v4935_v0 = vmul.f32 %v7857_v1, %v10093_v59  ;;  %7864 = vrsqrt.f32 %v4907_v49  ;;  %v4871_v27 = vpop.xlane.xlu1 %4870 }
0x1490   :  { %4992 = vadd.xlane.f32.xlu1 %v10180_v48  ;;  %v4953_v23 = vmul.f32 %v10141_v51, %v4932_v42  ;;  %v4890_v52 = vmul.f32 0.03125, %v4871_v27 }
0x1491   :  { %v7859_v11 = vpop.eup %7858  ;;  %4998 = vadd.xlane.f32.xlu0 %v10184_v50  ;;  %v4956_v41 = vmul.f32 %v10141_v51, %v4935_v0 }
0x1492   :  { %v7861_v45 = vpop.eup %7860  ;;  %v10192_v46 = vadd.f32 %v10144_v21, %v4953_v23  ;;  %v4934_v61 = vmul.f32 %v7859_v11, %v10102_v20  ;;  %v4906_v35 = vadd.f32 1e-12, %v4890_v52 }
0x1493   :  { %v10196_v59 = vadd.f32 %v10144_v21, %v4956_v41  ;;  %v4937_v31 = vmul.f32 %v7861_v45, %v10105_v6 }
0x1494   :  { %4996 = vadd.xlane.f32.xlu1 %v10192_v46  ;;  %v4955_v26 = vmul.f32 %v10141_v51, %v4934_v61  ;;  %7866 = vrsqrt.f32 %v4906_v35 }
0x1495   :  { %5002 = vadd.xlane.f32.xlu0 %v10196_v59  ;;  %v4958_v10 = vmul.f32 %v10141_v51, %v4937_v31 }
0x1496   :  { %v10204_v7 = vadd.f32 %v10144_v21, %v4955_v26  ;;  %v7863_v3 = vpop.eup %7862 }
0x1497   :  { %v4877_v20 = vpop.xlane.xlu0 %4876  ;;  %v10207_v30 = vadd.f32 %v10144_v21, %v4958_v10  ;;  %v4936_v6 = vmul.f32 %v7863_v3, %v10113_v40 }
0x1498   :  { %v4893_v62 = vmul.f32 0.03125, %v4877_v20  ;;  %5000 = vadd.xlane.f32.xlu1 %v10204_v7 }
0x1499   :  { %5006 = vadd.xlane.f32.xlu0 %v10207_v30  ;;  %v7865_v13 = vpop.eup %7864  ;;  %v4957_v43 = vmul.f32 %v10141_v51, %v4936_v6 }
0x149a   :  { %v4909_v32 = vadd.f32 1e-12, %v4893_v62  ;;  %v4939_v15 = vmul.f32 %v7865_v13, %v10119_v8 }
0x149b   :  { %v10215_v28 = vadd.f32 %v10144_v21, %v4957_v43 }
0x149c   :  { %7868 = vrsqrt.f32 %v4909_v32  ;;  %v4875_v47 = vpop.xlane.xlu1 %4874  ;;  %v4960_v38 = vmul.f32 %v10141_v51, %v4939_v15 }
0x149d   :  { %v4892_v63 = vmul.f32 0.03125, %v4875_v47  ;;  %5004 = vadd.xlane.f32.xlu1 %v10215_v28 }
0x149e   :  { %v7867_v56 = vpop.eup %7866  ;;  %v10220_v19 = vadd.f32 %v10144_v21, %v4960_v38 }
0x149f   :  { %v4908_v40 = vadd.f32 1e-12, %v4892_v63  ;;  %v4938_v54 = vmul.f32 %v7867_v56, %v10125_v16 }
0x14a0   :  { %5010 = vadd.xlane.f32.xlu0 %v10220_v19 }
0x14a1   :  { %7870 = vrsqrt.f32 %v4908_v40  ;;  %v4959_v8 = vmul.f32 %v10141_v51, %v4938_v54 }
0x14a3   :  { %v10226_v17 = vadd.f32 %v10144_v21, %v4959_v8 }
0x14a5   :  { %5008 = vadd.xlane.f32.xlu1 %v10226_v17 }
0x14a6   :  { %v7869_v9 = vpop.eup %7868 }
0x14a7   :  { %v4941_v34 = vmul.f32 %v7869_v9, %v10131_v58 }
0x14a9   :  { %v4962_v12 = vmul.f32 %v10141_v51, %v4941_v34 }
0x14ab   :  { %v7871_v25 = vpop.eup %7870  ;;  %v10232_v57 = vadd.f32 %v10144_v21, %v4962_v12 }
0x14ac   :  { %v4940_v16 = vmul.f32 %v7871_v25, %v10137_v24 }
0x14ad   :  { %5014 = vadd.xlane.f32.xlu0 %v10232_v57 }
0x14ae   :  { %v4961_v37 = vmul.f32 %v10141_v51, %v4940_v16 }
0x14b0   :  { %v10238_v39 = vadd.f32 %v10144_v21, %v4961_v37 }
0x14b2   :  { %5012 = vadd.xlane.f32.xlu1 %v10238_v39 }
0x150a   :  { %v4987_v22 = vpop.xlane.xlu0 %4986 }
0x150b   :  { %v5017_v53 = vmul.f32 0.03125, %v4987_v22 }
0x150c   :  { %v4985_v58 = vpop.xlane.xlu1 %4984 }
0x150d   :  { %v5033_v44 = vsub.f32 %v10149_v14, %v5017_v53  ;;  %v5016_v2 = vmul.f32 0.03125, %v4985_v58 }
0x150f   :  { %v10243_v5 = vmul.f32 %v10605_v4, %v5033_v44  ;;  %v5032_v24 = vsub.f32 %v10154_v18, %v5016_v2 }
0x1511   :  { %v10247_v60 = vmul.f32 %v10605_v4, %v5032_v24  ;;  %v5065_v51 = vmul.f32 %v10243_v5, %v10243_v5 }
0x1513   :  { %5082 = vadd.xlane.f32.xlu0 %v5065_v51  ;;  %v5064_v21 = vmul.f32 %v10247_v60, %v10247_v60 }
0x1515   :  { %v4991_v55 = vpop.xlane.xlu0 %4990  ;;  %5080 = vadd.xlane.f32.xlu1 %v5064_v21 }
0x1516   :  { %v5019_v1 = vmul.f32 0.03125, %v4991_v55 }
0x1518   :  { %v5035_v14 = vsub.f32 %v10161_v36, %v5019_v1 }
0x1519   :  { %v4989_v49 = vpop.xlane.xlu1 %4988 }
0x151a   :  { %v5018_v42 = vmul.f32 0.03125, %v4989_v49  ;;  %v4995_v0 = vpop.xlane.xlu0 %4994  ;;  %v10255_v18 = vmul.f32 %v10605_v4, %v5035_v14 }
0x151b   :  { %v5021_v27 = vmul.f32 0.03125, %v4995_v0 }
0x151c   :  { %v5034_v23 = vsub.f32 %v10168_v29, %v5018_v42  ;;  %v5067_v41 = vmul.f32 %v10255_v18, %v10255_v18 }
0x151d   :  { %v5037_v11 = vsub.f32 %v10172_v33, %v5021_v27  ;;  %v4993_v52 = vpop.xlane.xlu1 %4992 }
0x151e   :  { %v10262_v45 = vmul.f32 %v10605_v4, %v5034_v23  ;;  %v5020_v61 = vmul.f32 0.03125, %v4993_v52  ;;  %v4999_v36 = vpop.xlane.xlu0 %4998  ;;  %5086 = vadd.xlane.f32.xlu0 %v5067_v41 }
0x151f   :  { %v10265_v35 = vmul.f32 %v10605_v4, %v5037_v11  ;;  %v5023_v31 = vmul.f32 0.03125, %v4999_v36  ;;  %v5314_v36 = vld [vmem:[#allocation2 + $0x800] sm:$0xff] }
0x1520   :  { %v5036_v26 = vsub.f32 %v10180_v48, %v5020_v61  ;;  %v5066_v29 = vmul.f32 %v10262_v45, %v10262_v45  ;;  %v5219_v61 = vld [vmem:[%s10413_s1 + $0x8] sm:$0xff] }
0x1521   :  { %v5039_v33 = vsub.f32 %v10184_v50, %v5023_v31  ;;  %v4997_v10 = vpop.xlane.xlu1 %4996  ;;  %v5069_v3 = vmul.f32 %v10265_v35, %v10265_v35  ;;  %v5316_v31 = vld [vmem:[#allocation2 + $0x810] sm:$0xff] }
0x1522   :  { %v10274_v20 = vmul.f32 %v10605_v4, %v5036_v26  ;;  %v5022_v62 = vmul.f32 0.03125, %v4997_v10  ;;  %5084 = vadd.xlane.f32.xlu1 %v5066_v29  ;;  %v5003_v6 = vpop.xlane.xlu0 %5002  ;;  %v5319_v10 = vld [vmem:[#allocation2 + $0x828] sm:$0xff] }
0x1523   :  { %v10277_v13 = vmul.f32 %v10605_v4, %v5039_v33  ;;  %v5025_v32 = vmul.f32 0.03125, %v5003_v6  ;;  %5090 = vadd.xlane.f32.xlu0 %v5069_v3  ;;  %v5318_v33 = vld [vmem:[#allocation2 + $0x820] sm:$0xff]  ;;  %v5321_v6 = vld [vmem:[#allocation2 + $0x838] sm:$0xff] }
0x1524   :  { %v5038_v48 = vsub.f32 %v10192_v46, %v5022_v62  ;;  %v5068_v50 = vmul.f32 %v10274_v20, %v10274_v20  ;;  %v7550_v3 = vpack.c.bf16 %v5319_v10, %v5318_v33  ;;  %v5320_v62 = vld [vmem:[#allocation2 + $0x830] sm:$0xff] }
0x1525   :  { %v5041_v43 = vsub.f32 %v10196_v59, %v5025_v32  ;;  %v5001_v15 = vpop.xlane.xlu1 %5000  ;;  %v5071_v47 = vmul.f32 %v10277_v13, %v10277_v13  ;;  %v7554_v32 = vpack.c.bf16 %v5321_v6, %v5320_v62 }
0x1526   :  { %v10286_v63 = vmul.f32 %v10605_v4, %v5038_v48  ;;  %v5024_v38 = vmul.f32 0.03125, %v5001_v15  ;;  %5088 = vadd.xlane.f32.xlu1 %v5068_v50  ;;  %v5007_v56 = vpop.xlane.xlu0 %5006  ;;  %v5322_v48 = vld [vmem:[#allocation2 + $0x840] sm:$0xff]  ;;  %v5323_v50 = vld [vmem:[#allocation2 + $0x848] sm:$0xff]  ;;  %v5324_v15 = vld [vmem:[#allocation2 + $0x850] sm:$0xff] }
0x1527   :  { %v10289_v40 = vmul.f32 %v10605_v4, %v5041_v43  ;;  %v5027_v54 = vmul.f32 0.03125, %v5007_v56  ;;  %5094 = vadd.xlane.f32.xlu0 %v5071_v47  ;;  %v7558_v43 = vpack.c.bf16 %v5323_v50, %v5322_v48  ;;  %v5325_v47 = vld [vmem:[#allocation2 + $0x858] sm:$0xff]  ;;  %v5326_v56 = vld [vmem:[#allocation2 + $0x860] sm:$0xff] }
0x1528   :  { %v5040_v46 = vsub.f32 %v10204_v7, %v5024_v38  ;;  %v5070_v59 = vmul.f32 %v10286_v63, %v10286_v63  ;;  %v7562_v38 = vpack.c.bf16 %v5325_v47, %v5324_v15 }
0x1529   :  { %v5043_v8 = vsub.f32 %v10207_v30, %v5027_v54  ;;  %v5073_v9 = vmul.f32 %v10289_v40, %v10289_v40  ;;  %v5327_v54 = vld [vmem:[#allocation2 + $0x868] sm:$0xff] }
0x152a   :  { %v10298_v34 = vmul.f32 %v10605_v4, %v5040_v46  ;;  %5092 = vadd.xlane.f32.xlu1 %v5070_v59  ;;  %v5005_v25 = vpop.xlane.xlu1 %5004  ;;  %v7566_v46 = vpack.c.bf16 %v5327_v54, %v5326_v56  ;;  %v5328_v59 = vld [vmem:[#allocation2 + $0x870] sm:$0xff] }
0x152b   :  { %v10301_v12 = vmul.f32 %v10605_v4, %v5043_v8  ;;  %5098 = vadd.xlane.f32.xlu0 %v5073_v9  ;;  %v5026_v16 = vmul.f32 0.03125, %v5005_v25  ;;  %v5329_v8 = vld [vmem:[#allocation2 + $0x878] sm:$0xff] }
0x152c   :  { %v5072_v7 = vmul.f32 %v10298_v34, %v10298_v34  ;;  %v7570_v9 = vpack.c.bf16 %v5329_v8, %v5328_v59 }
0x152d   :  { %v5075_v37 = vmul.f32 %v10301_v12, %v10301_v12  ;;  %v5042_v30 = vsub.f32 %v10215_v28, %v5026_v16  ;;  %v5011_v22 = vpop.xlane.xlu0 %5010 }
0x152e   :  { %5096 = vadd.xlane.f32.xlu1 %v5072_v7  ;;  %v5029_v53 = vmul.f32 0.03125, %v5011_v22 }
0x152f   :  { %5102 = vadd.xlane.f32.xlu0 %v5075_v37  ;;  %v10309_v58 = vmul.f32 %v10605_v4, %v5042_v30 }
0x1530   :  { %v5045_v44 = vsub.f32 %v10220_v19, %v5029_v53 }
0x1531   :  { %v5074_v2 = vmul.f32 %v10309_v58, %v10309_v58 }
0x1532   :  { %v10315_v24 = vmul.f32 %v10605_v4, %v5045_v44  ;;  %v5009_v51 = vpop.xlane.xlu1 %5008 }
0x1533   :  { %v5028_v21 = vmul.f32 0.03125, %v5009_v51  ;;  %5100 = vadd.xlane.f32.xlu1 %v5074_v2 }
0x1534   :  { %v5077_v28 = vmul.f32 %v10315_v24, %v10315_v24 }
0x1535   :  { %v5044_v55 = vsub.f32 %v10226_v17, %v5028_v21 }
0x1536   :  { %5106 = vadd.xlane.f32.xlu0 %v5077_v28 }
0x1537   :  { %v10321_v1 = vmul.f32 %v10605_v4, %v5044_v55 }
0x1539   :  { %v5076_v19 = vmul.f32 %v10321_v1, %v10321_v1 }
0x153a   :  { %v5015_v14 = vpop.xlane.xlu0 %5014 }
0x153b   :  { %v5031_v49 = vmul.f32 0.03125, %v5015_v14  ;;  %5104 = vadd.xlane.f32.xlu1 %v5076_v19  ;;  %v10343_v14 = vld [vmem:[#allocation4 + $0x17] ss:$0 sm:$0xff] }
0x153d   :  { %v5047_v42 = vsub.f32 %v10232_v57, %v5031_v49  ;;  %v5218_v57 = vld [vmem:[%s10413_s1] sm:$0xff] }
0x153f   :  { %v10327_v0 = vmul.f32 %v10605_v4, %v5047_v42  ;;  %v5013_v27 = vpop.xlane.xlu1 %5012 }
0x1540   :  { %v5030_v23 = vmul.f32 0.03125, %v5013_v27 }
0x1541   :  { %v5079_v17 = vmul.f32 %v10327_v0, %v10327_v0 }
0x1542   :  { %v5046_v11 = vsub.f32 %v10238_v39, %v5030_v23  ;;  %v5315_v39 = vld [vmem:[#allocation2 + $0x808] sm:$0xff]  ;;  %v10346_v23 = vld [vmem:[#allocation4 + $0x18] ss:$0 sm:$0xff] }
0x1543   :  { %5110 = vadd.xlane.f32.xlu0 %v5079_v17  ;;  %v7542_v26 = vpack.c.bf16 %v5315_v39, %v5314_v36 }
0x1544   :  { %v10333_v52 = vmul.f32 %v10605_v4, %v5046_v11  ;;  %v5317_v4 = vld [vmem:[#allocation2 + $0x818] sm:$0xff] }
0x1545   :  { %v7546_v29 = vpack.c.bf16 %v5317_v4, %v5316_v31  ;;  %7543 = vmatprep.subr.bf16.mxu0 %v7542_v26 }
0x1546   :  { %v5078_v41 = vmul.f32 %v10333_v52, %v10333_v52  ;;  %7545 = vmatpush3.bf16.msra.mxu0 %v7542_v26 }
0x1547   :  { %7547 = vmatprep.subr.bf16.mxu0 %v7546_v29 }
0x1548   :  { %5108 = vadd.xlane.f32.xlu1 %v5078_v41 }
0x154a   :  { %7549 = vmatpush3.bf16.msra.mxu0 %v7546_v29 }
0x154b   :  { %7551 = vmatprep.subr.bf16.mxu0 %v7550_v3 }
0x154e   :  { %7553 = vmatpush3.bf16.msra.mxu0 %v7550_v3 }
0x154f   :  { %7555 = vmatprep.subr.bf16.mxu0 %v7554_v32 }
0x1552   :  { %7557 = vmatpush3.bf16.msra.mxu0 %v7554_v32 }
0x1553   :  { %7559 = vmatprep.subr.bf16.mxu0 %v7558_v43 }
0x1556   :  { %7561 = vmatpush3.bf16.msra.mxu0 %v7558_v43 }
0x1557   :  { %7563 = vmatprep.subr.bf16.mxu0 %v7562_v38 }
0x1559   :  { %5226 = vperm.xlu1 %7583, %v5218_v57   ;;  %5229 = vperm.xlu0 %7582, %v5219_v61  }
0x155a   :  { %7565 = vmatpush3.bf16.msra.mxu0 %v7562_v38 }
0x155b   :  { %7567 = vmatprep.subr.bf16.mxu0 %v7566_v46 }
0x155e   :  { %7569 = vmatpush3.bf16.msra.mxu0 %v7566_v46 }
0x155f   :  { %7571 = vmatprep.subr.bf16.mxu0 %v7570_v9 }
0x1562   :  { %7573 = vmatpush3.bf16.msra.mxu0 %v7570_v9 }
0x15a0   :  { %v5083_v25 = vpop.xlane.xlu0 %5082 }
0x15a1   :  { %v5113_v16 = vmul.f32 0.03125, %v5083_v25 }
0x15a2   :  { %v5081_v7 = vpop.xlane.xlu1 %5080 }
0x15a3   :  { %v5129_v37 = vadd.f32 1e-08, %v5113_v16  ;;  %v5112_v30 = vmul.f32 0.03125, %v5081_v7 }
0x15a5   :  { %7872 = vrsqrt.f32 %v5129_v37  ;;  %v5128_v22 = vadd.f32 1e-08, %v5112_v30 }
0x15a7   :  { %7874 = vrsqrt.f32 %v5128_v22 }
0x15ab   :  { %v5087_v53 = vpop.xlane.xlu0 %5086 }
0x15ac   :  { %v5115_v44 = vmul.f32 0.03125, %v5087_v53 }
0x15ae   :  { %v5131_v2 = vadd.f32 1e-08, %v5115_v44 }
0x15af   :  { %v5085_v51 = vpop.xlane.xlu1 %5084  ;;  %v7873_v21 = vpop.eup %7872 }
0x15b0   :  { %v5114_v28 = vmul.f32 0.03125, %v5085_v51  ;;  %v5091_v55 = vpop.xlane.xlu0 %5090  ;;  %7876 = vrsqrt.f32 %v5131_v2  ;;  %v5161_v49 = vmul.f32 %v7873_v21, %v10243_v5 }
0x15b1   :  { %v5117_v19 = vmul.f32 0.03125, %v5091_v55  ;;  %v7875_v42 = vpop.eup %7874 }
0x15b2   :  { %v5130_v27 = vadd.f32 1e-08, %v5114_v28  ;;  %v5160_v41 = vmul.f32 %v7875_v42, %v10247_v60  ;;  %v5182_v57 = vmul.f32 %v10343_v14, %v5161_v49 }
0x15b3   :  { %v5133_v17 = vadd.f32 1e-08, %v5117_v19  ;;  %v5089_v11 = vpop.xlane.xlu1 %5088 }
0x15b4   :  { %7878 = vrsqrt.f32 %v5130_v27  ;;  %v5116_v61 = vmul.f32 0.03125, %v5089_v11  ;;  %v5095_v36 = vpop.xlane.xlu0 %5094  ;;  %v5181_v31 = vmul.f32 %v10343_v14, %v5160_v41  ;;  %v5203_v26 = vadd.f32 %v10346_v23, %v5182_v57 }
0x15b5   :  { %7880 = vrsqrt.f32 %v5133_v17  ;;  %v5119_v39 = vmul.f32 0.03125, %v5095_v36 }
0x15b6   :  { %v5132_v5 = vadd.f32 1e-08, %v5116_v61  ;;  %v5202_v33 = vadd.f32 %v10346_v23, %v5181_v31 }
0x15b7   :  { %v5135_v4 = vadd.f32 1e-08, %v5119_v39  ;;  %v5093_v29 = vpop.xlane.xlu1 %5092 }
0x15b8   :  { %7882 = vrsqrt.f32 %v5132_v5  ;;  %v5118_v10 = vmul.f32 0.03125, %v5093_v29  ;;  %v5099_v3 = vpop.xlane.xlu0 %5098  ;;  %v7510_v62 = vpack.c.bf16 %v5203_v26, %v5202_v33 }
0x15b9   :  { %7884 = vrsqrt.f32 %v5135_v4  ;;  %v5121_v60 = vmul.f32 0.03125, %v5099_v3 }
0x15ba   :  { %v5134_v6 = vadd.f32 1e-08, %v5118_v10  ;;  %v7877_v32 = vpop.eup %7876  ;;  %7511 = vmatprep.subr.bf16.mxu1 %v7510_v62 }
0x15bb   :  { %v5137_v48 = vadd.f32 1e-08, %v5121_v60  ;;  %v5097_v50 = vpop.xlane.xlu1 %5096  ;;  %7513 = vmatpush3.bf16.msra.mxu1 %v7510_v62  ;;  %v5163_v47 = vmul.f32 %v7877_v32, %v10255_v18 }
0x15bc   :  { %7886 = vrsqrt.f32 %v5134_v6  ;;  %v5120_v43 = vmul.f32 0.03125, %v5097_v50  ;;  %v5103_v15 = vpop.xlane.xlu0 %5102 }
0x15bd   :  { %7888 = vrsqrt.f32 %v5137_v48  ;;  %v5123_v38 = vmul.f32 0.03125, %v5103_v15  ;;  %v5184_v46 = vmul.f32 %v10343_v14, %v5163_v47 }
0x15be   :  { %v7879_v56 = vpop.eup %7878  ;;  %v5136_v54 = vadd.f32 1e-08, %v5120_v43  ;;  %v10606_v43 = vlaneseq }
0x15bf   :  { %v7881_v59 = vpop.eup %7880  ;;  %v5139_v8 = vadd.f32 1e-08, %v5123_v38  ;;  %v5162_v9 = vmul.f32 %v7879_v56, %v10262_v45  ;;  %v5205_v37 = vadd.f32 %v10346_v23, %v5184_v46 }
0x15c0   :  { %7890 = vrsqrt.f32 %v5136_v54  ;;  %v5165_v25 = vmul.f32 %v7881_v59, %v10265_v35  ;;  %v5101_v16 = vpop.xlane.xlu1 %5100 }
0x15c1   :  { %7892 = vrsqrt.f32 %v5139_v8  ;;  %v5183_v7 = vmul.f32 %v10343_v14, %v5162_v9  ;;  %v5122_v30 = vmul.f32 0.03125, %v5101_v16 }
0x15c2   :  { %v7883_v18 = vpop.eup %7882  ;;  %v5186_v22 = vmul.f32 %v10343_v14, %v5165_v25 }
0x15c3   :  { %v7885_v53 = vpop.eup %7884  ;;  %v5204_v44 = vadd.f32 %v10346_v23, %v5183_v7  ;;  %v5164_v2 = vmul.f32 %v7883_v18, %v10274_v20  ;;  %v5138_v51 = vadd.f32 1e-08, %v5122_v30  ;;  %v5107_v45 = vpop.xlane.xlu0 %5106 }
0x15c4   :  { %v5167_v21 = vmul.f32 %v7885_v53, %v10277_v13  ;;  %v5125_v35 = vmul.f32 0.03125, %v5107_v45  ;;  %v5207_v19 = vadd.f32 %v10346_v23, %v5186_v22  ;;  %v10607_v53 = vld [vmem:[#allocation8_spill] sm:$0xff] }
0x15c5   :  { %v7514_v28 = vpack.c.bf16 %v5205_v37, %v5204_v44  ;;  %v5185_v55 = vmul.f32 %v10343_v14, %v5164_v2  ;;  %7894 = vrsqrt.f32 %v5138_v51  ;;  %v10608_v44 = vmov 1.0  }
0x15c6   :  { %v7887_v49 = vpop.eup %7886  ;;  %v5188_v42 = vmul.f32 %v10343_v14, %v5167_v21  ;;  %v5141_v17 = vadd.f32 1e-08, %v5125_v35 }
0x15c7   :  { %v7889_v27 = vpop.eup %7888  ;;  %7515 = vmatprep.subr.bf16.mxu1 %v7514_v28  ;;  %v5206_v11 = vadd.f32 %v10346_v23, %v5185_v55  ;;  %v5166_v20 = vmul.f32 %v7887_v49, %v10286_v63 }
0x15c8   :  { %7517 = vmatpush3.bf16.msra.mxu1 %v7514_v28  ;;  %v5169_v13 = vmul.f32 %v7889_v27, %v10289_v40  ;;  %7896 = vrsqrt.f32 %v5141_v17  ;;  %v5105_v41 = vpop.xlane.xlu1 %5104  ;;  %v5209_v36 = vadd.f32 %v10346_v23, %v5188_v42 }
0x15c9   :  { %v7518_v57 = vpack.c.bf16 %v5207_v19, %v5206_v11  ;;  %v5187_v61 = vmul.f32 %v10343_v14, %v5166_v20  ;;  %v5124_v31 = vmul.f32 0.03125, %v5105_v41 }
0x15ca   :  { %v7891_v39 = vpop.eup %7890  ;;  %v5190_v26 = vmul.f32 %v10343_v14, %v5169_v13 }
0x15cb   :  { %v7893_v5 = vpop.eup %7892  ;;  %7519 = vmatprep.subr.bf16.mxu1 %v7518_v57  ;;  %v5208_v4 = vadd.f32 %v10346_v23, %v5187_v61  ;;  %v5168_v63 = vmul.f32 %v7891_v39, %v10298_v34  ;;  %v5140_v29 = vadd.f32 1e-08, %v5124_v31 }
0x15cc   :  { %7521 = vmatpush3.bf16.msra.mxu1 %v7518_v57  ;;  %v5171_v40 = vmul.f32 %v7893_v5, %v10301_v12  ;;  %v5211_v3 = vadd.f32 %v10346_v23, %v5190_v26  ;;  %v5221_v12 = vshrl.u32 %v10606_v43, 7 }
0x15cd   :  { %v7522_v33 = vpack.c.bf16 %v5209_v36, %v5208_v4  ;;  %v5189_v10 = vmul.f32 %v10343_v14, %v5168_v63  ;;  %7898 = vrsqrt.f32 %v5140_v29 }
0x15ce   :  { %v5192_v62 = vmul.f32 %v10343_v14, %v5171_v40  ;;  %v5223_v9 = vmul.u32 8, %v5221_v12  ;;  %v5222_v28 = vadd.s32 8, %v5221_v12 }
0x15cf   :  { %7523 = vmatprep.subr.bf16.mxu1 %v7522_v33  ;;  %v5210_v60 = vadd.f32 %v10346_v23, %v5189_v10  ;;  %v7895_v6 = vpop.eup %7894 }
0x15d0   :  { %v5111_v32 = vpop.xlane.xlu0 %5110  ;;  %7525 = vmatpush3.bf16.msra.mxu1 %v7522_v33  ;;  %v5170_v50 = vmul.f32 %v7895_v6, %v10309_v58  ;;  %v5213_v56 = vadd.f32 %v10346_v23, %v5192_v62  ;;  %v5224_v42 = vmul.u32 8, %v5222_v28 }
0x15d1   :  { %v5127_v48 = vmul.f32 0.03125, %v5111_v32  ;;  %v7526_v34 = vpack.c.bf16 %v5211_v3, %v5210_v60 }
0x15d2   :  { %v7897_v15 = vpop.eup %7896  ;;  %v5191_v38 = vmul.f32 %v10343_v14, %v5170_v50 }
0x15d3   :  { %v5143_v47 = vadd.f32 1e-08, %v5127_v48  ;;  %7527 = vmatprep.subr.bf16.mxu1 %v7526_v34  ;;  %v5173_v54 = vmul.f32 %v7897_v15, %v10315_v24 }
0x15d4   :  { %7529 = vmatpush3.bf16.msra.mxu1 %v7526_v34  ;;  %v5212_v59 = vadd.f32 %v10346_v23, %v5191_v38 }
0x15d5   :  { %7900 = vrsqrt.f32 %v5143_v47  ;;  %v5109_v46 = vpop.xlane.xlu1 %5108  ;;  %v5194_v58 = vmul.f32 %v10343_v14, %v5173_v54 }
0x15d6   :  { %v5126_v8 = vmul.f32 0.03125, %v5109_v46  ;;  %v7530_v25 = vpack.c.bf16 %v5213_v56, %v5212_v59 }
0x15d7   :  { %v7899_v16 = vpop.eup %7898  ;;  %v5215_v22 = vadd.f32 %v10346_v23, %v5194_v58 }
0x15d8   :  { %v5142_v7 = vadd.f32 1e-08, %v5126_v8  ;;  %7531 = vmatprep.subr.bf16.mxu1 %v7530_v25  ;;  %v5172_v18 = vmul.f32 %v7899_v16, %v10321_v1  ;;  %v5230_v27 = vpop.permute.xlu0 %5229 }
0x15d9   :  { %v5227_v37 = vpop.permute.xlu1 %5226  ;;  %7533 = vmatpush3.bf16.msra.mxu1 %v7530_v25  ;;  %v5232_v20 = vadd.s32 %v5230_v27, %v5224_v42 }
0x15da   :  { %7902 = vrsqrt.f32 %v5142_v7  ;;  %v5231_v30 = vadd.s32 %v5227_v37, %v5223_v9  ;;  %v5193_v24 = vmul.f32 %v10343_v14, %v5172_v18 }
0x15db   :  { %vm5234_vm3 = vcmp.eq.s32.totalorder %v10607_v53, %v5232_v20 }
0x15dc   :  { %vm5233_vm2 = vcmp.eq.s32.totalorder %v10607_v53, %v5231_v30  ;;  %v5214_v2 = vadd.f32 %v10346_v23, %v5193_v24 }
0x15dd   :  { %6960 = vmatprep.mubr.msk.f32.mxu1 %vm5233_vm2, %v10608_v44 }
0x15de   :  { %v7534_v45 = vpack.c.bf16 %v5215_v22, %v5214_v2 }
0x15df   :  { %v7901_v51 = vpop.eup %7900 }
0x15e0   :  { %v5175_v21 = vmul.f32 %v7901_v51, %v10327_v0  ;;  %7535 = vmatprep.subr.bf16.mxu1 %v7534_v45 }
0x15e1   :  { %7537 = vmatpush3.bf16.msra.mxu1 %v7534_v45 }
0x15e2   :  { %v5196_v1 = vmul.f32 %v10343_v14, %v5175_v21 }
0x15e4   :  { %v7903_v35 = vpop.eup %7902  ;;  %v5217_v49 = vadd.f32 %v10346_v23, %v5196_v1 }
0x15e5   :  { %v5174_v55 = vmul.f32 %v7903_v35, %v10333_v52 }
0x15e7   :  { %v5195_v19 = vmul.f32 %v10343_v14, %v5174_v55  ;;  %v5483_v14 = vld [vmem:[#allocation4 + $0x19] ss:$0 sm:$0xff] }
0x15e9   :  { %v5216_v17 = vadd.f32 %v10346_v23, %v5195_v19 }
0x15eb   :  { %v7538_v11 = vpack.c.bf16 %v5217_v49, %v5216_v17 }
0x15ed   :  { %7539 = vmatprep.subr.bf16.mxu1 %v7538_v11 }
0x15ee   :  { %7541 = vmatpush3.bf16.msra.mxu1 %v7538_v11 }
0x15f1   :  { %6961 = vmatmul.mubr.msk.f32.vlgmr.msra.gmra.mrb[112].mxu1 %vm5234_vm3, %v10608_v44 }
0x16c4   :  { %v6962_v0 = vpop.f32.mrb[112].mxu1 }
0x16c5   :  { %5412 = vst [vmem:[%s10416_s4 + $0x10] sm:$0xff] %v6962_v0  ;;  %v5305_v52 = vpop.f32.mrb[113].mxu1 }
0x16c6   :  { %5410 = vst [vmem:[%s10416_s4] sm:$0xff] %v5305_v52  ;;  %6995 = vmatprep.mubr.f32.mxu0 %v5305_v52 }
0x16c7   :  { %6996 = vmatmul.mubr.f32.vlgmr.msra.gmra.mrb[144].mxu0 %v6962_v0 }
0x179a   :  { %v6997_v23 = vpop.f32.mrb[144].mxu0 }
0x179b   :  { %v5407_v13 = vadd.f32 %v6997_v23, %v5483_v14  ;;  %v5401_v41 = vpop.f32.mrb[145].mxu0 }
0x179c   :  { %v5402_v57 = vadd.f32 %v5483_v14, %v5401_v41 }
0x179d   :  { %5413 = vst [vmem:[%s10416_s4 + $0x18] sm:$0xff] %v5407_v13 }
0x179e   :  { %5411 = vst [vmem:[%s10416_s4 + $0x8] sm:$0xff] %v5402_v57 }
0x179f   :  { %5418 = vsyncpa [#allocation3], 1 }
0x17a0   :  { %5419 = vsyncpa [#allocation5], 1 }

</bundles_post_ra>
